<compile_context>
chip_gen: v6e
topology: v6e:2x2x1
jax: 0.10.0
libtpu: 0.0.40
codegen_flags: <defaults>
</compile_context>

<pallas_src>
import math

import jax
import jax.numpy as jnp
from jax.experimental import pallas as pl
from jax.experimental.pallas import tpu as pltpu


# ----------------------------------------------------------------------------
# Deterministic parameter construction (inference-mode BN folded to scale/shift)
# ----------------------------------------------------------------------------
class KeyGen:
    def __init__(self, seed):
        self.key = jax.random.PRNGKey(seed)

    def __call__(self):
        self.key, sub = jax.random.split(self.key)
        return sub


def _bn_fold(key, C, eps=1e-5):
    k1, k2, k3, k4 = jax.random.split(key, 4)
    gamma = 1.0 + 0.1 * jax.random.normal(k1, (C,), jnp.float32)
    beta = 0.1 * jax.random.normal(k2, (C,), jnp.float32)
    mean = 0.1 * jax.random.normal(k3, (C,), jnp.float32)
    var = jnp.abs(1.0 + 0.1 * jax.random.normal(k4, (C,), jnp.float32))
    s = gamma / jnp.sqrt(var + eps)
    t = beta - mean * s
    return s, t


def _w(kg, shape, scale=0.2):
    return scale * jax.random.normal(kg(), shape, jnp.float32)


def gaussian_kernel(size, sigma):
    rng = range(-size // 2 + 1, size // 2 + 1)
    k = jnp.array(
        [[1.0 / (2 * math.pi * sigma ** 2) * math.exp(-(xx ** 2 + yy ** 2) / (2 * sigma ** 2))
          for xx in rng] for yy in rng], jnp.float32)
    return k / k.sum()


def init_mab(kg, c):
    m = {}
    # --- TLKA_v2 ---
    m["proj_w"] = _w(kg, (2 * c, c))                       # Conv(c, 2c, 1): bias-free + BN + SiLU
    m["proj_bn"] = _bn_fold(kg(), 2 * c)
    m["lka3_dw3_w"] = _w(kg, (3, 3, c)); m["lka3_dw3_b"] = _w(kg, (c,), 0.1)
    m["lka3_dw5_w"] = _w(kg, (5, 5, c)); m["lka3_dw5_b"] = _w(kg, (c,), 0.1)
    m["lka3_pw_w"] = _w(kg, (c, c));     m["lka3_pw_b"] = _w(kg, (c,), 0.1)
    m["lka5_dw5_w"] = _w(kg, (5, 5, c)); m["lka5_dw5_b"] = _w(kg, (c,), 0.1)
    m["lka5_dw7_w"] = _w(kg, (7, 7, c)); m["lka5_dw7_b"] = _w(kg, (c,), 0.1)
    m["lka5_pw_w"] = _w(kg, (c, c));     m["lka5_pw_b"] = _w(kg, (c,), 0.1)
    m["conv1d_w"] = _w(kg, (3,), 0.3)                      # conv1d(k=3, bias=False) over channels
    # --- LFE: EdgeGaussianAggregation (size=3, sigma=1.0, ReLU) ---
    m["gauss_w"] = jnp.tile(gaussian_kernel(3, 1.0)[:, :, None], (1, 1, c))
    m["lfe_bn"] = _bn_fold(kg(), c)
    # Conv_Extra: 1x1(+b)+BN+ReLU -> 3x3(no b)+BN+ReLU -> 1x1(+b)+BN
    m["ce1_w"] = _w(kg, (64, c)); m["ce1_b"] = _w(kg, (64,), 0.1)
    m["ce1_bn"] = _bn_fold(kg(), 64)
    m["ce2_w"] = _w(kg, (3, 3, 64, 64), 0.05)              # [kh, kw, out, in]
    m["ce2_bn"] = _bn_fold(kg(), 64)
    m["ce3_w"] = _w(kg, (c, 64)); m["ce3_b"] = _w(kg, (c,), 0.1)
    m["ce3_bn"] = _bn_fold(kg(), c)
    # TODO(synk): TLKA_v2's scale / X3 / X5 / proj_last never appear in the
    # reference forward pass, so they are not instantiated.
    return m


def init_params(kg, c1, c2, n=1, e=0.5):
    c = int(c2 * e)
    p = {"c": c, "n": n, "c1": c1, "c2": c2}
    p["cv1_w"] = _w(kg, (2 * c, c1))
    p["cv1_bn"] = _bn_fold(kg(), 2 * c)
    p["cv2_w"] = _w(kg, (c2, (1 + n) * c))
    p["cv2_bn"] = _bn_fold(kg(), c2)
    p["dw1_w"] = _w(kg, (5, 5, c))                         # DWConv1 (with bias, no BN)
    p["dw1_b"] = _w(kg, (c,), 0.1)
    p["mabs"] = [init_mab(kg, c) for _ in range(n)]
    return p


# ----------------------------------------------------------------------------
# Fused forward builder
# ----------------------------------------------------------------------------
def build_tmsab_forward(params, B, H, W):
    """Returns (fwd, weight_arrays); fwd(x_nchw, *weight_arrays) runs the fused kernel."""
    c, n, c1, c2 = params["c"], params["n"], params["c1"], params["c2"]
    HW = H * W
    f32 = jnp.float32
    bf16 = jnp.bfloat16

    # ---- tap offsets (dh, dw) per conv geometry ----
    def offsets(K, dil):
        pad = (K // 2) * dil
        return [(kh * dil - pad, kw * dil - pad) for kh in range(K) for kw in range(K)]

    OFF3, OFF5 = offsets(3, 1), offsets(5, 1)
    OFF7D2 = offsets(7, 2)

    def roll_of(dh, dw):
        return (-(dh * W + dw)) % HW

    # ---- precomputed multiplicative boundary masks (dedup'd across tap sets) ----
    jj = jnp.arange(HW, dtype=jnp.int32)
    hh, ww = jj // W, jj % W
    mask_index = {}
    mask_rows = []

    def mask_of(dh, dw):
        if dh == 0 and dw == 0:
            return None                                   # center tap: no mask needed
        key = (dh, dw)
        if key not in mask_index:
            m = (hh + dh >= 0) & (hh + dh < H) & (ww + dw >= 0) & (ww + dw < W)
            mask_index[key] = len(mask_rows)
            mask_rows.append(m.astype(f32))
        return mask_index[key]

    # ---- consolidated weight containers (few big DMAs, not ~50 tiny ones) ----
    col_list = []            # each: (64,) zero-padded per-channel scale/shift/bias column

    def add_col(vec):
        v = jnp.zeros((64,), f32).at[:vec.shape[0]].set(jnp.asarray(vec, f32))
        col_list.append(v)
        return len(col_list) - 1

    dww_list = []            # each: (8,) zero-padded per-tap depthwise weight column

    def add_dww(vec):
        v = jnp.zeros((8,), f32).at[:vec.shape[0]].set(jnp.asarray(vec, f32))
        dww_list.append(v)
        return len(dww_list) - 1

    mat_list = []            # each: (64, 64) zero-padded small matrix

    def add_mat(m):
        m = jnp.asarray(m, f32)
        pm = jnp.zeros((64, 64), f32).at[:m.shape[0], :m.shape[1]].set(m)
        mat_list.append(pm)
        return len(mat_list) - 1

    zc = jnp.zeros((c,), f32)

    # ---- global (outer) weights ----
    G = {}
    s, t = params["cv1_bn"]
    G["cv1_wa"] = add_mat(params["cv1_w"][:c]); G["cv1_sa"] = add_col(s[:c]); G["cv1_ta"] = add_col(t[:c])
    G["cv1_wb"] = add_mat(params["cv1_w"][c:]); G["cv1_sb"] = add_col(s[c:]); G["cv1_tb"] = add_col(t[c:])
    s, t = params["cv2_bn"]
    G["cv2_w"] = [add_mat(params["cv2_w"][:, i * c:(i + 1) * c]) for i in range(n + 1)]
    G["cv2_s"] = add_col(s); G["cv2_t"] = add_col(t)
    dw1w = params["dw1_w"]
    G["dw1_plan"] = [(add_dww(dw1w[dh + 2, dw + 2]), roll_of(dh, dw), mask_of(dh, dw))
                     for (dh, dw) in OFF5]
    G["dw1_b"] = add_col(params["dw1_b"])

    # ---- per-MAB weights / tap plans ----
    mabs_meta = []
    ce2w_stack = []
    for m in params["mabs"]:
        MI = {}
        s, t = m["proj_bn"]
        MI["proj_w"] = add_mat(m["proj_w"])                       # (2c, c): fused proj -> (p1; p2)
        MI["proj_s"] = add_col(s); MI["proj_t"] = add_col(t)

        # stacked-branch depthwise stage 1: union of 3x3 (LKA3, top half) and 5x5 (LKA5, bottom)
        w3, w5 = m["lka3_dw3_w"], m["lka5_dw5_w"]
        plan1 = []
        for (dh, dw) in OFF5:
            top = w3[dh + 1, dw + 1] if (abs(dh) <= 1 and abs(dw) <= 1) else zc
            bot = w5[dh + 2, dw + 2]
            plan1.append((add_dww(jnp.concatenate([top, bot])), roll_of(dh, dw), mask_of(dh, dw)))
        MI["plan1"] = plan1
        MI["b1"] = add_col(jnp.concatenate([m["lka3_dw3_b"], m["lka5_dw5_b"]]))

        # stacked-branch depthwise stage 2: union of 5x5 dil2 (top) and 7x7 dil2 (bottom)
        w5d, w7d = m["lka3_dw5_w"], m["lka5_dw7_w"]
        plan2 = []
        for (dh, dw) in OFF7D2:
            top = w5d[(dh + 4) // 2, (dw + 4) // 2] if (abs(dh) <= 4 and abs(dw) <= 4) else zc
            bot = w7d[(dh + 6) // 2, (dw + 6) // 2]
            plan2.append((add_dww(jnp.concatenate([top, bot])), roll_of(dh, dw), mask_of(dh, dw)))
        MI["plan2"] = plan2
        MI["b2"] = add_col(jnp.concatenate([m["lka3_dw5_b"], m["lka5_dw7_b"]]))

        # fused [pw3 | pw5] 1x1 that also performs the branch sum (xs = pw3(a) + pw5(bb))
        MI["pw_w"] = add_mat(jnp.concatenate([m["lka3_pw_w"], m["lka5_pw_w"]], axis=1))   # (c, 2c)
        MI["pw_b"] = add_col(m["lka3_pw_b"] + m["lka5_pw_b"])

        # channel-attention conv1d(k=3, pad=1, no bias) as a banded (c, c) matrix
        w1d = m["conv1d_w"]
        Tt = (w1d[0] * jnp.eye(c, k=-1) + w1d[1] * jnp.eye(c) + w1d[2] * jnp.eye(c, k=1)).astype(f32)
        MI["Tt"] = add_mat(Tt)

        # LFE: gaussian depthwise 3x3 + BN + ReLU
        gw = m["gauss_w"]
        MI["gplan"] = [(add_dww(gw[dh + 1, dw + 1]), roll_of(dh, dw), mask_of(dh, dw))
                       for (dh, dw) in OFF3]
        s, t = m["lfe_bn"]
        MI["lfe_s"] = add_col(s); MI["lfe_t"] = add_col(t)

        # Conv_Extra
        s1, t1 = m["ce1_bn"]
        MI["ce1_w"] = add_mat(m["ce1_w"])
        MI["ce1_s"] = add_col(s1); MI["ce1_t"] = add_col(s1 * m["ce1_b"] + t1)
        s2, t2 = m["ce2_bn"]
        MI["ce2_s"] = add_col(s2); MI["ce2_t"] = add_col(t2)
        # ce2 taps stacked along K: W_st[o, t*64 + i] = ce2_w[t, o, i]
        w9 = jnp.asarray(m["ce2_w"], f32).reshape(9, 64, 64)
        ce2w_stack.append(jnp.transpose(w9, (1, 0, 2)).reshape(64, 9 * 64))
        s3, t3 = m["ce3_bn"]
        MI["ce3_w"] = add_mat(m["ce3_w"])
        MI["ce3_s"] = add_col(s3); MI["ce3_t"] = add_col(s3 * m["ce3_b"] + t3)
        mabs_meta.append(MI)

    # ce2 shift plan (shared offsets; slot == tap index in the stacked weight)
    CE2_PLAN = [(slot, roll_of(dh, dw), mask_of(dh, dw)) for slot, (dh, dw) in enumerate(OFF3)]

    # ---- assemble the 5 consolidated weight arrays ----
    MASKS = jnp.stack(mask_rows).reshape(len(mask_rows), 1, HW)          # (n_masks, 1, HW)
    COLS = jnp.stack(col_list, axis=1)                                   # (64, NC)
    DWW = jnp.stack(dww_list, axis=1)                                    # (8, NT)
    SQW = jnp.stack(mat_list, axis=0)                                    # (NM, 64, 64)
    CE2W = jnp.stack(ce2w_stack, axis=0).astype(bf16)                    # (n, 64, 576)

    n_masks, NC, NT, NM = MASKS.shape[0], COLS.shape[1], DWW.shape[1], SQW.shape[0]

    # ------------------------------------------------------------------
    # The fused per-image kernel.
    # ------------------------------------------------------------------
    def kernel(x_ref, masks_ref, cols_ref, dww_ref, sqw_ref, ce2w_ref, o_ref, ce2_scr):
        def col(i, h):                      # (h, 1) per-channel scale/shift/bias column
            return cols_ref[0:h, i:i + 1]

        def mat(i, r, q):                   # (r, q) small matrix from the padded stack
            return sqw_ref[i][0:r, 0:q]

        def silu(v):
            return v * jax.nn.sigmoid(v)

        def shift_mask(v, r, mi):
            sh = pltpu.roll(v, r, axis=1) if r else v
            if mi is not None:
                sh = sh * masks_ref[mi]                     # one multiply per tap (no selects)
            return sh

        def dw_stage(v, plan, h, bias=None):
            acc = None
            for (wc, r, mi) in plan:
                term = shift_mask(v, r, mi) * dww_ref[0:h, wc:wc + 1]
                acc = term if acc is None else acc + term
            if bias is not None:
                acc = acc + col(bias, h)
            return acc

        def pw(v, wi, rows, k, si=None, ti=None, act=None):
            y = jnp.dot(mat(wi, rows, k), v, preferred_element_type=jnp.float32)
            if si is not None:
                y = y * col(si, rows) + col(ti, rows)
            if act == "silu":
                y = silu(y)
            elif act == "relu":
                y = jnp.maximum(y, 0.0)
            return y

        xin = x_ref[...]                                     # (c1, HW) for this image

        # cv1 (Conv + BN + SiLU), kept as two half matmuls so the kernel never
        # row-slices a value at a non-tile-aligned sublane offset.
        x1v = pw(xin, G["cv1_wa"], c, c1, G["cv1_sa"], G["cv1_ta"], "silu")
        x2v = pw(xin, G["cv1_wb"], c, c1, G["cv1_sb"], G["cv1_tb"], "silu")

        ys = []
        for mi_idx, MI in enumerate(mabs_meta):
            # -------- TLKA_v2 (both branches stacked on 2c sublanes) --------
            p = pw(x2v, MI["proj_w"], 2 * c, c, MI["proj_s"], MI["proj_t"], "silu")
            ab = dw_stage(p, MI["plan1"], 2 * c, MI["b1"])     # 3x3 | 5x5 union taps
            ab = dw_stage(ab, MI["plan2"], 2 * c, MI["b2"])    # 5x5d2 | 7x7d2 union taps
            xs = pw(ab, MI["pw_w"], c, 2 * c) + col(MI["pw_b"], c)
            # channel attention: conv1d over channels, per-image GAP (lane mean), sigmoid
            cf = jnp.dot(mat(MI["Tt"], c, c), xs, preferred_element_type=jnp.float32)
            attn = jax.nn.sigmoid(jnp.mean(cf, axis=1, keepdims=True))      # (c, 1)
            xt = xs * attn + x2v
            # -------- LFE: EdgeGaussianAggregation --------
            g = dw_stage(xt, MI["gplan"], c)
            g = jnp.maximum(g * col(MI["lfe_s"], c) + col(MI["lfe_t"], c), 0.0)
            z = xt + g
            # -------- Conv_Extra: 1x1 -> 3x3 (stacked K=576 bf16 MXU) -> 1x1 --------
            y1 = pw(z, MI["ce1_w"], 64, c, MI["ce1_s"], MI["ce1_t"], "relu")
            for (slot, r, mi2) in CE2_PLAN:
                ce2_scr[slot * 64:(slot + 1) * 64, :] = shift_mask(y1, r, mi2).astype(jnp.bfloat16)
            acc2 = jnp.dot(ce2w_ref[mi_idx], ce2_scr[...], preferred_element_type=jnp.float32)
            y2 = jnp.maximum(acc2 * col(MI["ce2_s"], 64) + col(MI["ce2_t"], 64), 0.0)
            y3 = jnp.dot(mat(MI["ce3_w"], c, 64).astype(jnp.bfloat16),
                         y2.astype(jnp.bfloat16), preferred_element_type=jnp.float32)
            y3 = y3 * col(MI["ce3_s"], c) + col(MI["ce3_t"], c)
            ys.append(y3)

        # -------- outer tail: DWConv1, x1 * dw, split-K cv2 (no sublane concat) --------
        d1 = dw_stage(x2v, G["dw1_plan"], c, G["dw1_b"])
        srcs = ys + [x1v * d1]
        acc = None
        for src, wi in zip(srcs, G["cv2_w"]):
            term = jnp.dot(mat(wi, c2, c), src, preferred_element_type=jnp.float32)
            acc = term if acc is None else acc + term
        out = silu(acc * col(G["cv2_s"], c2) + col(G["cv2_t"], c2))
        o_ref[...] = out.astype(o_ref.dtype)                  # (c2, HW) lane-dense store

    call = pl.pallas_call(
        kernel,
        out_shape=jax.ShapeDtypeStruct((B, c2, HW), f32),
        grid_spec=pltpu.PrefetchScalarGridSpec(
            num_scalar_prefetch=0,
            grid=(B,),
            in_specs=[
                pl.BlockSpec((None, c1, HW), lambda b: (b, 0, 0)),       # activations: one image
                pl.BlockSpec((n_masks, 1, HW), lambda b: (0, 0, 0)),     # boundary masks (resident)
                pl.BlockSpec((64, NC), lambda b: (0, 0)),                # per-channel columns
                pl.BlockSpec((8, NT), lambda b: (0, 0)),                 # depthwise tap columns
                pl.BlockSpec((NM, 64, 64), lambda b: (0, 0, 0)),         # padded small matrices
                pl.BlockSpec((n, 64, 9 * 64), lambda b: (0, 0, 0)),      # stacked ce2 weights (bf16)
            ],
            out_specs=pl.BlockSpec((None, c2, HW), lambda b: (b, 0, 0)),
            scratch_shapes=[pltpu.VMEM((9 * 64, HW), jnp.bfloat16)],     # ce2 stacked-K operand
        ),
        compiler_params=pltpu.CompilerParams(
            dimension_semantics=("parallel",),                            # megacore on v7x
            vmem_limit_bytes=32 * 1024 * 1024,
        ),
    )

    arrays = [MASKS, COLS, DWW, SQW, CE2W]

    def fwd(x_nchw, masks, cols, dww, sqw, ce2w):
        x = x_nchw.reshape(B, c1, HW).astype(f32)             # per-image channel-major, free reshape
        out = call(x, masks, cols, dww, sqw, ce2w)
        return out.reshape(B, c2, H, W)

    return fwd, arrays


# ----------------------------------------------------------------------------
if __name__ == "__main__":
    B, c1, c2, H, W = 2, 8, 8, 16, 16
    n = 1
    kg = KeyGen(0)
    params = init_params(kg, c1, c2, n=n, e=0.5)

    fwd_fn, weight_args = build_tmsab_forward(params, B, H, W)
    fwd = jax.jit(fwd_fn)

    x = jax.random.normal(jax.random.PRNGKey(0), (B, c1, H, W), jnp.float32)
    out = fwd(x, *weight_args)
    jax.block_until_ready(out)

    assert out.shape == (B, c2, H, W), out.shape
    assert bool(jnp.all(jnp.isfinite(out)))
    print("KERNEL_OK")
</pallas_src>

<mosaic_0001>
module attributes {stable_mosaic.version = 11 : i64} {
  func.func @kernel(%arg0: i32, %arg1: memref<1x8x256xf32, #tpu.memory_space<vmem>>, %arg2: memref<64x1x256xf32, #tpu.memory_space<vmem>>, %arg3: memref<64x20xf32, #tpu.memory_space<vmem>>, %arg4: memref<8x108xf32, #tpu.memory_space<vmem>>, %arg5: memref<9x64x64xf32, #tpu.memory_space<vmem>>, %arg6: memref<1x64x576xbf16, #tpu.memory_space<vmem>>, %arg7: memref<1x8x256xf32, #tpu.memory_space<vmem>>, %arg8: memref<576x256xbf16, #tpu.memory_space<vmem>>) attributes {dimension_semantics = [#tpu.dimension_semantics<parallel>], iteration_bounds = array<i64: 2>, scalar_prefetch = 0 : i64, scratch_operands = 1 : i64, tpu.core_type = #tpu.core_type<tc>, window_params = [{transform_indices = @transform_0, window_bounds = array<i64: 1, 8, 256>}, {pipeline_mode = #tpu.pipeline_mode<synchronous>, transform_indices = @transform_1, window_bounds = array<i64: 64, 1, 256>}, {pipeline_mode = #tpu.pipeline_mode<synchronous>, transform_indices = @transform_2, window_bounds = array<i64: 64, 20>}, {pipeline_mode = #tpu.pipeline_mode<synchronous>, transform_indices = @transform_3, window_bounds = array<i64: 8, 108>}, {pipeline_mode = #tpu.pipeline_mode<synchronous>, transform_indices = @transform_4, window_bounds = array<i64: 9, 64, 64>}, {pipeline_mode = #tpu.pipeline_mode<synchronous>, transform_indices = @transform_5, window_bounds = array<i64: 1, 64, 576>}, {transform_indices = @transform_6, window_bounds = array<i64: 1, 8, 256>}]} {
    %c0 = arith.constant 0 : index
    %c0_0 = arith.constant 0 : index
    %c0_1 = arith.constant 0 : index
    %0 = vector.load %arg1[%c0, %c0_0, %c0_1] : memref<1x8x256xf32, #tpu.memory_space<vmem>>, vector<1x8x256xf32>
    %1 = vector.shape_cast %0 : vector<1x8x256xf32> to vector<8x256xf32>
    %c0_2 = arith.constant 0 : index
    %c0_3 = arith.constant 0 : index
    %c0_4 = arith.constant 0 : index
    %2 = vector.load %arg5[%c0_2, %c0_3, %c0_4] : memref<9x64x64xf32, #tpu.memory_space<vmem>>, vector<1x64x64xf32>
    %3 = vector.shape_cast %2 : vector<1x64x64xf32> to vector<64x64xf32>
    %4 = vector.extract_strided_slice %3 {offsets = [0, 0], sizes = [4, 8], strides = [1, 1]} : vector<64x64xf32> to vector<4x8xf32>
    %cst = arith.constant dense<0.000000e+00> : vector<4x256xf32>
    %5 = tpu.matmul %4, %1, %cst {dimension_numbers = #tpu.dot_dimension_numbers<[1], [0], [0], [1], [0, 0, 1, 1], [], []>} : vector<4x8xf32>, vector<8x256xf32>, vector<4x256xf32> -> vector<4x256xf32>
    %c0_5 = arith.constant 0 : index
    %c0_6 = arith.constant 0 : index
    %6 = vector.load %arg3[%c0_5, %c0_6] : memref<64x20xf32, #tpu.memory_space<vmem>>, vector<4x1xf32>
    %7 = vector.broadcast %6 : vector<4x1xf32> to vector<4x256xf32>
    %8 = arith.mulf %5, %7 : vector<4x256xf32>
    %c0_7 = arith.constant 0 : index
    %c1 = arith.constant 1 : index
    %9 = vector.load %arg3[%c0_7, %c1] : memref<64x20xf32, #tpu.memory_space<vmem>>, vector<4x1xf32>
    %10 = vector.broadcast %9 : vector<4x1xf32> to vector<4x256xf32>
    %11 = arith.addf %8, %10 : vector<4x256xf32>
    %12 = arith.negf %11 : vector<4x256xf32>
    %13 = math.exp %12 : vector<4x256xf32>
    %cst_8 = arith.constant 1.000000e+00 : f32
    %14 = vector.broadcast %cst_8 : f32 to vector<4x256xf32>
    %15 = arith.addf %14, %13 : vector<4x256xf32>
    %16 = arith.divf %14, %15 : vector<4x256xf32>
    %17 = arith.mulf %11, %16 : vector<4x256xf32>
    %c1_9 = arith.constant 1 : index
    %c0_10 = arith.constant 0 : index
    %c0_11 = arith.constant 0 : index
    %18 = vector.load %arg5[%c1_9, %c0_10, %c0_11] : memref<9x64x64xf32, #tpu.memory_space<vmem>>, vector<1x64x64xf32>
    %19 = vector.shape_cast %18 : vector<1x64x64xf32> to vector<64x64xf32>
    %20 = vector.extract_strided_slice %19 {offsets = [0, 0], sizes = [4, 8], strides = [1, 1]} : vector<64x64xf32> to vector<4x8xf32>
    %cst_12 = arith.constant dense<0.000000e+00> : vector<4x256xf32>
    %21 = tpu.matmul %20, %1, %cst_12 {dimension_numbers = #tpu.dot_dimension_numbers<[1], [0], [0], [1], [0, 0, 1, 1], [], []>} : vector<4x8xf32>, vector<8x256xf32>, vector<4x256xf32> -> vector<4x256xf32>
    %c0_13 = arith.constant 0 : index
    %c2 = arith.constant 2 : index
    %22 = vector.load %arg3[%c0_13, %c2] : memref<64x20xf32, #tpu.memory_space<vmem>>, vector<4x1xf32>
    %23 = vector.broadcast %22 : vector<4x1xf32> to vector<4x256xf32>
    %24 = arith.mulf %21, %23 : vector<4x256xf32>
    %c0_14 = arith.constant 0 : index
    %c3 = arith.constant 3 : index
    %25 = vector.load %arg3[%c0_14, %c3] : memref<64x20xf32, #tpu.memory_space<vmem>>, vector<4x1xf32>
    %26 = vector.broadcast %25 : vector<4x1xf32> to vector<4x256xf32>
    %27 = arith.addf %24, %26 : vector<4x256xf32>
    %28 = arith.negf %27 : vector<4x256xf32>
    %29 = math.exp %28 : vector<4x256xf32>
    %cst_15 = arith.constant 1.000000e+00 : f32
    %30 = vector.broadcast %cst_15 : f32 to vector<4x256xf32>
    %31 = arith.addf %30, %29 : vector<4x256xf32>
    %32 = arith.divf %30, %31 : vector<4x256xf32>
    %33 = arith.mulf %27, %32 : vector<4x256xf32>
    %c4 = arith.constant 4 : index
    %c0_16 = arith.constant 0 : index
    %c0_17 = arith.constant 0 : index
    %34 = vector.load %arg5[%c4, %c0_16, %c0_17] : memref<9x64x64xf32, #tpu.memory_space<vmem>>, vector<1x64x64xf32>
    %35 = vector.shape_cast %34 : vector<1x64x64xf32> to vector<64x64xf32>
    %36 = vector.extract_strided_slice %35 {offsets = [0, 0], sizes = [8, 4], strides = [1, 1]} : vector<64x64xf32> to vector<8x4xf32>
    %cst_18 = arith.constant dense<0.000000e+00> : vector<8x256xf32>
    %37 = tpu.matmul %36, %33, %cst_18 {dimension_numbers = #tpu.dot_dimension_numbers<[1], [0], [0], [1], [0, 0, 1, 1], [], []>} : vector<8x4xf32>, vector<4x256xf32>, vector<8x256xf32> -> vector<8x256xf32>
    %c0_19 = arith.constant 0 : index
    %c7 = arith.constant 7 : index
    %38 = vector.load %arg3[%c0_19, %c7] : memref<64x20xf32, #tpu.memory_space<vmem>>, vector<8x1xf32>
    %39 = vector.broadcast %38 : vector<8x1xf32> to vector<8x256xf32>
    %40 = arith.mulf %37, %39 : vector<8x256xf32>
    %c0_20 = arith.constant 0 : index
    %c8 = arith.constant 8 : index
    %41 = vector.load %arg3[%c0_20, %c8] : memref<64x20xf32, #tpu.memory_space<vmem>>, vector<8x1xf32>
    %42 = vector.broadcast %41 : vector<8x1xf32> to vector<8x256xf32>
    %43 = arith.addf %40, %42 : vector<8x256xf32>
    %44 = arith.negf %43 : vector<8x256xf32>
    %45 = math.exp %44 : vector<8x256xf32>
    %cst_21 = arith.constant 1.000000e+00 : f32
    %46 = vector.broadcast %cst_21 : f32 to vector<8x256xf32>
    %47 = arith.addf %46, %45 : vector<8x256xf32>
    %48 = arith.divf %46, %47 : vector<8x256xf32>
    %49 = arith.mulf %43, %48 : vector<8x256xf32>
    %c34_i32 = arith.constant 34 : i32
    %50 = tpu.dynamic_rotate %49 by %c34_i32 dim 1 : vector<8x256xf32>, i32 -> vector<8x256xf32>
    %c0_22 = arith.constant 0 : index
    %c0_23 = arith.constant 0 : index
    %c0_24 = arith.constant 0 : index
    %51 = vector.load %arg2[%c0_22, %c0_23, %c0_24] : memref<64x1x256xf32, #tpu.memory_space<vmem>>, vector<1x1x256xf32>
    %52 = vector.shape_cast %51 : vector<1x1x256xf32> to vector<1x256xf32>
    %53 = vector.broadcast %52 : vector<1x256xf32> to vector<8x256xf32>
    %54 = arith.mulf %50, %53 : vector<8x256xf32>
    %c0_25 = arith.constant 0 : index
    %c25 = arith.constant 25 : index
    %55 = vector.load %arg4[%c0_25, %c25] : memref<8x108xf32, #tpu.memory_space<vmem>>, vector<8x1xf32>
    %56 = vector.broadcast %55 : vector<8x1xf32> to vector<8x256xf32>
    %57 = arith.mulf %54, %56 : vector<8x256xf32>
    %c33_i32 = arith.constant 33 : i32
    %58 = tpu.dynamic_rotate %49 by %c33_i32 dim 1 : vector<8x256xf32>, i32 -> vector<8x256xf32>
    %c1_26 = arith.constant 1 : index
    %c0_27 = arith.constant 0 : index
    %c0_28 = arith.constant 0 : index
    %59 = vector.load %arg2[%c1_26, %c0_27, %c0_28] : memref<64x1x256xf32, #tpu.memory_space<vmem>>, vector<1x1x256xf32>
    %60 = vector.shape_cast %59 : vector<1x1x256xf32> to vector<1x256xf32>
    %61 = vector.broadcast %60 : vector<1x256xf32> to vector<8x256xf32>
    %62 = arith.mulf %58, %61 : vector<8x256xf32>
    %c0_29 = arith.constant 0 : index
    %c26 = arith.constant 26 : index
    %63 = vector.load %arg4[%c0_29, %c26] : memref<8x108xf32, #tpu.memory_space<vmem>>, vector<8x1xf32>
    %64 = vector.broadcast %63 : vector<8x1xf32> to vector<8x256xf32>
    %65 = arith.mulf %62, %64 : vector<8x256xf32>
    %66 = arith.addf %57, %65 : vector<8x256xf32>
    %c32_i32 = arith.constant 32 : i32
    %67 = tpu.dynamic_rotate %49 by %c32_i32 dim 1 : vector<8x256xf32>, i32 -> vector<8x256xf32>
    %c2_30 = arith.constant 2 : index
    %c0_31 = arith.constant 0 : index
    %c0_32 = arith.constant 0 : index
    %68 = vector.load %arg2[%c2_30, %c0_31, %c0_32] : memref<64x1x256xf32, #tpu.memory_space<vmem>>, vector<1x1x256xf32>
    %69 = vector.shape_cast %68 : vector<1x1x256xf32> to vector<1x256xf32>
    %70 = vector.broadcast %69 : vector<1x256xf32> to vector<8x256xf32>
    %71 = arith.mulf %67, %70 : vector<8x256xf32>
    %c0_33 = arith.constant 0 : index
    %c27 = arith.constant 27 : index
    %72 = vector.load %arg4[%c0_33, %c27] : memref<8x108xf32, #tpu.memory_space<vmem>>, vector<8x1xf32>
    %73 = vector.broadcast %72 : vector<8x1xf32> to vector<8x256xf32>
    %74 = arith.mulf %71, %73 : vector<8x256xf32>
    %75 = arith.addf %66, %74 : vector<8x256xf32>
    %c31_i32 = arith.constant 31 : i32
    %76 = tpu.dynamic_rotate %49 by %c31_i32 dim 1 : vector<8x256xf32>, i32 -> vector<8x256xf32>
    %c3_34 = arith.constant 3 : index
    %c0_35 = arith.constant 0 : index
    %c0_36 = arith.constant 0 : index
    %77 = vector.load %arg2[%c3_34, %c0_35, %c0_36] : memref<64x1x256xf32, #tpu.memory_space<vmem>>, vector<1x1x256xf32>
    %78 = vector.shape_cast %77 : vector<1x1x256xf32> to vector<1x256xf32>
    %79 = vector.broadcast %78 : vector<1x256xf32> to vector<8x256xf32>
    %80 = arith.mulf %76, %79 : vector<8x256xf32>
    %c0_37 = arith.constant 0 : index
    %c28 = arith.constant 28 : index
    %81 = vector.load %arg4[%c0_37, %c28] : memref<8x108xf32, #tpu.memory_space<vmem>>, vector<8x1xf32>
    %82 = vector.broadcast %81 : vector<8x1xf32> to vector<8x256xf32>
    %83 = arith.mulf %80, %82 : vector<8x256xf32>
    %84 = arith.addf %75, %83 : vector<8x256xf32>
    %c30_i32 = arith.constant 30 : i32
    %85 = tpu.dynamic_rotate %49 by %c30_i32 dim 1 : vector<8x256xf32>, i32 -> vector<8x256xf32>
    %c4_38 = arith.constant 4 : index
    %c0_39 = arith.constant 0 : index
    %c0_40 = arith.constant 0 : index
    %86 = vector.load %arg2[%c4_38, %c0_39, %c0_40] : memref<64x1x256xf32, #tpu.memory_space<vmem>>, vector<1x1x256xf32>
    %87 = vector.shape_cast %86 : vector<1x1x256xf32> to vector<1x256xf32>
    %88 = vector.broadcast %87 : vector<1x256xf32> to vector<8x256xf32>
    %89 = arith.mulf %85, %88 : vector<8x256xf32>
    %c0_41 = arith.constant 0 : index
    %c29 = arith.constant 29 : index
    %90 = vector.load %arg4[%c0_41, %c29] : memref<8x108xf32, #tpu.memory_space<vmem>>, vector<8x1xf32>
    %91 = vector.broadcast %90 : vector<8x1xf32> to vector<8x256xf32>
    %92 = arith.mulf %89, %91 : vector<8x256xf32>
    %93 = arith.addf %84, %92 : vector<8x256xf32>
    %c18_i32 = arith.constant 18 : i32
    %94 = tpu.dynamic_rotate %49 by %c18_i32 dim 1 : vector<8x256xf32>, i32 -> vector<8x256xf32>
    %c5 = arith.constant 5 : index
    %c0_42 = arith.constant 0 : index
    %c0_43 = arith.constant 0 : index
    %95 = vector.load %arg2[%c5, %c0_42, %c0_43] : memref<64x1x256xf32, #tpu.memory_space<vmem>>, vector<1x1x256xf32>
    %96 = vector.shape_cast %95 : vector<1x1x256xf32> to vector<1x256xf32>
    %97 = vector.broadcast %96 : vector<1x256xf32> to vector<8x256xf32>
    %98 = arith.mulf %94, %97 : vector<8x256xf32>
    %c0_44 = arith.constant 0 : index
    %c30 = arith.constant 30 : index
    %99 = vector.load %arg4[%c0_44, %c30] : memref<8x108xf32, #tpu.memory_space<vmem>>, vector<8x1xf32>
    %100 = vector.broadcast %99 : vector<8x1xf32> to vector<8x256xf32>
    %101 = arith.mulf %98, %100 : vector<8x256xf32>
    %102 = arith.addf %93, %101 : vector<8x256xf32>
    %c17_i32 = arith.constant 17 : i32
    %103 = tpu.dynamic_rotate %49 by %c17_i32 dim 1 : vector<8x256xf32>, i32 -> vector<8x256xf32>
    %c6 = arith.constant 6 : index
    %c0_45 = arith.constant 0 : index
    %c0_46 = arith.constant 0 : index
    %104 = vector.load %arg2[%c6, %c0_45, %c0_46] : memref<64x1x256xf32, #tpu.memory_space<vmem>>, vector<1x1x256xf32>
    %105 = vector.shape_cast %104 : vector<1x1x256xf32> to vector<1x256xf32>
    %106 = vector.broadcast %105 : vector<1x256xf32> to vector<8x256xf32>
    %107 = arith.mulf %103, %106 : vector<8x256xf32>
    %c0_47 = arith.constant 0 : index
    %c31 = arith.constant 31 : index
    %108 = vector.load %arg4[%c0_47, %c31] : memref<8x108xf32, #tpu.memory_space<vmem>>, vector<8x1xf32>
    %109 = vector.broadcast %108 : vector<8x1xf32> to vector<8x256xf32>
    %110 = arith.mulf %107, %109 : vector<8x256xf32>
    %111 = arith.addf %102, %110 : vector<8x256xf32>
    %c16_i32 = arith.constant 16 : i32
    %112 = tpu.dynamic_rotate %49 by %c16_i32 dim 1 : vector<8x256xf32>, i32 -> vector<8x256xf32>
    %c7_48 = arith.constant 7 : index
    %c0_49 = arith.constant 0 : index
    %c0_50 = arith.constant 0 : index
    %113 = vector.load %arg2[%c7_48, %c0_49, %c0_50] : memref<64x1x256xf32, #tpu.memory_space<vmem>>, vector<1x1x256xf32>
    %114 = vector.shape_cast %113 : vector<1x1x256xf32> to vector<1x256xf32>
    %115 = vector.broadcast %114 : vector<1x256xf32> to vector<8x256xf32>
    %116 = arith.mulf %112, %115 : vector<8x256xf32>
    %c0_51 = arith.constant 0 : index
    %c32 = arith.constant 32 : index
    %117 = vector.load %arg4[%c0_51, %c32] : memref<8x108xf32, #tpu.memory_space<vmem>>, vector<8x1xf32>
    %118 = vector.broadcast %117 : vector<8x1xf32> to vector<8x256xf32>
    %119 = arith.mulf %116, %118 : vector<8x256xf32>
    %120 = arith.addf %111, %119 : vector<8x256xf32>
    %c15_i32 = arith.constant 15 : i32
    %121 = tpu.dynamic_rotate %49 by %c15_i32 dim 1 : vector<8x256xf32>, i32 -> vector<8x256xf32>
    %c8_52 = arith.constant 8 : index
    %c0_53 = arith.constant 0 : index
    %c0_54 = arith.constant 0 : index
    %122 = vector.load %arg2[%c8_52, %c0_53, %c0_54] : memref<64x1x256xf32, #tpu.memory_space<vmem>>, vector<1x1x256xf32>
    %123 = vector.shape_cast %122 : vector<1x1x256xf32> to vector<1x256xf32>
    %124 = vector.broadcast %123 : vector<1x256xf32> to vector<8x256xf32>
    %125 = arith.mulf %121, %124 : vector<8x256xf32>
    %c0_55 = arith.constant 0 : index
    %c33 = arith.constant 33 : index
    %126 = vector.load %arg4[%c0_55, %c33] : memref<8x108xf32, #tpu.memory_space<vmem>>, vector<8x1xf32>
    %127 = vector.broadcast %126 : vector<8x1xf32> to vector<8x256xf32>
    %128 = arith.mulf %125, %127 : vector<8x256xf32>
    %129 = arith.addf %120, %128 : vector<8x256xf32>
    %c14_i32 = arith.constant 14 : i32
    %130 = tpu.dynamic_rotate %49 by %c14_i32 dim 1 : vector<8x256xf32>, i32 -> vector<8x256xf32>
    %c9 = arith.constant 9 : index
    %c0_56 = arith.constant 0 : index
    %c0_57 = arith.constant 0 : index
    %131 = vector.load %arg2[%c9, %c0_56, %c0_57] : memref<64x1x256xf32, #tpu.memory_space<vmem>>, vector<1x1x256xf32>
    %132 = vector.shape_cast %131 : vector<1x1x256xf32> to vector<1x256xf32>
    %133 = vector.broadcast %132 : vector<1x256xf32> to vector<8x256xf32>
    %134 = arith.mulf %130, %133 : vector<8x256xf32>
    %c0_58 = arith.constant 0 : index
    %c34 = arith.constant 34 : index
    %135 = vector.load %arg4[%c0_58, %c34] : memref<8x108xf32, #tpu.memory_space<vmem>>, vector<8x1xf32>
    %136 = vector.broadcast %135 : vector<8x1xf32> to vector<8x256xf32>
    %137 = arith.mulf %134, %136 : vector<8x256xf32>
    %138 = arith.addf %129, %137 : vector<8x256xf32>
    %c2_i32 = arith.constant 2 : i32
    %139 = tpu.dynamic_rotate %49 by %c2_i32 dim 1 : vector<8x256xf32>, i32 -> vector<8x256xf32>
    %c10 = arith.constant 10 : index
    %c0_59 = arith.constant 0 : index
    %c0_60 = arith.constant 0 : index
    %140 = vector.load %arg2[%c10, %c0_59, %c0_60] : memref<64x1x256xf32, #tpu.memory_space<vmem>>, vector<1x1x256xf32>
    %141 = vector.shape_cast %140 : vector<1x1x256xf32> to vector<1x256xf32>
    %142 = vector.broadcast %141 : vector<1x256xf32> to vector<8x256xf32>
    %143 = arith.mulf %139, %142 : vector<8x256xf32>
    %c0_61 = arith.constant 0 : index
    %c35 = arith.constant 35 : index
    %144 = vector.load %arg4[%c0_61, %c35] : memref<8x108xf32, #tpu.memory_space<vmem>>, vector<8x1xf32>
    %145 = vector.broadcast %144 : vector<8x1xf32> to vector<8x256xf32>
    %146 = arith.mulf %143, %145 : vector<8x256xf32>
    %147 = arith.addf %138, %146 : vector<8x256xf32>
    %c1_i32 = arith.constant 1 : i32
    %148 = tpu.dynamic_rotate %49 by %c1_i32 dim 1 : vector<8x256xf32>, i32 -> vector<8x256xf32>
    %c11 = arith.constant 11 : index
    %c0_62 = arith.constant 0 : index
    %c0_63 = arith.constant 0 : index
    %149 = vector.load %arg2[%c11, %c0_62, %c0_63] : memref<64x1x256xf32, #tpu.memory_space<vmem>>, vector<1x1x256xf32>
    %150 = vector.shape_cast %149 : vector<1x1x256xf32> to vector<1x256xf32>
    %151 = vector.broadcast %150 : vector<1x256xf32> to vector<8x256xf32>
    %152 = arith.mulf %148, %151 : vector<8x256xf32>
    %c0_64 = arith.constant 0 : index
    %c36 = arith.constant 36 : index
    %153 = vector.load %arg4[%c0_64, %c36] : memref<8x108xf32, #tpu.memory_space<vmem>>, vector<8x1xf32>
    %154 = vector.broadcast %153 : vector<8x1xf32> to vector<8x256xf32>
    %155 = arith.mulf %152, %154 : vector<8x256xf32>
    %156 = arith.addf %147, %155 : vector<8x256xf32>
    %c0_65 = arith.constant 0 : index
    %c37 = arith.constant 37 : index
    %157 = vector.load %arg4[%c0_65, %c37] : memref<8x108xf32, #tpu.memory_space<vmem>>, vector<8x1xf32>
    %158 = vector.broadcast %157 : vector<8x1xf32> to vector<8x256xf32>
    %159 = arith.mulf %49, %158 : vector<8x256xf32>
    %160 = arith.addf %156, %159 : vector<8x256xf32>
    %c255_i32 = arith.constant 255 : i32
    %161 = tpu.dynamic_rotate %49 by %c255_i32 dim 1 : vector<8x256xf32>, i32 -> vector<8x256xf32>
    %c12 = arith.constant 12 : index
    %c0_66 = arith.constant 0 : index
    %c0_67 = arith.constant 0 : index
    %162 = vector.load %arg2[%c12, %c0_66, %c0_67] : memref<64x1x256xf32, #tpu.memory_space<vmem>>, vector<1x1x256xf32>
    %163 = vector.shape_cast %162 : vector<1x1x256xf32> to vector<1x256xf32>
    %164 = vector.broadcast %163 : vector<1x256xf32> to vector<8x256xf32>
    %165 = arith.mulf %161, %164 : vector<8x256xf32>
    %c0_68 = arith.constant 0 : index
    %c38 = arith.constant 38 : index
    %166 = vector.load %arg4[%c0_68, %c38] : memref<8x108xf32, #tpu.memory_space<vmem>>, vector<8x1xf32>
    %167 = vector.broadcast %166 : vector<8x1xf32> to vector<8x256xf32>
    %168 = arith.mulf %165, %167 : vector<8x256xf32>
    %169 = arith.addf %160, %168 : vector<8x256xf32>
    %c254_i32 = arith.constant 254 : i32
    %170 = tpu.dynamic_rotate %49 by %c254_i32 dim 1 : vector<8x256xf32>, i32 -> vector<8x256xf32>
    %c13 = arith.constant 13 : index
    %c0_69 = arith.constant 0 : index
    %c0_70 = arith.constant 0 : index
    %171 = vector.load %arg2[%c13, %c0_69, %c0_70] : memref<64x1x256xf32, #tpu.memory_space<vmem>>, vector<1x1x256xf32>
    %172 = vector.shape_cast %171 : vector<1x1x256xf32> to vector<1x256xf32>
    %173 = vector.broadcast %172 : vector<1x256xf32> to vector<8x256xf32>
    %174 = arith.mulf %170, %173 : vector<8x256xf32>
    %c0_71 = arith.constant 0 : index
    %c39 = arith.constant 39 : index
    %175 = vector.load %arg4[%c0_71, %c39] : memref<8x108xf32, #tpu.memory_space<vmem>>, vector<8x1xf32>
    %176 = vector.broadcast %175 : vector<8x1xf32> to vector<8x256xf32>
    %177 = arith.mulf %174, %176 : vector<8x256xf32>
    %178 = arith.addf %169, %177 : vector<8x256xf32>
    %c242_i32 = arith.constant 242 : i32
    %179 = tpu.dynamic_rotate %49 by %c242_i32 dim 1 : vector<8x256xf32>, i32 -> vector<8x256xf32>
    %c14 = arith.constant 14 : index
    %c0_72 = arith.constant 0 : index
    %c0_73 = arith.constant 0 : index
    %180 = vector.load %arg2[%c14, %c0_72, %c0_73] : memref<64x1x256xf32, #tpu.memory_space<vmem>>, vector<1x1x256xf32>
    %181 = vector.shape_cast %180 : vector<1x1x256xf32> to vector<1x256xf32>
    %182 = vector.broadcast %181 : vector<1x256xf32> to vector<8x256xf32>
    %183 = arith.mulf %179, %182 : vector<8x256xf32>
    %c0_74 = arith.constant 0 : index
    %c40 = arith.constant 40 : index
    %184 = vector.load %arg4[%c0_74, %c40] : memref<8x108xf32, #tpu.memory_space<vmem>>, vector<8x1xf32>
    %185 = vector.broadcast %184 : vector<8x1xf32> to vector<8x256xf32>
    %186 = arith.mulf %183, %185 : vector<8x256xf32>
    %187 = arith.addf %178, %186 : vector<8x256xf32>
    %c241_i32 = arith.constant 241 : i32
    %188 = tpu.dynamic_rotate %49 by %c241_i32 dim 1 : vector<8x256xf32>, i32 -> vector<8x256xf32>
    %c15 = arith.constant 15 : index
    %c0_75 = arith.constant 0 : index
    %c0_76 = arith.constant 0 : index
    %189 = vector.load %arg2[%c15, %c0_75, %c0_76] : memref<64x1x256xf32, #tpu.memory_space<vmem>>, vector<1x1x256xf32>
    %190 = vector.shape_cast %189 : vector<1x1x256xf32> to vector<1x256xf32>
    %191 = vector.broadcast %190 : vector<1x256xf32> to vector<8x256xf32>
    %192 = arith.mulf %188, %191 : vector<8x256xf32>
    %c0_77 = arith.constant 0 : index
    %c41 = arith.constant 41 : index
    %193 = vector.load %arg4[%c0_77, %c41] : memref<8x108xf32, #tpu.memory_space<vmem>>, vector<8x1xf32>
    %194 = vector.broadcast %193 : vector<8x1xf32> to vector<8x256xf32>
    %195 = arith.mulf %192, %194 : vector<8x256xf32>
    %196 = arith.addf %187, %195 : vector<8x256xf32>
    %c240_i32 = arith.constant 240 : i32
    %197 = tpu.dynamic_rotate %49 by %c240_i32 dim 1 : vector<8x256xf32>, i32 -> vector<8x256xf32>
    %c16 = arith.constant 16 : index
    %c0_78 = arith.constant 0 : index
    %c0_79 = arith.constant 0 : index
    %198 = vector.load %arg2[%c16, %c0_78, %c0_79] : memref<64x1x256xf32, #tpu.memory_space<vmem>>, vector<1x1x256xf32>
    %199 = vector.shape_cast %198 : vector<1x1x256xf32> to vector<1x256xf32>
    %200 = vector.broadcast %199 : vector<1x256xf32> to vector<8x256xf32>
    %201 = arith.mulf %197, %200 : vector<8x256xf32>
    %c0_80 = arith.constant 0 : index
    %c42 = arith.constant 42 : index
    %202 = vector.load %arg4[%c0_80, %c42] : memref<8x108xf32, #tpu.memory_space<vmem>>, vector<8x1xf32>
    %203 = vector.broadcast %202 : vector<8x1xf32> to vector<8x256xf32>
    %204 = arith.mulf %201, %203 : vector<8x256xf32>
    %205 = arith.addf %196, %204 : vector<8x256xf32>
    %c239_i32 = arith.constant 239 : i32
    %206 = tpu.dynamic_rotate %49 by %c239_i32 dim 1 : vector<8x256xf32>, i32 -> vector<8x256xf32>
    %c17 = arith.constant 17 : index
    %c0_81 = arith.constant 0 : index
    %c0_82 = arith.constant 0 : index
    %207 = vector.load %arg2[%c17, %c0_81, %c0_82] : memref<64x1x256xf32, #tpu.memory_space<vmem>>, vector<1x1x256xf32>
    %208 = vector.shape_cast %207 : vector<1x1x256xf32> to vector<1x256xf32>
    %209 = vector.broadcast %208 : vector<1x256xf32> to vector<8x256xf32>
    %210 = arith.mulf %206, %209 : vector<8x256xf32>
    %c0_83 = arith.constant 0 : index
    %c43 = arith.constant 43 : index
    %211 = vector.load %arg4[%c0_83, %c43] : memref<8x108xf32, #tpu.memory_space<vmem>>, vector<8x1xf32>
    %212 = vector.broadcast %211 : vector<8x1xf32> to vector<8x256xf32>
    %213 = arith.mulf %210, %212 : vector<8x256xf32>
    %214 = arith.addf %205, %213 : vector<8x256xf32>
    %c238_i32 = arith.constant 238 : i32
    %215 = tpu.dynamic_rotate %49 by %c238_i32 dim 1 : vector<8x256xf32>, i32 -> vector<8x256xf32>
    %c18 = arith.constant 18 : index
    %c0_84 = arith.constant 0 : index
    %c0_85 = arith.constant 0 : index
    %216 = vector.load %arg2[%c18, %c0_84, %c0_85] : memref<64x1x256xf32, #tpu.memory_space<vmem>>, vector<1x1x256xf32>
    %217 = vector.shape_cast %216 : vector<1x1x256xf32> to vector<1x256xf32>
    %218 = vector.broadcast %217 : vector<1x256xf32> to vector<8x256xf32>
    %219 = arith.mulf %215, %218 : vector<8x256xf32>
    %c0_86 = arith.constant 0 : index
    %c44 = arith.constant 44 : index
    %220 = vector.load %arg4[%c0_86, %c44] : memref<8x108xf32, #tpu.memory_space<vmem>>, vector<8x1xf32>
    %221 = vector.broadcast %220 : vector<8x1xf32> to vector<8x256xf32>
    %222 = arith.mulf %219, %221 : vector<8x256xf32>
    %223 = arith.addf %214, %222 : vector<8x256xf32>
    %c226_i32 = arith.constant 226 : i32
    %224 = tpu.dynamic_rotate %49 by %c226_i32 dim 1 : vector<8x256xf32>, i32 -> vector<8x256xf32>
    %c19 = arith.constant 19 : index
    %c0_87 = arith.constant 0 : index
    %c0_88 = arith.constant 0 : index
    %225 = vector.load %arg2[%c19, %c0_87, %c0_88] : memref<64x1x256xf32, #tpu.memory_space<vmem>>, vector<1x1x256xf32>
    %226 = vector.shape_cast %225 : vector<1x1x256xf32> to vector<1x256xf32>
    %227 = vector.broadcast %226 : vector<1x256xf32> to vector<8x256xf32>
    %228 = arith.mulf %224, %227 : vector<8x256xf32>
    %c0_89 = arith.constant 0 : index
    %c45 = arith.constant 45 : index
    %229 = vector.load %arg4[%c0_89, %c45] : memref<8x108xf32, #tpu.memory_space<vmem>>, vector<8x1xf32>
    %230 = vector.broadcast %229 : vector<8x1xf32> to vector<8x256xf32>
    %231 = arith.mulf %228, %230 : vector<8x256xf32>
    %232 = arith.addf %223, %231 : vector<8x256xf32>
    %c225_i32 = arith.constant 225 : i32
    %233 = tpu.dynamic_rotate %49 by %c225_i32 dim 1 : vector<8x256xf32>, i32 -> vector<8x256xf32>
    %c20 = arith.constant 20 : index
    %c0_90 = arith.constant 0 : index
    %c0_91 = arith.constant 0 : index
    %234 = vector.load %arg2[%c20, %c0_90, %c0_91] : memref<64x1x256xf32, #tpu.memory_space<vmem>>, vector<1x1x256xf32>
    %235 = vector.shape_cast %234 : vector<1x1x256xf32> to vector<1x256xf32>
    %236 = vector.broadcast %235 : vector<1x256xf32> to vector<8x256xf32>
    %237 = arith.mulf %233, %236 : vector<8x256xf32>
    %c0_92 = arith.constant 0 : index
    %c46 = arith.constant 46 : index
    %238 = vector.load %arg4[%c0_92, %c46] : memref<8x108xf32, #tpu.memory_space<vmem>>, vector<8x1xf32>
    %239 = vector.broadcast %238 : vector<8x1xf32> to vector<8x256xf32>
    %240 = arith.mulf %237, %239 : vector<8x256xf32>
    %241 = arith.addf %232, %240 : vector<8x256xf32>
    %c224_i32 = arith.constant 224 : i32
    %242 = tpu.dynamic_rotate %49 by %c224_i32 dim 1 : vector<8x256xf32>, i32 -> vector<8x256xf32>
    %c21 = arith.constant 21 : index
    %c0_93 = arith.constant 0 : index
    %c0_94 = arith.constant 0 : index
    %243 = vector.load %arg2[%c21, %c0_93, %c0_94] : memref<64x1x256xf32, #tpu.memory_space<vmem>>, vector<1x1x256xf32>
    %244 = vector.shape_cast %243 : vector<1x1x256xf32> to vector<1x256xf32>
    %245 = vector.broadcast %244 : vector<1x256xf32> to vector<8x256xf32>
    %246 = arith.mulf %242, %245 : vector<8x256xf32>
    %c0_95 = arith.constant 0 : index
    %c47 = arith.constant 47 : index
    %247 = vector.load %arg4[%c0_95, %c47] : memref<8x108xf32, #tpu.memory_space<vmem>>, vector<8x1xf32>
    %248 = vector.broadcast %247 : vector<8x1xf32> to vector<8x256xf32>
    %249 = arith.mulf %246, %248 : vector<8x256xf32>
    %250 = arith.addf %241, %249 : vector<8x256xf32>
    %c223_i32 = arith.constant 223 : i32
    %251 = tpu.dynamic_rotate %49 by %c223_i32 dim 1 : vector<8x256xf32>, i32 -> vector<8x256xf32>
    %c22 = arith.constant 22 : index
    %c0_96 = arith.constant 0 : index
    %c0_97 = arith.constant 0 : index
    %252 = vector.load %arg2[%c22, %c0_96, %c0_97] : memref<64x1x256xf32, #tpu.memory_space<vmem>>, vector<1x1x256xf32>
    %253 = vector.shape_cast %252 : vector<1x1x256xf32> to vector<1x256xf32>
    %254 = vector.broadcast %253 : vector<1x256xf32> to vector<8x256xf32>
    %255 = arith.mulf %251, %254 : vector<8x256xf32>
    %c0_98 = arith.constant 0 : index
    %c48 = arith.constant 48 : index
    %256 = vector.load %arg4[%c0_98, %c48] : memref<8x108xf32, #tpu.memory_space<vmem>>, vector<8x1xf32>
    %257 = vector.broadcast %256 : vector<8x1xf32> to vector<8x256xf32>
    %258 = arith.mulf %255, %257 : vector<8x256xf32>
    %259 = arith.addf %250, %258 : vector<8x256xf32>
    %c222_i32 = arith.constant 222 : i32
    %260 = tpu.dynamic_rotate %49 by %c222_i32 dim 1 : vector<8x256xf32>, i32 -> vector<8x256xf32>
    %c23 = arith.constant 23 : index
    %c0_99 = arith.constant 0 : index
    %c0_100 = arith.constant 0 : index
    %261 = vector.load %arg2[%c23, %c0_99, %c0_100] : memref<64x1x256xf32, #tpu.memory_space<vmem>>, vector<1x1x256xf32>
    %262 = vector.shape_cast %261 : vector<1x1x256xf32> to vector<1x256xf32>
    %263 = vector.broadcast %262 : vector<1x256xf32> to vector<8x256xf32>
    %264 = arith.mulf %260, %263 : vector<8x256xf32>
    %c0_101 = arith.constant 0 : index
    %c49 = arith.constant 49 : index
    %265 = vector.load %arg4[%c0_101, %c49] : memref<8x108xf32, #tpu.memory_space<vmem>>, vector<8x1xf32>
    %266 = vector.broadcast %265 : vector<8x1xf32> to vector<8x256xf32>
    %267 = arith.mulf %264, %266 : vector<8x256xf32>
    %268 = arith.addf %259, %267 : vector<8x256xf32>
    %c0_102 = arith.constant 0 : index
    %c9_103 = arith.constant 9 : index
    %269 = vector.load %arg3[%c0_102, %c9_103] : memref<64x20xf32, #tpu.memory_space<vmem>>, vector<8x1xf32>
    %270 = vector.broadcast %269 : vector<8x1xf32> to vector<8x256xf32>
    %271 = arith.addf %268, %270 : vector<8x256xf32>
    %c102_i32 = arith.constant 102 : i32
    %272 = tpu.dynamic_rotate %271 by %c102_i32 dim 1 : vector<8x256xf32>, i32 -> vector<8x256xf32>
    %c24 = arith.constant 24 : index
    %c0_104 = arith.constant 0 : index
    %c0_105 = arith.constant 0 : index
    %273 = vector.load %arg2[%c24, %c0_104, %c0_105] : memref<64x1x256xf32, #tpu.memory_space<vmem>>, vector<1x1x256xf32>
    %274 = vector.shape_cast %273 : vector<1x1x256xf32> to vector<1x256xf32>
    %275 = vector.broadcast %274 : vector<1x256xf32> to vector<8x256xf32>
    %276 = arith.mulf %272, %275 : vector<8x256xf32>
    %c0_106 = arith.constant 0 : index
    %c50 = arith.constant 50 : index
    %277 = vector.load %arg4[%c0_106, %c50] : memref<8x108xf32, #tpu.memory_space<vmem>>, vector<8x1xf32>
    %278 = vector.broadcast %277 : vector<8x1xf32> to vector<8x256xf32>
    %279 = arith.mulf %276, %278 : vector<8x256xf32>
    %c100_i32 = arith.constant 100 : i32
    %280 = tpu.dynamic_rotate %271 by %c100_i32 dim 1 : vector<8x256xf32>, i32 -> vector<8x256xf32>
    %c25_107 = arith.constant 25 : index
    %c0_108 = arith.constant 0 : index
    %c0_109 = arith.constant 0 : index
    %281 = vector.load %arg2[%c25_107, %c0_108, %c0_109] : memref<64x1x256xf32, #tpu.memory_space<vmem>>, vector<1x1x256xf32>
    %282 = vector.shape_cast %281 : vector<1x1x256xf32> to vector<1x256xf32>
    %283 = vector.broadcast %282 : vector<1x256xf32> to vector<8x256xf32>
    %284 = arith.mulf %280, %283 : vector<8x256xf32>
    %c0_110 = arith.constant 0 : index
    %c51 = arith.constant 51 : index
    %285 = vector.load %arg4[%c0_110, %c51] : memref<8x108xf32, #tpu.memory_space<vmem>>, vector<8x1xf32>
    %286 = vector.broadcast %285 : vector<8x1xf32> to vector<8x256xf32>
    %287 = arith.mulf %284, %286 : vector<8x256xf32>
    %288 = arith.addf %279, %287 : vector<8x256xf32>
    %c98_i32 = arith.constant 98 : i32
    %289 = tpu.dynamic_rotate %271 by %c98_i32 dim 1 : vector<8x256xf32>, i32 -> vector<8x256xf32>
    %c26_111 = arith.constant 26 : index
    %c0_112 = arith.constant 0 : index
    %c0_113 = arith.constant 0 : index
    %290 = vector.load %arg2[%c26_111, %c0_112, %c0_113] : memref<64x1x256xf32, #tpu.memory_space<vmem>>, vector<1x1x256xf32>
    %291 = vector.shape_cast %290 : vector<1x1x256xf32> to vector<1x256xf32>
    %292 = vector.broadcast %291 : vector<1x256xf32> to vector<8x256xf32>
    %293 = arith.mulf %289, %292 : vector<8x256xf32>
    %c0_114 = arith.constant 0 : index
    %c52 = arith.constant 52 : index
    %294 = vector.load %arg4[%c0_114, %c52] : memref<8x108xf32, #tpu.memory_space<vmem>>, vector<8x1xf32>
    %295 = vector.broadcast %294 : vector<8x1xf32> to vector<8x256xf32>
    %296 = arith.mulf %293, %295 : vector<8x256xf32>
    %297 = arith.addf %288, %296 : vector<8x256xf32>
    %c96_i32 = arith.constant 96 : i32
    %298 = tpu.dynamic_rotate %271 by %c96_i32 dim 1 : vector<8x256xf32>, i32 -> vector<8x256xf32>
    %c27_115 = arith.constant 27 : index
    %c0_116 = arith.constant 0 : index
    %c0_117 = arith.constant 0 : index
    %299 = vector.load %arg2[%c27_115, %c0_116, %c0_117] : memref<64x1x256xf32, #tpu.memory_space<vmem>>, vector<1x1x256xf32>
    %300 = vector.shape_cast %299 : vector<1x1x256xf32> to vector<1x256xf32>
    %301 = vector.broadcast %300 : vector<1x256xf32> to vector<8x256xf32>
    %302 = arith.mulf %298, %301 : vector<8x256xf32>
    %c0_118 = arith.constant 0 : index
    %c53 = arith.constant 53 : index
    %303 = vector.load %arg4[%c0_118, %c53] : memref<8x108xf32, #tpu.memory_space<vmem>>, vector<8x1xf32>
    %304 = vector.broadcast %303 : vector<8x1xf32> to vector<8x256xf32>
    %305 = arith.mulf %302, %304 : vector<8x256xf32>
    %306 = arith.addf %297, %305 : vector<8x256xf32>
    %c94_i32 = arith.constant 94 : i32
    %307 = tpu.dynamic_rotate %271 by %c94_i32 dim 1 : vector<8x256xf32>, i32 -> vector<8x256xf32>
    %c28_119 = arith.constant 28 : index
    %c0_120 = arith.constant 0 : index
    %c0_121 = arith.constant 0 : index
    %308 = vector.load %arg2[%c28_119, %c0_120, %c0_121] : memref<64x1x256xf32, #tpu.memory_space<vmem>>, vector<1x1x256xf32>
    %309 = vector.shape_cast %308 : vector<1x1x256xf32> to vector<1x256xf32>
    %310 = vector.broadcast %309 : vector<1x256xf32> to vector<8x256xf32>
    %311 = arith.mulf %307, %310 : vector<8x256xf32>
    %c0_122 = arith.constant 0 : index
    %c54 = arith.constant 54 : index
    %312 = vector.load %arg4[%c0_122, %c54] : memref<8x108xf32, #tpu.memory_space<vmem>>, vector<8x1xf32>
    %313 = vector.broadcast %312 : vector<8x1xf32> to vector<8x256xf32>
    %314 = arith.mulf %311, %313 : vector<8x256xf32>
    %315 = arith.addf %306, %314 : vector<8x256xf32>
    %c92_i32 = arith.constant 92 : i32
    %316 = tpu.dynamic_rotate %271 by %c92_i32 dim 1 : vector<8x256xf32>, i32 -> vector<8x256xf32>
    %c29_123 = arith.constant 29 : index
    %c0_124 = arith.constant 0 : index
    %c0_125 = arith.constant 0 : index
    %317 = vector.load %arg2[%c29_123, %c0_124, %c0_125] : memref<64x1x256xf32, #tpu.memory_space<vmem>>, vector<1x1x256xf32>
    %318 = vector.shape_cast %317 : vector<1x1x256xf32> to vector<1x256xf32>
    %319 = vector.broadcast %318 : vector<1x256xf32> to vector<8x256xf32>
    %320 = arith.mulf %316, %319 : vector<8x256xf32>
    %c0_126 = arith.constant 0 : index
    %c55 = arith.constant 55 : index
    %321 = vector.load %arg4[%c0_126, %c55] : memref<8x108xf32, #tpu.memory_space<vmem>>, vector<8x1xf32>
    %322 = vector.broadcast %321 : vector<8x1xf32> to vector<8x256xf32>
    %323 = arith.mulf %320, %322 : vector<8x256xf32>
    %324 = arith.addf %315, %323 : vector<8x256xf32>
    %c90_i32 = arith.constant 90 : i32
    %325 = tpu.dynamic_rotate %271 by %c90_i32 dim 1 : vector<8x256xf32>, i32 -> vector<8x256xf32>
    %c30_127 = arith.constant 30 : index
    %c0_128 = arith.constant 0 : index
    %c0_129 = arith.constant 0 : index
    %326 = vector.load %arg2[%c30_127, %c0_128, %c0_129] : memref<64x1x256xf32, #tpu.memory_space<vmem>>, vector<1x1x256xf32>
    %327 = vector.shape_cast %326 : vector<1x1x256xf32> to vector<1x256xf32>
    %328 = vector.broadcast %327 : vector<1x256xf32> to vector<8x256xf32>
    %329 = arith.mulf %325, %328 : vector<8x256xf32>
    %c0_130 = arith.constant 0 : index
    %c56 = arith.constant 56 : index
    %330 = vector.load %arg4[%c0_130, %c56] : memref<8x108xf32, #tpu.memory_space<vmem>>, vector<8x1xf32>
    %331 = vector.broadcast %330 : vector<8x1xf32> to vector<8x256xf32>
    %332 = arith.mulf %329, %331 : vector<8x256xf32>
    %333 = arith.addf %324, %332 : vector<8x256xf32>
    %c70_i32 = arith.constant 70 : i32
    %334 = tpu.dynamic_rotate %271 by %c70_i32 dim 1 : vector<8x256xf32>, i32 -> vector<8x256xf32>
    %c31_131 = arith.constant 31 : index
    %c0_132 = arith.constant 0 : index
    %c0_133 = arith.constant 0 : index
    %335 = vector.load %arg2[%c31_131, %c0_132, %c0_133] : memref<64x1x256xf32, #tpu.memory_space<vmem>>, vector<1x1x256xf32>
    %336 = vector.shape_cast %335 : vector<1x1x256xf32> to vector<1x256xf32>
    %337 = vector.broadcast %336 : vector<1x256xf32> to vector<8x256xf32>
    %338 = arith.mulf %334, %337 : vector<8x256xf32>
    %c0_134 = arith.constant 0 : index
    %c57 = arith.constant 57 : index
    %339 = vector.load %arg4[%c0_134, %c57] : memref<8x108xf32, #tpu.memory_space<vmem>>, vector<8x1xf32>
    %340 = vector.broadcast %339 : vector<8x1xf32> to vector<8x256xf32>
    %341 = arith.mulf %338, %340 : vector<8x256xf32>
    %342 = arith.addf %333, %341 : vector<8x256xf32>
    %c68_i32 = arith.constant 68 : i32
    %343 = tpu.dynamic_rotate %271 by %c68_i32 dim 1 : vector<8x256xf32>, i32 -> vector<8x256xf32>
    %c32_135 = arith.constant 32 : index
    %c0_136 = arith.constant 0 : index
    %c0_137 = arith.constant 0 : index
    %344 = vector.load %arg2[%c32_135, %c0_136, %c0_137] : memref<64x1x256xf32, #tpu.memory_space<vmem>>, vector<1x1x256xf32>
    %345 = vector.shape_cast %344 : vector<1x1x256xf32> to vector<1x256xf32>
    %346 = vector.broadcast %345 : vector<1x256xf32> to vector<8x256xf32>
    %347 = arith.mulf %343, %346 : vector<8x256xf32>
    %c0_138 = arith.constant 0 : index
    %c58 = arith.constant 58 : index
    %348 = vector.load %arg4[%c0_138, %c58] : memref<8x108xf32, #tpu.memory_space<vmem>>, vector<8x1xf32>
    %349 = vector.broadcast %348 : vector<8x1xf32> to vector<8x256xf32>
    %350 = arith.mulf %347, %349 : vector<8x256xf32>
    %351 = arith.addf %342, %350 : vector<8x256xf32>
    %c66_i32 = arith.constant 66 : i32
    %352 = tpu.dynamic_rotate %271 by %c66_i32 dim 1 : vector<8x256xf32>, i32 -> vector<8x256xf32>
    %c33_139 = arith.constant 33 : index
    %c0_140 = arith.constant 0 : index
    %c0_141 = arith.constant 0 : index
    %353 = vector.load %arg2[%c33_139, %c0_140, %c0_141] : memref<64x1x256xf32, #tpu.memory_space<vmem>>, vector<1x1x256xf32>
    %354 = vector.shape_cast %353 : vector<1x1x256xf32> to vector<1x256xf32>
    %355 = vector.broadcast %354 : vector<1x256xf32> to vector<8x256xf32>
    %356 = arith.mulf %352, %355 : vector<8x256xf32>
    %c0_142 = arith.constant 0 : index
    %c59 = arith.constant 59 : index
    %357 = vector.load %arg4[%c0_142, %c59] : memref<8x108xf32, #tpu.memory_space<vmem>>, vector<8x1xf32>
    %358 = vector.broadcast %357 : vector<8x1xf32> to vector<8x256xf32>
    %359 = arith.mulf %356, %358 : vector<8x256xf32>
    %360 = arith.addf %351, %359 : vector<8x256xf32>
    %c64_i32 = arith.constant 64 : i32
    %361 = tpu.dynamic_rotate %271 by %c64_i32 dim 1 : vector<8x256xf32>, i32 -> vector<8x256xf32>
    %c34_143 = arith.constant 34 : index
    %c0_144 = arith.constant 0 : index
    %c0_145 = arith.constant 0 : index
    %362 = vector.load %arg2[%c34_143, %c0_144, %c0_145] : memref<64x1x256xf32, #tpu.memory_space<vmem>>, vector<1x1x256xf32>
    %363 = vector.shape_cast %362 : vector<1x1x256xf32> to vector<1x256xf32>
    %364 = vector.broadcast %363 : vector<1x256xf32> to vector<8x256xf32>
    %365 = arith.mulf %361, %364 : vector<8x256xf32>
    %c0_146 = arith.constant 0 : index
    %c60 = arith.constant 60 : index
    %366 = vector.load %arg4[%c0_146, %c60] : memref<8x108xf32, #tpu.memory_space<vmem>>, vector<8x1xf32>
    %367 = vector.broadcast %366 : vector<8x1xf32> to vector<8x256xf32>
    %368 = arith.mulf %365, %367 : vector<8x256xf32>
    %369 = arith.addf %360, %368 : vector<8x256xf32>
    %c62_i32 = arith.constant 62 : i32
    %370 = tpu.dynamic_rotate %271 by %c62_i32 dim 1 : vector<8x256xf32>, i32 -> vector<8x256xf32>
    %c35_147 = arith.constant 35 : index
    %c0_148 = arith.constant 0 : index
    %c0_149 = arith.constant 0 : index
    %371 = vector.load %arg2[%c35_147, %c0_148, %c0_149] : memref<64x1x256xf32, #tpu.memory_space<vmem>>, vector<1x1x256xf32>
    %372 = vector.shape_cast %371 : vector<1x1x256xf32> to vector<1x256xf32>
    %373 = vector.broadcast %372 : vector<1x256xf32> to vector<8x256xf32>
    %374 = arith.mulf %370, %373 : vector<8x256xf32>
    %c0_150 = arith.constant 0 : index
    %c61 = arith.constant 61 : index
    %375 = vector.load %arg4[%c0_150, %c61] : memref<8x108xf32, #tpu.memory_space<vmem>>, vector<8x1xf32>
    %376 = vector.broadcast %375 : vector<8x1xf32> to vector<8x256xf32>
    %377 = arith.mulf %374, %376 : vector<8x256xf32>
    %378 = arith.addf %369, %377 : vector<8x256xf32>
    %c60_i32 = arith.constant 60 : i32
    %379 = tpu.dynamic_rotate %271 by %c60_i32 dim 1 : vector<8x256xf32>, i32 -> vector<8x256xf32>
    %c36_151 = arith.constant 36 : index
    %c0_152 = arith.constant 0 : index
    %c0_153 = arith.constant 0 : index
    %380 = vector.load %arg2[%c36_151, %c0_152, %c0_153] : memref<64x1x256xf32, #tpu.memory_space<vmem>>, vector<1x1x256xf32>
    %381 = vector.shape_cast %380 : vector<1x1x256xf32> to vector<1x256xf32>
    %382 = vector.broadcast %381 : vector<1x256xf32> to vector<8x256xf32>
    %383 = arith.mulf %379, %382 : vector<8x256xf32>
    %c0_154 = arith.constant 0 : index
    %c62 = arith.constant 62 : index
    %384 = vector.load %arg4[%c0_154, %c62] : memref<8x108xf32, #tpu.memory_space<vmem>>, vector<8x1xf32>
    %385 = vector.broadcast %384 : vector<8x1xf32> to vector<8x256xf32>
    %386 = arith.mulf %383, %385 : vector<8x256xf32>
    %387 = arith.addf %378, %386 : vector<8x256xf32>
    %c58_i32 = arith.constant 58 : i32
    %388 = tpu.dynamic_rotate %271 by %c58_i32 dim 1 : vector<8x256xf32>, i32 -> vector<8x256xf32>
    %c37_155 = arith.constant 37 : index
    %c0_156 = arith.constant 0 : index
    %c0_157 = arith.constant 0 : index
    %389 = vector.load %arg2[%c37_155, %c0_156, %c0_157] : memref<64x1x256xf32, #tpu.memory_space<vmem>>, vector<1x1x256xf32>
    %390 = vector.shape_cast %389 : vector<1x1x256xf32> to vector<1x256xf32>
    %391 = vector.broadcast %390 : vector<1x256xf32> to vector<8x256xf32>
    %392 = arith.mulf %388, %391 : vector<8x256xf32>
    %c0_158 = arith.constant 0 : index
    %c63 = arith.constant 63 : index
    %393 = vector.load %arg4[%c0_158, %c63] : memref<8x108xf32, #tpu.memory_space<vmem>>, vector<8x1xf32>
    %394 = vector.broadcast %393 : vector<8x1xf32> to vector<8x256xf32>
    %395 = arith.mulf %392, %394 : vector<8x256xf32>
    %396 = arith.addf %387, %395 : vector<8x256xf32>
    %c38_i32 = arith.constant 38 : i32
    %397 = tpu.dynamic_rotate %271 by %c38_i32 dim 1 : vector<8x256xf32>, i32 -> vector<8x256xf32>
    %c38_159 = arith.constant 38 : index
    %c0_160 = arith.constant 0 : index
    %c0_161 = arith.constant 0 : index
    %398 = vector.load %arg2[%c38_159, %c0_160, %c0_161] : memref<64x1x256xf32, #tpu.memory_space<vmem>>, vector<1x1x256xf32>
    %399 = vector.shape_cast %398 : vector<1x1x256xf32> to vector<1x256xf32>
    %400 = vector.broadcast %399 : vector<1x256xf32> to vector<8x256xf32>
    %401 = arith.mulf %397, %400 : vector<8x256xf32>
    %c0_162 = arith.constant 0 : index
    %c64 = arith.constant 64 : index
    %402 = vector.load %arg4[%c0_162, %c64] : memref<8x108xf32, #tpu.memory_space<vmem>>, vector<8x1xf32>
    %403 = vector.broadcast %402 : vector<8x1xf32> to vector<8x256xf32>
    %404 = arith.mulf %401, %403 : vector<8x256xf32>
    %405 = arith.addf %396, %404 : vector<8x256xf32>
    %c36_i32 = arith.constant 36 : i32
    %406 = tpu.dynamic_rotate %271 by %c36_i32 dim 1 : vector<8x256xf32>, i32 -> vector<8x256xf32>
    %c39_163 = arith.constant 39 : index
    %c0_164 = arith.constant 0 : index
    %c0_165 = arith.constant 0 : index
    %407 = vector.load %arg2[%c39_163, %c0_164, %c0_165] : memref<64x1x256xf32, #tpu.memory_space<vmem>>, vector<1x1x256xf32>
    %408 = vector.shape_cast %407 : vector<1x1x256xf32> to vector<1x256xf32>
    %409 = vector.broadcast %408 : vector<1x256xf32> to vector<8x256xf32>
    %410 = arith.mulf %406, %409 : vector<8x256xf32>
    %c0_166 = arith.constant 0 : index
    %c65 = arith.constant 65 : index
    %411 = vector.load %arg4[%c0_166, %c65] : memref<8x108xf32, #tpu.memory_space<vmem>>, vector<8x1xf32>
    %412 = vector.broadcast %411 : vector<8x1xf32> to vector<8x256xf32>
    %413 = arith.mulf %410, %412 : vector<8x256xf32>
    %414 = arith.addf %405, %413 : vector<8x256xf32>
    %c34_i32_167 = arith.constant 34 : i32
    %415 = tpu.dynamic_rotate %271 by %c34_i32_167 dim 1 : vector<8x256xf32>, i32 -> vector<8x256xf32>
    %c0_168 = arith.constant 0 : index
    %c0_169 = arith.constant 0 : index
    %c0_170 = arith.constant 0 : index
    %416 = vector.load %arg2[%c0_168, %c0_169, %c0_170] : memref<64x1x256xf32, #tpu.memory_space<vmem>>, vector<1x1x256xf32>
    %417 = vector.shape_cast %416 : vector<1x1x256xf32> to vector<1x256xf32>
    %418 = vector.broadcast %417 : vector<1x256xf32> to vector<8x256xf32>
    %419 = arith.mulf %415, %418 : vector<8x256xf32>
    %c0_171 = arith.constant 0 : index
    %c66 = arith.constant 66 : index
    %420 = vector.load %arg4[%c0_171, %c66] : memref<8x108xf32, #tpu.memory_space<vmem>>, vector<8x1xf32>
    %421 = vector.broadcast %420 : vector<8x1xf32> to vector<8x256xf32>
    %422 = arith.mulf %419, %421 : vector<8x256xf32>
    %423 = arith.addf %414, %422 : vector<8x256xf32>
    %c32_i32_172 = arith.constant 32 : i32
    %424 = tpu.dynamic_rotate %271 by %c32_i32_172 dim 1 : vector<8x256xf32>, i32 -> vector<8x256xf32>
    %c2_173 = arith.constant 2 : index
    %c0_174 = arith.constant 0 : index
    %c0_175 = arith.constant 0 : index
    %425 = vector.load %arg2[%c2_173, %c0_174, %c0_175] : memref<64x1x256xf32, #tpu.memory_space<vmem>>, vector<1x1x256xf32>
    %426 = vector.shape_cast %425 : vector<1x1x256xf32> to vector<1x256xf32>
    %427 = vector.broadcast %426 : vector<1x256xf32> to vector<8x256xf32>
    %428 = arith.mulf %424, %427 : vector<8x256xf32>
    %c0_176 = arith.constant 0 : index
    %c67 = arith.constant 67 : index
    %429 = vector.load %arg4[%c0_176, %c67] : memref<8x108xf32, #tpu.memory_space<vmem>>, vector<8x1xf32>
    %430 = vector.broadcast %429 : vector<8x1xf32> to vector<8x256xf32>
    %431 = arith.mulf %428, %430 : vector<8x256xf32>
    %432 = arith.addf %423, %431 : vector<8x256xf32>
    %c30_i32_177 = arith.constant 30 : i32
    %433 = tpu.dynamic_rotate %271 by %c30_i32_177 dim 1 : vector<8x256xf32>, i32 -> vector<8x256xf32>
    %c4_178 = arith.constant 4 : index
    %c0_179 = arith.constant 0 : index
    %c0_180 = arith.constant 0 : index
    %434 = vector.load %arg2[%c4_178, %c0_179, %c0_180] : memref<64x1x256xf32, #tpu.memory_space<vmem>>, vector<1x1x256xf32>
    %435 = vector.shape_cast %434 : vector<1x1x256xf32> to vector<1x256xf32>
    %436 = vector.broadcast %435 : vector<1x256xf32> to vector<8x256xf32>
    %437 = arith.mulf %433, %436 : vector<8x256xf32>
    %c0_181 = arith.constant 0 : index
    %c68 = arith.constant 68 : index
    %438 = vector.load %arg4[%c0_181, %c68] : memref<8x108xf32, #tpu.memory_space<vmem>>, vector<8x1xf32>
    %439 = vector.broadcast %438 : vector<8x1xf32> to vector<8x256xf32>
    %440 = arith.mulf %437, %439 : vector<8x256xf32>
    %441 = arith.addf %432, %440 : vector<8x256xf32>
    %c28_i32 = arith.constant 28 : i32
    %442 = tpu.dynamic_rotate %271 by %c28_i32 dim 1 : vector<8x256xf32>, i32 -> vector<8x256xf32>
    %c40_182 = arith.constant 40 : index
    %c0_183 = arith.constant 0 : index
    %c0_184 = arith.constant 0 : index
    %443 = vector.load %arg2[%c40_182, %c0_183, %c0_184] : memref<64x1x256xf32, #tpu.memory_space<vmem>>, vector<1x1x256xf32>
    %444 = vector.shape_cast %443 : vector<1x1x256xf32> to vector<1x256xf32>
    %445 = vector.broadcast %444 : vector<1x256xf32> to vector<8x256xf32>
    %446 = arith.mulf %442, %445 : vector<8x256xf32>
    %c0_185 = arith.constant 0 : index
    %c69 = arith.constant 69 : index
    %447 = vector.load %arg4[%c0_185, %c69] : memref<8x108xf32, #tpu.memory_space<vmem>>, vector<8x1xf32>
    %448 = vector.broadcast %447 : vector<8x1xf32> to vector<8x256xf32>
    %449 = arith.mulf %446, %448 : vector<8x256xf32>
    %450 = arith.addf %441, %449 : vector<8x256xf32>
    %c26_i32 = arith.constant 26 : i32
    %451 = tpu.dynamic_rotate %271 by %c26_i32 dim 1 : vector<8x256xf32>, i32 -> vector<8x256xf32>
    %c41_186 = arith.constant 41 : index
    %c0_187 = arith.constant 0 : index
    %c0_188 = arith.constant 0 : index
    %452 = vector.load %arg2[%c41_186, %c0_187, %c0_188] : memref<64x1x256xf32, #tpu.memory_space<vmem>>, vector<1x1x256xf32>
    %453 = vector.shape_cast %452 : vector<1x1x256xf32> to vector<1x256xf32>
    %454 = vector.broadcast %453 : vector<1x256xf32> to vector<8x256xf32>
    %455 = arith.mulf %451, %454 : vector<8x256xf32>
    %c0_189 = arith.constant 0 : index
    %c70 = arith.constant 70 : index
    %456 = vector.load %arg4[%c0_189, %c70] : memref<8x108xf32, #tpu.memory_space<vmem>>, vector<8x1xf32>
    %457 = vector.broadcast %456 : vector<8x1xf32> to vector<8x256xf32>
    %458 = arith.mulf %455, %457 : vector<8x256xf32>
    %459 = arith.addf %450, %458 : vector<8x256xf32>
    %c6_i32 = arith.constant 6 : i32
    %460 = tpu.dynamic_rotate %271 by %c6_i32 dim 1 : vector<8x256xf32>, i32 -> vector<8x256xf32>
    %c42_190 = arith.constant 42 : index
    %c0_191 = arith.constant 0 : index
    %c0_192 = arith.constant 0 : index
    %461 = vector.load %arg2[%c42_190, %c0_191, %c0_192] : memref<64x1x256xf32, #tpu.memory_space<vmem>>, vector<1x1x256xf32>
    %462 = vector.shape_cast %461 : vector<1x1x256xf32> to vector<1x256xf32>
    %463 = vector.broadcast %462 : vector<1x256xf32> to vector<8x256xf32>
    %464 = arith.mulf %460, %463 : vector<8x256xf32>
    %c0_193 = arith.constant 0 : index
    %c71 = arith.constant 71 : index
    %465 = vector.load %arg4[%c0_193, %c71] : memref<8x108xf32, #tpu.memory_space<vmem>>, vector<8x1xf32>
    %466 = vector.broadcast %465 : vector<8x1xf32> to vector<8x256xf32>
    %467 = arith.mulf %464, %466 : vector<8x256xf32>
    %468 = arith.addf %459, %467 : vector<8x256xf32>
    %c4_i32 = arith.constant 4 : i32
    %469 = tpu.dynamic_rotate %271 by %c4_i32 dim 1 : vector<8x256xf32>, i32 -> vector<8x256xf32>
    %c43_194 = arith.constant 43 : index
    %c0_195 = arith.constant 0 : index
    %c0_196 = arith.constant 0 : index
    %470 = vector.load %arg2[%c43_194, %c0_195, %c0_196] : memref<64x1x256xf32, #tpu.memory_space<vmem>>, vector<1x1x256xf32>
    %471 = vector.shape_cast %470 : vector<1x1x256xf32> to vector<1x256xf32>
    %472 = vector.broadcast %471 : vector<1x256xf32> to vector<8x256xf32>
    %473 = arith.mulf %469, %472 : vector<8x256xf32>
    %c0_197 = arith.constant 0 : index
    %c72 = arith.constant 72 : index
    %474 = vector.load %arg4[%c0_197, %c72] : memref<8x108xf32, #tpu.memory_space<vmem>>, vector<8x1xf32>
    %475 = vector.broadcast %474 : vector<8x1xf32> to vector<8x256xf32>
    %476 = arith.mulf %473, %475 : vector<8x256xf32>
    %477 = arith.addf %468, %476 : vector<8x256xf32>
    %c2_i32_198 = arith.constant 2 : i32
    %478 = tpu.dynamic_rotate %271 by %c2_i32_198 dim 1 : vector<8x256xf32>, i32 -> vector<8x256xf32>
    %c10_199 = arith.constant 10 : index
    %c0_200 = arith.constant 0 : index
    %c0_201 = arith.constant 0 : index
    %479 = vector.load %arg2[%c10_199, %c0_200, %c0_201] : memref<64x1x256xf32, #tpu.memory_space<vmem>>, vector<1x1x256xf32>
    %480 = vector.shape_cast %479 : vector<1x1x256xf32> to vector<1x256xf32>
    %481 = vector.broadcast %480 : vector<1x256xf32> to vector<8x256xf32>
    %482 = arith.mulf %478, %481 : vector<8x256xf32>
    %c0_202 = arith.constant 0 : index
    %c73 = arith.constant 73 : index
    %483 = vector.load %arg4[%c0_202, %c73] : memref<8x108xf32, #tpu.memory_space<vmem>>, vector<8x1xf32>
    %484 = vector.broadcast %483 : vector<8x1xf32> to vector<8x256xf32>
    %485 = arith.mulf %482, %484 : vector<8x256xf32>
    %486 = arith.addf %477, %485 : vector<8x256xf32>
    %c0_203 = arith.constant 0 : index
    %c74 = arith.constant 74 : index
    %487 = vector.load %arg4[%c0_203, %c74] : memref<8x108xf32, #tpu.memory_space<vmem>>, vector<8x1xf32>
    %488 = vector.broadcast %487 : vector<8x1xf32> to vector<8x256xf32>
    %489 = arith.mulf %271, %488 : vector<8x256xf32>
    %490 = arith.addf %486, %489 : vector<8x256xf32>
    %c254_i32_204 = arith.constant 254 : i32
    %491 = tpu.dynamic_rotate %271 by %c254_i32_204 dim 1 : vector<8x256xf32>, i32 -> vector<8x256xf32>
    %c13_205 = arith.constant 13 : index
    %c0_206 = arith.constant 0 : index
    %c0_207 = arith.constant 0 : index
    %492 = vector.load %arg2[%c13_205, %c0_206, %c0_207] : memref<64x1x256xf32, #tpu.memory_space<vmem>>, vector<1x1x256xf32>
    %493 = vector.shape_cast %492 : vector<1x1x256xf32> to vector<1x256xf32>
    %494 = vector.broadcast %493 : vector<1x256xf32> to vector<8x256xf32>
    %495 = arith.mulf %491, %494 : vector<8x256xf32>
    %c0_208 = arith.constant 0 : index
    %c75 = arith.constant 75 : index
    %496 = vector.load %arg4[%c0_208, %c75] : memref<8x108xf32, #tpu.memory_space<vmem>>, vector<8x1xf32>
    %497 = vector.broadcast %496 : vector<8x1xf32> to vector<8x256xf32>
    %498 = arith.mulf %495, %497 : vector<8x256xf32>
    %499 = arith.addf %490, %498 : vector<8x256xf32>
    %c252_i32 = arith.constant 252 : i32
    %500 = tpu.dynamic_rotate %271 by %c252_i32 dim 1 : vector<8x256xf32>, i32 -> vector<8x256xf32>
    %c44_209 = arith.constant 44 : index
    %c0_210 = arith.constant 0 : index
    %c0_211 = arith.constant 0 : index
    %501 = vector.load %arg2[%c44_209, %c0_210, %c0_211] : memref<64x1x256xf32, #tpu.memory_space<vmem>>, vector<1x1x256xf32>
    %502 = vector.shape_cast %501 : vector<1x1x256xf32> to vector<1x256xf32>
    %503 = vector.broadcast %502 : vector<1x256xf32> to vector<8x256xf32>
    %504 = arith.mulf %500, %503 : vector<8x256xf32>
    %c0_212 = arith.constant 0 : index
    %c76 = arith.constant 76 : index
    %505 = vector.load %arg4[%c0_212, %c76] : memref<8x108xf32, #tpu.memory_space<vmem>>, vector<8x1xf32>
    %506 = vector.broadcast %505 : vector<8x1xf32> to vector<8x256xf32>
    %507 = arith.mulf %504, %506 : vector<8x256xf32>
    %508 = arith.addf %499, %507 : vector<8x256xf32>
    %c250_i32 = arith.constant 250 : i32
    %509 = tpu.dynamic_rotate %271 by %c250_i32 dim 1 : vector<8x256xf32>, i32 -> vector<8x256xf32>
    %c45_213 = arith.constant 45 : index
    %c0_214 = arith.constant 0 : index
    %c0_215 = arith.constant 0 : index
    %510 = vector.load %arg2[%c45_213, %c0_214, %c0_215] : memref<64x1x256xf32, #tpu.memory_space<vmem>>, vector<1x1x256xf32>
    %511 = vector.shape_cast %510 : vector<1x1x256xf32> to vector<1x256xf32>
    %512 = vector.broadcast %511 : vector<1x256xf32> to vector<8x256xf32>
    %513 = arith.mulf %509, %512 : vector<8x256xf32>
    %c0_216 = arith.constant 0 : index
    %c77 = arith.constant 77 : index
    %514 = vector.load %arg4[%c0_216, %c77] : memref<8x108xf32, #tpu.memory_space<vmem>>, vector<8x1xf32>
    %515 = vector.broadcast %514 : vector<8x1xf32> to vector<8x256xf32>
    %516 = arith.mulf %513, %515 : vector<8x256xf32>
    %517 = arith.addf %508, %516 : vector<8x256xf32>
    %c230_i32 = arith.constant 230 : i32
    %518 = tpu.dynamic_rotate %271 by %c230_i32 dim 1 : vector<8x256xf32>, i32 -> vector<8x256xf32>
    %c46_217 = arith.constant 46 : index
    %c0_218 = arith.constant 0 : index
    %c0_219 = arith.constant 0 : index
    %519 = vector.load %arg2[%c46_217, %c0_218, %c0_219] : memref<64x1x256xf32, #tpu.memory_space<vmem>>, vector<1x1x256xf32>
    %520 = vector.shape_cast %519 : vector<1x1x256xf32> to vector<1x256xf32>
    %521 = vector.broadcast %520 : vector<1x256xf32> to vector<8x256xf32>
    %522 = arith.mulf %518, %521 : vector<8x256xf32>
    %c0_220 = arith.constant 0 : index
    %c78 = arith.constant 78 : index
    %523 = vector.load %arg4[%c0_220, %c78] : memref<8x108xf32, #tpu.memory_space<vmem>>, vector<8x1xf32>
    %524 = vector.broadcast %523 : vector<8x1xf32> to vector<8x256xf32>
    %525 = arith.mulf %522, %524 : vector<8x256xf32>
    %526 = arith.addf %517, %525 : vector<8x256xf32>
    %c228_i32 = arith.constant 228 : i32
    %527 = tpu.dynamic_rotate %271 by %c228_i32 dim 1 : vector<8x256xf32>, i32 -> vector<8x256xf32>
    %c47_221 = arith.constant 47 : index
    %c0_222 = arith.constant 0 : index
    %c0_223 = arith.constant 0 : index
    %528 = vector.load %arg2[%c47_221, %c0_222, %c0_223] : memref<64x1x256xf32, #tpu.memory_space<vmem>>, vector<1x1x256xf32>
    %529 = vector.shape_cast %528 : vector<1x1x256xf32> to vector<1x256xf32>
    %530 = vector.broadcast %529 : vector<1x256xf32> to vector<8x256xf32>
    %531 = arith.mulf %527, %530 : vector<8x256xf32>
    %c0_224 = arith.constant 0 : index
    %c79 = arith.constant 79 : index
    %532 = vector.load %arg4[%c0_224, %c79] : memref<8x108xf32, #tpu.memory_space<vmem>>, vector<8x1xf32>
    %533 = vector.broadcast %532 : vector<8x1xf32> to vector<8x256xf32>
    %534 = arith.mulf %531, %533 : vector<8x256xf32>
    %535 = arith.addf %526, %534 : vector<8x256xf32>
    %c226_i32_225 = arith.constant 226 : i32
    %536 = tpu.dynamic_rotate %271 by %c226_i32_225 dim 1 : vector<8x256xf32>, i32 -> vector<8x256xf32>
    %c19_226 = arith.constant 19 : index
    %c0_227 = arith.constant 0 : index
    %c0_228 = arith.constant 0 : index
    %537 = vector.load %arg2[%c19_226, %c0_227, %c0_228] : memref<64x1x256xf32, #tpu.memory_space<vmem>>, vector<1x1x256xf32>
    %538 = vector.shape_cast %537 : vector<1x1x256xf32> to vector<1x256xf32>
    %539 = vector.broadcast %538 : vector<1x256xf32> to vector<8x256xf32>
    %540 = arith.mulf %536, %539 : vector<8x256xf32>
    %c0_229 = arith.constant 0 : index
    %c80 = arith.constant 80 : index
    %541 = vector.load %arg4[%c0_229, %c80] : memref<8x108xf32, #tpu.memory_space<vmem>>, vector<8x1xf32>
    %542 = vector.broadcast %541 : vector<8x1xf32> to vector<8x256xf32>
    %543 = arith.mulf %540, %542 : vector<8x256xf32>
    %544 = arith.addf %535, %543 : vector<8x256xf32>
    %c224_i32_230 = arith.constant 224 : i32
    %545 = tpu.dynamic_rotate %271 by %c224_i32_230 dim 1 : vector<8x256xf32>, i32 -> vector<8x256xf32>
    %c21_231 = arith.constant 21 : index
    %c0_232 = arith.constant 0 : index
    %c0_233 = arith.constant 0 : index
    %546 = vector.load %arg2[%c21_231, %c0_232, %c0_233] : memref<64x1x256xf32, #tpu.memory_space<vmem>>, vector<1x1x256xf32>
    %547 = vector.shape_cast %546 : vector<1x1x256xf32> to vector<1x256xf32>
    %548 = vector.broadcast %547 : vector<1x256xf32> to vector<8x256xf32>
    %549 = arith.mulf %545, %548 : vector<8x256xf32>
    %c0_234 = arith.constant 0 : index
    %c81 = arith.constant 81 : index
    %550 = vector.load %arg4[%c0_234, %c81] : memref<8x108xf32, #tpu.memory_space<vmem>>, vector<8x1xf32>
    %551 = vector.broadcast %550 : vector<8x1xf32> to vector<8x256xf32>
    %552 = arith.mulf %549, %551 : vector<8x256xf32>
    %553 = arith.addf %544, %552 : vector<8x256xf32>
    %c222_i32_235 = arith.constant 222 : i32
    %554 = tpu.dynamic_rotate %271 by %c222_i32_235 dim 1 : vector<8x256xf32>, i32 -> vector<8x256xf32>
    %c23_236 = arith.constant 23 : index
    %c0_237 = arith.constant 0 : index
    %c0_238 = arith.constant 0 : index
    %555 = vector.load %arg2[%c23_236, %c0_237, %c0_238] : memref<64x1x256xf32, #tpu.memory_space<vmem>>, vector<1x1x256xf32>
    %556 = vector.shape_cast %555 : vector<1x1x256xf32> to vector<1x256xf32>
    %557 = vector.broadcast %556 : vector<1x256xf32> to vector<8x256xf32>
    %558 = arith.mulf %554, %557 : vector<8x256xf32>
    %c0_239 = arith.constant 0 : index
    %c82 = arith.constant 82 : index
    %559 = vector.load %arg4[%c0_239, %c82] : memref<8x108xf32, #tpu.memory_space<vmem>>, vector<8x1xf32>
    %560 = vector.broadcast %559 : vector<8x1xf32> to vector<8x256xf32>
    %561 = arith.mulf %558, %560 : vector<8x256xf32>
    %562 = arith.addf %553, %561 : vector<8x256xf32>
    %c220_i32 = arith.constant 220 : i32
    %563 = tpu.dynamic_rotate %271 by %c220_i32 dim 1 : vector<8x256xf32>, i32 -> vector<8x256xf32>
    %c48_240 = arith.constant 48 : index
    %c0_241 = arith.constant 0 : index
    %c0_242 = arith.constant 0 : index
    %564 = vector.load %arg2[%c48_240, %c0_241, %c0_242] : memref<64x1x256xf32, #tpu.memory_space<vmem>>, vector<1x1x256xf32>
    %565 = vector.shape_cast %564 : vector<1x1x256xf32> to vector<1x256xf32>
    %566 = vector.broadcast %565 : vector<1x256xf32> to vector<8x256xf32>
    %567 = arith.mulf %563, %566 : vector<8x256xf32>
    %c0_243 = arith.constant 0 : index
    %c83 = arith.constant 83 : index
    %568 = vector.load %arg4[%c0_243, %c83] : memref<8x108xf32, #tpu.memory_space<vmem>>, vector<8x1xf32>
    %569 = vector.broadcast %568 : vector<8x1xf32> to vector<8x256xf32>
    %570 = arith.mulf %567, %569 : vector<8x256xf32>
    %571 = arith.addf %562, %570 : vector<8x256xf32>
    %c218_i32 = arith.constant 218 : i32
    %572 = tpu.dynamic_rotate %271 by %c218_i32 dim 1 : vector<8x256xf32>, i32 -> vector<8x256xf32>
    %c49_244 = arith.constant 49 : index
    %c0_245 = arith.constant 0 : index
    %c0_246 = arith.constant 0 : index
    %573 = vector.load %arg2[%c49_244, %c0_245, %c0_246] : memref<64x1x256xf32, #tpu.memory_space<vmem>>, vector<1x1x256xf32>
    %574 = vector.shape_cast %573 : vector<1x1x256xf32> to vector<1x256xf32>
    %575 = vector.broadcast %574 : vector<1x256xf32> to vector<8x256xf32>
    %576 = arith.mulf %572, %575 : vector<8x256xf32>
    %c0_247 = arith.constant 0 : index
    %c84 = arith.constant 84 : index
    %577 = vector.load %arg4[%c0_247, %c84] : memref<8x108xf32, #tpu.memory_space<vmem>>, vector<8x1xf32>
    %578 = vector.broadcast %577 : vector<8x1xf32> to vector<8x256xf32>
    %579 = arith.mulf %576, %578 : vector<8x256xf32>
    %580 = arith.addf %571, %579 : vector<8x256xf32>
    %c198_i32 = arith.constant 198 : i32
    %581 = tpu.dynamic_rotate %271 by %c198_i32 dim 1 : vector<8x256xf32>, i32 -> vector<8x256xf32>
    %c50_248 = arith.constant 50 : index
    %c0_249 = arith.constant 0 : index
    %c0_250 = arith.constant 0 : index
    %582 = vector.load %arg2[%c50_248, %c0_249, %c0_250] : memref<64x1x256xf32, #tpu.memory_space<vmem>>, vector<1x1x256xf32>
    %583 = vector.shape_cast %582 : vector<1x1x256xf32> to vector<1x256xf32>
    %584 = vector.broadcast %583 : vector<1x256xf32> to vector<8x256xf32>
    %585 = arith.mulf %581, %584 : vector<8x256xf32>
    %c0_251 = arith.constant 0 : index
    %c85 = arith.constant 85 : index
    %586 = vector.load %arg4[%c0_251, %c85] : memref<8x108xf32, #tpu.memory_space<vmem>>, vector<8x1xf32>
    %587 = vector.broadcast %586 : vector<8x1xf32> to vector<8x256xf32>
    %588 = arith.mulf %585, %587 : vector<8x256xf32>
    %589 = arith.addf %580, %588 : vector<8x256xf32>
    %c196_i32 = arith.constant 196 : i32
    %590 = tpu.dynamic_rotate %271 by %c196_i32 dim 1 : vector<8x256xf32>, i32 -> vector<8x256xf32>
    %c51_252 = arith.constant 51 : index
    %c0_253 = arith.constant 0 : index
    %c0_254 = arith.constant 0 : index
    %591 = vector.load %arg2[%c51_252, %c0_253, %c0_254] : memref<64x1x256xf32, #tpu.memory_space<vmem>>, vector<1x1x256xf32>
    %592 = vector.shape_cast %591 : vector<1x1x256xf32> to vector<1x256xf32>
    %593 = vector.broadcast %592 : vector<1x256xf32> to vector<8x256xf32>
    %594 = arith.mulf %590, %593 : vector<8x256xf32>
    %c0_255 = arith.constant 0 : index
    %c86 = arith.constant 86 : index
    %595 = vector.load %arg4[%c0_255, %c86] : memref<8x108xf32, #tpu.memory_space<vmem>>, vector<8x1xf32>
    %596 = vector.broadcast %595 : vector<8x1xf32> to vector<8x256xf32>
    %597 = arith.mulf %594, %596 : vector<8x256xf32>
    %598 = arith.addf %589, %597 : vector<8x256xf32>
    %c194_i32 = arith.constant 194 : i32
    %599 = tpu.dynamic_rotate %271 by %c194_i32 dim 1 : vector<8x256xf32>, i32 -> vector<8x256xf32>
    %c52_256 = arith.constant 52 : index
    %c0_257 = arith.constant 0 : index
    %c0_258 = arith.constant 0 : index
    %600 = vector.load %arg2[%c52_256, %c0_257, %c0_258] : memref<64x1x256xf32, #tpu.memory_space<vmem>>, vector<1x1x256xf32>
    %601 = vector.shape_cast %600 : vector<1x1x256xf32> to vector<1x256xf32>
    %602 = vector.broadcast %601 : vector<1x256xf32> to vector<8x256xf32>
    %603 = arith.mulf %599, %602 : vector<8x256xf32>
    %c0_259 = arith.constant 0 : index
    %c87 = arith.constant 87 : index
    %604 = vector.load %arg4[%c0_259, %c87] : memref<8x108xf32, #tpu.memory_space<vmem>>, vector<8x1xf32>
    %605 = vector.broadcast %604 : vector<8x1xf32> to vector<8x256xf32>
    %606 = arith.mulf %603, %605 : vector<8x256xf32>
    %607 = arith.addf %598, %606 : vector<8x256xf32>
    %c192_i32 = arith.constant 192 : i32
    %608 = tpu.dynamic_rotate %271 by %c192_i32 dim 1 : vector<8x256xf32>, i32 -> vector<8x256xf32>
    %c53_260 = arith.constant 53 : index
    %c0_261 = arith.constant 0 : index
    %c0_262 = arith.constant 0 : index
    %609 = vector.load %arg2[%c53_260, %c0_261, %c0_262] : memref<64x1x256xf32, #tpu.memory_space<vmem>>, vector<1x1x256xf32>
    %610 = vector.shape_cast %609 : vector<1x1x256xf32> to vector<1x256xf32>
    %611 = vector.broadcast %610 : vector<1x256xf32> to vector<8x256xf32>
    %612 = arith.mulf %608, %611 : vector<8x256xf32>
    %c0_263 = arith.constant 0 : index
    %c88 = arith.constant 88 : index
    %613 = vector.load %arg4[%c0_263, %c88] : memref<8x108xf32, #tpu.memory_space<vmem>>, vector<8x1xf32>
    %614 = vector.broadcast %613 : vector<8x1xf32> to vector<8x256xf32>
    %615 = arith.mulf %612, %614 : vector<8x256xf32>
    %616 = arith.addf %607, %615 : vector<8x256xf32>
    %c190_i32 = arith.constant 190 : i32
    %617 = tpu.dynamic_rotate %271 by %c190_i32 dim 1 : vector<8x256xf32>, i32 -> vector<8x256xf32>
    %c54_264 = arith.constant 54 : index
    %c0_265 = arith.constant 0 : index
    %c0_266 = arith.constant 0 : index
    %618 = vector.load %arg2[%c54_264, %c0_265, %c0_266] : memref<64x1x256xf32, #tpu.memory_space<vmem>>, vector<1x1x256xf32>
    %619 = vector.shape_cast %618 : vector<1x1x256xf32> to vector<1x256xf32>
    %620 = vector.broadcast %619 : vector<1x256xf32> to vector<8x256xf32>
    %621 = arith.mulf %617, %620 : vector<8x256xf32>
    %c0_267 = arith.constant 0 : index
    %c89 = arith.constant 89 : index
    %622 = vector.load %arg4[%c0_267, %c89] : memref<8x108xf32, #tpu.memory_space<vmem>>, vector<8x1xf32>
    %623 = vector.broadcast %622 : vector<8x1xf32> to vector<8x256xf32>
    %624 = arith.mulf %621, %623 : vector<8x256xf32>
    %625 = arith.addf %616, %624 : vector<8x256xf32>
    %c188_i32 = arith.constant 188 : i32
    %626 = tpu.dynamic_rotate %271 by %c188_i32 dim 1 : vector<8x256xf32>, i32 -> vector<8x256xf32>
    %c55_268 = arith.constant 55 : index
    %c0_269 = arith.constant 0 : index
    %c0_270 = arith.constant 0 : index
    %627 = vector.load %arg2[%c55_268, %c0_269, %c0_270] : memref<64x1x256xf32, #tpu.memory_space<vmem>>, vector<1x1x256xf32>
    %628 = vector.shape_cast %627 : vector<1x1x256xf32> to vector<1x256xf32>
    %629 = vector.broadcast %628 : vector<1x256xf32> to vector<8x256xf32>
    %630 = arith.mulf %626, %629 : vector<8x256xf32>
    %c0_271 = arith.constant 0 : index
    %c90 = arith.constant 90 : index
    %631 = vector.load %arg4[%c0_271, %c90] : memref<8x108xf32, #tpu.memory_space<vmem>>, vector<8x1xf32>
    %632 = vector.broadcast %631 : vector<8x1xf32> to vector<8x256xf32>
    %633 = arith.mulf %630, %632 : vector<8x256xf32>
    %634 = arith.addf %625, %633 : vector<8x256xf32>
    %c186_i32 = arith.constant 186 : i32
    %635 = tpu.dynamic_rotate %271 by %c186_i32 dim 1 : vector<8x256xf32>, i32 -> vector<8x256xf32>
    %c56_272 = arith.constant 56 : index
    %c0_273 = arith.constant 0 : index
    %c0_274 = arith.constant 0 : index
    %636 = vector.load %arg2[%c56_272, %c0_273, %c0_274] : memref<64x1x256xf32, #tpu.memory_space<vmem>>, vector<1x1x256xf32>
    %637 = vector.shape_cast %636 : vector<1x1x256xf32> to vector<1x256xf32>
    %638 = vector.broadcast %637 : vector<1x256xf32> to vector<8x256xf32>
    %639 = arith.mulf %635, %638 : vector<8x256xf32>
    %c0_275 = arith.constant 0 : index
    %c91 = arith.constant 91 : index
    %640 = vector.load %arg4[%c0_275, %c91] : memref<8x108xf32, #tpu.memory_space<vmem>>, vector<8x1xf32>
    %641 = vector.broadcast %640 : vector<8x1xf32> to vector<8x256xf32>
    %642 = arith.mulf %639, %641 : vector<8x256xf32>
    %643 = arith.addf %634, %642 : vector<8x256xf32>
    %c166_i32 = arith.constant 166 : i32
    %644 = tpu.dynamic_rotate %271 by %c166_i32 dim 1 : vector<8x256xf32>, i32 -> vector<8x256xf32>
    %c57_276 = arith.constant 57 : index
    %c0_277 = arith.constant 0 : index
    %c0_278 = arith.constant 0 : index
    %645 = vector.load %arg2[%c57_276, %c0_277, %c0_278] : memref<64x1x256xf32, #tpu.memory_space<vmem>>, vector<1x1x256xf32>
    %646 = vector.shape_cast %645 : vector<1x1x256xf32> to vector<1x256xf32>
    %647 = vector.broadcast %646 : vector<1x256xf32> to vector<8x256xf32>
    %648 = arith.mulf %644, %647 : vector<8x256xf32>
    %c0_279 = arith.constant 0 : index
    %c92 = arith.constant 92 : index
    %649 = vector.load %arg4[%c0_279, %c92] : memref<8x108xf32, #tpu.memory_space<vmem>>, vector<8x1xf32>
    %650 = vector.broadcast %649 : vector<8x1xf32> to vector<8x256xf32>
    %651 = arith.mulf %648, %650 : vector<8x256xf32>
    %652 = arith.addf %643, %651 : vector<8x256xf32>
    %c164_i32 = arith.constant 164 : i32
    %653 = tpu.dynamic_rotate %271 by %c164_i32 dim 1 : vector<8x256xf32>, i32 -> vector<8x256xf32>
    %c58_280 = arith.constant 58 : index
    %c0_281 = arith.constant 0 : index
    %c0_282 = arith.constant 0 : index
    %654 = vector.load %arg2[%c58_280, %c0_281, %c0_282] : memref<64x1x256xf32, #tpu.memory_space<vmem>>, vector<1x1x256xf32>
    %655 = vector.shape_cast %654 : vector<1x1x256xf32> to vector<1x256xf32>
    %656 = vector.broadcast %655 : vector<1x256xf32> to vector<8x256xf32>
    %657 = arith.mulf %653, %656 : vector<8x256xf32>
    %c0_283 = arith.constant 0 : index
    %c93 = arith.constant 93 : index
    %658 = vector.load %arg4[%c0_283, %c93] : memref<8x108xf32, #tpu.memory_space<vmem>>, vector<8x1xf32>
    %659 = vector.broadcast %658 : vector<8x1xf32> to vector<8x256xf32>
    %660 = arith.mulf %657, %659 : vector<8x256xf32>
    %661 = arith.addf %652, %660 : vector<8x256xf32>
    %c162_i32 = arith.constant 162 : i32
    %662 = tpu.dynamic_rotate %271 by %c162_i32 dim 1 : vector<8x256xf32>, i32 -> vector<8x256xf32>
    %c59_284 = arith.constant 59 : index
    %c0_285 = arith.constant 0 : index
    %c0_286 = arith.constant 0 : index
    %663 = vector.load %arg2[%c59_284, %c0_285, %c0_286] : memref<64x1x256xf32, #tpu.memory_space<vmem>>, vector<1x1x256xf32>
    %664 = vector.shape_cast %663 : vector<1x1x256xf32> to vector<1x256xf32>
    %665 = vector.broadcast %664 : vector<1x256xf32> to vector<8x256xf32>
    %666 = arith.mulf %662, %665 : vector<8x256xf32>
    %c0_287 = arith.constant 0 : index
    %c94 = arith.constant 94 : index
    %667 = vector.load %arg4[%c0_287, %c94] : memref<8x108xf32, #tpu.memory_space<vmem>>, vector<8x1xf32>
    %668 = vector.broadcast %667 : vector<8x1xf32> to vector<8x256xf32>
    %669 = arith.mulf %666, %668 : vector<8x256xf32>
    %670 = arith.addf %661, %669 : vector<8x256xf32>
    %c160_i32 = arith.constant 160 : i32
    %671 = tpu.dynamic_rotate %271 by %c160_i32 dim 1 : vector<8x256xf32>, i32 -> vector<8x256xf32>
    %c60_288 = arith.constant 60 : index
    %c0_289 = arith.constant 0 : index
    %c0_290 = arith.constant 0 : index
    %672 = vector.load %arg2[%c60_288, %c0_289, %c0_290] : memref<64x1x256xf32, #tpu.memory_space<vmem>>, vector<1x1x256xf32>
    %673 = vector.shape_cast %672 : vector<1x1x256xf32> to vector<1x256xf32>
    %674 = vector.broadcast %673 : vector<1x256xf32> to vector<8x256xf32>
    %675 = arith.mulf %671, %674 : vector<8x256xf32>
    %c0_291 = arith.constant 0 : index
    %c95 = arith.constant 95 : index
    %676 = vector.load %arg4[%c0_291, %c95] : memref<8x108xf32, #tpu.memory_space<vmem>>, vector<8x1xf32>
    %677 = vector.broadcast %676 : vector<8x1xf32> to vector<8x256xf32>
    %678 = arith.mulf %675, %677 : vector<8x256xf32>
    %679 = arith.addf %670, %678 : vector<8x256xf32>
    %c158_i32 = arith.constant 158 : i32
    %680 = tpu.dynamic_rotate %271 by %c158_i32 dim 1 : vector<8x256xf32>, i32 -> vector<8x256xf32>
    %c61_292 = arith.constant 61 : index
    %c0_293 = arith.constant 0 : index
    %c0_294 = arith.constant 0 : index
    %681 = vector.load %arg2[%c61_292, %c0_293, %c0_294] : memref<64x1x256xf32, #tpu.memory_space<vmem>>, vector<1x1x256xf32>
    %682 = vector.shape_cast %681 : vector<1x1x256xf32> to vector<1x256xf32>
    %683 = vector.broadcast %682 : vector<1x256xf32> to vector<8x256xf32>
    %684 = arith.mulf %680, %683 : vector<8x256xf32>
    %c0_295 = arith.constant 0 : index
    %c96 = arith.constant 96 : index
    %685 = vector.load %arg4[%c0_295, %c96] : memref<8x108xf32, #tpu.memory_space<vmem>>, vector<8x1xf32>
    %686 = vector.broadcast %685 : vector<8x1xf32> to vector<8x256xf32>
    %687 = arith.mulf %684, %686 : vector<8x256xf32>
    %688 = arith.addf %679, %687 : vector<8x256xf32>
    %c156_i32 = arith.constant 156 : i32
    %689 = tpu.dynamic_rotate %271 by %c156_i32 dim 1 : vector<8x256xf32>, i32 -> vector<8x256xf32>
    %c62_296 = arith.constant 62 : index
    %c0_297 = arith.constant 0 : index
    %c0_298 = arith.constant 0 : index
    %690 = vector.load %arg2[%c62_296, %c0_297, %c0_298] : memref<64x1x256xf32, #tpu.memory_space<vmem>>, vector<1x1x256xf32>
    %691 = vector.shape_cast %690 : vector<1x1x256xf32> to vector<1x256xf32>
    %692 = vector.broadcast %691 : vector<1x256xf32> to vector<8x256xf32>
    %693 = arith.mulf %689, %692 : vector<8x256xf32>
    %c0_299 = arith.constant 0 : index
    %c97 = arith.constant 97 : index
    %694 = vector.load %arg4[%c0_299, %c97] : memref<8x108xf32, #tpu.memory_space<vmem>>, vector<8x1xf32>
    %695 = vector.broadcast %694 : vector<8x1xf32> to vector<8x256xf32>
    %696 = arith.mulf %693, %695 : vector<8x256xf32>
    %697 = arith.addf %688, %696 : vector<8x256xf32>
    %c154_i32 = arith.constant 154 : i32
    %698 = tpu.dynamic_rotate %271 by %c154_i32 dim 1 : vector<8x256xf32>, i32 -> vector<8x256xf32>
    %c63_300 = arith.constant 63 : index
    %c0_301 = arith.constant 0 : index
    %c0_302 = arith.constant 0 : index
    %699 = vector.load %arg2[%c63_300, %c0_301, %c0_302] : memref<64x1x256xf32, #tpu.memory_space<vmem>>, vector<1x1x256xf32>
    %700 = vector.shape_cast %699 : vector<1x1x256xf32> to vector<1x256xf32>
    %701 = vector.broadcast %700 : vector<1x256xf32> to vector<8x256xf32>
    %702 = arith.mulf %698, %701 : vector<8x256xf32>
    %c0_303 = arith.constant 0 : index
    %c98 = arith.constant 98 : index
    %703 = vector.load %arg4[%c0_303, %c98] : memref<8x108xf32, #tpu.memory_space<vmem>>, vector<8x1xf32>
    %704 = vector.broadcast %703 : vector<8x1xf32> to vector<8x256xf32>
    %705 = arith.mulf %702, %704 : vector<8x256xf32>
    %706 = arith.addf %697, %705 : vector<8x256xf32>
    %c0_304 = arith.constant 0 : index
    %c10_305 = arith.constant 10 : index
    %707 = vector.load %arg3[%c0_304, %c10_305] : memref<64x20xf32, #tpu.memory_space<vmem>>, vector<8x1xf32>
    %708 = vector.broadcast %707 : vector<8x1xf32> to vector<8x256xf32>
    %709 = arith.addf %706, %708 : vector<8x256xf32>
    %c5_306 = arith.constant 5 : index
    %c0_307 = arith.constant 0 : index
    %c0_308 = arith.constant 0 : index
    %710 = vector.load %arg5[%c5_306, %c0_307, %c0_308] : memref<9x64x64xf32, #tpu.memory_space<vmem>>, vector<1x64x64xf32>
    %711 = vector.shape_cast %710 : vector<1x64x64xf32> to vector<64x64xf32>
    %712 = vector.extract_strided_slice %711 {offsets = [0, 0], sizes = [4, 8], strides = [1, 1]} : vector<64x64xf32> to vector<4x8xf32>
    %cst_309 = arith.constant dense<0.000000e+00> : vector<4x256xf32>
    %713 = tpu.matmul %712, %709, %cst_309 {dimension_numbers = #tpu.dot_dimension_numbers<[1], [0], [0], [1], [0, 0, 1, 1], [], []>} : vector<4x8xf32>, vector<8x256xf32>, vector<4x256xf32> -> vector<4x256xf32>
    %c0_310 = arith.constant 0 : index
    %c11_311 = arith.constant 11 : index
    %714 = vector.load %arg3[%c0_310, %c11_311] : memref<64x20xf32, #tpu.memory_space<vmem>>, vector<4x1xf32>
    %715 = vector.broadcast %714 : vector<4x1xf32> to vector<4x256xf32>
    %716 = arith.addf %713, %715 : vector<4x256xf32>
    %c6_312 = arith.constant 6 : index
    %c0_313 = arith.constant 0 : index
    %c0_314 = arith.constant 0 : index
    %717 = vector.load %arg5[%c6_312, %c0_313, %c0_314] : memref<9x64x64xf32, #tpu.memory_space<vmem>>, vector<1x64x64xf32>
    %718 = vector.shape_cast %717 : vector<1x64x64xf32> to vector<64x64xf32>
    %719 = vector.extract_strided_slice %718 {offsets = [0, 0], sizes = [4, 4], strides = [1, 1]} : vector<64x64xf32> to vector<4x4xf32>
    %cst_315 = arith.constant dense<0.000000e+00> : vector<4x256xf32>
    %720 = tpu.matmul %719, %716, %cst_315 {dimension_numbers = #tpu.dot_dimension_numbers<[1], [0], [0], [1], [0, 0, 1, 1], [], []>} : vector<4x4xf32>, vector<4x256xf32>, vector<4x256xf32> -> vector<4x256xf32>
    %cst_316 = arith.constant dense<0.000000e+00> : vector<4xf32>
    %721 = vector.multi_reduction <add>, %720, %cst_316 [1] : vector<4x256xf32> to vector<4xf32>
    %722 = vector.shape_cast %721 : vector<4xf32> to vector<4x1xf32>
    %cst_317 = arith.constant 2.560000e+02 : f32
    %723 = vector.broadcast %cst_317 : f32 to vector<4x1xf32>
    %724 = arith.divf %722, %723 : vector<4x1xf32>
    %725 = arith.negf %724 : vector<4x1xf32>
    %726 = math.exp %725 : vector<4x1xf32>
    %cst_318 = arith.constant 1.000000e+00 : f32
    %727 = vector.broadcast %cst_318 : f32 to vector<4x1xf32>
    %728 = arith.addf %727, %726 : vector<4x1xf32>
    %729 = arith.divf %727, %728 : vector<4x1xf32>
    %730 = vector.broadcast %729 : vector<4x1xf32> to vector<4x256xf32>
    %731 = arith.mulf %716, %730 : vector<4x256xf32>
    %732 = arith.addf %731, %33 : vector<4x256xf32>
    %c17_i32_319 = arith.constant 17 : i32
    %733 = tpu.dynamic_rotate %732 by %c17_i32_319 dim 1 : vector<4x256xf32>, i32 -> vector<4x256xf32>
    %c6_320 = arith.constant 6 : index
    %c0_321 = arith.constant 0 : index
    %c0_322 = arith.constant 0 : index
    %734 = vector.load %arg2[%c6_320, %c0_321, %c0_322] : memref<64x1x256xf32, #tpu.memory_space<vmem>>, vector<1x1x256xf32>
    %735 = vector.shape_cast %734 : vector<1x1x256xf32> to vector<1x256xf32>
    %736 = vector.broadcast %735 : vector<1x256xf32> to vector<4x256xf32>
    %737 = arith.mulf %733, %736 : vector<4x256xf32>
    %c0_323 = arith.constant 0 : index
    %c99 = arith.constant 99 : index
    %738 = vector.load %arg4[%c0_323, %c99] : memref<8x108xf32, #tpu.memory_space<vmem>>, vector<4x1xf32>
    %739 = vector.broadcast %738 : vector<4x1xf32> to vector<4x256xf32>
    %740 = arith.mulf %737, %739 : vector<4x256xf32>
    %c16_i32_324 = arith.constant 16 : i32
    %741 = tpu.dynamic_rotate %732 by %c16_i32_324 dim 1 : vector<4x256xf32>, i32 -> vector<4x256xf32>
    %c7_325 = arith.constant 7 : index
    %c0_326 = arith.constant 0 : index
    %c0_327 = arith.constant 0 : index
    %742 = vector.load %arg2[%c7_325, %c0_326, %c0_327] : memref<64x1x256xf32, #tpu.memory_space<vmem>>, vector<1x1x256xf32>
    %743 = vector.shape_cast %742 : vector<1x1x256xf32> to vector<1x256xf32>
    %744 = vector.broadcast %743 : vector<1x256xf32> to vector<4x256xf32>
    %745 = arith.mulf %741, %744 : vector<4x256xf32>
    %c0_328 = arith.constant 0 : index
    %c100 = arith.constant 100 : index
    %746 = vector.load %arg4[%c0_328, %c100] : memref<8x108xf32, #tpu.memory_space<vmem>>, vector<4x1xf32>
    %747 = vector.broadcast %746 : vector<4x1xf32> to vector<4x256xf32>
    %748 = arith.mulf %745, %747 : vector<4x256xf32>
    %749 = arith.addf %740, %748 : vector<4x256xf32>
    %c15_i32_329 = arith.constant 15 : i32
    %750 = tpu.dynamic_rotate %732 by %c15_i32_329 dim 1 : vector<4x256xf32>, i32 -> vector<4x256xf32>
    %c8_330 = arith.constant 8 : index
    %c0_331 = arith.constant 0 : index
    %c0_332 = arith.constant 0 : index
    %751 = vector.load %arg2[%c8_330, %c0_331, %c0_332] : memref<64x1x256xf32, #tpu.memory_space<vmem>>, vector<1x1x256xf32>
    %752 = vector.shape_cast %751 : vector<1x1x256xf32> to vector<1x256xf32>
    %753 = vector.broadcast %752 : vector<1x256xf32> to vector<4x256xf32>
    %754 = arith.mulf %750, %753 : vector<4x256xf32>
    %c0_333 = arith.constant 0 : index
    %c101 = arith.constant 101 : index
    %755 = vector.load %arg4[%c0_333, %c101] : memref<8x108xf32, #tpu.memory_space<vmem>>, vector<4x1xf32>
    %756 = vector.broadcast %755 : vector<4x1xf32> to vector<4x256xf32>
    %757 = arith.mulf %754, %756 : vector<4x256xf32>
    %758 = arith.addf %749, %757 : vector<4x256xf32>
    %c1_i32_334 = arith.constant 1 : i32
    %759 = tpu.dynamic_rotate %732 by %c1_i32_334 dim 1 : vector<4x256xf32>, i32 -> vector<4x256xf32>
    %c11_335 = arith.constant 11 : index
    %c0_336 = arith.constant 0 : index
    %c0_337 = arith.constant 0 : index
    %760 = vector.load %arg2[%c11_335, %c0_336, %c0_337] : memref<64x1x256xf32, #tpu.memory_space<vmem>>, vector<1x1x256xf32>
    %761 = vector.shape_cast %760 : vector<1x1x256xf32> to vector<1x256xf32>
    %762 = vector.broadcast %761 : vector<1x256xf32> to vector<4x256xf32>
    %763 = arith.mulf %759, %762 : vector<4x256xf32>
    %c0_338 = arith.constant 0 : index
    %c102 = arith.constant 102 : index
    %764 = vector.load %arg4[%c0_338, %c102] : memref<8x108xf32, #tpu.memory_space<vmem>>, vector<4x1xf32>
    %765 = vector.broadcast %764 : vector<4x1xf32> to vector<4x256xf32>
    %766 = arith.mulf %763, %765 : vector<4x256xf32>
    %767 = arith.addf %758, %766 : vector<4x256xf32>
    %c0_339 = arith.constant 0 : index
    %c103 = arith.constant 103 : index
    %768 = vector.load %arg4[%c0_339, %c103] : memref<8x108xf32, #tpu.memory_space<vmem>>, vector<4x1xf32>
    %769 = vector.broadcast %768 : vector<4x1xf32> to vector<4x256xf32>
    %770 = arith.mulf %732, %769 : vector<4x256xf32>
    %771 = arith.addf %767, %770 : vector<4x256xf32>
    %c255_i32_340 = arith.constant 255 : i32
    %772 = tpu.dynamic_rotate %732 by %c255_i32_340 dim 1 : vector<4x256xf32>, i32 -> vector<4x256xf32>
    %c12_341 = arith.constant 12 : index
    %c0_342 = arith.constant 0 : index
    %c0_343 = arith.constant 0 : index
    %773 = vector.load %arg2[%c12_341, %c0_342, %c0_343] : memref<64x1x256xf32, #tpu.memory_space<vmem>>, vector<1x1x256xf32>
    %774 = vector.shape_cast %773 : vector<1x1x256xf32> to vector<1x256xf32>
    %775 = vector.broadcast %774 : vector<1x256xf32> to vector<4x256xf32>
    %776 = arith.mulf %772, %775 : vector<4x256xf32>
    %c0_344 = arith.constant 0 : index
    %c104 = arith.constant 104 : index
    %777 = vector.load %arg4[%c0_344, %c104] : memref<8x108xf32, #tpu.memory_space<vmem>>, vector<4x1xf32>
    %778 = vector.broadcast %777 : vector<4x1xf32> to vector<4x256xf32>
    %779 = arith.mulf %776, %778 : vector<4x256xf32>
    %780 = arith.addf %771, %779 : vector<4x256xf32>
    %c241_i32_345 = arith.constant 241 : i32
    %781 = tpu.dynamic_rotate %732 by %c241_i32_345 dim 1 : vector<4x256xf32>, i32 -> vector<4x256xf32>
    %c15_346 = arith.constant 15 : index
    %c0_347 = arith.constant 0 : index
    %c0_348 = arith.constant 0 : index
    %782 = vector.load %arg2[%c15_346, %c0_347, %c0_348] : memref<64x1x256xf32, #tpu.memory_space<vmem>>, vector<1x1x256xf32>
    %783 = vector.shape_cast %782 : vector<1x1x256xf32> to vector<1x256xf32>
    %784 = vector.broadcast %783 : vector<1x256xf32> to vector<4x256xf32>
    %785 = arith.mulf %781, %784 : vector<4x256xf32>
    %c0_349 = arith.constant 0 : index
    %c105 = arith.constant 105 : index
    %786 = vector.load %arg4[%c0_349, %c105] : memref<8x108xf32, #tpu.memory_space<vmem>>, vector<4x1xf32>
    %787 = vector.broadcast %786 : vector<4x1xf32> to vector<4x256xf32>
    %788 = arith.mulf %785, %787 : vector<4x256xf32>
    %789 = arith.addf %780, %788 : vector<4x256xf32>
    %c240_i32_350 = arith.constant 240 : i32
    %790 = tpu.dynamic_rotate %732 by %c240_i32_350 dim 1 : vector<4x256xf32>, i32 -> vector<4x256xf32>
    %c16_351 = arith.constant 16 : index
    %c0_352 = arith.constant 0 : index
    %c0_353 = arith.constant 0 : index
    %791 = vector.load %arg2[%c16_351, %c0_352, %c0_353] : memref<64x1x256xf32, #tpu.memory_space<vmem>>, vector<1x1x256xf32>
    %792 = vector.shape_cast %791 : vector<1x1x256xf32> to vector<1x256xf32>
    %793 = vector.broadcast %792 : vector<1x256xf32> to vector<4x256xf32>
    %794 = arith.mulf %790, %793 : vector<4x256xf32>
    %c0_354 = arith.constant 0 : index
    %c106 = arith.constant 106 : index
    %795 = vector.load %arg4[%c0_354, %c106] : memref<8x108xf32, #tpu.memory_space<vmem>>, vector<4x1xf32>
    %796 = vector.broadcast %795 : vector<4x1xf32> to vector<4x256xf32>
    %797 = arith.mulf %794, %796 : vector<4x256xf32>
    %798 = arith.addf %789, %797 : vector<4x256xf32>
    %c239_i32_355 = arith.constant 239 : i32
    %799 = tpu.dynamic_rotate %732 by %c239_i32_355 dim 1 : vector<4x256xf32>, i32 -> vector<4x256xf32>
    %c17_356 = arith.constant 17 : index
    %c0_357 = arith.constant 0 : index
    %c0_358 = arith.constant 0 : index
    %800 = vector.load %arg2[%c17_356, %c0_357, %c0_358] : memref<64x1x256xf32, #tpu.memory_space<vmem>>, vector<1x1x256xf32>
    %801 = vector.shape_cast %800 : vector<1x1x256xf32> to vector<1x256xf32>
    %802 = vector.broadcast %801 : vector<1x256xf32> to vector<4x256xf32>
    %803 = arith.mulf %799, %802 : vector<4x256xf32>
    %c0_359 = arith.constant 0 : index
    %c107 = arith.constant 107 : index
    %804 = vector.load %arg4[%c0_359, %c107] : memref<8x108xf32, #tpu.memory_space<vmem>>, vector<4x1xf32>
    %805 = vector.broadcast %804 : vector<4x1xf32> to vector<4x256xf32>
    %806 = arith.mulf %803, %805 : vector<4x256xf32>
    %807 = arith.addf %798, %806 : vector<4x256xf32>
    %c0_360 = arith.constant 0 : index
    %c12_361 = arith.constant 12 : index
    %808 = vector.load %arg3[%c0_360, %c12_361] : memref<64x20xf32, #tpu.memory_space<vmem>>, vector<4x1xf32>
    %809 = vector.broadcast %808 : vector<4x1xf32> to vector<4x256xf32>
    %810 = arith.mulf %807, %809 : vector<4x256xf32>
    %c0_362 = arith.constant 0 : index
    %c13_363 = arith.constant 13 : index
    %811 = vector.load %arg3[%c0_362, %c13_363] : memref<64x20xf32, #tpu.memory_space<vmem>>, vector<4x1xf32>
    %812 = vector.broadcast %811 : vector<4x1xf32> to vector<4x256xf32>
    %813 = arith.addf %810, %812 : vector<4x256xf32>
    %cst_364 = arith.constant 0.000000e+00 : f32
    %814 = vector.broadcast %cst_364 : f32 to vector<4x256xf32>
    %815 = arith.maximumf %813, %814 : vector<4x256xf32>
    %816 = arith.addf %732, %815 : vector<4x256xf32>
    %c7_365 = arith.constant 7 : index
    %c0_366 = arith.constant 0 : index
    %c0_367 = arith.constant 0 : index
    %817 = vector.load %arg5[%c7_365, %c0_366, %c0_367] : memref<9x64x64xf32, #tpu.memory_space<vmem>>, vector<1x64x64xf32>
    %818 = vector.shape_cast %817 : vector<1x64x64xf32> to vector<64x64xf32>
    %819 = vector.extract_strided_slice %818 {offsets = [0, 0], sizes = [64, 4], strides = [1, 1]} : vector<64x64xf32> to vector<64x4xf32>
    %cst_368 = arith.constant dense<0.000000e+00> : vector<64x256xf32>
    %820 = tpu.matmul %819, %816, %cst_368 {dimension_numbers = #tpu.dot_dimension_numbers<[1], [0], [0], [1], [0, 0, 1, 1], [], []>} : vector<64x4xf32>, vector<4x256xf32>, vector<64x256xf32> -> vector<64x256xf32>
    %c0_369 = arith.constant 0 : index
    %c14_370 = arith.constant 14 : index
    %821 = vector.load %arg3[%c0_369, %c14_370] : memref<64x20xf32, #tpu.memory_space<vmem>>, vector<64x1xf32>
    %822 = vector.broadcast %821 : vector<64x1xf32> to vector<64x256xf32>
    %823 = arith.mulf %820, %822 : vector<64x256xf32>
    %c0_371 = arith.constant 0 : index
    %c15_372 = arith.constant 15 : index
    %824 = vector.load %arg3[%c0_371, %c15_372] : memref<64x20xf32, #tpu.memory_space<vmem>>, vector<64x1xf32>
    %825 = vector.broadcast %824 : vector<64x1xf32> to vector<64x256xf32>
    %826 = arith.addf %823, %825 : vector<64x256xf32>
    %cst_373 = arith.constant 0.000000e+00 : f32
    %827 = vector.broadcast %cst_373 : f32 to vector<64x256xf32>
    %828 = arith.maximumf %826, %827 : vector<64x256xf32>
    %c17_i32_374 = arith.constant 17 : i32
    %829 = tpu.dynamic_rotate %828 by %c17_i32_374 dim 1 : vector<64x256xf32>, i32 -> vector<64x256xf32>
    %c6_375 = arith.constant 6 : index
    %c0_376 = arith.constant 0 : index
    %c0_377 = arith.constant 0 : index
    %830 = vector.load %arg2[%c6_375, %c0_376, %c0_377] : memref<64x1x256xf32, #tpu.memory_space<vmem>>, vector<1x1x256xf32>
    %831 = vector.shape_cast %830 : vector<1x1x256xf32> to vector<1x256xf32>
    %832 = vector.broadcast %831 : vector<1x256xf32> to vector<64x256xf32>
    %833 = arith.mulf %829, %832 : vector<64x256xf32>
    %834 = arith.truncf %833 : vector<64x256xf32> to vector<64x256xbf16>
    %c0_378 = arith.constant 0 : index
    %c0_379 = arith.constant 0 : index
    %835 = vector.load %arg8[%c0_378, %c0_379] : memref<576x256xbf16, #tpu.memory_space<vmem>>, vector<64x256xbf16>
    tpu.vector_store %arg8[%c0_378, %c0_379], %834 {strides = array<i32>} : memref<576x256xbf16, #tpu.memory_space<vmem>>, vector<64x256xbf16>,
    %c16_i32_380 = arith.constant 16 : i32
    %836 = tpu.dynamic_rotate %828 by %c16_i32_380 dim 1 : vector<64x256xf32>, i32 -> vector<64x256xf32>
    %c7_381 = arith.constant 7 : index
    %c0_382 = arith.constant 0 : index
    %c0_383 = arith.constant 0 : index
    %837 = vector.load %arg2[%c7_381, %c0_382, %c0_383] : memref<64x1x256xf32, #tpu.memory_space<vmem>>, vector<1x1x256xf32>
    %838 = vector.shape_cast %837 : vector<1x1x256xf32> to vector<1x256xf32>
    %839 = vector.broadcast %838 : vector<1x256xf32> to vector<64x256xf32>
    %840 = arith.mulf %836, %839 : vector<64x256xf32>
    %841 = arith.truncf %840 : vector<64x256xf32> to vector<64x256xbf16>
    %c64_384 = arith.constant 64 : index
    %c0_385 = arith.constant 0 : index
    %842 = vector.load %arg8[%c64_384, %c0_385] : memref<576x256xbf16, #tpu.memory_space<vmem>>, vector<64x256xbf16>
    tpu.vector_store %arg8[%c64_384, %c0_385], %841 {strides = array<i32>} : memref<576x256xbf16, #tpu.memory_space<vmem>>, vector<64x256xbf16>,
    %c15_i32_386 = arith.constant 15 : i32
    %843 = tpu.dynamic_rotate %828 by %c15_i32_386 dim 1 : vector<64x256xf32>, i32 -> vector<64x256xf32>
    %c8_387 = arith.constant 8 : index
    %c0_388 = arith.constant 0 : index
    %c0_389 = arith.constant 0 : index
    %844 = vector.load %arg2[%c8_387, %c0_388, %c0_389] : memref<64x1x256xf32, #tpu.memory_space<vmem>>, vector<1x1x256xf32>
    %845 = vector.shape_cast %844 : vector<1x1x256xf32> to vector<1x256xf32>
    %846 = vector.broadcast %845 : vector<1x256xf32> to vector<64x256xf32>
    %847 = arith.mulf %843, %846 : vector<64x256xf32>
    %848 = arith.truncf %847 : vector<64x256xf32> to vector<64x256xbf16>
    %c128 = arith.constant 128 : index
    %c0_390 = arith.constant 0 : index
    %849 = vector.load %arg8[%c128, %c0_390] : memref<576x256xbf16, #tpu.memory_space<vmem>>, vector<64x256xbf16>
    tpu.vector_store %arg8[%c128, %c0_390], %848 {strides = array<i32>} : memref<576x256xbf16, #tpu.memory_space<vmem>>, vector<64x256xbf16>,
    %c1_i32_391 = arith.constant 1 : i32
    %850 = tpu.dynamic_rotate %828 by %c1_i32_391 dim 1 : vector<64x256xf32>, i32 -> vector<64x256xf32>
    %c11_392 = arith.constant 11 : index
    %c0_393 = arith.constant 0 : index
    %c0_394 = arith.constant 0 : index
    %851 = vector.load %arg2[%c11_392, %c0_393, %c0_394] : memref<64x1x256xf32, #tpu.memory_space<vmem>>, vector<1x1x256xf32>
    %852 = vector.shape_cast %851 : vector<1x1x256xf32> to vector<1x256xf32>
    %853 = vector.broadcast %852 : vector<1x256xf32> to vector<64x256xf32>
    %854 = arith.mulf %850, %853 : vector<64x256xf32>
    %855 = arith.truncf %854 : vector<64x256xf32> to vector<64x256xbf16>
    %c192 = arith.constant 192 : index
    %c0_395 = arith.constant 0 : index
    %856 = vector.load %arg8[%c192, %c0_395] : memref<576x256xbf16, #tpu.memory_space<vmem>>, vector<64x256xbf16>
    tpu.vector_store %arg8[%c192, %c0_395], %855 {strides = array<i32>} : memref<576x256xbf16, #tpu.memory_space<vmem>>, vector<64x256xbf16>,
    %857 = arith.truncf %828 : vector<64x256xf32> to vector<64x256xbf16>
    %c256 = arith.constant 256 : index
    %c0_396 = arith.constant 0 : index
    %858 = vector.load %arg8[%c256, %c0_396] : memref<576x256xbf16, #tpu.memory_space<vmem>>, vector<64x256xbf16>
    tpu.vector_store %arg8[%c256, %c0_396], %857 {strides = array<i32>} : memref<576x256xbf16, #tpu.memory_space<vmem>>, vector<64x256xbf16>,
    %c255_i32_397 = arith.constant 255 : i32
    %859 = tpu.dynamic_rotate %828 by %c255_i32_397 dim 1 : vector<64x256xf32>, i32 -> vector<64x256xf32>
    %c12_398 = arith.constant 12 : index
    %c0_399 = arith.constant 0 : index
    %c0_400 = arith.constant 0 : index
    %860 = vector.load %arg2[%c12_398, %c0_399, %c0_400] : memref<64x1x256xf32, #tpu.memory_space<vmem>>, vector<1x1x256xf32>
    %861 = vector.shape_cast %860 : vector<1x1x256xf32> to vector<1x256xf32>
    %862 = vector.broadcast %861 : vector<1x256xf32> to vector<64x256xf32>
    %863 = arith.mulf %859, %862 : vector<64x256xf32>
    %864 = arith.truncf %863 : vector<64x256xf32> to vector<64x256xbf16>
    %c320 = arith.constant 320 : index
    %c0_401 = arith.constant 0 : index
    %865 = vector.load %arg8[%c320, %c0_401] : memref<576x256xbf16, #tpu.memory_space<vmem>>, vector<64x256xbf16>
    tpu.vector_store %arg8[%c320, %c0_401], %864 {strides = array<i32>} : memref<576x256xbf16, #tpu.memory_space<vmem>>, vector<64x256xbf16>,
    %c241_i32_402 = arith.constant 241 : i32
    %866 = tpu.dynamic_rotate %828 by %c241_i32_402 dim 1 : vector<64x256xf32>, i32 -> vector<64x256xf32>
    %c15_403 = arith.constant 15 : index
    %c0_404 = arith.constant 0 : index
    %c0_405 = arith.constant 0 : index
    %867 = vector.load %arg2[%c15_403, %c0_404, %c0_405] : memref<64x1x256xf32, #tpu.memory_space<vmem>>, vector<1x1x256xf32>
    %868 = vector.shape_cast %867 : vector<1x1x256xf32> to vector<1x256xf32>
    %869 = vector.broadcast %868 : vector<1x256xf32> to vector<64x256xf32>
    %870 = arith.mulf %866, %869 : vector<64x256xf32>
    %871 = arith.truncf %870 : vector<64x256xf32> to vector<64x256xbf16>
    %c384 = arith.constant 384 : index
    %c0_406 = arith.constant 0 : index
    %872 = vector.load %arg8[%c384, %c0_406] : memref<576x256xbf16, #tpu.memory_space<vmem>>, vector<64x256xbf16>
    tpu.vector_store %arg8[%c384, %c0_406], %871 {strides = array<i32>} : memref<576x256xbf16, #tpu.memory_space<vmem>>, vector<64x256xbf16>,
    %c240_i32_407 = arith.constant 240 : i32
    %873 = tpu.dynamic_rotate %828 by %c240_i32_407 dim 1 : vector<64x256xf32>, i32 -> vector<64x256xf32>
    %c16_408 = arith.constant 16 : index
    %c0_409 = arith.constant 0 : index
    %c0_410 = arith.constant 0 : index
    %874 = vector.load %arg2[%c16_408, %c0_409, %c0_410] : memref<64x1x256xf32, #tpu.memory_space<vmem>>, vector<1x1x256xf32>
    %875 = vector.shape_cast %874 : vector<1x1x256xf32> to vector<1x256xf32>
    %876 = vector.broadcast %875 : vector<1x256xf32> to vector<64x256xf32>
    %877 = arith.mulf %873, %876 : vector<64x256xf32>
    %878 = arith.truncf %877 : vector<64x256xf32> to vector<64x256xbf16>
    %c448 = arith.constant 448 : index
    %c0_411 = arith.constant 0 : index
    %879 = vector.load %arg8[%c448, %c0_411] : memref<576x256xbf16, #tpu.memory_space<vmem>>, vector<64x256xbf16>
    tpu.vector_store %arg8[%c448, %c0_411], %878 {strides = array<i32>} : memref<576x256xbf16, #tpu.memory_space<vmem>>, vector<64x256xbf16>,
    %c239_i32_412 = arith.constant 239 : i32
    %880 = tpu.dynamic_rotate %828 by %c239_i32_412 dim 1 : vector<64x256xf32>, i32 -> vector<64x256xf32>
    %c17_413 = arith.constant 17 : index
    %c0_414 = arith.constant 0 : index
    %c0_415 = arith.constant 0 : index
    %881 = vector.load %arg2[%c17_413, %c0_414, %c0_415] : memref<64x1x256xf32, #tpu.memory_space<vmem>>, vector<1x1x256xf32>
    %882 = vector.shape_cast %881 : vector<1x1x256xf32> to vector<1x256xf32>
    %883 = vector.broadcast %882 : vector<1x256xf32> to vector<64x256xf32>
    %884 = arith.mulf %880, %883 : vector<64x256xf32>
    %885 = arith.truncf %884 : vector<64x256xf32> to vector<64x256xbf16>
    %c512 = arith.constant 512 : index
    %c0_416 = arith.constant 0 : index
    %886 = vector.load %arg8[%c512, %c0_416] : memref<576x256xbf16, #tpu.memory_space<vmem>>, vector<64x256xbf16>
    tpu.vector_store %arg8[%c512, %c0_416], %885 {strides = array<i32>} : memref<576x256xbf16, #tpu.memory_space<vmem>>, vector<64x256xbf16>,
    %c0_417 = arith.constant 0 : index
    %c0_418 = arith.constant 0 : index
    %c0_419 = arith.constant 0 : index
    %887 = vector.load %arg6[%c0_417, %c0_418, %c0_419] : memref<1x64x576xbf16, #tpu.memory_space<vmem>>, vector<1x64x576xbf16>
    %888 = vector.shape_cast %887 : vector<1x64x576xbf16> to vector<64x576xbf16>
    %c0_420 = arith.constant 0 : index
    %c0_421 = arith.constant 0 : index
    %889 = vector.load %arg8[%c0_420, %c0_421] : memref<576x256xbf16, #tpu.memory_space<vmem>>, vector<576x256xbf16>
    %cst_422 = arith.constant dense<0.000000e+00> : vector<64x256xf32>
    %890 = tpu.matmul %888, %889, %cst_422 {dimension_numbers = #tpu.dot_dimension_numbers<[1], [0], [0], [1], [0, 0, 1, 1], [], []>} : vector<64x576xbf16>, vector<576x256xbf16>, vector<64x256xf32> -> vector<64x256xf32>
    %c0_423 = arith.constant 0 : index
    %c16_424 = arith.constant 16 : index
    %891 = vector.load %arg3[%c0_423, %c16_424] : memref<64x20xf32, #tpu.memory_space<vmem>>, vector<64x1xf32>
    %892 = vector.broadcast %891 : vector<64x1xf32> to vector<64x256xf32>
    %893 = arith.mulf %890, %892 : vector<64x256xf32>
    %c0_425 = arith.constant 0 : index
    %c17_426 = arith.constant 17 : index
    %894 = vector.load %arg3[%c0_425, %c17_426] : memref<64x20xf32, #tpu.memory_space<vmem>>, vector<64x1xf32>
    %895 = vector.broadcast %894 : vector<64x1xf32> to vector<64x256xf32>
    %896 = arith.addf %893, %895 : vector<64x256xf32>
    %cst_427 = arith.constant 0.000000e+00 : f32
    %897 = vector.broadcast %cst_427 : f32 to vector<64x256xf32>
    %898 = arith.maximumf %896, %897 : vector<64x256xf32>
    %c8_428 = arith.constant 8 : index
    %c0_429 = arith.constant 0 : index
    %c0_430 = arith.constant 0 : index
    %899 = vector.load %arg5[%c8_428, %c0_429, %c0_430] : memref<9x64x64xf32, #tpu.memory_space<vmem>>, vector<1x64x64xf32>
    %900 = vector.shape_cast %899 : vector<1x64x64xf32> to vector<64x64xf32>
    %901 = vector.extract_strided_slice %900 {offsets = [0, 0], sizes = [4, 64], strides = [1, 1]} : vector<64x64xf32> to vector<4x64xf32>
    %902 = arith.truncf %901 : vector<4x64xf32> to vector<4x64xbf16>
    %903 = arith.truncf %898 : vector<64x256xf32> to vector<64x256xbf16>
    %cst_431 = arith.constant dense<0.000000e+00> : vector<4x256xf32>
    %904 = tpu.matmul %902, %903, %cst_431 {dimension_numbers = #tpu.dot_dimension_numbers<[1], [0], [0], [1], [0, 0, 1, 1], [], []>} : vector<4x64xbf16>, vector<64x256xbf16>, vector<4x256xf32> -> vector<4x256xf32>
    %c0_432 = arith.constant 0 : index
    %c18_433 = arith.constant 18 : index
    %905 = vector.load %arg3[%c0_432, %c18_433] : memref<64x20xf32, #tpu.memory_space<vmem>>, vector<4x1xf32>
    %906 = vector.broadcast %905 : vector<4x1xf32> to vector<4x256xf32>
    %907 = arith.mulf %904, %906 : vector<4x256xf32>
    %c0_434 = arith.constant 0 : index
    %c19_435 = arith.constant 19 : index
    %908 = vector.load %arg3[%c0_434, %c19_435] : memref<64x20xf32, #tpu.memory_space<vmem>>, vector<4x1xf32>
    %909 = vector.broadcast %908 : vector<4x1xf32> to vector<4x256xf32>
    %910 = arith.addf %907, %909 : vector<4x256xf32>
    %c34_i32_436 = arith.constant 34 : i32
    %911 = tpu.dynamic_rotate %33 by %c34_i32_436 dim 1 : vector<4x256xf32>, i32 -> vector<4x256xf32>
    %c0_437 = arith.constant 0 : index
    %c0_438 = arith.constant 0 : index
    %c0_439 = arith.constant 0 : index
    %912 = vector.load %arg2[%c0_437, %c0_438, %c0_439] : memref<64x1x256xf32, #tpu.memory_space<vmem>>, vector<1x1x256xf32>
    %913 = vector.shape_cast %912 : vector<1x1x256xf32> to vector<1x256xf32>
    %914 = vector.broadcast %913 : vector<1x256xf32> to vector<4x256xf32>
    %915 = arith.mulf %911, %914 : vector<4x256xf32>
    %c0_440 = arith.constant 0 : index
    %c0_441 = arith.constant 0 : index
    %916 = vector.load %arg4[%c0_440, %c0_441] : memref<8x108xf32, #tpu.memory_space<vmem>>, vector<4x1xf32>
    %917 = vector.broadcast %916 : vector<4x1xf32> to vector<4x256xf32>
    %918 = arith.mulf %915, %917 : vector<4x256xf32>
    %c33_i32_442 = arith.constant 33 : i32
    %919 = tpu.dynamic_rotate %33 by %c33_i32_442 dim 1 : vector<4x256xf32>, i32 -> vector<4x256xf32>
    %c1_443 = arith.constant 1 : index
    %c0_444 = arith.constant 0 : index
    %c0_445 = arith.constant 0 : index
    %920 = vector.load %arg2[%c1_443, %c0_444, %c0_445] : memref<64x1x256xf32, #tpu.memory_space<vmem>>, vector<1x1x256xf32>
    %921 = vector.shape_cast %920 : vector<1x1x256xf32> to vector<1x256xf32>
    %922 = vector.broadcast %921 : vector<1x256xf32> to vector<4x256xf32>
    %923 = arith.mulf %919, %922 : vector<4x256xf32>
    %c0_446 = arith.constant 0 : index
    %c1_447 = arith.constant 1 : index
    %924 = vector.load %arg4[%c0_446, %c1_447] : memref<8x108xf32, #tpu.memory_space<vmem>>, vector<4x1xf32>
    %925 = vector.broadcast %924 : vector<4x1xf32> to vector<4x256xf32>
    %926 = arith.mulf %923, %925 : vector<4x256xf32>
    %927 = arith.addf %918, %926 : vector<4x256xf32>
    %c32_i32_448 = arith.constant 32 : i32
    %928 = tpu.dynamic_rotate %33 by %c32_i32_448 dim 1 : vector<4x256xf32>, i32 -> vector<4x256xf32>
    %c2_449 = arith.constant 2 : index
    %c0_450 = arith.constant 0 : index
    %c0_451 = arith.constant 0 : index
    %929 = vector.load %arg2[%c2_449, %c0_450, %c0_451] : memref<64x1x256xf32, #tpu.memory_space<vmem>>, vector<1x1x256xf32>
    %930 = vector.shape_cast %929 : vector<1x1x256xf32> to vector<1x256xf32>
    %931 = vector.broadcast %930 : vector<1x256xf32> to vector<4x256xf32>
    %932 = arith.mulf %928, %931 : vector<4x256xf32>
    %c0_452 = arith.constant 0 : index
    %c2_453 = arith.constant 2 : index
    %933 = vector.load %arg4[%c0_452, %c2_453] : memref<8x108xf32, #tpu.memory_space<vmem>>, vector<4x1xf32>
    %934 = vector.broadcast %933 : vector<4x1xf32> to vector<4x256xf32>
    %935 = arith.mulf %932, %934 : vector<4x256xf32>
    %936 = arith.addf %927, %935 : vector<4x256xf32>
    %c31_i32_454 = arith.constant 31 : i32
    %937 = tpu.dynamic_rotate %33 by %c31_i32_454 dim 1 : vector<4x256xf32>, i32 -> vector<4x256xf32>
    %c3_455 = arith.constant 3 : index
    %c0_456 = arith.constant 0 : index
    %c0_457 = arith.constant 0 : index
    %938 = vector.load %arg2[%c3_455, %c0_456, %c0_457] : memref<64x1x256xf32, #tpu.memory_space<vmem>>, vector<1x1x256xf32>
    %939 = vector.shape_cast %938 : vector<1x1x256xf32> to vector<1x256xf32>
    %940 = vector.broadcast %939 : vector<1x256xf32> to vector<4x256xf32>
    %941 = arith.mulf %937, %940 : vector<4x256xf32>
    %c0_458 = arith.constant 0 : index
    %c3_459 = arith.constant 3 : index
    %942 = vector.load %arg4[%c0_458, %c3_459] : memref<8x108xf32, #tpu.memory_space<vmem>>, vector<4x1xf32>
    %943 = vector.broadcast %942 : vector<4x1xf32> to vector<4x256xf32>
    %944 = arith.mulf %941, %943 : vector<4x256xf32>
    %945 = arith.addf %936, %944 : vector<4x256xf32>
    %c30_i32_460 = arith.constant 30 : i32
    %946 = tpu.dynamic_rotate %33 by %c30_i32_460 dim 1 : vector<4x256xf32>, i32 -> vector<4x256xf32>
    %c4_461 = arith.constant 4 : index
    %c0_462 = arith.constant 0 : index
    %c0_463 = arith.constant 0 : index
    %947 = vector.load %arg2[%c4_461, %c0_462, %c0_463] : memref<64x1x256xf32, #tpu.memory_space<vmem>>, vector<1x1x256xf32>
    %948 = vector.shape_cast %947 : vector<1x1x256xf32> to vector<1x256xf32>
    %949 = vector.broadcast %948 : vector<1x256xf32> to vector<4x256xf32>
    %950 = arith.mulf %946, %949 : vector<4x256xf32>
    %c0_464 = arith.constant 0 : index
    %c4_465 = arith.constant 4 : index
    %951 = vector.load %arg4[%c0_464, %c4_465] : memref<8x108xf32, #tpu.memory_space<vmem>>, vector<4x1xf32>
    %952 = vector.broadcast %951 : vector<4x1xf32> to vector<4x256xf32>
    %953 = arith.mulf %950, %952 : vector<4x256xf32>
    %954 = arith.addf %945, %953 : vector<4x256xf32>
    %c18_i32_466 = arith.constant 18 : i32
    %955 = tpu.dynamic_rotate %33 by %c18_i32_466 dim 1 : vector<4x256xf32>, i32 -> vector<4x256xf32>
    %c5_467 = arith.constant 5 : index
    %c0_468 = arith.constant 0 : index
    %c0_469 = arith.constant 0 : index
    %956 = vector.load %arg2[%c5_467, %c0_468, %c0_469] : memref<64x1x256xf32, #tpu.memory_space<vmem>>, vector<1x1x256xf32>
    %957 = vector.shape_cast %956 : vector<1x1x256xf32> to vector<1x256xf32>
    %958 = vector.broadcast %957 : vector<1x256xf32> to vector<4x256xf32>
    %959 = arith.mulf %955, %958 : vector<4x256xf32>
    %c0_470 = arith.constant 0 : index
    %c5_471 = arith.constant 5 : index
    %960 = vector.load %arg4[%c0_470, %c5_471] : memref<8x108xf32, #tpu.memory_space<vmem>>, vector<4x1xf32>
    %961 = vector.broadcast %960 : vector<4x1xf32> to vector<4x256xf32>
    %962 = arith.mulf %959, %961 : vector<4x256xf32>
    %963 = arith.addf %954, %962 : vector<4x256xf32>
    %c17_i32_472 = arith.constant 17 : i32
    %964 = tpu.dynamic_rotate %33 by %c17_i32_472 dim 1 : vector<4x256xf32>, i32 -> vector<4x256xf32>
    %c6_473 = arith.constant 6 : index
    %c0_474 = arith.constant 0 : index
    %c0_475 = arith.constant 0 : index
    %965 = vector.load %arg2[%c6_473, %c0_474, %c0_475] : memref<64x1x256xf32, #tpu.memory_space<vmem>>, vector<1x1x256xf32>
    %966 = vector.shape_cast %965 : vector<1x1x256xf32> to vector<1x256xf32>
    %967 = vector.broadcast %966 : vector<1x256xf32> to vector<4x256xf32>
    %968 = arith.mulf %964, %967 : vector<4x256xf32>
    %c0_476 = arith.constant 0 : index
    %c6_477 = arith.constant 6 : index
    %969 = vector.load %arg4[%c0_476, %c6_477] : memref<8x108xf32, #tpu.memory_space<vmem>>, vector<4x1xf32>
    %970 = vector.broadcast %969 : vector<4x1xf32> to vector<4x256xf32>
    %971 = arith.mulf %968, %970 : vector<4x256xf32>
    %972 = arith.addf %963, %971 : vector<4x256xf32>
    %c16_i32_478 = arith.constant 16 : i32
    %973 = tpu.dynamic_rotate %33 by %c16_i32_478 dim 1 : vector<4x256xf32>, i32 -> vector<4x256xf32>
    %c7_479 = arith.constant 7 : index
    %c0_480 = arith.constant 0 : index
    %c0_481 = arith.constant 0 : index
    %974 = vector.load %arg2[%c7_479, %c0_480, %c0_481] : memref<64x1x256xf32, #tpu.memory_space<vmem>>, vector<1x1x256xf32>
    %975 = vector.shape_cast %974 : vector<1x1x256xf32> to vector<1x256xf32>
    %976 = vector.broadcast %975 : vector<1x256xf32> to vector<4x256xf32>
    %977 = arith.mulf %973, %976 : vector<4x256xf32>
    %c0_482 = arith.constant 0 : index
    %c7_483 = arith.constant 7 : index
    %978 = vector.load %arg4[%c0_482, %c7_483] : memref<8x108xf32, #tpu.memory_space<vmem>>, vector<4x1xf32>
    %979 = vector.broadcast %978 : vector<4x1xf32> to vector<4x256xf32>
    %980 = arith.mulf %977, %979 : vector<4x256xf32>
    %981 = arith.addf %972, %980 : vector<4x256xf32>
    %c15_i32_484 = arith.constant 15 : i32
    %982 = tpu.dynamic_rotate %33 by %c15_i32_484 dim 1 : vector<4x256xf32>, i32 -> vector<4x256xf32>
    %c8_485 = arith.constant 8 : index
    %c0_486 = arith.constant 0 : index
    %c0_487 = arith.constant 0 : index
    %983 = vector.load %arg2[%c8_485, %c0_486, %c0_487] : memref<64x1x256xf32, #tpu.memory_space<vmem>>, vector<1x1x256xf32>
    %984 = vector.shape_cast %983 : vector<1x1x256xf32> to vector<1x256xf32>
    %985 = vector.broadcast %984 : vector<1x256xf32> to vector<4x256xf32>
    %986 = arith.mulf %982, %985 : vector<4x256xf32>
    %c0_488 = arith.constant 0 : index
    %c8_489 = arith.constant 8 : index
    %987 = vector.load %arg4[%c0_488, %c8_489] : memref<8x108xf32, #tpu.memory_space<vmem>>, vector<4x1xf32>
    %988 = vector.broadcast %987 : vector<4x1xf32> to vector<4x256xf32>
    %989 = arith.mulf %986, %988 : vector<4x256xf32>
    %990 = arith.addf %981, %989 : vector<4x256xf32>
    %c14_i32_490 = arith.constant 14 : i32
    %991 = tpu.dynamic_rotate %33 by %c14_i32_490 dim 1 : vector<4x256xf32>, i32 -> vector<4x256xf32>
    %c9_491 = arith.constant 9 : index
    %c0_492 = arith.constant 0 : index
    %c0_493 = arith.constant 0 : index
    %992 = vector.load %arg2[%c9_491, %c0_492, %c0_493] : memref<64x1x256xf32, #tpu.memory_space<vmem>>, vector<1x1x256xf32>
    %993 = vector.shape_cast %992 : vector<1x1x256xf32> to vector<1x256xf32>
    %994 = vector.broadcast %993 : vector<1x256xf32> to vector<4x256xf32>
    %995 = arith.mulf %991, %994 : vector<4x256xf32>
    %c0_494 = arith.constant 0 : index
    %c9_495 = arith.constant 9 : index
    %996 = vector.load %arg4[%c0_494, %c9_495] : memref<8x108xf32, #tpu.memory_space<vmem>>, vector<4x1xf32>
    %997 = vector.broadcast %996 : vector<4x1xf32> to vector<4x256xf32>
    %998 = arith.mulf %995, %997 : vector<4x256xf32>
    %999 = arith.addf %990, %998 : vector<4x256xf32>
    %c2_i32_496 = arith.constant 2 : i32
    %1000 = tpu.dynamic_rotate %33 by %c2_i32_496 dim 1 : vector<4x256xf32>, i32 -> vector<4x256xf32>
    %c10_497 = arith.constant 10 : index
    %c0_498 = arith.constant 0 : index
    %c0_499 = arith.constant 0 : index
    %1001 = vector.load %arg2[%c10_497, %c0_498, %c0_499] : memref<64x1x256xf32, #tpu.memory_space<vmem>>, vector<1x1x256xf32>
    %1002 = vector.shape_cast %1001 : vector<1x1x256xf32> to vector<1x256xf32>
    %1003 = vector.broadcast %1002 : vector<1x256xf32> to vector<4x256xf32>
    %1004 = arith.mulf %1000, %1003 : vector<4x256xf32>
    %c0_500 = arith.constant 0 : index
    %c10_501 = arith.constant 10 : index
    %1005 = vector.load %arg4[%c0_500, %c10_501] : memref<8x108xf32, #tpu.memory_space<vmem>>, vector<4x1xf32>
    %1006 = vector.broadcast %1005 : vector<4x1xf32> to vector<4x256xf32>
    %1007 = arith.mulf %1004, %1006 : vector<4x256xf32>
    %1008 = arith.addf %999, %1007 : vector<4x256xf32>
    %c1_i32_502 = arith.constant 1 : i32
    %1009 = tpu.dynamic_rotate %33 by %c1_i32_502 dim 1 : vector<4x256xf32>, i32 -> vector<4x256xf32>
    %c11_503 = arith.constant 11 : index
    %c0_504 = arith.constant 0 : index
    %c0_505 = arith.constant 0 : index
    %1010 = vector.load %arg2[%c11_503, %c0_504, %c0_505] : memref<64x1x256xf32, #tpu.memory_space<vmem>>, vector<1x1x256xf32>
    %1011 = vector.shape_cast %1010 : vector<1x1x256xf32> to vector<1x256xf32>
    %1012 = vector.broadcast %1011 : vector<1x256xf32> to vector<4x256xf32>
    %1013 = arith.mulf %1009, %1012 : vector<4x256xf32>
    %c0_506 = arith.constant 0 : index
    %c11_507 = arith.constant 11 : index
    %1014 = vector.load %arg4[%c0_506, %c11_507] : memref<8x108xf32, #tpu.memory_space<vmem>>, vector<4x1xf32>
    %1015 = vector.broadcast %1014 : vector<4x1xf32> to vector<4x256xf32>
    %1016 = arith.mulf %1013, %1015 : vector<4x256xf32>
    %1017 = arith.addf %1008, %1016 : vector<4x256xf32>
    %c0_508 = arith.constant 0 : index
    %c12_509 = arith.constant 12 : index
    %1018 = vector.load %arg4[%c0_508, %c12_509] : memref<8x108xf32, #tpu.memory_space<vmem>>, vector<4x1xf32>
    %1019 = vector.broadcast %1018 : vector<4x1xf32> to vector<4x256xf32>
    %1020 = arith.mulf %33, %1019 : vector<4x256xf32>
    %1021 = arith.addf %1017, %1020 : vector<4x256xf32>
    %c255_i32_510 = arith.constant 255 : i32
    %1022 = tpu.dynamic_rotate %33 by %c255_i32_510 dim 1 : vector<4x256xf32>, i32 -> vector<4x256xf32>
    %c12_511 = arith.constant 12 : index
    %c0_512 = arith.constant 0 : index
    %c0_513 = arith.constant 0 : index
    %1023 = vector.load %arg2[%c12_511, %c0_512, %c0_513] : memref<64x1x256xf32, #tpu.memory_space<vmem>>, vector<1x1x256xf32>
    %1024 = vector.shape_cast %1023 : vector<1x1x256xf32> to vector<1x256xf32>
    %1025 = vector.broadcast %1024 : vector<1x256xf32> to vector<4x256xf32>
    %1026 = arith.mulf %1022, %1025 : vector<4x256xf32>
    %c0_514 = arith.constant 0 : index
    %c13_515 = arith.constant 13 : index
    %1027 = vector.load %arg4[%c0_514, %c13_515] : memref<8x108xf32, #tpu.memory_space<vmem>>, vector<4x1xf32>
    %1028 = vector.broadcast %1027 : vector<4x1xf32> to vector<4x256xf32>
    %1029 = arith.mulf %1026, %1028 : vector<4x256xf32>
    %1030 = arith.addf %1021, %1029 : vector<4x256xf32>
    %c254_i32_516 = arith.constant 254 : i32
    %1031 = tpu.dynamic_rotate %33 by %c254_i32_516 dim 1 : vector<4x256xf32>, i32 -> vector<4x256xf32>
    %c13_517 = arith.constant 13 : index
    %c0_518 = arith.constant 0 : index
    %c0_519 = arith.constant 0 : index
    %1032 = vector.load %arg2[%c13_517, %c0_518, %c0_519] : memref<64x1x256xf32, #tpu.memory_space<vmem>>, vector<1x1x256xf32>
    %1033 = vector.shape_cast %1032 : vector<1x1x256xf32> to vector<1x256xf32>
    %1034 = vector.broadcast %1033 : vector<1x256xf32> to vector<4x256xf32>
    %1035 = arith.mulf %1031, %1034 : vector<4x256xf32>
    %c0_520 = arith.constant 0 : index
    %c14_521 = arith.constant 14 : index
    %1036 = vector.load %arg4[%c0_520, %c14_521] : memref<8x108xf32, #tpu.memory_space<vmem>>, vector<4x1xf32>
    %1037 = vector.broadcast %1036 : vector<4x1xf32> to vector<4x256xf32>
    %1038 = arith.mulf %1035, %1037 : vector<4x256xf32>
    %1039 = arith.addf %1030, %1038 : vector<4x256xf32>
    %c242_i32_522 = arith.constant 242 : i32
    %1040 = tpu.dynamic_rotate %33 by %c242_i32_522 dim 1 : vector<4x256xf32>, i32 -> vector<4x256xf32>
    %c14_523 = arith.constant 14 : index
    %c0_524 = arith.constant 0 : index
    %c0_525 = arith.constant 0 : index
    %1041 = vector.load %arg2[%c14_523, %c0_524, %c0_525] : memref<64x1x256xf32, #tpu.memory_space<vmem>>, vector<1x1x256xf32>
    %1042 = vector.shape_cast %1041 : vector<1x1x256xf32> to vector<1x256xf32>
    %1043 = vector.broadcast %1042 : vector<1x256xf32> to vector<4x256xf32>
    %1044 = arith.mulf %1040, %1043 : vector<4x256xf32>
    %c0_526 = arith.constant 0 : index
    %c15_527 = arith.constant 15 : index
    %1045 = vector.load %arg4[%c0_526, %c15_527] : memref<8x108xf32, #tpu.memory_space<vmem>>, vector<4x1xf32>
    %1046 = vector.broadcast %1045 : vector<4x1xf32> to vector<4x256xf32>
    %1047 = arith.mulf %1044, %1046 : vector<4x256xf32>
    %1048 = arith.addf %1039, %1047 : vector<4x256xf32>
    %c241_i32_528 = arith.constant 241 : i32
    %1049 = tpu.dynamic_rotate %33 by %c241_i32_528 dim 1 : vector<4x256xf32>, i32 -> vector<4x256xf32>
    %c15_529 = arith.constant 15 : index
    %c0_530 = arith.constant 0 : index
    %c0_531 = arith.constant 0 : index
    %1050 = vector.load %arg2[%c15_529, %c0_530, %c0_531] : memref<64x1x256xf32, #tpu.memory_space<vmem>>, vector<1x1x256xf32>
    %1051 = vector.shape_cast %1050 : vector<1x1x256xf32> to vector<1x256xf32>
    %1052 = vector.broadcast %1051 : vector<1x256xf32> to vector<4x256xf32>
    %1053 = arith.mulf %1049, %1052 : vector<4x256xf32>
    %c0_532 = arith.constant 0 : index
    %c16_533 = arith.constant 16 : index
    %1054 = vector.load %arg4[%c0_532, %c16_533] : memref<8x108xf32, #tpu.memory_space<vmem>>, vector<4x1xf32>
    %1055 = vector.broadcast %1054 : vector<4x1xf32> to vector<4x256xf32>
    %1056 = arith.mulf %1053, %1055 : vector<4x256xf32>
    %1057 = arith.addf %1048, %1056 : vector<4x256xf32>
    %c240_i32_534 = arith.constant 240 : i32
    %1058 = tpu.dynamic_rotate %33 by %c240_i32_534 dim 1 : vector<4x256xf32>, i32 -> vector<4x256xf32>
    %c16_535 = arith.constant 16 : index
    %c0_536 = arith.constant 0 : index
    %c0_537 = arith.constant 0 : index
    %1059 = vector.load %arg2[%c16_535, %c0_536, %c0_537] : memref<64x1x256xf32, #tpu.memory_space<vmem>>, vector<1x1x256xf32>
    %1060 = vector.shape_cast %1059 : vector<1x1x256xf32> to vector<1x256xf32>
    %1061 = vector.broadcast %1060 : vector<1x256xf32> to vector<4x256xf32>
    %1062 = arith.mulf %1058, %1061 : vector<4x256xf32>
    %c0_538 = arith.constant 0 : index
    %c17_539 = arith.constant 17 : index
    %1063 = vector.load %arg4[%c0_538, %c17_539] : memref<8x108xf32, #tpu.memory_space<vmem>>, vector<4x1xf32>
    %1064 = vector.broadcast %1063 : vector<4x1xf32> to vector<4x256xf32>
    %1065 = arith.mulf %1062, %1064 : vector<4x256xf32>
    %1066 = arith.addf %1057, %1065 : vector<4x256xf32>
    %c239_i32_540 = arith.constant 239 : i32
    %1067 = tpu.dynamic_rotate %33 by %c239_i32_540 dim 1 : vector<4x256xf32>, i32 -> vector<4x256xf32>
    %c17_541 = arith.constant 17 : index
    %c0_542 = arith.constant 0 : index
    %c0_543 = arith.constant 0 : index
    %1068 = vector.load %arg2[%c17_541, %c0_542, %c0_543] : memref<64x1x256xf32, #tpu.memory_space<vmem>>, vector<1x1x256xf32>
    %1069 = vector.shape_cast %1068 : vector<1x1x256xf32> to vector<1x256xf32>
    %1070 = vector.broadcast %1069 : vector<1x256xf32> to vector<4x256xf32>
    %1071 = arith.mulf %1067, %1070 : vector<4x256xf32>
    %c0_544 = arith.constant 0 : index
    %c18_545 = arith.constant 18 : index
    %1072 = vector.load %arg4[%c0_544, %c18_545] : memref<8x108xf32, #tpu.memory_space<vmem>>, vector<4x1xf32>
    %1073 = vector.broadcast %1072 : vector<4x1xf32> to vector<4x256xf32>
    %1074 = arith.mulf %1071, %1073 : vector<4x256xf32>
    %1075 = arith.addf %1066, %1074 : vector<4x256xf32>
    %c238_i32_546 = arith.constant 238 : i32
    %1076 = tpu.dynamic_rotate %33 by %c238_i32_546 dim 1 : vector<4x256xf32>, i32 -> vector<4x256xf32>
    %c18_547 = arith.constant 18 : index
    %c0_548 = arith.constant 0 : index
    %c0_549 = arith.constant 0 : index
    %1077 = vector.load %arg2[%c18_547, %c0_548, %c0_549] : memref<64x1x256xf32, #tpu.memory_space<vmem>>, vector<1x1x256xf32>
    %1078 = vector.shape_cast %1077 : vector<1x1x256xf32> to vector<1x256xf32>
    %1079 = vector.broadcast %1078 : vector<1x256xf32> to vector<4x256xf32>
    %1080 = arith.mulf %1076, %1079 : vector<4x256xf32>
    %c0_550 = arith.constant 0 : index
    %c19_551 = arith.constant 19 : index
    %1081 = vector.load %arg4[%c0_550, %c19_551] : memref<8x108xf32, #tpu.memory_space<vmem>>, vector<4x1xf32>
    %1082 = vector.broadcast %1081 : vector<4x1xf32> to vector<4x256xf32>
    %1083 = arith.mulf %1080, %1082 : vector<4x256xf32>
    %1084 = arith.addf %1075, %1083 : vector<4x256xf32>
    %c226_i32_552 = arith.constant 226 : i32
    %1085 = tpu.dynamic_rotate %33 by %c226_i32_552 dim 1 : vector<4x256xf32>, i32 -> vector<4x256xf32>
    %c19_553 = arith.constant 19 : index
    %c0_554 = arith.constant 0 : index
    %c0_555 = arith.constant 0 : index
    %1086 = vector.load %arg2[%c19_553, %c0_554, %c0_555] : memref<64x1x256xf32, #tpu.memory_space<vmem>>, vector<1x1x256xf32>
    %1087 = vector.shape_cast %1086 : vector<1x1x256xf32> to vector<1x256xf32>
    %1088 = vector.broadcast %1087 : vector<1x256xf32> to vector<4x256xf32>
    %1089 = arith.mulf %1085, %1088 : vector<4x256xf32>
    %c0_556 = arith.constant 0 : index
    %c20_557 = arith.constant 20 : index
    %1090 = vector.load %arg4[%c0_556, %c20_557] : memref<8x108xf32, #tpu.memory_space<vmem>>, vector<4x1xf32>
    %1091 = vector.broadcast %1090 : vector<4x1xf32> to vector<4x256xf32>
    %1092 = arith.mulf %1089, %1091 : vector<4x256xf32>
    %1093 = arith.addf %1084, %1092 : vector<4x256xf32>
    %c225_i32_558 = arith.constant 225 : i32
    %1094 = tpu.dynamic_rotate %33 by %c225_i32_558 dim 1 : vector<4x256xf32>, i32 -> vector<4x256xf32>
    %c20_559 = arith.constant 20 : index
    %c0_560 = arith.constant 0 : index
    %c0_561 = arith.constant 0 : index
    %1095 = vector.load %arg2[%c20_559, %c0_560, %c0_561] : memref<64x1x256xf32, #tpu.memory_space<vmem>>, vector<1x1x256xf32>
    %1096 = vector.shape_cast %1095 : vector<1x1x256xf32> to vector<1x256xf32>
    %1097 = vector.broadcast %1096 : vector<1x256xf32> to vector<4x256xf32>
    %1098 = arith.mulf %1094, %1097 : vector<4x256xf32>
    %c0_562 = arith.constant 0 : index
    %c21_563 = arith.constant 21 : index
    %1099 = vector.load %arg4[%c0_562, %c21_563] : memref<8x108xf32, #tpu.memory_space<vmem>>, vector<4x1xf32>
    %1100 = vector.broadcast %1099 : vector<4x1xf32> to vector<4x256xf32>
    %1101 = arith.mulf %1098, %1100 : vector<4x256xf32>
    %1102 = arith.addf %1093, %1101 : vector<4x256xf32>
    %c224_i32_564 = arith.constant 224 : i32
    %1103 = tpu.dynamic_rotate %33 by %c224_i32_564 dim 1 : vector<4x256xf32>, i32 -> vector<4x256xf32>
    %c21_565 = arith.constant 21 : index
    %c0_566 = arith.constant 0 : index
    %c0_567 = arith.constant 0 : index
    %1104 = vector.load %arg2[%c21_565, %c0_566, %c0_567] : memref<64x1x256xf32, #tpu.memory_space<vmem>>, vector<1x1x256xf32>
    %1105 = vector.shape_cast %1104 : vector<1x1x256xf32> to vector<1x256xf32>
    %1106 = vector.broadcast %1105 : vector<1x256xf32> to vector<4x256xf32>
    %1107 = arith.mulf %1103, %1106 : vector<4x256xf32>
    %c0_568 = arith.constant 0 : index
    %c22_569 = arith.constant 22 : index
    %1108 = vector.load %arg4[%c0_568, %c22_569] : memref<8x108xf32, #tpu.memory_space<vmem>>, vector<4x1xf32>
    %1109 = vector.broadcast %1108 : vector<4x1xf32> to vector<4x256xf32>
    %1110 = arith.mulf %1107, %1109 : vector<4x256xf32>
    %1111 = arith.addf %1102, %1110 : vector<4x256xf32>
    %c223_i32_570 = arith.constant 223 : i32
    %1112 = tpu.dynamic_rotate %33 by %c223_i32_570 dim 1 : vector<4x256xf32>, i32 -> vector<4x256xf32>
    %c22_571 = arith.constant 22 : index
    %c0_572 = arith.constant 0 : index
    %c0_573 = arith.constant 0 : index
    %1113 = vector.load %arg2[%c22_571, %c0_572, %c0_573] : memref<64x1x256xf32, #tpu.memory_space<vmem>>, vector<1x1x256xf32>
    %1114 = vector.shape_cast %1113 : vector<1x1x256xf32> to vector<1x256xf32>
    %1115 = vector.broadcast %1114 : vector<1x256xf32> to vector<4x256xf32>
    %1116 = arith.mulf %1112, %1115 : vector<4x256xf32>
    %c0_574 = arith.constant 0 : index
    %c23_575 = arith.constant 23 : index
    %1117 = vector.load %arg4[%c0_574, %c23_575] : memref<8x108xf32, #tpu.memory_space<vmem>>, vector<4x1xf32>
    %1118 = vector.broadcast %1117 : vector<4x1xf32> to vector<4x256xf32>
    %1119 = arith.mulf %1116, %1118 : vector<4x256xf32>
    %1120 = arith.addf %1111, %1119 : vector<4x256xf32>
    %c222_i32_576 = arith.constant 222 : i32
    %1121 = tpu.dynamic_rotate %33 by %c222_i32_576 dim 1 : vector<4x256xf32>, i32 -> vector<4x256xf32>
    %c23_577 = arith.constant 23 : index
    %c0_578 = arith.constant 0 : index
    %c0_579 = arith.constant 0 : index
    %1122 = vector.load %arg2[%c23_577, %c0_578, %c0_579] : memref<64x1x256xf32, #tpu.memory_space<vmem>>, vector<1x1x256xf32>
    %1123 = vector.shape_cast %1122 : vector<1x1x256xf32> to vector<1x256xf32>
    %1124 = vector.broadcast %1123 : vector<1x256xf32> to vector<4x256xf32>
    %1125 = arith.mulf %1121, %1124 : vector<4x256xf32>
    %c0_580 = arith.constant 0 : index
    %c24_581 = arith.constant 24 : index
    %1126 = vector.load %arg4[%c0_580, %c24_581] : memref<8x108xf32, #tpu.memory_space<vmem>>, vector<4x1xf32>
    %1127 = vector.broadcast %1126 : vector<4x1xf32> to vector<4x256xf32>
    %1128 = arith.mulf %1125, %1127 : vector<4x256xf32>
    %1129 = arith.addf %1120, %1128 : vector<4x256xf32>
    %c0_582 = arith.constant 0 : index
    %c6_583 = arith.constant 6 : index
    %1130 = vector.load %arg3[%c0_582, %c6_583] : memref<64x20xf32, #tpu.memory_space<vmem>>, vector<4x1xf32>
    %1131 = vector.broadcast %1130 : vector<4x1xf32> to vector<4x256xf32>
    %1132 = arith.addf %1129, %1131 : vector<4x256xf32>
    %1133 = arith.mulf %17, %1132 : vector<4x256xf32>
    %c2_584 = arith.constant 2 : index
    %c0_585 = arith.constant 0 : index
    %c0_586 = arith.constant 0 : index
    %1134 = vector.load %arg5[%c2_584, %c0_585, %c0_586] : memref<9x64x64xf32, #tpu.memory_space<vmem>>, vector<1x64x64xf32>
    %1135 = vector.shape_cast %1134 : vector<1x64x64xf32> to vector<64x64xf32>
    %1136 = vector.extract_strided_slice %1135 {offsets = [0, 0], sizes = [8, 4], strides = [1, 1]} : vector<64x64xf32> to vector<8x4xf32>
    %cst_587 = arith.constant dense<0.000000e+00> : vector<8x256xf32>
    %1137 = tpu.matmul %1136, %910, %cst_587 {dimension_numbers = #tpu.dot_dimension_numbers<[1], [0], [0], [1], [0, 0, 1, 1], [], []>} : vector<8x4xf32>, vector<4x256xf32>, vector<8x256xf32> -> vector<8x256xf32>
    %c3_588 = arith.constant 3 : index
    %c0_589 = arith.constant 0 : index
    %c0_590 = arith.constant 0 : index
    %1138 = vector.load %arg5[%c3_588, %c0_589, %c0_590] : memref<9x64x64xf32, #tpu.memory_space<vmem>>, vector<1x64x64xf32>
    %1139 = vector.shape_cast %1138 : vector<1x64x64xf32> to vector<64x64xf32>
    %1140 = vector.extract_strided_slice %1139 {offsets = [0, 0], sizes = [8, 4], strides = [1, 1]} : vector<64x64xf32> to vector<8x4xf32>
    %cst_591 = arith.constant dense<0.000000e+00> : vector<8x256xf32>
    %1141 = tpu.matmul %1140, %1133, %cst_591 {dimension_numbers = #tpu.dot_dimension_numbers<[1], [0], [0], [1], [0, 0, 1, 1], [], []>} : vector<8x4xf32>, vector<4x256xf32>, vector<8x256xf32> -> vector<8x256xf32>
    %1142 = arith.addf %1137, %1141 : vector<8x256xf32>
    %c0_592 = arith.constant 0 : index
    %c4_593 = arith.constant 4 : index
    %1143 = vector.load %arg3[%c0_592, %c4_593] : memref<64x20xf32, #tpu.memory_space<vmem>>, vector<8x1xf32>
    %1144 = vector.broadcast %1143 : vector<8x1xf32> to vector<8x256xf32>
    %1145 = arith.mulf %1142, %1144 : vector<8x256xf32>
    %c0_594 = arith.constant 0 : index
    %c5_595 = arith.constant 5 : index
    %1146 = vector.load %arg3[%c0_594, %c5_595] : memref<64x20xf32, #tpu.memory_space<vmem>>, vector<8x1xf32>
    %1147 = vector.broadcast %1146 : vector<8x1xf32> to vector<8x256xf32>
    %1148 = arith.addf %1145, %1147 : vector<8x256xf32>
    %1149 = arith.negf %1148 : vector<8x256xf32>
    %1150 = math.exp %1149 : vector<8x256xf32>
    %cst_596 = arith.constant 1.000000e+00 : f32
    %1151 = vector.broadcast %cst_596 : f32 to vector<8x256xf32>
    %1152 = arith.addf %1151, %1150 : vector<8x256xf32>
    %1153 = arith.divf %1151, %1152 : vector<8x256xf32>
    %1154 = arith.mulf %1148, %1153 : vector<8x256xf32>
    %c0_597 = arith.constant 0 : index
    %c0_598 = arith.constant 0 : index
    %c0_599 = arith.constant 0 : index
    %1155 = vector.load %arg7[%c0_597, %c0_598, %c0_599] : memref<1x8x256xf32, #tpu.memory_space<vmem>>, vector<1x8x256xf32>
    %1156 = vector.shape_cast %1155 : vector<1x8x256xf32> to vector<8x256xf32>
    %1157 = vector.shape_cast %1154 : vector<8x256xf32> to vector<1x8x256xf32>
    tpu.vector_store %arg7[%c0_597, %c0_598, %c0_599], %1157 {strides = array<i32>} : memref<1x8x256xf32, #tpu.memory_space<vmem>>, vector<1x8x256xf32>,
    return
  }
  func.func @transform_0(%arg0: i32) -> (i32, i32, i32) {
    %c0_i32 = arith.constant 0 : i32
    %c0_i32_0 = arith.constant 0 : i32
    %c0_i32_1 = arith.constant 0 : i32
    return %arg0, %c0_i32, %c0_i32_0 : i32, i32, i32
  }
  func.func @transform_1(%arg0: i32) -> (i32, i32, i32) {
    %c0_i32 = arith.constant 0 : i32
    %c0_i32_0 = arith.constant 0 : i32
    %c0_i32_1 = arith.constant 0 : i32
    %c0_i32_2 = arith.constant 0 : i32
    return %c0_i32, %c0_i32_0, %c0_i32_1 : i32, i32, i32
  }
  func.func @transform_2(%arg0: i32) -> (i32, i32) {
    %c0_i32 = arith.constant 0 : i32
    %c0_i32_0 = arith.constant 0 : i32
    %c0_i32_1 = arith.constant 0 : i32
    return %c0_i32, %c0_i32_0 : i32, i32
  }
  func.func @transform_3(%arg0: i32) -> (i32, i32) {
    %c0_i32 = arith.constant 0 : i32
    %c0_i32_0 = arith.constant 0 : i32
    %c0_i32_1 = arith.constant 0 : i32
    return %c0_i32, %c0_i32_0 : i32, i32
  }
  func.func @transform_4(%arg0: i32) -> (i32, i32, i32) {
    %c0_i32 = arith.constant 0 : i32
    %c0_i32_0 = arith.constant 0 : i32
    %c0_i32_1 = arith.constant 0 : i32
    %c0_i32_2 = arith.constant 0 : i32
    return %c0_i32, %c0_i32_0, %c0_i32_1 : i32, i32, i32
  }
  func.func @transform_5(%arg0: i32) -> (i32, i32, i32) {
    %c0_i32 = arith.constant 0 : i32
    %c0_i32_0 = arith.constant 0 : i32
    %c0_i32_1 = arith.constant 0 : i32
    %c0_i32_2 = arith.constant 0 : i32
    return %c0_i32, %c0_i32_0, %c0_i32_1 : i32, i32, i32
  }
  func.func @transform_6(%arg0: i32) -> (i32, i32, i32) {
    %c0_i32 = arith.constant 0 : i32
    %c0_i32_0 = arith.constant 0 : i32
    %c0_i32_1 = arith.constant 0 : i32
    return %arg0, %c0_i32, %c0_i32_0 : i32, i32, i32
  }
}

</mosaic_0001>

<bundles_post_ra>
// kernel: fwd.1
= control target key start
LH: loop header
LB: loop body
LE: loop exit
PB: predicated region body
PF: predicated region fallthrough
CT: control target
= control target key end

     0   :  { %11 = vsyncpa [#allocation4], 0  ;;  %s7232_s21 = smov 0   ;;  %s11315_s0 = inlined_call_operand.vmem [shape: f32[2,8,256], index: 0, kind: input, shape index: {}]   ;;  %s11316_s1 = inlined_call_operand.vmem [shape: f32[64,1,256], index: 1, kind: input, shape index: {}]   ;;  %s11317_s2 = inlined_call_operand.vmem [shape: f32[64,20], index: 2, kind: input, shape index: {}]   ;;  %s11318_s3 = inlined_call_operand.vmem [shape: f32[8,108], index: 3, kind: input, shape index: {}]   ;;  %s11319_s4 = inlined_call_operand.hbm [shape: f32[9,64,64], index: 4, kind: input, shape index: {}]   ;;  %s11320_s5 = inlined_call_operand.vmem [shape: bf16[1,64,576], index: 5, kind: input, shape index: {}]   ;;  %s11321_s6 = inlined_call_operand.vmem [shape: f32[2,8,256], index: 6, kind: output, shape index: {}]  }
   0x1 LB: > { %s7238_s22 = sadd.s32 4294967295, %s7040_s21   ;;  %p6163_p0 = scmp.ge.s32.totalorder %s7040_s21, 1  ;;  %s7040_s21 = sphi %s7232_s21, %s17_s21  }
   0x2   : > { %p179_p1 = scmp.lt.s32.totalorder %s7040_s21, 3  ;;  %s7042_s23 = smov [#allocation3]  }
   0x3   : > { %s200_s24 = sshll.u32 %s7042_s23, 4  ;;  %p6624_p3 = scmp.eq.s32.totalorder %s7238_s22, 0  ;;  %s201_s24 = int_to_ptr.vmem [resolvable:$true] %s200_s24 }
   0x4   : > { %p7242_p2 = pnand %p6163_p0, %p179_p1  ;;  %s7015_s26 = scalar_lea.vmem %s201_s24, 9216 }
   0x5   : > { %p7016_p7 = scmp.ne.s32.totalorder %s201_s24, %s7015_s26  ;;  %p7023_p10 = scmp.lt.s32.totalorder %s201_s24, %s201_s24 }
   0x6   : > { %p6620_p4 = pneg %p7242_p2  ;;  %p7024_p11 = scmp.lt.s32.totalorder %s7015_s26, %s7015_s26 }
   0x8   : > { %p6621_p5 = pnand %p6624_p3, %p6620_p4  ;;  %p7025_p12 = por %p7024_p11, %p7023_p10 }
   0xa   : > { %p7006_p6 = pneg %p6621_p5 }
   0xc   : > { %p7018_p8 = pnand %p7016_p7, %p7006_p6 }
   0xe   : > { %p7019_p9 = pneg %p7018_p8 }
  0x10   : > { %p7026_p13 = pnand %p7025_p12, %p7019_p9 }
  0x12   : > { %7029 = shalt.err (!%p7026_p13)
}
  0x13   : > { %s7043_s27 = smov 128   ;;  %s7044_s28 = smov 8  }
  0x14   : > { %6623 = dma.hbm_to_vmem [thread:$0]  (!%p6621_p5), %s11319_s4, 9216, %s201_s24, [#allocation4], %s7043_s27, %s7043_s27, %s7044_s28  }
  0x15   : > { %227 = sbr.rel (%p7242_p2) target bundleno = 3226 (0xc9a), region = 44 }
  0x1a   : > { %7035 = dma.done.wait (%p6624_p3), [#allocation4], 9216  }
  0x1b   : > { %7037 = vsyncadd (%p6624_p3), [#allocation4], 4294958080  ;;  %p257_p0 = scmp.lt.s32.totalorder %s7238_s22, 1  ;;  %v11334_v0 = vmov 0.0   ;;  %v11333_v1 = vmov 2   ;;  %v270_v4 = vld [vmem:[#allocation3] sm:$0xff] }
  0x1c   : > { %339 = vmatprep.mubr.f32.mxu1 %v11334_v0  ;;  %6789 = vset.pattern.permute.xlu0 %v11333_v1  ;;  %vm271_vm0 = vcmask 64512   ;;  %v346_v5 = vld [vmem:[%s11317_s2] sm:$0xf]  ;;  %v11332_v7 = vmov 3   ;;  %v7048_v10 = vmov 26   ;;  %v11331_v11 = vmov 7  }
  0x1d   : > { %s12112_s22 = smov (!%p257_p0, %s7238_s22), 1  ;;  %2671 = vmatprep.mubr.f32.mxu0 %v11334_v0  ;;  %v375_v6 = vld [vmem:[#allocation3 + $0x40] sm:$0xff]  ;;  %451 = vperm.xlu0 %6789, %v346_v5   ;;  %v7050_v12 = vmov 27   ;;  %v11329_v13 = vmov 8   ;;  %v7052_v14 = vmov 28   ;;  %v7053_v15 = vmov 29  }
  0x1e   : > { %s11322_s7 = sshll.u32 %s12112_s22, 4  ;;  %v7284_v8 = vld [vmem:[%s11318_s3] sm:$0xff]  ;;  %6791 = vset.pattern.permute.xlu1 %v11331_v11  ;;  %v7054_v16 = vmov 30   ;;  %v7055_v17 = vmov 31   ;;  %v7056_v18 = vmov 32   ;;  %v7057_v19 = vmov 33  }
  0x1f   : > { %s261_s10 = scalar_lea.vmem %s11315_s0, %s11322_s7  ;;  %v7289_v9 = vld [vmem:[%s11317_s2] sm:$0xff]  ;;  %v7058_v20 = vmov 34   ;;  %v7059_v21 = vmov 35   ;;  %v7060_v22 = vmov 36   ;;  %v7061_v23 = vmov 37   ;;  %s11358_s17 = smov 33  }
  0x20   : > { %v269_v2 = vld [vmem:[%s261_s10 + $0x8] sm:$0xff]  ;;  %v268_v3 = vld [vmem:[%s261_s10] sm:$0xff]  ;;  %563 = vperm.xlu1 %6791, %v7289_v9   ;;  %v7062_v24 = vmov 40   ;;  %v7063_v25 = vmov 41   ;;  %v7064_v26 = vmov 42   ;;  %v7065_v27 = vmov 43  }
  0x21   : > { %305 = vmatprep.subr.mxu1 %v269_v2  ;;  %6790 = vset.pattern.permute.xlu0 %v11332_v7  ;;  %v7066_v30 = vmov 44   ;;  %v7067_v35 = vmov 45   ;;  %v7068_v41 = vmov 46   ;;  %v7069_v43 = vmov 47   ;;  %v477_v57 = vld [vmem:[#allocation3 + $0x100] sm:$0xff]  ;;  %s7088_s18 = smov 34  }
  0x22   : > { %306 = vmatpush1.msra.mxu1 %v268_v3  ;;  %457 = vperm.xlu0 %6790, %v346_v5   ;;  %v7070_v44 = vmov 48   ;;  %v7071_v47 = vmov 49   ;;  %v11330_v50 = vmov 9   ;;  %v7073_v51 = vmov 52   ;;  %s7089_s19 = smov 32   ;;  %s11356_s20 = smov 31  }
  0x23   : > { %6172 = vmatmul.mubr.msk.f32.vlgmr.msra.gmra.mxu1 %vm271_vm0, %v270_v4  ;;  %409 = vmatprep.subr.mxu1 %v269_v2  ;;  %v7074_v52 = vmov 53   ;;  %vm482_vm1 = vcmask 1043456   ;;  %vm478_vm2 = vcmask 31744   ;;  %v7075_v58 = vmov 54   ;;  %s7092_s23 = smov 30   ;;  %s7093_s24 = smov 126  }
  0x24   : > { %410 = vmatpush1.msra.mxu1 %v268_v3  ;;  %443 = vmatprep.mubr.f32.mxu1 %v11334_v0  ;;  %v7076_v59 = vmov 25   ;;  %v7077_v60 = vmov 55   ;;  %v7078_v61 = vmov 38   ;;  %v7079_v62 = vmov 56   ;;  %s11353_s25 = smov 18   ;;  %s11323_s26 = smov 127  }
  0x25   : > { %6792 = vset.pattern.permute.xlu1 %v11329_v13  ;;  %v7080_v63 = vmov 39   ;;  %v7081_v2 = vmov 57   ;;  %v7082_v3 = vmov 50   ;;  %v7083_v4 = vmov 58   ;;  %s7096_s27 = smov 17   ;;  %s7097_s28 = smov 16  }
  0x26   : > { %6794 = vset.pattern.permute.xlu0 %v7048_v10  ;;  %569 = vperm.xlu1 %6792, %v7289_v9   ;;  %v7084_v5 = vmov 51   ;;  %s7098_s29 = smov 15   ;;  %s11351_s30 = smov 14  }
  0x27   : > { %6175 = vmatmul.mubr.msk.f32.vlgmr.msra.gmra.mxu1 %vm271_vm0, %v375_v6  ;;  %642 = vperm.xlu0 %6794, %v7284_v8   ;;  %v7085_v6 = vmov 59   ;;  %s7100_s8 = smov 2   ;;  %s7101_s9 = smov 1  }
  0x28   : > { %553 = vmatprep.mubr.f32.mxu1 %v11334_v0  ;;  %s11327_s10 = smov 114   ;;  %s7103_s11 = smov 113  }
  0x29   : > { %s7104_s12 = smov 112   ;;  %s7105_s13 = smov 111  }
  0x2a   : > { %6793 = vset.pattern.permute.xlu1 %v7076_v59  ;;  %s11325_s14 = smov 110   ;;  %s7107_s15 = smov 98  }
  0x2b   : > { %6795 = vset.pattern.permute.xlu0 %v7050_v12  ;;  %614 = vperm.xlu1 %6793, %v7284_v8   ;;  %s11345_s16 = smov 97   ;;  %s11425_s7 = smov 96  }
  0x2c   : > { %672 = vperm.xlu0 %6795, %v7284_v8  }
  0x2f   : > { %6806 = vset.pattern.permute.xlu1 %v7078_v61  ;;  %v7114_v61 = vmov 64  }
  0x30   : > { %6796 = vset.pattern.permute.xlu0 %v7052_v14  ;;  %980 = vperm.xlu1 %6806, %v7284_v8  }
  0x31   : > { %702 = vperm.xlu0 %6796, %v7284_v8  }
  0x34   : > { %6807 = vset.pattern.permute.xlu1 %v7080_v63 }
  0x35   : > { %6797 = vset.pattern.permute.xlu0 %v7053_v15  ;;  %1010 = vperm.xlu1 %6807, %v7284_v8  }
  0x36   : > { %732 = vperm.xlu0 %6797, %v7284_v8  }
  0x39   : > { %6819 = vset.pattern.permute.xlu1 %v7082_v3 }
  0x3a   : > { %6798 = vset.pattern.permute.xlu0 %v7054_v16  ;;  %1346 = vperm.xlu1 %6819, %v7284_v8  }
  0x3b   : > { %762 = vperm.xlu0 %6798, %v7284_v8  }
  0x3e   : > { %6820 = vset.pattern.permute.xlu1 %v7084_v5  ;;  %v7116_v5 = vmov 66  }
  0x3f   : > { %6799 = vset.pattern.permute.xlu0 %v7055_v17  ;;  %1374 = vperm.xlu1 %6820, %v7284_v8  }
  0x40   : > { %792 = vperm.xlu0 %6799, %v7284_v8  }
  0x44   : > { %6800 = vset.pattern.permute.xlu0 %v7056_v18 }
  0x45   : > { %822 = vperm.xlu0 %6800, %v7284_v8  }
  0x49   : > { %6801 = vset.pattern.permute.xlu0 %v7057_v19 }
  0x4a   : > { %852 = vperm.xlu0 %6801, %v7284_v8  }
  0x4e   : > { %6802 = vset.pattern.permute.xlu0 %v7058_v20 }
  0x4f   : > { %882 = vperm.xlu0 %6802, %v7284_v8  }
  0x53   : > { %6803 = vset.pattern.permute.xlu0 %v7059_v21 }
  0x54   : > { %912 = vperm.xlu0 %6803, %v7284_v8  }
  0x58   : > { %6804 = vset.pattern.permute.xlu0 %v7060_v22 }
  0x59   : > { %942 = vperm.xlu0 %6804, %v7284_v8  }
  0x5d   : > { %6805 = vset.pattern.permute.xlu0 %v7061_v23 }
  0x5e   : > { %950 = vperm.xlu0 %6805, %v7284_v8  }
  0x62   : > { %6808 = vset.pattern.permute.xlu0 %v7062_v24 }
  0x63   : > { %1040 = vperm.xlu0 %6808, %v7284_v8  }
  0x67   : > { %6809 = vset.pattern.permute.xlu0 %v7063_v25 }
  0x68   : > { %1070 = vperm.xlu0 %6809, %v7284_v8  }
  0x6c   : > { %6810 = vset.pattern.permute.xlu0 %v7064_v26 }
  0x6d   : > { %1100 = vperm.xlu0 %6810, %v7284_v8  }
  0x71   : > { %6811 = vset.pattern.permute.xlu0 %v7065_v27 }
  0x72   : > { %1130 = vperm.xlu0 %6811, %v7284_v8  }
  0x76   : > { %6812 = vset.pattern.permute.xlu0 %v7066_v30 }
  0x77   : > { %1160 = vperm.xlu0 %6812, %v7284_v8  }
  0x7b   : > { %6813 = vset.pattern.permute.xlu0 %v7067_v35 }
  0x7c   : > { %1190 = vperm.xlu0 %6813, %v7284_v8  }
  0x80   : > { %6814 = vset.pattern.permute.xlu0 %v7068_v41 }
  0x81   : > { %1220 = vperm.xlu0 %6814, %v7284_v8  }
  0x85   : > { %6815 = vset.pattern.permute.xlu0 %v7069_v43 }
  0x86   : > { %1250 = vperm.xlu0 %6815, %v7284_v8  }
  0x8a   : > { %6816 = vset.pattern.permute.xlu0 %v7070_v44 }
  0x8b   : > { %1280 = vperm.xlu0 %6816, %v7284_v8  }
  0x8f   : > { %6817 = vset.pattern.permute.xlu0 %v7071_v47 }
  0x90   : > { %1310 = vperm.xlu0 %6817, %v7284_v8  }
  0x94   : > { %6818 = vset.pattern.permute.xlu0 %v11330_v50 }
  0x95   : > { %1318 = vperm.xlu0 %6818, %v7289_v9   ;;  %v7086_v9 = vmov 60  }
  0x98   : > { %v452_v28 = vpop.permute.xlu0 %451 }
  0x99   : > { %6821 = vset.pattern.permute.xlu0 %v7073_v51 }
  0x9a   : > { %1403 = vperm.xlu0 %6821, %v7284_v8  }
  0x9b   : > { %v564_v10 = vpop.permute.xlu1 %563 }
  0x9d   : > { %v458_v33 = vpop.permute.xlu0 %457 }
  0x9e   : > { %6822 = vset.pattern.permute.xlu0 %v7074_v52  ;;  %v7112_v52 = vmov 62  }
  0x9f   : > { %1432 = vperm.xlu0 %6822, %v7284_v8  }
  0xa1   : > { %v570_v14 = vpop.permute.xlu1 %569 }
  0xa3   : > { %6823 = vset.pattern.permute.xlu0 %v7075_v58  ;;  %v7113_v58 = vmov 63  }
  0xa4   : > { %1461 = vperm.xlu0 %6823, %v7284_v8  }
  0xa6   : > { %v7418_v41 = vpop.permute.xlu1 %614 }
  0xa8   : > { %6824 = vset.pattern.permute.xlu0 %v7077_v60 }
  0xa9   : > { %1491 = vperm.xlu0 %6824, %v7284_v8  }
  0xab   : > { %v7424_v43 = vpop.permute.xlu1 %980 }
  0xad   : > { %6825 = vset.pattern.permute.xlu0 %v7079_v62 }
  0xae   : > { %1521 = vperm.xlu0 %6825, %v7284_v8  }
  0xb2   : > { %6826 = vset.pattern.permute.xlu0 %v7081_v2  ;;  %v7115_v2 = vmov 65  }
  0xb3   : > { %1551 = vperm.xlu0 %6826, %v7284_v8  }
  0xb7   : > { %6827 = vset.pattern.permute.xlu0 %v7083_v4 }
  0xb8   : > { %1581 = vperm.xlu0 %6827, %v7284_v8  }
  0xbc   : > { %6828 = vset.pattern.permute.xlu0 %v7085_v6 }
  0xbd   : > { %1611 = vperm.xlu0 %6828, %v7284_v8  }
  0xc1   : > { %6829 = vset.pattern.permute.xlu0 %v7086_v9 }
  0xe3   : > { %v7311_v29 = vpop.f32.mrf.mxu1 }
  0xe4   : > { %11570 = vst [vmem:[#allocation6_spill] sm:$0xff] %v7311_v29 }
  0xe5   : > { %v7314_v31 = vpop.f32.mrf.mxu1 }
  0xe6   : > { %11571 = vst [vmem:[#allocation7_spill] sm:$0xff] %v7314_v31 }
  0xe7   : > { %v445_v32 = vpop.f32.mrf.mxu1 }
  0xe8   : > { %v454_v34 = vmul.f32 %v452_v28, %v445_v32 }
  0xe9   : > { %v447_v36 = vpop.f32.mrf.mxu1 }
  0xea   : > { %v460_v37 = vadd.f32 %v458_v33, %v454_v34  ;;  %v455_v38 = vmul.f32 %v452_v28, %v447_v36  ;;  %v7090_v28 = vmov 61  }
  0xec   : > { %v6176_v39 = vmul.f32 -1.442695, %v460_v37  ;;  %v461_v40 = vadd.f32 %v458_v33, %v455_v38  ;;  %v7378_v33 = vpop.permute.xlu0 %642 }
  0xee   : > { %6961 = vpow2.f32 %v6176_v39  ;;  %v6177_v42 = vmul.f32 -1.442695, %v461_v40 }
  0xf0   : > { %6963 = vpow2.f32 %v6177_v42  ;;  %v7382_v34 = vpop.permute.xlu0 %672 }
  0xf4   : > { %v7388_v35 = vpop.permute.xlu0 %702 }
  0xf8   : > { %v7392_v36 = vpop.permute.xlu0 %732 }
  0xfb   : > { %v6962_v45 = vpop.eup %6961 }
  0xfc   : > { %v468_v46 = vadd.f32 1.0, %v6962_v45  ;;  %v7432_v45 = vpop.permute.xlu1 %1010 }
  0xfd   : > { %v6964_v48 = vpop.eup %6963 }
  0xfe   : > { %v469_v49 = vadd.f32 1.0, %v6964_v48  ;;  %6965 = vrcp.f32 %v468_v46 }
 0x100   : > { %6967 = vrcp.f32 %v469_v49  ;;  %v7438_v47 = vpop.permute.xlu1 %1346 }
 0x101   : > { %11574 = vst [vmem:[#allocation10_spill] sm:$0xff] %v7438_v47 }
 0x104   : > { %v7448_v51 = vpop.permute.xlu1 %1374 }
 0x105   : > { %11575 = vst [vmem:[#allocation11_spill] sm:$0xff] %v7448_v51 }
 0x10b   : > { %v6966_v53 = vpop.eup %6965 }
 0x10c   : > { %v7327_v56 = vmul.f32 %v6966_v53, %v460_v37  ;;  %v7398_v37 = vpop.permute.xlu0 %762 }
 0x10d   : > { %v6968_v54 = vpop.eup %6967 }
 0x10e   : > { %v7325_v55 = vmul.f32 %v6968_v54, %v461_v40  ;;  %11573 = vst [vmem:[#allocation9_spill] sm:$0xff] %v7327_v56 }
 0x110   : > { %11572 = vst [vmem:[#allocation8_spill] sm:$0xff] %v7325_v55  ;;  %6178 = vmatprep.subr.msk.mxu1 %vm482_vm1, %v7325_v55  ;;  %v7402_v38 = vpop.permute.xlu0 %792  ;;  %v592_v55 = vlaneseq }
 0x111   : > { %6179 = vmatpush1.msk.msra.mxu1 %vm482_vm1, %v7327_v56 }
 0x112   : > { %6180 = vmatmul.mubr.msk.f32.vlgmr.msra.gmra.mxu1 %vm478_vm2, %v477_v57 }
 0x113   : > { %2589 = vmatprep.mubr.f32.mxu1 %v11334_v0 }
 0x114   : > { %v7408_v39 = vpop.permute.xlu0 %822 }
 0x118   : > { %v7412_v40 = vpop.permute.xlu0 %852 }
 0x11c   : > { %v7420_v42 = vpop.permute.xlu0 %882 }
 0x120   : > { %v7426_v44 = vpop.permute.xlu0 %912 }
 0x124   : > { %v7434_v46 = vpop.permute.xlu0 %942 }
 0x128   : > { %v7440_v48 = vpop.permute.xlu0 %950 }
 0x12c   : > { %v7444_v49 = vpop.permute.xlu0 %1040 }
 0x130   : > { %v7452_v53 = vpop.permute.xlu0 %1070 }
 0x131   : > { %11576 = vst [vmem:[#allocation12_spill] sm:$0xff] %v7452_v53 }
 0x134   : > { %v7462_v59 = vpop.permute.xlu0 %1100 }
 0x135   : > { %11577 = vst [vmem:[#allocation13_spill] sm:$0xff] %v7462_v59 }
 0x138   : > { %v7471_v62 = vpop.permute.xlu0 %1130 }
 0x139   : > { %11578 = vst [vmem:[#allocation14_spill] sm:$0xff] %v7471_v62 }
 0x13c   : > { %v7480_v4 = vpop.permute.xlu0 %1160 }
 0x13d   : > { %11579 = vst [vmem:[#allocation15_spill] sm:$0xff] %v7480_v4 }
 0x140   : > { %v7489_v9 = vpop.permute.xlu0 %1190 }
 0x141   : > { %11580 = vst [vmem:[#allocation16_spill] sm:$0xff] %v7489_v9 }
 0x1d2   : > { %v555_v12 = vpop.f32.mrf.mxu1 }
 0x1d3   : > { %v566_v15 = vmul.f32 %v564_v10, %v555_v12  ;;  %v7117_v12 = vmov 67  }
 0x1d4   : > { %v557_v17 = vpop.f32.mrf.mxu1 }
 0x1d5   : > { %v572_v16 = vadd.f32 %v570_v14, %v566_v15  ;;  %v567_v19 = vmul.f32 %v564_v10, %v557_v17  ;;  %v7118_v15 = vmov 68  }
 0x1d7   : > { %v6181_v18 = vmul.f32 -1.442695, %v572_v16  ;;  %v573_v20 = vadd.f32 %v570_v14, %v567_v19 }
 0x1d9   : > { %6969 = vpow2.f32 %v6181_v18  ;;  %v6182_v21 = vmul.f32 -1.442695, %v573_v20  ;;  %v7119_v18 = vmov 69  }
 0x1db   : > { %6971 = vpow2.f32 %v6182_v21  ;;  %v7120_v21 = vmov 70  }
 0x1e6   : > { %v6970_v22 = vpop.eup %6969 }
 0x1e7   : > { %v580_v23 = vadd.f32 1.0, %v6970_v22 }
 0x1e8   : > { %v6972_v24 = vpop.eup %6971 }
 0x1e9   : > { %6973 = vrcp.f32 %v580_v23  ;;  %v581_v25 = vadd.f32 1.0, %v6972_v24 }
 0x1eb   : > { %6975 = vrcp.f32 %v581_v25  ;;  %v7121_v25 = vmov 71  }
 0x1f6   : > { %v6974_v26 = vpop.eup %6973 }
 0x1f7   : > { %v7346_v27 = vmul.f32 %v6974_v26, %v572_v16  ;;  %v7498_v16 = vpop.permute.xlu0 %1220 }
 0x1f8   : > { %v6976_v30 = vpop.eup %6975  ;;  %11581 = vst [vmem:[#allocation17_spill] sm:$0xff] %v7498_v16 }
 0x1f9   : > { %619 = vrot.lane.b32.xlu0 %v7346_v27, %s11358_s17  ;;  %588 = vrot.lane.b32.xlu1 %v7346_v27, %s7088_s18  ;;  %v7362_v32 = vmul.f32 %v6976_v30, %v573_v20 }
 0x1fb   : > { %v7508_v19 = vpop.permute.xlu0 %1250 }
 0x1fc   : > { %11582 = vst [vmem:[#allocation18_spill] sm:$0xff] %v7508_v19 }
 0x1fd   : > { %1641 = vperm.xlu0 %6829, %v7284_v8   ;;  %649 = vrot.lane.b32.xlu1 %v7346_v27, %s7089_s19 }
 0x1ff   : > { %v7517_v23 = vpop.permute.xlu0 %1280 }
 0x200   : > { %11583 = vst [vmem:[#allocation19_spill] sm:$0xff] %v7517_v23 }
 0x201   : > { %6830 = vset.pattern.permute.xlu0 %v7090_v28  ;;  %679 = vrot.lane.b32.xlu1 %v7346_v27, %s11356_s20 }
 0x202   : > { %1671 = vperm.xlu0 %6830, %v7284_v8  }
 0x203   : > { %v7526_v26 = vpop.permute.xlu0 %1310 }
 0x204   : > { %11585 = vst [vmem:[#allocation20_spill] sm:$0xff] %v7526_v26 }
 0x205   : > { %709 = vrot.lane.b32.xlu1 %v7346_v27, %s7092_s23 }
 0x206   : > { %987 = vrot.lane.b32.xlu0 %v7346_v27, %s7093_s24 }
 0x207   : > { %6831 = vset.pattern.permute.xlu0 %v7112_v52  ;;  %v7534_v52 = vpop.permute.xlu0 %1318 }
 0x208   : > { %11586 = vst [vmem:[#allocation21_spill] sm:$0xff] %v7534_v52  ;;  %v6186_v52 = vld [vmem:[%s11316_s1 + $0x8] sm:$0x3] }
 0x209   : > { %739 = vrot.lane.b32.xlu1 %v7346_v27, %s11353_s25 }
 0x20a   : > { %959 = vrot.lane.b32.xlu0 %v7362_v32, %s11323_s26 }
 0x20d   : > { %769 = vrot.lane.b32.xlu1 %v7346_v27, %s7096_s27 }
 0x20e   : > { %1701 = vperm.xlu0 %6831, %v7284_v8  }
 0x211   : > { %799 = vrot.lane.b32.xlu1 %v7346_v27, %s7097_s28 }
 0x212   : > { %6832 = vset.pattern.permute.xlu0 %v7113_v58 }
 0x213   : > { %1731 = vperm.xlu0 %6832, %v7284_v8  }
 0x215   : > { %829 = vrot.lane.b32.xlu1 %v7346_v27, %s7098_s29 }
 0x217   : > { %6833 = vset.pattern.permute.xlu0 %v7114_v61  ;;  %v7542_v61 = vpop.permute.xlu0 %1403 }
 0x218   : > { %1761 = vperm.xlu0 %6833, %v7284_v8   ;;  %11587 = vst [vmem:[#allocation22_spill] sm:$0xff] %v7542_v61  ;;  %v7574_v61 = vand.u32 127, %v592_v55 }
 0x219   : > { %859 = vrot.lane.b32.xlu1 %v7346_v27, %s11351_s30 }
 0x21a   : > { %vm11385_vm3 = vcmp.lt.s32.totalorder %v7574_v61, 33  ;;  %vm594_vm4 = vcmp.lt.s32.totalorder %v7574_v61, 34  ;;  %vm653_vm5 = vcmp.lt.s32.totalorder %v7574_v61, 32  ;;  %vm11384_vm6 = vcmp.lt.s32.totalorder %v7574_v61, 31 }
 0x21b   : > { %vm713_vm7 = vcmp.lt.s32.totalorder %v7574_v61, 30  ;;  %vm11383_vm8 = vcmp.lt.s32.totalorder %v7574_v61, 18  ;;  %vm773_vm9 = vcmp.lt.s32.totalorder %v7574_v61, 17  ;;  %vm803_vm10 = vcmp.lt.s32.totalorder %v7574_v61, 16 }
 0x21c   : > { %6834 = vset.pattern.permute.xlu0 %v7115_v2  ;;  %vm11439_vm11 = vcmp.lt.s32.totalorder %v7574_v61, 15  ;;  %vm11382_vm12 = vcmp.lt.s32.totalorder %v7574_v61, 14  ;;  %vm893_vm13 = vcmp.lt.s32.totalorder %v7574_v61, 2  ;;  %vm11427_vm14 = vcmp.lt.s32.totalorder %v7574_v61, 1 }
 0x21d   : > { %889 = vrot.lane.b32.xlu1 %v7346_v27, %s7100_s8  ;;  %1791 = vperm.xlu0 %6834, %v7284_v8   ;;  %vm11391_vm15 = vcmp.lt.s32.totalorder %v7574_v61, 127 }
 0x221   : > { %919 = vrot.lane.b32.xlu1 %v7346_v27, %s7101_s9  ;;  %6835 = vset.pattern.permute.xlu0 %v7116_v5  ;;  %v7123_v5 = vmov 72  }
 0x222   : > { %1807 = vperm.xlu0 %6835, %v7284_v8  }
 0x225   : > { %957 = vrot.lane.b32.xlu1 %v7346_v27, %s11323_s26  ;;  %s11343_s26 = smov 95  }
 0x226   : > { %6836 = vset.pattern.permute.xlu0 %v7117_v12 }
 0x227   : > { %1823 = vperm.xlu0 %6836, %v7284_v8  }
 0x229   : > { %1017 = vrot.lane.b32.xlu1 %v7346_v27, %s11327_s10 }
 0x22b   : > { %6837 = vset.pattern.permute.xlu0 %v7118_v15  ;;  %v7550_v15 = vpop.permute.xlu0 %1432 }
 0x22c   : > { %1839 = vperm.xlu0 %6837, %v7284_v8   ;;  %11590 = vst [vmem:[#allocation25_spill] sm:$0xff] %v7550_v15 }
 0x22d   : > { %1047 = vrot.lane.b32.xlu1 %v7346_v27, %s7103_s11 }
 0x230   : > { %6838 = vset.pattern.permute.xlu0 %v7119_v18 }
 0x231   : > { %1077 = vrot.lane.b32.xlu1 %v7346_v27, %s7104_s12  ;;  %1869 = vperm.xlu0 %6838, %v7284_v8  }
 0x235   : > { %1107 = vrot.lane.b32.xlu1 %v7346_v27, %s7105_s13  ;;  %6839 = vset.pattern.permute.xlu0 %v7120_v21  ;;  %v7554_v21 = vpop.permute.xlu0 %1461 }
 0x236   : > { %1899 = vperm.xlu0 %6839, %v7284_v8   ;;  %11592 = vst [vmem:[#allocation27_spill] sm:$0xff] %v7554_v21  ;;  %v600_v21 = vshrl.u32 %v592_v55, 7 }
 0x238   : > { %v7579_v47 = vsub.s32 0, %v600_v21  ;;  %v7581_v51 = vsub.s32 1, %v600_v21  ;;  %v6185_v21 = vld [vmem:[%s11316_s1 + $0x6] sm:$0x3] }
 0x239   : > { %1137 = vrot.lane.b32.xlu1 %v7346_v27, %s11325_s14  ;;  %s11423_s14 = smov 94   ;;  %v7560_v13 = vpop.permute.xlu0 %1491 }
 0x23a   : > { %6840 = vset.pattern.permute.xlu0 %v7121_v25  ;;  %11595 = vst [vmem:[#allocation30_spill] sm:$0xff] %v7560_v13  ;;  %v692_v9 = vrot.slane %v6185_v21, %v7579_v47  ;;  %v7621_v4 = vrot.slane %v6186_v52, %v7579_v47 }
 0x23b   : > { %1929 = vperm.xlu0 %6840, %v7284_v8   ;;  %v7122_v8 = vmov 75  }
 0x23c   : > { %6844 = vset.pattern.permute.xlu1 %v7122_v8  ;;  %11606 = vst [vmem:[#allocation41_spill] sm:$0xff] %v7621_v4 }
 0x23d   : > { %1167 = vrot.lane.b32.xlu1 %v7346_v27, %s7107_s15  ;;  %v7564_v11 = vpop.permute.xlu0 %1521 }
 0x23e   : > { %11597 = vst [vmem:[#allocation32_spill] sm:$0xff] %v7564_v11  ;;  %v597_v11 = vld [vmem:[%s11316_s1] sm:$0x3] }
 0x23f   : > { %6841 = vset.pattern.permute.xlu0 %v7123_v5  ;;  %v7592_v55 = vrot.slane %v597_v11, %v7579_v47 }
 0x241   : > { %1197 = vrot.lane.b32.xlu1 %v7346_v27, %s11345_s16  ;;  %v7568_v1 = vpop.permute.xlu0 %1551  ;;  %11602 = vst [vmem:[#allocation37_spill] sm:$0xff] %v7592_v55 }
 0x242   : > { %11599 = vst [vmem:[#allocation34_spill] sm:$0xff] %v7568_v1  ;;  %v6184_v1 = vld [vmem:[%s11316_s1 + $0x4] sm:$0x3] }
 0x243   : > { %v7607_v19 = vrot.slane %v6184_v1, %v7579_v47 }
 0x245   : > { %1227 = vrot.lane.b32.xlu1 %v7346_v27, %s11425_s7  ;;  %v7570_v31 = vpop.permute.xlu0 %1581  ;;  %11604 = vst [vmem:[#allocation39_spill] sm:$0xff] %v7607_v19 }
 0x246   : > { %11600 = vst [vmem:[#allocation35_spill] sm:$0xff] %v7570_v31  ;;  %v6183_v31 = vld [vmem:[%s11316_s1 + $0x2] sm:$0x3] }
 0x247   : > { %v636_v23 = vrot.slane %v6183_v31, %v7581_v51 }
 0x249   : > { %1257 = vrot.lane.b32.xlu1 %v7346_v27, %s11343_s26  ;;  %v7572_v15 = vpop.permute.xlu0 %1611 }
 0x24a   : > { %11601 = vst [vmem:[#allocation36_spill] sm:$0xff] %v7572_v15  ;;  %v7595_v15 = vrot.slane %v597_v11, %v7581_v51 }
 0x24c   : > { %11603 = vst [vmem:[#allocation38_spill] sm:$0xff] %v7595_v15 }
 0x24d   : > { %1287 = vrot.lane.b32.xlu1 %v7346_v27, %s11423_s14 }
 0x251   : > { %590 = vrot.lane.b32.xlu1 %v7362_v32, %s7088_s18 }
 0x255   : > { %621 = vrot.lane.b32.xlu1 %v7362_v32, %s11358_s17  ;;  %s7134_s17 = smov 124  }
 0x259   : > { %651 = vrot.lane.b32.xlu1 %v7362_v32, %s7089_s19 }
 0x25d   : > { %681 = vrot.lane.b32.xlu1 %v7362_v32, %s11356_s20  ;;  %s7137_s20 = smov 92  }
 0x261   : > { %711 = vrot.lane.b32.xlu1 %v7362_v32, %s7092_s23 }
 0x265   : > { %741 = vrot.lane.b32.xlu1 %v7362_v32, %s11353_s25  ;;  %s7143_s25 = smov 68  }
 0x269   : > { %771 = vrot.lane.b32.xlu1 %v7362_v32, %s7096_s27 }
 0x26b   : > { %v7454_v54 = vpop.permute.xlu1 %588  ;;  %v620_v26 = vpop.permute.xlu0 %619 }
 0x26d   : > { %801 = vrot.lane.b32.xlu1 %v7362_v32, %s7097_s28 }
 0x26f   : > { %v7459_v57 = vpop.permute.xlu1 %649 }
 0x271   : > { %831 = vrot.lane.b32.xlu1 %v7362_v32, %s7098_s29 }
 0x273   : > { %v7466_v60 = vpop.permute.xlu1 %679 }
 0x275   : > { %861 = vrot.lane.b32.xlu1 %v7362_v32, %s11351_s30  ;;  %s7145_s30 = smov 66  }
 0x277   : > { %v7473_v63 = vpop.permute.xlu1 %709 }
 0x279   : > { %891 = vrot.lane.b32.xlu1 %v7362_v32, %s7100_s8 }
 0x27b   : > { %v7478_v3 = vpop.permute.xlu1 %739 }
 0x27d   : > { %921 = vrot.lane.b32.xlu1 %v7362_v32, %s7101_s9 }
 0x27f   : > { %v7484_v6 = vpop.permute.xlu1 %769 }
 0x281   : > { %989 = vrot.lane.b32.xlu1 %v7362_v32, %s7093_s24 }
 0x283   : > { %v7491_v10 = vpop.permute.xlu1 %799 }
 0x285   : > { %1019 = vrot.lane.b32.xlu1 %v7362_v32, %s11327_s10  ;;  %s11584_s10 = smov 110  }
 0x287   : > { %v7496_v14 = vpop.permute.xlu1 %829 }
 0x289   : > { %1049 = vrot.lane.b32.xlu1 %v7362_v32, %s7103_s11 }
 0x28b   : > { %v7503_v17 = vpop.permute.xlu1 %859 }
 0x28d   : > { %1079 = vrot.lane.b32.xlu1 %v7362_v32, %s7104_s12 }
 0x28f   : > { %v7510_v20 = vpop.permute.xlu1 %889 }
 0x291   : > { %1109 = vrot.lane.b32.xlu1 %v7362_v32, %s7105_s13 }
 0x293   : > { %v7514_v22 = vpop.permute.xlu1 %919 }
 0x295   : > { %1139 = vrot.lane.b32.xlu1 %v7362_v32, %s11584_s10 }
 0x297   : > { %v7521_v24 = vpop.permute.xlu1 %957 }
 0x299   : > { %1169 = vrot.lane.b32.xlu1 %v7362_v32, %s7107_s15 }
 0x29b   : > { %v7528_v28 = vpop.permute.xlu1 %1017 }
 0x29d   : > { %1199 = vrot.lane.b32.xlu1 %v7362_v32, %s11345_s16  ;;  %s7125_s16 = smov 100  }
 0x29f   : > { %v7532_v30 = vpop.permute.xlu1 %1047 }
 0x2a1   : > { %1229 = vrot.lane.b32.xlu1 %v7362_v32, %s11425_s7 }
 0x2a3   : > { %v7538_v58 = vpop.permute.xlu1 %1077 }
 0x2a5   : > { %1259 = vrot.lane.b32.xlu1 %v7362_v32, %s11343_s26  ;;  %s7124_s26 = smov 102  }
 0x2a7   : > { %v7544_v2 = vpop.permute.xlu1 %1107 }
 0x2a8   : > { %11588 = vst [vmem:[#allocation23_spill] sm:$0xff] %v7544_v2 }
 0x2a9   : > { %1289 = vrot.lane.b32.xlu1 %v7362_v32, %s11423_s14 }
 0x2ab   : > { %v7548_v12 = vpop.permute.xlu1 %1137 }
 0x2ac   : > { %11589 = vst [vmem:[#allocation24_spill] sm:$0xff] %v7548_v12 }
 0x2af   : > { %v7552_v18 = vpop.permute.xlu1 %1167 }
 0x2b0   : > { %11591 = vst [vmem:[#allocation26_spill] sm:$0xff] %v7552_v18 }
 0x2b3   : > { %v7556_v25 = vpop.permute.xlu1 %1197 }
 0x2b4   : > { %11593 = vst [vmem:[#allocation28_spill] sm:$0xff] %v7556_v25  ;;  %v6187_v25 = vld [vmem:[%s11316_s1 + $0xa] sm:$0x3] }
 0x2b5   : > { %v752_v2 = vrot.slane %v6187_v25, %v7579_v47 }
 0x2b7   : > { %v7558_v8 = vpop.permute.xlu1 %1227 }
 0x2b8   : > { %11594 = vst [vmem:[#allocation29_spill] sm:$0xff] %v7558_v8  ;;  %v7614_v8 = vrot.slane %v6184_v1, %v7581_v51 }
 0x2ba   : > { %11605 = vst [vmem:[#allocation40_spill] sm:$0xff] %v7614_v8 }
 0x2bb   : > { %v7562_v50 = vpop.permute.xlu1 %1257 }
 0x2bc   : > { %11596 = vst [vmem:[#allocation31_spill] sm:$0xff] %v7562_v50 }
 0x2bf   : > { %v7566_v7 = vpop.permute.xlu1 %1287 }
 0x2c0   : > { %11598 = vst [vmem:[#allocation33_spill] sm:$0xff] %v7566_v7  ;;  %v632_v7 = vrot.slane %v6183_v31, %v7579_v47  ;;  %v696_v31 = vrot.slane %v6185_v21, %v7581_v51  ;;  %v7636_v21 = vrot.slane %v6186_v52, %v7581_v51 }
 0x2c2   : > { %11607 = vst [vmem:[#allocation42_spill] sm:$0xff] %v7636_v21 }
 0x2c3   : > { %v591_v5 = vpop.permute.xlu1 %590 }
 0x2c4   : > { %v595_v1 = vsel %vm594_vm4, %v7454_v54, %v591_v5 }
 0x2c7   : > { %v622_v0 = vpop.permute.xlu1 %621 }
 0x2c8   : > { %v624_v50 = vsel %vm11385_vm3, %v620_v26, %v622_v0  ;;  %v625_v16 = vsel %vm11385_vm3, %v622_v0, %v620_v26  ;;  %v6188_v0 = vld [vmem:[%s11316_s1 + $0xc] sm:$0x3]  ;;  %v596_v26 = vsel %vm594_vm4, %v591_v5, %v7454_v54  ;;  %v756_v54 = vrot.slane %v6187_v25, %v7581_v51 }
 0x2c9   : > { %v639_v62 = vmul.f32 %v632_v7, %v625_v16  ;;  %v640_v18 = vmul.f32 %v636_v23, %v624_v50  ;;  %v7649_v52 = vrot.slane %v6188_v0, %v7579_v47  ;;  %v6189_v7 = vld [vmem:[%s11316_s1 + $0xe] sm:$0x3]  ;;  %v609_v50 = vmul.f32 %v7592_v55, %v596_v26 }
 0x2ca   : > { %v610_v16 = vmul.f32 %v7595_v15, %v595_v1  ;;  %v7665_v5 = vrot.slane %v6188_v0, %v7581_v51  ;;  %v6190_v1 = vld [vmem:[%s11316_s1 + $0x10] sm:$0x3]  ;;  %v7674_v55 = vrot.slane %v6189_v7, %v7579_v47  ;;  %vm11388_vm3 = vcmp.lt.s32.totalorder %v7574_v61, 112 }
 0x2cb   : > { %v652_v29 = vpop.permute.xlu1 %651  ;;  %11608 = vst [vmem:[#allocation43_spill] sm:$0xff] %v7649_v52  ;;  %v645_v26 = vmul.f32 %v7378_v33, %v639_v62  ;;  %v646_v15 = vmul.f32 %v7378_v33, %v640_v18  ;;  %v617_v62 = vmul.f32 %v7418_v41, %v609_v50  ;;  %v7689_v18 = vrot.slane %v6190_v1, %v7579_v47 }
 0x2cc   : > { %v654_v59 = vsel %vm653_vm5, %v7459_v57, %v652_v29  ;;  %v655_v12 = vsel %vm653_vm5, %v652_v29, %v7459_v57  ;;  %11609 = vst [vmem:[#allocation44_spill] sm:$0xff] %v7665_v5  ;;  %11610 = vst [vmem:[#allocation45_spill] sm:$0xff] %v7674_v55  ;;  %v618_v33 = vmul.f32 %v7418_v41, %v610_v16 }
 0x2cd   : > { %v669_v23 = vmul.f32 %v7607_v19, %v655_v12  ;;  %v670_v25 = vmul.f32 %v7614_v8, %v654_v59  ;;  %11612 = vst [vmem:[#allocation47_spill] sm:$0xff] %v7689_v18  ;;  %v7702_v50 = vrot.slane %v6190_v1, %v7581_v51 }
 0x2cf   : > { %v682_v56 = vpop.permute.xlu1 %681  ;;  %11613 = vst [vmem:[#allocation48_spill] sm:$0xff] %v7702_v50 }
 0x2d0   : > { %v684_v29 = vsel %vm11384_vm6, %v7466_v60, %v682_v56  ;;  %v685_v57 = vsel %vm11384_vm6, %v682_v56, %v7466_v60  ;;  %v7677_v56 = vrot.slane %v6189_v7, %v7581_v51  ;;  %vm11387_vm6 = vcmp.lt.s32.totalorder %v7574_v61, 113 }
 0x2d1   : > { %v699_v60 = vmul.f32 %v692_v9, %v685_v57  ;;  %v700_v12 = vmul.f32 %v696_v31, %v684_v29  ;;  %v675_v9 = vmul.f32 %v7382_v34, %v669_v23  ;;  %v676_v31 = vmul.f32 %v7382_v34, %v670_v25  ;;  %v6191_v34 = vld [vmem:[%s11316_s1 + $0x12] sm:$0x3] }
 0x2d2   : > { %11611 = vst [vmem:[#allocation46_spill] sm:$0xff] %v7677_v56  ;;  %v647_v29 = vadd.f32 %v645_v26, %v617_v62  ;;  %v648_v57 = vadd.f32 %v646_v15, %v618_v33  ;;  %v7719_v26 = vpop.permute.xlu0 %1641 }
 0x2d3   : > { %v712_v13 = vpop.permute.xlu1 %711  ;;  %v705_v23 = vmul.f32 %v7388_v35, %v699_v60 }
 0x2d4   : > { %v714_v0 = vsel %vm713_vm7, %v7473_v63, %v712_v13  ;;  %v715_v8 = vsel %vm713_vm7, %v712_v13, %v7473_v63  ;;  %v677_v15 = vadd.f32 %v675_v9, %v647_v29  ;;  %v678_v60 = vadd.f32 %v676_v31, %v648_v57 }
 0x2d5   : > { %v729_v63 = vmul.f32 %v7621_v4, %v715_v8  ;;  %v730_v41 = vmul.f32 %v7636_v21, %v714_v0  ;;  %v6192_v0 = vld [vmem:[%s11316_s1 + $0x14] sm:$0x3]  ;;  %v8272_v21 = vld [vmem:[%s11316_s1 + $0x3c] sm:$0x3] }
 0x2d6   : > { %v7735_v31 = vrot.slane %v6192_v0, %v7579_v47 }
 0x2d7   : > { %v742_v11 = vpop.permute.xlu1 %741 }
 0x2d8   : > { %v744_v7 = vsel %vm11383_vm8, %v7478_v3, %v742_v11  ;;  %v745_v13 = vsel %vm11383_vm8, %v742_v11, %v7478_v3  ;;  %v706_v3 = vmul.f32 %v7388_v35, %v700_v12  ;;  %v872_v35 = vrot.slane %v6191_v34, %v7579_v47  ;;  %11614 = vst [vmem:[#allocation49_spill] sm:$0xff] %v7735_v31 }
 0x2d9   : > { %v759_v11 = vmul.f32 %v752_v2, %v745_v13  ;;  %v760_v8 = vmul.f32 %v756_v54, %v744_v7  ;;  %v876_v2 = vrot.slane %v6191_v34, %v7581_v51  ;;  %v735_v54 = vmul.f32 %v7392_v36, %v729_v63 }
 0x2da   : > { %v736_v12 = vmul.f32 %v7392_v36, %v730_v41  ;;  %v707_v7 = vadd.f32 %v705_v23, %v677_v15  ;;  %v708_v36 = vadd.f32 %v706_v3, %v678_v60  ;;  %v7748_v23 = vrot.slane %v6192_v0, %v7581_v51 }
 0x2db   : > { %v772_v53 = vpop.permute.xlu1 %771  ;;  %v765_v13 = vmul.f32 %v7398_v37, %v759_v11  ;;  %v766_v63 = vmul.f32 %v7398_v37, %v760_v8  ;;  %v7751_v37 = vpop.permute.xlu0 %1671  ;;  %vm11386_vm8 = vcmp.lt.s32.totalorder %v7574_v61, 114 }
 0x2dc   : > { %v774_v25 = vsel %vm773_vm9, %v7484_v6, %v772_v53  ;;  %v775_v1 = vsel %vm773_vm9, %v772_v53, %v7484_v6  ;;  %v737_v29 = vadd.f32 %v735_v54, %v707_v7  ;;  %v738_v57 = vadd.f32 %v736_v12, %v708_v36  ;;  %11615 = vst [vmem:[#allocation50_spill] sm:$0xff] %v7748_v23 }
 0x2dd   : > { %v789_v33 = vmul.f32 %v7649_v52, %v775_v1  ;;  %v790_v9 = vmul.f32 %v7665_v5, %v774_v25  ;;  %v7163_v52 = vmov 91  }
 0x2de   : > { %v767_v1 = vadd.f32 %v765_v13, %v737_v29  ;;  %v768_v0 = vadd.f32 %v766_v63, %v738_v57 }
 0x2df   : > { %v802_v59 = vpop.permute.xlu1 %801  ;;  %v795_v11 = vmul.f32 %v7402_v38, %v789_v33  ;;  %v796_v8 = vmul.f32 %v7402_v38, %v790_v9 }
 0x2e0   : > { %v804_v53 = vsel %vm803_vm10, %v7491_v10, %v802_v59  ;;  %v805_v6 = vsel %vm803_vm10, %v802_v59, %v7491_v10 }
 0x2e1   : > { %v819_v41 = vmul.f32 %v7674_v55, %v805_v6  ;;  %v820_v10 = vmul.f32 %v7677_v56, %v804_v53  ;;  %v797_v7 = vadd.f32 %v795_v11, %v767_v1  ;;  %v798_v36 = vadd.f32 %v796_v8, %v768_v0 }
 0x2e2   : > { %v7164_v55 = vmov 92  }
 0x2e3   : > { %v832_v16 = vpop.permute.xlu1 %831  ;;  %v825_v38 = vmul.f32 %v7408_v39, %v819_v41  ;;  %v826_v54 = vmul.f32 %v7408_v39, %v820_v10  ;;  %v988_v41 = vpop.permute.xlu0 %987 }
 0x2e4   : > { %v834_v59 = vsel %vm11439_vm11, %v7496_v14, %v832_v16  ;;  %v835_v34 = vsel %vm11439_vm11, %v832_v16, %v7496_v14  ;;  %v6193_v16 = vld [vmem:[%s11316_s1 + $0x16] sm:$0x3]  ;;  %vm1472_vm11 = vcmp.lt.s32.totalorder %v7574_v61, 92 }
 0x2e5   : > { %v849_v15 = vmul.f32 %v7689_v18, %v835_v34  ;;  %v850_v60 = vmul.f32 %v7702_v50, %v834_v59  ;;  %v7778_v33 = vrot.slane %v6193_v16, %v7581_v51  ;;  %v827_v10 = vadd.f32 %v825_v38, %v797_v7 }
 0x2e6   : > { %v828_v59 = vadd.f32 %v826_v54, %v798_v36  ;;  %v7162_v50 = vmov 89  }
 0x2e7   : > { %v862_v62 = vpop.permute.xlu1 %861  ;;  %11617 = vst [vmem:[#allocation52_spill] sm:$0xff] %v7778_v33 }
 0x2e8   : > { %v864_v25 = vsel %vm11382_vm12, %v7503_v17, %v862_v62  ;;  %v865_v14 = vsel %vm11382_vm12, %v862_v62, %v7503_v17  ;;  %v7775_v62 = vrot.slane %v6193_v16, %v7579_v47  ;;  %vm991_vm12 = vcmp.lt.s32.totalorder %v7574_v61, 126 }
 0x2e9   : > { %v879_v53 = vmul.f32 %v872_v35, %v865_v14  ;;  %v880_v6 = vmul.f32 %v876_v2, %v864_v25  ;;  %v856_v35 = vmul.f32 %v7412_v40, %v850_v60  ;;  %v960_v60 = vpop.permute.xlu0 %959 }
 0x2ea   : > { %11616 = vst [vmem:[#allocation51_spill] sm:$0xff] %v7775_v62 }
 0x2eb   : > { %v892_v3 = vpop.permute.xlu1 %891  ;;  %v885_v34 = vmul.f32 %v7420_v42, %v879_v53  ;;  %v886_v29 = vmul.f32 %v7420_v42, %v880_v6  ;;  %v858_v8 = vadd.f32 %v856_v35, %v828_v59 }
 0x2ec   : > { %v894_v12 = vsel %vm893_vm13, %v7510_v20, %v892_v3  ;;  %v895_v17 = vsel %vm893_vm13, %v892_v3, %v7510_v20  ;;  %v855_v20 = vmul.f32 %v7412_v40, %v849_v15  ;;  %v6194_v40 = vld [vmem:[%s11316_s1 + $0x18] sm:$0x3] }
 0x2ed   : > { %v909_v2 = vmul.f32 %v7735_v31, %v895_v17  ;;  %v910_v63 = vmul.f32 %v7748_v23, %v894_v12  ;;  %v888_v1 = vadd.f32 %v886_v29, %v858_v8  ;;  %v7803_v38 = vrot.slane %v6194_v40, %v7579_v47 }
 0x2ee   : > { %v857_v11 = vadd.f32 %v855_v20, %v827_v10  ;;  %v7806_v54 = vrot.slane %v6194_v40, %v7581_v51  ;;  %v963_v12 = vsel %vm11391_vm15, %v960_v60, %v7521_v24  ;;  %v954_v20 = vmul.f32 %v7440_v48, %v7362_v32  ;;  %v6197_v32 = vld [vmem:[%s11316_s1 + $0x1e] sm:$0x3] }
 0x2ef   : > { %v922_v9 = vpop.permute.xlu1 %921  ;;  %v915_v25 = vmul.f32 %v7426_v44, %v909_v2  ;;  %v916_v14 = vmul.f32 %v7426_v44, %v910_v63  ;;  %11618 = vst [vmem:[#allocation53_spill] sm:$0xff] %v7803_v38  ;;  %v962_v44 = vsel %vm11391_vm15, %v7521_v24, %v960_v60  ;;  %v953_v24 = vmul.f32 %v7440_v48, %v7346_v27  ;;  %v6198_v48 = vld [vmem:[%s11316_s1 + $0x20] sm:$0x3] }
 0x2f0   : > { %v924_v39 = vsel %vm11427_vm14, %v7514_v22, %v922_v9  ;;  %v925_v13 = vsel %vm11427_vm14, %v922_v9, %v7514_v22  ;;  %v887_v16 = vadd.f32 %v885_v34, %v857_v11  ;;  %11619 = vst [vmem:[#allocation54_spill] sm:$0xff] %v7806_v54  ;;  %v977_v36 = vmul.f32 %v7803_v38, %v962_v44 }
 0x2f1   : > { %v939_v57 = vmul.f32 %v7775_v62, %v925_v13  ;;  %v940_v3 = vmul.f32 %v7778_v33, %v924_v39  ;;  %v918_v53 = vadd.f32 %v916_v14, %v888_v1  ;;  %v978_v39 = vmul.f32 %v7806_v54, %v963_v12  ;;  %v6196_v13 = vld [vmem:[%s11316_s1 + $0x1c] sm:$0x3] }
 0x2f2   : > { %v917_v17 = vadd.f32 %v915_v25, %v887_v16  ;;  %v1030_v27 = vrot.slane %v6196_v13, %v7579_v47  ;;  %v7858_v25 = vrot.slane %v6197_v32, %v7579_v47  ;;  %v7865_v14 = vrot.slane %v6198_v48, %v7579_v47  ;;  %v6199_v16 = vld [vmem:[%s11316_s1 + $0x22] sm:$0x3] }
 0x2f3   : > { %v990_v22 = vpop.permute.xlu1 %989  ;;  %v945_v42 = vmul.f32 %v7434_v46, %v939_v57  ;;  %v946_v0 = vmul.f32 %v7434_v46, %v940_v3  ;;  %v6195_v46 = vld [vmem:[%s11316_s1 + $0x1a] sm:$0x3]  ;;  %v983_v57 = vmul.f32 %v7424_v43, %v977_v36  ;;  %v984_v3 = vmul.f32 %v7424_v43, %v978_v39 }
 0x2f4   : > { %v7828_v35 = vrot.slane %v6195_v46, %v7579_v47  ;;  %v7831_v2 = vrot.slane %v6195_v46, %v7581_v51  ;;  %v992_v63 = vsel %vm991_vm12, %v988_v41, %v990_v22  ;;  %v993_v10 = vsel %vm991_vm12, %v990_v22, %v988_v41  ;;  %11622 = vst [vmem:[#allocation57_spill] sm:$0xff] %v7858_v25 }
 0x2f5   : > { %v947_v6 = vadd.f32 %v945_v42, %v917_v17  ;;  %v948_v9 = vadd.f32 %v946_v0, %v918_v53  ;;  %v1034_v41 = vrot.slane %v6196_v13, %v7581_v51  ;;  %v7861_v43 = vrot.slane %v6197_v32, %v7581_v51  ;;  %11624 = vst [vmem:[#allocation59_spill] sm:$0xff] %v7865_v14  ;;  %v6200_v17 = vld [vmem:[%s11316_s1 + $0x24] sm:$0x3] }
 0x2f6   : > { %11620 = vst [vmem:[#allocation55_spill] sm:$0xff] %v7828_v35  ;;  %11621 = vst [vmem:[#allocation56_spill] sm:$0xff] %v7831_v2  ;;  %v1007_v22 = vmul.f32 %v7828_v35, %v992_v63  ;;  %v1008_v40 = vmul.f32 %v7831_v2, %v993_v10  ;;  %v7877_v12 = vrot.slane %v6198_v48, %v7581_v51  ;;  %v6201_v63 = vld [vmem:[%s11316_s1 + $0x26] sm:$0x3]  ;;  %vm11422_vm15 = vcmp.lt.s32.totalorder %v7574_v61, 95 }
 0x2f7   : > { %v1020_v15 = vpop.permute.xlu1 %1019  ;;  %v955_v59 = vadd.f32 %v953_v24, %v947_v6  ;;  %v956_v34 = vadd.f32 %v954_v20, %v948_v9  ;;  %11623 = vst [vmem:[#allocation58_spill] sm:$0xff] %v7861_v43  ;;  %v7886_v6 = vrot.slane %v6199_v16, %v7579_v47  ;;  %v1150_v24 = vrot.slane %v6200_v17, %v7579_v47  ;;  %v8243_v2 = vld [vmem:[%s11316_s1 + $0x38] sm:$0x3] }
 0x2f8   : > { %v1022_v11 = vsel %vm11386_vm8, %v7528_v28, %v1020_v15  ;;  %v1023_v8 = vsel %vm11386_vm8, %v1020_v15, %v7528_v28  ;;  %11625 = vst [vmem:[#allocation60_spill] sm:$0xff] %v7877_v12  ;;  %vm11389_vm8 = vcmp.lt.s32.totalorder %v7574_v61, 111  ;;  %v1013_v53 = vmul.f32 %v7432_v45, %v1007_v22 }
 0x2f9   : > { %v985_v1 = vadd.f32 %v983_v57, %v955_v59  ;;  %v986_v42 = vadd.f32 %v984_v3, %v956_v34  ;;  %v1037_v60 = vmul.f32 %v1030_v27, %v1022_v11  ;;  %v1038_v44 = vmul.f32 %v1034_v41, %v1023_v8  ;;  %11626 = vst [vmem:[#allocation61_spill] sm:$0xff] %v7886_v6  ;;  %v11628_v34 = vld [vmem:[#allocation23_spill] sm:$0xff]  ;;  %v11629_v57 = vld [vmem:[#allocation12_spill] sm:$0xff] }
 0x2fa   : > { %v1014_v46 = vmul.f32 %v7432_v45, %v1008_v40  ;;  %v7922_v22 = vrot.slane %v6201_v63, %v7579_v47  ;;  %v7925_v40 = vrot.slane %v6201_v63, %v7581_v51  ;;  %v7161_v38 = vmov 88  }
 0x2fb   : > { %v1050_v7 = vpop.permute.xlu1 %1049  ;;  %v1015_v13 = vadd.f32 %v1013_v53, %v985_v1  ;;  %v1043_v10 = vmul.f32 %v7444_v49, %v1037_v60  ;;  %v1044_v59 = vmul.f32 %v7444_v49, %v1038_v44  ;;  %v6202_v49 = vld [vmem:[%s11316_s1 + $0x28] sm:$0x3]  ;;  %v11633_v44 = vld [vmem:[#allocation13_spill] sm:$0xff]  ;;  %vm1327_vm14 = vcmp.lt.s32.totalorder %v7574_v61, 102 }
 0x2fc   : > { %v1052_v28 = vsel %vm11387_vm6, %v7532_v30, %v1050_v7  ;;  %v1053_v0 = vsel %vm11387_vm6, %v1050_v7, %v7532_v30  ;;  %v7889_v30 = vrot.slane %v6199_v16, %v7581_v51  ;;  %v1016_v45 = vadd.f32 %v1014_v46, %v986_v42  ;;  %11630 = vst [vmem:[#allocation23_spill] sm:$0xff] %v7922_v22  ;;  %v11632_v16 = vld [vmem:[#allocation24_spill] sm:$0xff]  ;;  %v11634_v46 = vld [vmem:[#allocation26_spill] sm:$0xff] }
 0x2fd   : > { %v1067_v9 = vmul.f32 %v7858_v25, %v1052_v28  ;;  %v1068_v7 = vmul.f32 %v7861_v43, %v1053_v0  ;;  %vm11390_vm6 = vcmp.lt.s32.totalorder %v7574_v61, 110  ;;  %11631 = vst [vmem:[#allocation12_spill] sm:$0xff] %v7925_v40  ;;  %v1045_v0 = vadd.f32 %v1043_v10, %v1015_v13  ;;  %v11635_v10 = vld [vmem:[#allocation14_spill] sm:$0xff] }
 0x2fe   : > { %11627 = vst [vmem:[#allocation62_spill] sm:$0xff] %v7889_v30  ;;  %v1210_v60 = vrot.slane %v6202_v49, %v7579_v47  ;;  %v1214_v13 = vrot.slane %v6202_v49, %v7581_v51 }
 0x2ff   : > { %v1080_v29 = vpop.permute.xlu1 %1079  ;;  %v1073_v3 = vmul.f32 %v11629_v57, %v1067_v9  ;;  %v1074_v41 = vmul.f32 %v11629_v57, %v1068_v7 }
 0x300   : > { %v1082_v36 = vsel %vm11388_vm3, %v7538_v58, %v1080_v29  ;;  %v1083_v39 = vsel %vm11388_vm3, %v1080_v29, %v7538_v58  ;;  %v1154_v29 = vrot.slane %v6200_v17, %v7581_v51  ;;  %vm11453_vm3 = vcmp.lt.s32.totalorder %v7574_v61, 98 }
 0x301   : > { %v1097_v32 = vmul.f32 %v7865_v14, %v1082_v36  ;;  %v1098_v48 = vmul.f32 %v7877_v12, %v1083_v39 }
 0x303   : > { %v1110_v15 = vpop.permute.xlu1 %1109  ;;  %v1103_v17 = vmul.f32 %v11633_v44, %v1097_v32  ;;  %v1104_v53 = vmul.f32 %v11633_v44, %v1098_v48  ;;  %v11636_v32 = vld [vmem:[#allocation28_spill] sm:$0xff] }
 0x304   : > { %v1112_v27 = vsel %vm11389_vm8, %v11628_v34, %v1110_v15  ;;  %v1113_v58 = vsel %vm11389_vm8, %v1110_v15, %v11628_v34  ;;  %v1046_v15 = vadd.f32 %v1044_v59, %v1016_v45  ;;  %vm11392_vm8 = vcmp.lt.s32.totalorder %v7574_v61, 97  ;;  %v6203_v45 = vld [vmem:[%s11316_s1 + $0x2a] sm:$0x3] }
 0x305   : > { %v1127_v11 = vmul.f32 %v7886_v6, %v1112_v27  ;;  %v1128_v8 = vmul.f32 %v7889_v30, %v1113_v58 }
 0x306   : > { %v1076_v63 = vadd.f32 %v1074_v41, %v1046_v15  ;;  %v7964_v41 = vrot.slane %v6203_v45, %v7581_v51 }
 0x307   : > { %v1140_v20 = vpop.permute.xlu1 %1139  ;;  %v1133_v59 = vmul.f32 %v11635_v10, %v1127_v11  ;;  %v1134_v34 = vmul.f32 %v11635_v10, %v1128_v8  ;;  %v11639_v11 = vld [vmem:[#allocation15_spill] sm:$0xff] }
 0x308   : > { %v1142_v1 = vsel %vm11390_vm6, %v11632_v16, %v1140_v20  ;;  %v1143_v42 = vsel %vm11390_vm6, %v1140_v20, %v11632_v16  ;;  %vm11454_vm6 = vcmp.lt.s32.totalorder %v7574_v61, 96  ;;  %v1075_v20 = vadd.f32 %v1073_v3, %v1045_v0  ;;  %11638 = vst [vmem:[#allocation13_spill] sm:$0xff] %v7964_v41 }
 0x309   : > { %v1157_v36 = vmul.f32 %v1150_v24, %v1142_v1  ;;  %v1158_v39 = vmul.f32 %v1154_v29, %v1143_v42  ;;  %v1106_v57 = vadd.f32 %v1104_v53, %v1076_v63  ;;  %v7961_v3 = vrot.slane %v6203_v45, %v7579_v47  ;;  %v6204_v1 = vld [vmem:[%s11316_s1 + $0x2c] sm:$0x3] }
 0x30a   : > { %v1105_v49 = vadd.f32 %v1103_v17, %v1075_v20  ;;  %v11640_v17 = vld [vmem:[#allocation16_spill] sm:$0xff]  ;;  %v1270_v45 = vrot.slane %v6204_v1, %v7579_v47  ;;  %v1274_v20 = vrot.slane %v6204_v1, %v7581_v51 }
 0x30b   : > { %v1170_v28 = vpop.permute.xlu1 %1169  ;;  %11637 = vst [vmem:[#allocation24_spill] sm:$0xff] %v7961_v3  ;;  %v1163_v8 = vmul.f32 %v11639_v11, %v1157_v36  ;;  %v1164_v16 = vmul.f32 %v11639_v11, %v1158_v39  ;;  %v6205_v39 = vld [vmem:[%s11316_s1 + $0x2e] sm:$0x3] }
 0x30c   : > { %v1172_v9 = vsel %vm11453_vm3, %v11634_v46, %v1170_v28  ;;  %v1173_v7 = vsel %vm11453_vm3, %v1170_v28, %v11634_v46  ;;  %v1135_v42 = vadd.f32 %v1133_v59, %v1105_v49  ;;  %v1136_v28 = vadd.f32 %v1134_v34, %v1106_v57  ;;  %v11642_v59 = vld [vmem:[#allocation17_spill] sm:$0xff]  ;;  %v11645_v49 = vld [vmem:[#allocation31_spill] sm:$0xff] }
 0x30d   : > { %v1187_v58 = vmul.f32 %v7922_v22, %v1172_v9  ;;  %v1188_v24 = vmul.f32 %v7925_v40, %v1173_v7  ;;  %v11641_v9 = vld [vmem:[#allocation29_spill] sm:$0xff]  ;;  %v6206_v22 = vld [vmem:[%s11316_s1 + $0x30] sm:$0x3] }
 0x30e   : > { %v1165_v63 = vadd.f32 %v1163_v8, %v1135_v42  ;;  %v1166_v10 = vadd.f32 %v1164_v16, %v1136_v28  ;;  %v11646_v8 = vld [vmem:[#allocation18_spill] sm:$0xff] }
 0x30f   : > { %v1200_v27 = vpop.permute.xlu1 %1199  ;;  %v1193_v53 = vmul.f32 %v11640_v17, %v1187_v58  ;;  %v1194_v46 = vmul.f32 %v11640_v17, %v1188_v24  ;;  %v7991_v24 = vrot.slane %v6205_v39, %v7579_v47 }
 0x310   : > { %v1202_v48 = vsel %vm11392_vm8, %v11636_v32, %v1200_v27  ;;  %v1203_v29 = vsel %vm11392_vm8, %v1200_v27, %v11636_v32  ;;  %vm1291_vm8 = vcmp.lt.s32.totalorder %v7574_v61, 94  ;;  %v7994_v32 = vrot.slane %v6205_v39, %v7581_v51 }
 0x311   : > { %v1217_v0 = vmul.f32 %v1210_v60, %v1202_v48  ;;  %v1218_v15 = vmul.f32 %v1214_v13, %v1203_v29  ;;  %11643 = vst [vmem:[#allocation26_spill] sm:$0xff] %v7991_v24  ;;  %v1195_v48 = vadd.f32 %v1193_v53, %v1165_v63  ;;  %v1196_v29 = vadd.f32 %v1194_v46, %v1166_v10  ;;  %v11649_v10 = vld [vmem:[#allocation20_spill] sm:$0xff] }
 0x312   : > { %11644 = vst [vmem:[#allocation14_spill] sm:$0xff] %v7994_v32 }
 0x313   : > { %v1230_v44 = vpop.permute.xlu1 %1229  ;;  %v1223_v34 = vmul.f32 %v11642_v59, %v1217_v0  ;;  %v1224_v27 = vmul.f32 %v11642_v59, %v1218_v15 }
 0x314   : > { %v1232_v7 = vsel %vm11454_vm6, %v11641_v9, %v1230_v44  ;;  %v1233_v36 = vsel %vm11454_vm6, %v1230_v44, %v11641_v9  ;;  %v11647_v44 = vld [vmem:[#allocation19_spill] sm:$0xff]  ;;  %v11648_v9 = vld [vmem:[#allocation33_spill] sm:$0xff] }
 0x315   : > { %v1247_v60 = vmul.f32 %v7961_v3, %v1232_v7  ;;  %v1248_v13 = vmul.f32 %v7964_v41, %v1233_v36  ;;  %v1225_v0 = vadd.f32 %v1223_v34, %v1195_v48  ;;  %v1226_v15 = vadd.f32 %v1224_v27, %v1196_v29  ;;  %v11650_v48 = vld [vmem:[#allocation21_spill] sm:$0xff] }
 0x316   : > { %v7167_v3 = vmov 97  }
 0x317   : > { %v1260_v58 = vpop.permute.xlu1 %1259  ;;  %v1253_v16 = vmul.f32 %v11646_v8, %v1247_v60  ;;  %v1254_v1 = vmul.f32 %v11646_v8, %v1248_v13  ;;  %v7127_v8 = vmov 73  }
 0x318   : > { %v1262_v57 = vsel %vm11422_vm15, %v11645_v49, %v1260_v58  ;;  %v1263_v11 = vsel %vm11422_vm15, %v1260_v58, %v11645_v49  ;;  %vm1355_vm15 = vcmp.lt.s32.totalorder %v7574_v61, 100 }
 0x319   : > { %v1277_v42 = vmul.f32 %v1270_v45, %v1262_v57  ;;  %v1278_v28 = vmul.f32 %v1274_v20, %v1263_v11  ;;  %v1255_v39 = vadd.f32 %v1253_v16, %v1225_v0  ;;  %v1256_v60 = vadd.f32 %v1254_v1, %v1226_v15  ;;  %v8028_v57 = vld [vmem:[%s11318_s3] sm:$0xff] }
 0x31a   : > { %v7126_v11 = vmov 76   ;;  %v7128_v16 = vmov 79   ;;  %v7129_v1 = vmov 74   ;;  %v7132_v0 = vmov 78  }
 0x31b   : > { %v1283_v17 = vmul.f32 %v11647_v44, %v1277_v42  ;;  %v1284_v53 = vmul.f32 %v11647_v44, %v1278_v28  ;;  %v1290_v46 = vpop.permute.xlu1 %1289  ;;  %v7130_v42 = vmov 80   ;;  %v7131_v28 = vmov 77  }
 0x31c   : > { %v1292_v7 = vsel %vm1291_vm8, %v11648_v9, %v1290_v46  ;;  %v1293_v36 = vsel %vm1291_vm8, %v1290_v46, %v11648_v9  ;;  %v7133_v15 = vmov 81   ;;  %v7135_v44 = vmov 84  }
 0x31d   : > { %v1307_v13 = vmul.f32 %v7991_v24, %v1292_v7  ;;  %v1308_v45 = vmul.f32 %v7994_v32, %v1293_v36  ;;  %v1285_v20 = vadd.f32 %v1283_v17, %v1255_v39  ;;  %v1286_v63 = vadd.f32 %v1284_v53, %v1256_v60 }
 0x31e   : > { %v7136_v17 = vmov 87   ;;  %v7138_v53 = vmov 90   ;;  %v7140_v46 = vmov 93   ;;  %v7141_v9 = vmov 96  }
 0x31f   : > { %v1313_v59 = vmul.f32 %v11649_v10, %v1307_v13  ;;  %v1314_v34 = vmul.f32 %v11649_v10, %v1308_v45  ;;  %v7144_v7 = vmov 82   ;;  %v6998_v10 = vld [vmem:[%s11317_s2] sm:$0xff]  ;;  %v7165_v24 = vmov 94  }
 0x321   : > { %v1315_v27 = vadd.f32 %v1313_v59, %v1285_v20  ;;  %v1316_v58 = vadd.f32 %v1314_v34, %v1286_v63  ;;  %v11393_v63 = vmov 10  }
 0x323   : > { %v8017_v29 = vadd.f32 %v11650_v48, %v1315_v27  ;;  %v8020_v49 = vadd.f32 %v11650_v48, %v1316_v58 }
 0x325   : > { %11651 = vst [vmem:[#allocation28_spill] sm:$0xff] %v8017_v29  ;;  %11652 = vst [vmem:[#allocation15_spill] sm:$0xff] %v8020_v49  ;;  %1323 = vrot.lane.b32.xlu0 %v8017_v29, %s7124_s26  ;;  %1325 = vrot.lane.b32.xlu1 %v8020_v49, %s7124_s26  ;;  %s7139_s26 = smov 90  }
 0x329   : > { %1351 = vrot.lane.b32.xlu0 %v8017_v29, %s7125_s16  ;;  %1999 = vperm.xlu1 %6844, %v8028_v57  }
 0x32d   : > { %1959 = vperm.xlu0 %6841, %v8028_v57   ;;  %6845 = vset.pattern.permute.xlu1 %v7126_v11 }
 0x32e   : > { %2029 = vperm.xlu1 %6845, %v8028_v57  }
 0x331   : > { %6842 = vset.pattern.permute.xlu0 %v7127_v8 }
 0x332   : > { %1975 = vperm.xlu0 %6842, %v8028_v57   ;;  %6848 = vset.pattern.permute.xlu1 %v7128_v16 }
 0x333   : > { %2105 = vperm.xlu1 %6848, %v8028_v57  }
 0x336   : > { %6843 = vset.pattern.permute.xlu0 %v7129_v1 }
 0x337   : > { %1983 = vperm.xlu0 %6843, %v8028_v57   ;;  %6849 = vset.pattern.permute.xlu1 %v7130_v42 }
 0x338   : > { %2115 = vperm.xlu1 %6849, %v8028_v57  }
 0x33b   : > { %6846 = vset.pattern.permute.xlu0 %v7131_v28 }
 0x33c   : > { %2059 = vperm.xlu0 %6846, %v8028_v57   ;;  %1353 = vrot.lane.b32.xlu1 %v8020_v49, %s7125_s16  ;;  %s7142_s16 = smov 70  }
 0x33d   : > { %6851 = vset.pattern.permute.xlu1 %v7144_v7 }
 0x340   : > { %6847 = vset.pattern.permute.xlu0 %v7132_v0  ;;  %1381 = vrot.lane.b32.xlu1 %v8017_v29, %s7107_s15 }
 0x341   : > { %2082 = vperm.xlu0 %6847, %v8028_v57  }
 0x344   : > { %1383 = vrot.lane.b32.xlu1 %v8020_v49, %s7107_s15 }
 0x345   : > { %1992 = vrot.lane.b32.xlu0 %v8020_v49, %s7093_s24 }
 0x346   : > { %6850 = vset.pattern.permute.xlu0 %v7133_v15 }
 0x348   : > { %1410 = vrot.lane.b32.xlu1 %v8017_v29, %s11425_s7 }
 0x349   : > { %2006 = vrot.lane.b32.xlu0 %v8017_v29, %s7134_s17 }
 0x34c   : > { %1412 = vrot.lane.b32.xlu1 %v8020_v49, %s11425_s7 }
 0x34d   : > { %2125 = vperm.xlu0 %6850, %v8028_v57  }
 0x350   : > { %1439 = vrot.lane.b32.xlu1 %v8017_v29, %s11423_s14 }
 0x351   : > { %6853 = vset.pattern.permute.xlu0 %v7135_v44 }
 0x352   : > { %2181 = vperm.xlu0 %6853, %v8028_v57  }
 0x354   : > { %1441 = vrot.lane.b32.xlu1 %v8020_v49, %s11423_s14 }
 0x356   : > { %6856 = vset.pattern.permute.xlu0 %v7136_v17 }
 0x357   : > { %2250 = vperm.xlu0 %6856, %v8028_v57  }
 0x358   : > { %1468 = vrot.lane.b32.xlu1 %v8017_v29, %s7137_s20 }
 0x35b   : > { %6859 = vset.pattern.permute.xlu0 %v7138_v53  ;;  %v8157_v53 = vpop.permute.xlu0 %1701 }
 0x35c   : > { %1470 = vrot.lane.b32.xlu1 %v8020_v49, %s7137_s20  ;;  %2319 = vperm.xlu0 %6859, %v8028_v57   ;;  %s7146_s20 = smov 64  }
 0x360   : > { %1498 = vrot.lane.b32.xlu1 %v8017_v29, %s7139_s26  ;;  %6862 = vset.pattern.permute.xlu0 %v7140_v46 }
 0x361   : > { %2388 = vperm.xlu0 %6862, %v8028_v57  }
 0x364   : > { %1500 = vrot.lane.b32.xlu1 %v8020_v49, %s7139_s26  ;;  %s7147_s26 = smov 62  }
 0x365   : > { %6865 = vset.pattern.permute.xlu0 %v7141_v9  ;;  %v7157_v9 = vmov 83  }
 0x366   : > { %2457 = vperm.xlu0 %6865, %v8028_v57  }
 0x368   : > { %1528 = vrot.lane.b32.xlu1 %v8017_v29, %s7142_s16 }
 0x36a   : > { %6868 = vset.pattern.permute.xlu0 %v11393_v63  ;;  %v7158_v63 = vmov 85  }
 0x36b   : > { %2511 = vperm.xlu0 %6868, %v6998_v10   ;;  %v8164_v10 = vpop.permute.xlu0 %1731 }
 0x36c   : > { %1530 = vrot.lane.b32.xlu1 %v8020_v49, %s7142_s16  ;;  %s7148_s16 = smov 60  }
 0x36f   : > { %v8171_v6 = vpop.permute.xlu0 %1761 }
 0x370   : > { %1558 = vrot.lane.b32.xlu1 %v8017_v29, %s7143_s25 }
 0x373   : > { %v8178_v14 = vpop.permute.xlu0 %1791 }
 0x374   : > { %1560 = vrot.lane.b32.xlu1 %v8020_v49, %s7143_s25  ;;  %s7149_s25 = smov 58   ;;  %11657 = vst [vmem:[#allocation18_spill] sm:$0xff] %v8178_v14 }
 0x377   : > { %v8183_v25 = vpop.permute.xlu0 %1807 }
 0x378   : > { %1588 = vrot.lane.b32.xlu1 %v8017_v29, %s7145_s30  ;;  %11658 = vst [vmem:[#allocation19_spill] sm:$0xff] %v8183_v25  ;;  %v11445_v25 = vmov 11  }
 0x37b   : > { %v8191_v62 = vpop.permute.xlu0 %1823 }
 0x37c   : > { %1590 = vrot.lane.b32.xlu1 %v8020_v49, %s7145_s30  ;;  %s7150_s30 = smov 38   ;;  %11659 = vst [vmem:[#allocation33_spill] sm:$0xff] %v8191_v62 }
 0x380   : > { %1618 = vrot.lane.b32.xlu1 %v8017_v29, %s7146_s20 }
 0x384   : > { %1620 = vrot.lane.b32.xlu1 %v8020_v49, %s7146_s20  ;;  %s7151_s20 = smov 36  }
 0x388   : > { %1648 = vrot.lane.b32.xlu1 %v8017_v29, %s7147_s26 }
 0x38c   : > { %1650 = vrot.lane.b32.xlu1 %v8020_v49, %s7147_s26  ;;  %s7156_s26 = smov 4  }
 0x390   : > { %1678 = vrot.lane.b32.xlu1 %v8017_v29, %s7148_s16 }
 0x394   : > { %1680 = vrot.lane.b32.xlu1 %v8020_v49, %s7148_s16  ;;  %s7159_s16 = smov 122  }
 0x397   : > { %v8080_v36 = vpop.permute.xlu1 %1325 }
 0x398   : > { %1708 = vrot.lane.b32.xlu1 %v8017_v29, %s7149_s25 }
 0x39c   : > { %1710 = vrot.lane.b32.xlu1 %v8020_v49, %s7149_s25  ;;  %s7153_s25 = smov 28  }
 0x3a0   : > { %1738 = vrot.lane.b32.xlu1 %v8017_v29, %s7150_s30 }
 0x3a4   : > { %1740 = vrot.lane.b32.xlu1 %v8020_v49, %s7150_s30  ;;  %v8084_v39 = vpop.permute.xlu1 %1999  ;;  %s7154_s30 = smov 26  }
 0x3a5   : > { %11653 = vst [vmem:[#allocation16_spill] sm:$0xff] %v8084_v39  ;;  %v7168_v39 = vmov 98  }
 0x3a8   : > { %1768 = vrot.lane.b32.xlu1 %v8017_v29, %s7151_s20 }
 0x3a9   : > { %v8087_v60 = vpop.permute.xlu1 %2029 }
 0x3aa   : > { %11654 = vst [vmem:[#allocation29_spill] sm:$0xff] %v8087_v60  ;;  %v6208_v60 = vld [vmem:[%s11316_s1 + $0x34] sm:$0x3] }
 0x3ac   : > { %1770 = vrot.lane.b32.xlu1 %v8020_v49, %s7151_s20  ;;  %s7155_s20 = smov 6  }
 0x3ae   : > { %v8090_v13 = vpop.permute.xlu1 %2105 }
 0x3af   : > { %11655 = vst [vmem:[#allocation17_spill] sm:$0xff] %v8090_v13 }
 0x3b0   : > { %1798 = vrot.lane.b32.xlu1 %v8017_v29, %s7088_s18 }
 0x3b3   : > { %v8094_v45 = vpop.permute.xlu1 %2115 }
 0x3b4   : > { %11656 = vst [vmem:[#allocation31_spill] sm:$0xff] %v8094_v45  ;;  %1800 = vrot.lane.b32.xlu1 %v8020_v49, %s7088_s18 }
 0x3b7   : > { %v8098_v20 = vpop.permute.xlu1 %1353 }
 0x3b8   : > { %1814 = vrot.lane.b32.xlu1 %v8017_v29, %s7089_s19 }
 0x3bb   : > { %v8106_v59 = vpop.permute.xlu1 %1381 }
 0x3bc   : > { %1816 = vrot.lane.b32.xlu1 %v8020_v49, %s7089_s19 }
 0x3bf   : > { %v8110_v34 = vpop.permute.xlu1 %1383 }
 0x3c0   : > { %1830 = vrot.lane.b32.xlu1 %v8017_v29, %s7092_s23 }
 0x3c3   : > { %v8114_v27 = vpop.permute.xlu1 %1410 }
 0x3c4   : > { %1832 = vrot.lane.b32.xlu1 %v8020_v49, %s7092_s23 }
 0x3c7   : > { %v8118_v58 = vpop.permute.xlu1 %1412 }
 0x3c8   : > { %1846 = vrot.lane.b32.xlu1 %v8017_v29, %s7153_s25 }
 0x3cb   : > { %v8121_v48 = vpop.permute.xlu1 %1439 }
 0x3cc   : > { %1848 = vrot.lane.b32.xlu1 %v8020_v49, %s7153_s25  ;;  %s11937_s25 = smov 31  }
 0x3cf   : > { %v8124_v11 = vpop.permute.xlu1 %1441 }
 0x3d0   : > { %1876 = vrot.lane.b32.xlu1 %v8017_v29, %s7154_s30 }
 0x3d3   : > { %v8127_v8 = vpop.permute.xlu1 %1468 }
 0x3d4   : > { %1878 = vrot.lane.b32.xlu1 %v8020_v49, %s7154_s30  ;;  %s11754_s30 = smov 127  }
 0x3d7   : > { %v8130_v16 = vpop.permute.xlu1 %1470 }
 0x3d8   : > { %1906 = vrot.lane.b32.xlu1 %v8017_v29, %s7155_s20 }
 0x3db   : > { %v8133_v1 = vpop.permute.xlu1 %1498 }
 0x3dc   : > { %1908 = vrot.lane.b32.xlu1 %v8020_v49, %s7155_s20 }
 0x3df   : > { %v8136_v42 = vpop.permute.xlu1 %1500 }
 0x3e0   : > { %1936 = vrot.lane.b32.xlu1 %v8017_v29, %s7156_s26 }
 0x3e3   : > { %v8139_v28 = vpop.permute.xlu1 %1528 }
 0x3e4   : > { %1938 = vrot.lane.b32.xlu1 %v8020_v49, %s7156_s26  ;;  %s11989_s26 = smov 18  }
 0x3e7   : > { %v8142_v0 = vpop.permute.xlu1 %1530 }
 0x3e8   : > { %1966 = vrot.lane.b32.xlu1 %v8017_v29, %s7100_s8 }
 0x3eb   : > { %v8146_v15 = vpop.permute.xlu1 %1558 }
 0x3ec   : > { %1968 = vrot.lane.b32.xlu1 %v8020_v49, %s7100_s8 }
 0x3ef   : > { %v8150_v44 = vpop.permute.xlu1 %1560 }
 0x3f0   : > { %1990 = vrot.lane.b32.xlu1 %v8017_v29, %s7093_s24 }
 0x3f3   : > { %v8154_v17 = vpop.permute.xlu1 %1588 }
 0x3f4   : > { %2135 = vperm.xlu1 %6851, %v8028_v57  }
 0x3f7   : > { %v8159_v46 = vpop.permute.xlu1 %1590 }
 0x3f8   : > { %6852 = vset.pattern.permute.xlu1 %v7157_v9 }
 0x3f9   : > { %2158 = vperm.xlu1 %6852, %v8028_v57  }
 0x3fb   : > { %v8162_v7 = vpop.permute.xlu1 %1618 }
 0x3fd   : > { %2008 = vrot.lane.b32.xlu1 %v8020_v49, %s7134_s17 }
 0x3fe   : > { %6854 = vset.pattern.permute.xlu1 %v7158_v63  ;;  %v7160_v63 = vmov 86  }
 0x3ff   : > { %v8168_v30 = vpop.permute.xlu1 %1620 }
 0x401   : > { %2036 = vrot.lane.b32.xlu1 %v8017_v29, %s7159_s16  ;;  %v1340_v29 = vrot.slane %v6206_v22, %v7581_v51 }
 0x403   : > { %v8173_v12 = vpop.permute.xlu1 %1648 }
 0x405   : > { %2038 = vrot.lane.b32.xlu1 %v8020_v49, %s7159_s16  ;;  %v1336_v49 = vrot.slane %v6206_v22, %v7579_v47  ;;  %v8254_v22 = vld [vmem:[%s11316_s1 + $0x3a] sm:$0x3]  ;;  %s11848_s16 = smov 33  }
 0x407   : > { %v8176_v9 = vpop.permute.xlu1 %1650 }
 0x409   : > { %2204 = vperm.xlu1 %6854, %v8028_v57  }
 0x40b   : > { %v8181_v43 = vpop.permute.xlu1 %1678 }
 0x40d   : > { %6855 = vset.pattern.permute.xlu1 %v7160_v63  ;;  %v8196_v63 = vpop.permute.xlu0 %1839 }
 0x40e   : > { %2227 = vperm.xlu1 %6855, %v8028_v57   ;;  %11660 = vst [vmem:[#allocation20_spill] sm:$0xff] %v8196_v63 }
 0x40f   : > { %v8186_v54 = vpop.permute.xlu1 %1680 }
 0x411   : > { %v8203_v56 = vpop.permute.xlu0 %1869 }
 0x412   : > { %6857 = vset.pattern.permute.xlu1 %v7161_v38  ;;  %11661 = vst [vmem:[#allocation21_spill] sm:$0xff] %v8203_v56 }
 0x413   : > { %2273 = vperm.xlu1 %6857, %v8028_v57   ;;  %v8189_v33 = vpop.permute.xlu1 %1708 }
 0x415   : > { %v8208_v32 = vpop.permute.xlu0 %1899 }
 0x416   : > { %11662 = vst [vmem:[#allocation63_spill] sm:$0xff] %v8208_v32 }
 0x417   : > { %6858 = vset.pattern.permute.xlu1 %v7162_v50  ;;  %v8193_v18 = vpop.permute.xlu1 %1710 }
 0x418   : > { %2296 = vperm.xlu1 %6858, %v8028_v57  }
 0x419   : > { %v8215_v41 = vpop.permute.xlu0 %1929 }
 0x41a   : > { %11663 = vst [vmem:[#allocation64_spill] sm:$0xff] %v8215_v41  ;;  %v1397_v41 = vrot.slane %v6208_v60, %v7581_v51 }
 0x41b   : > { %v8198_v5 = vpop.permute.xlu1 %1738 }
 0x41c   : > { %6860 = vset.pattern.permute.xlu1 %v7163_v52  ;;  %v7166_v52 = vmov 95  }
 0x41d   : > { %2342 = vperm.xlu1 %6860, %v8028_v57   ;;  %v1324_v40 = vpop.permute.xlu0 %1323 }
 0x41f   : > { %v8201_v38 = vpop.permute.xlu1 %1740 }
 0x421   : > { %6861 = vset.pattern.permute.xlu1 %v7164_v55  ;;  %v1352_v35 = vpop.permute.xlu0 %1351 }
 0x422   : > { %2365 = vperm.xlu1 %6861, %v8028_v57   ;;  %v8257_v32 = vsel %vm1355_vm15, %v1352_v35, %v8098_v20  ;;  %v8260_v56 = vsel %vm1355_vm15, %v8098_v20, %v1352_v35  ;;  %v8277_v35 = vsel %vm1327_vm14, %v1324_v40, %v8080_v36  ;;  %v8282_v20 = vsel %vm1327_vm14, %v8080_v36, %v1324_v40 }
 0x423   : > { %v8206_v50 = vpop.permute.xlu1 %1768  ;;  %11666 = vst [vmem:[#allocation67_spill] sm:$0xff] %v8257_v32  ;;  %11667 = vst [vmem:[#allocation68_spill] sm:$0xff] %v8260_v56  ;;  %v8297_v40 = vsel %vm11453_vm3, %v8106_v59, %v8110_v34  ;;  %v8303_v36 = vsel %vm11453_vm3, %v8110_v34, %v8106_v59  ;;  %vm1502_vm14 = vcmp.lt.s32.totalorder %v7574_v61, 90  ;;  %vm1532_vm15 = vcmp.lt.s32.totalorder %v7574_v61, 70  ;;  %v8322_v59 = vld [vmem:[%s11316_s1 + $0x40] sm:$0x3] }
 0x424   : > { %11668 = vst [vmem:[#allocation69_spill] sm:$0xff] %v8277_v35  ;;  %11669 = vst [vmem:[#allocation70_spill] sm:$0xff] %v8282_v20  ;;  %v1343_v34 = vmul.f32 %v1336_v49, %v8282_v20  ;;  %vm1562_vm3 = vcmp.lt.s32.totalorder %v7574_v61, 68 }
 0x425   : > { %11671 = vst [vmem:[#allocation72_spill] sm:$0xff] %v8297_v40  ;;  %11672 = vst [vmem:[#allocation73_spill] sm:$0xff] %v8303_v36 }
 0x426   : > { %6863 = vset.pattern.permute.xlu1 %v7165_v24 }
 0x427   : > { %2411 = vperm.xlu1 %6863, %v8028_v57   ;;  %v8211_v45 = vpop.permute.xlu1 %1770 }
 0x42b   : > { %6864 = vset.pattern.permute.xlu1 %v7166_v52  ;;  %v8213_v13 = vpop.permute.xlu1 %1798  ;;  %v6207_v52 = vld [vmem:[%s11316_s1 + $0x32] sm:$0x3] }
 0x42c   : > { %2434 = vperm.xlu1 %6864, %v8028_v57   ;;  %v1364_v23 = vrot.slane %v6207_v52, %v7579_v47  ;;  %v1368_v31 = vrot.slane %v6207_v52, %v7581_v51  ;;  %v1451_v52 = vrot.slane %v8243_v2, %v7579_v47 }
 0x42e   : > { %v1371_v19 = vmul.f32 %v1364_v23, %v8260_v56  ;;  %v1372_v14 = vmul.f32 %v1368_v31, %v8257_v32  ;;  %v6999_v31 = vld [vmem:[%s11317_s2] sm:$0xf]  ;;  %v1511_v23 = vrot.slane %v8272_v21, %v7579_v47  ;;  %v1344_v56 = vmul.f32 %v1340_v29, %v8277_v35  ;;  %v11675_v35 = vld [vmem:[#allocation11_spill] sm:$0xff] }
 0x42f   : > { %v8218_v55 = vpop.permute.xlu1 %1800 }
 0x430   : > { %6866 = vset.pattern.permute.xlu1 %v7167_v3  ;;  %v6209_v3 = vld [vmem:[%s11316_s1 + $0x36] sm:$0x3] }
 0x431   : > { %2480 = vperm.xlu1 %6866, %v8028_v57   ;;  %v1422_v63 = vrot.slane %v6209_v3, %v7579_v47  ;;  %v1426_v62 = vrot.slane %v6209_v3, %v7581_v51  ;;  %v1485_v3 = vrot.slane %v8254_v22, %v7581_v51 }
 0x433   : > { %v8221_v24 = vpop.permute.xlu1 %1814 }
 0x434   : > { %11664 = vst [vmem:[#allocation65_spill] sm:$0xff] %v8221_v24  ;;  %v1377_v24 = vmul.f32 %v11675_v35, %v1371_v19  ;;  %v8363_v19 = vsel %vm1291_vm8, %v8124_v11, %v8121_v48 }
 0x435   : > { %6867 = vset.pattern.permute.xlu1 %v7168_v39 }
 0x436   : > { %2503 = vperm.xlu1 %6867, %v8028_v57   ;;  %v1393_v57 = vrot.slane %v6208_v60, %v7579_v47  ;;  %v1455_v60 = vrot.slane %v8243_v2, %v7581_v51  ;;  %v1481_v2 = vrot.slane %v8254_v22, %v7579_v47  ;;  %v8308_v22 = vld [vmem:[%s11316_s1 + $0x3e] sm:$0x3] }
 0x437   : > { %v8245_v39 = vpop.permute.xlu1 %1816  ;;  %v1541_v49 = vrot.slane %v8308_v22, %v7579_v47  ;;  %v1545_v29 = vrot.slane %v8308_v22, %v7581_v51  ;;  %v1575_v22 = vrot.slane %v8322_v59, %v7581_v51 }
 0x438   : > { %11665 = vst [vmem:[#allocation66_spill] sm:$0xff] %v8245_v39  ;;  %v1400_v32 = vmul.f32 %v1393_v57, %v8303_v36  ;;  %v1378_v39 = vmul.f32 %v11675_v35, %v1372_v14  ;;  %v8357_v57 = vsel %vm1291_vm8, %v8121_v48, %v8124_v11  ;;  %v8368_v14 = vld [vmem:[%s11316_s1 + $0x42] sm:$0x3]  ;;  %v8381_v48 = vsel %vm1472_vm11, %v8127_v8, %v8130_v16 }
 0x43a   : > { %6869 = vset.pattern.permute.xlu1 %v11445_v25  ;;  %v1515_v25 = vrot.slane %v8272_v21, %v7581_v51  ;;  %v8336_v21 = vsel %vm11454_vm6, %v8118_v58, %v8114_v27 }
 0x43b   : > { %v8288_v4 = vpop.permute.xlu1 %1830  ;;  %2519 = vperm.xlu1 %6869, %v6999_v31   ;;  %v8330_v31 = vsel %vm11454_vm6, %v8114_v27, %v8118_v58  ;;  %11674 = vst [vmem:[#allocation75_spill] sm:$0xff] %v8336_v21  ;;  %v1571_v27 = vrot.slane %v8322_v59, %v7579_v47  ;;  %v1429_v58 = vmul.f32 %v1422_v63, %v8336_v21  ;;  %v11676_v63 = vld [vmem:[#allocation10_spill] sm:$0xff]  ;;  %vm1592_vm6 = vcmp.lt.s32.totalorder %v7574_v61, 66 }
 0x43c   : > { %11670 = vst [vmem:[#allocation71_spill] sm:$0xff] %v8288_v4  ;;  %11673 = vst [vmem:[#allocation74_spill] sm:$0xff] %v8330_v31  ;;  %v1401_v4 = vmul.f32 %v1397_v41, %v8297_v40  ;;  %v1430_v41 = vmul.f32 %v1426_v62, %v8330_v31  ;;  %v1349_v35 = vmul.f32 %v11676_v63, %v1343_v34  ;;  %v11677_v21 = vld [vmem:[#allocation22_spill] sm:$0xff] }
 0x43d   : > { %v1350_v62 = vmul.f32 %v11676_v63, %v1344_v56  ;;  %v1406_v31 = vmul.f32 %v11677_v21, %v1400_v32  ;;  %v8387_v56 = vsel %vm1472_vm11, %v8130_v16, %v8127_v8  ;;  %v1458_v59 = vmul.f32 %v1451_v52, %v8363_v19  ;;  %v11679_v16 = vld [vmem:[#allocation25_spill] sm:$0xff] }
 0x43e   : > { %v1407_v36 = vmul.f32 %v11677_v21, %v1401_v4  ;;  %v1459_v32 = vmul.f32 %v1455_v60, %v8357_v57  ;;  %v1601_v4 = vrot.slane %v8368_v14, %v7579_v47  ;;  %v1605_v34 = vrot.slane %v8368_v14, %v7581_v51  ;;  %v8400_v21 = vld [vmem:[%s11316_s1 + $0x44] sm:$0x3] }
 0x43f   : > { %v8344_v20 = vpop.permute.xlu1 %1832  ;;  %v1379_v63 = vadd.f32 %v1377_v24, %v1349_v35  ;;  %v1380_v8 = vadd.f32 %v1378_v39, %v1350_v62  ;;  %v1435_v40 = vmul.f32 %v11679_v16, %v1429_v58  ;;  %v1488_v52 = vmul.f32 %v1481_v2, %v8387_v56 }
 0x440   : > { %v1489_v60 = vmul.f32 %v1485_v3, %v8381_v48  ;;  %v8410_v14 = vsel %vm1502_vm14, %v8133_v1, %v8136_v42  ;;  %v8416_v24 = vsel %vm1502_vm14, %v8136_v42, %v8133_v1  ;;  %vm1622_vm11 = vcmp.lt.s32.totalorder %v7574_v61, 64 }
 0x441   : > { %v1408_v39 = vadd.f32 %v1406_v31, %v1379_v63  ;;  %v1409_v58 = vadd.f32 %v1407_v36, %v1380_v8  ;;  %v1631_v2 = vrot.slane %v8400_v21, %v7579_v47  ;;  %v8435_v1 = vsel %vm1532_vm15, %v8142_v0, %v8139_v28  ;;  %v11683_v8 = vld [vmem:[#allocation30_spill] sm:$0xff] }
 0x442   : > { %11682 = vst [vmem:[#allocation22_spill] sm:$0xff] %v8435_v1  ;;  %v1518_v42 = vmul.f32 %v1511_v23, %v8416_v24  ;;  %v1519_v36 = vmul.f32 %v1515_v25, %v8410_v14  ;;  %v1635_v31 = vrot.slane %v8400_v21, %v7581_v51  ;;  %vm1652_vm14 = vcmp.lt.s32.totalorder %v7574_v61, 62 }
 0x443   : > { %v8389_v11 = vpop.permute.xlu1 %1846  ;;  %v8453_v25 = vsel %vm1562_vm3, %v8146_v15, %v8150_v44 }
 0x444   : > { %11678 = vst [vmem:[#allocation11_spill] sm:$0xff] %v8389_v11  ;;  %v1436_v11 = vmul.f32 %v11679_v16, %v1430_v41  ;;  %v11680_v41 = vld [vmem:[#allocation27_spill] sm:$0xff]  ;;  %v8429_v16 = vsel %vm1532_vm15, %v8139_v28, %v8142_v0  ;;  %v1495_v28 = vmul.f32 %v11683_v8, %v1489_v60  ;;  %v1548_v0 = vmul.f32 %v1541_v49, %v8435_v1 }
 0x445   : > { %v1464_v35 = vmul.f32 %v11680_v41, %v1458_v59  ;;  %v1465_v62 = vmul.f32 %v11680_v41, %v1459_v32  ;;  %11681 = vst [vmem:[#allocation10_spill] sm:$0xff] %v8429_v16  ;;  %v6217_v59 = vld [vmem:[%s11316_s1 + $0x46] sm:$0x3]  ;;  %v1437_v32 = vadd.f32 %v1435_v40, %v1408_v39  ;;  %v1494_v41 = vmul.f32 %v11683_v8, %v1488_v52  ;;  %v11684_v39 = vld [vmem:[#allocation32_spill] sm:$0xff] }
 0x446   : > { %v1438_v63 = vadd.f32 %v1436_v11, %v1409_v58  ;;  %v1549_v23 = vmul.f32 %v1545_v29, %v8429_v16  ;;  %v8459_v40 = vsel %vm1562_vm3, %v8150_v44, %v8146_v15  ;;  %v6218_v11 = vld [vmem:[%s11316_s1 + $0x48] sm:$0x3]  ;;  %v1661_v52 = vrot.slane %v6217_v59, %v7579_v47 }
 0x447   : > { %v8421_v3 = vpop.permute.xlu1 %1848  ;;  %v1466_v49 = vadd.f32 %v1464_v35, %v1437_v32  ;;  %v1665_v60 = vrot.slane %v6217_v59, %v7581_v51  ;;  %v1524_v58 = vmul.f32 %v11684_v39, %v1518_v42  ;;  %v1525_v8 = vmul.f32 %v11684_v39, %v1519_v36  ;;  %v11685_v32 = vld [vmem:[#allocation34_spill] sm:$0xff] }
 0x448   : > { %v1467_v29 = vadd.f32 %v1465_v62, %v1438_v63  ;;  %v8474_v15 = vsel %vm1592_vm6, %v8154_v17, %v8159_v46  ;;  %v8480_v44 = vsel %vm1592_vm6, %v8159_v46, %v8154_v17  ;;  %v1578_v35 = vmul.f32 %v1571_v27, %v8459_v40 }
 0x449   : > { %v1579_v62 = vmul.f32 %v1575_v22, %v8453_v25  ;;  %vm1682_vm3 = vcmp.lt.s32.totalorder %v7574_v61, 60  ;;  %v1691_v42 = vrot.slane %v6218_v11, %v7579_v47  ;;  %v1496_v36 = vadd.f32 %v1494_v41, %v1466_v49  ;;  %v6219_v22 = vld [vmem:[%s11316_s1 + $0x4a] sm:$0x3] }
 0x44a   : > { %v1497_v59 = vadd.f32 %v1495_v28, %v1467_v29  ;;  %v1554_v63 = vmul.f32 %v11685_v32, %v1548_v0  ;;  %v1555_v39 = vmul.f32 %v11685_v32, %v1549_v23  ;;  %v1608_v16 = vmul.f32 %v1601_v4, %v8480_v44  ;;  %v11686_v28 = vld [vmem:[#allocation35_spill] sm:$0xff] }
 0x44b   : > { %v8464_v21 = vpop.permute.xlu1 %1876  ;;  %v1609_v17 = vmul.f32 %v1605_v34, %v8474_v15  ;;  %v8496_v46 = vsel %vm1622_vm11, %v8162_v7, %v8168_v30  ;;  %v8502_v27 = vsel %vm1622_vm11, %v8168_v30, %v8162_v7  ;;  %v1526_v41 = vadd.f32 %v1524_v58, %v1496_v36 }
 0x44c   : > { %v1527_v4 = vadd.f32 %v1525_v8, %v1497_v59  ;;  %v1695_v34 = vrot.slane %v6218_v11, %v7581_v51  ;;  %vm1712_vm6 = vcmp.lt.s32.totalorder %v7574_v61, 58  ;;  %v1584_v0 = vmul.f32 %v11686_v28, %v1578_v35  ;;  %v6220_v8 = vld [vmem:[%s11316_s1 + $0x4c] sm:$0x3]  ;;  %v11687_v59 = vld [vmem:[#allocation36_spill] sm:$0xff] }
 0x44d   : > { %v1585_v23 = vmul.f32 %v11686_v28, %v1579_v62  ;;  %v8515_v30 = vsel %vm1652_vm14, %v8173_v12, %v8176_v9  ;;  %v8521_v7 = vsel %vm1652_vm14, %v8176_v9, %v8173_v12  ;;  %v1638_v11 = vmul.f32 %v1631_v2, %v8502_v27 }
 0x44e   : > { %v1639_v49 = vmul.f32 %v1635_v31, %v8496_v46  ;;  %v1721_v29 = vrot.slane %v6219_v22, %v7579_v47  ;;  %v1725_v58 = vrot.slane %v6219_v22, %v7581_v51  ;;  %v1556_v62 = vadd.f32 %v1554_v63, %v1526_v41 }
 0x44f   : > { %v8488_v1 = vpop.permute.xlu1 %1878  ;;  %v1557_v36 = vadd.f32 %v1555_v39, %v1527_v4  ;;  %v1614_v32 = vmul.f32 %v11687_v59, %v1608_v16  ;;  %v1615_v12 = vmul.f32 %v11687_v59, %v1609_v17  ;;  %v1668_v9 = vmul.f32 %v1661_v52, %v8521_v7  ;;  %v8548_v39 = vpop.permute.xlu0 %1959 }
 0x450   : > { %v1669_v2 = vmul.f32 %v1665_v60, %v8515_v30  ;;  %v8540_v31 = vsel %vm1682_vm3, %v8181_v43, %v8186_v54  ;;  %v8546_v63 = vsel %vm1682_vm3, %v8186_v54, %v8181_v43  ;;  %v1586_v16 = vadd.f32 %v1584_v0, %v1556_v62  ;;  %v6221_v0 = vld [vmem:[%s11316_s1 + $0x4e] sm:$0x3] }
 0x451   : > { %v1587_v17 = vadd.f32 %v1585_v23, %v1557_v36  ;;  %vm1742_vm15 = vcmp.lt.s32.totalorder %v7574_v61, 38  ;;  %v1751_v52 = vrot.slane %v6220_v8, %v7579_v47  ;;  %v1644_v60 = vmul.f32 %v7719_v26, %v1638_v11 }
 0x452   : > { %v1645_v22 = vmul.f32 %v7719_v26, %v1639_v49  ;;  %v8558_v41 = vsel %vm1712_vm6, %v8189_v33, %v8193_v18  ;;  %v8564_v54 = vsel %vm1712_vm6, %v8193_v18, %v8189_v33  ;;  %v1698_v4 = vmul.f32 %v1691_v42, %v8546_v63 }
 0x453   : > { %v8530_v35 = vpop.permute.xlu1 %1906  ;;  %v1699_v28 = vmul.f32 %v1695_v34, %v8540_v31  ;;  %v1755_v26 = vrot.slane %v6220_v8, %v7581_v51  ;;  %vm1772_vm11 = vcmp.lt.s32.totalorder %v7574_v61, 36  ;;  %v1616_v23 = vadd.f32 %v1614_v32, %v1586_v16  ;;  %v8600_v32 = vpop.permute.xlu0 %1975 }
 0x454   : > { %v1617_v11 = vadd.f32 %v1615_v12, %v1587_v17  ;;  %v1674_v49 = vmul.f32 %v7751_v37, %v1668_v9  ;;  %v1675_v18 = vmul.f32 %v7751_v37, %v1669_v2  ;;  %v1728_v33 = vmul.f32 %v1721_v29, %v8564_v54  ;;  %v8594_v37 = vld [vmem:[%s11316_s1 + $0x50] sm:$0x3] }
 0x455   : > { %v1729_v42 = vmul.f32 %v1725_v58, %v8558_v41  ;;  %v8583_v34 = vsel %vm1742_vm15, %v8198_v5, %v8201_v38  ;;  %v8589_v8 = vsel %vm1742_vm15, %v8201_v38, %v8198_v5  ;;  %v1646_v29 = vadd.f32 %v1644_v60, %v1616_v23 }
 0x456   : > { %v1647_v62 = vadd.f32 %v1645_v22, %v1617_v11  ;;  %v1781_v58 = vrot.slane %v6221_v0, %v7579_v47  ;;  %v1785_v36 = vrot.slane %v6221_v0, %v7581_v51  ;;  %v1704_v12 = vmul.f32 %v8157_v53, %v1698_v4 }
 0x457   : > { %v8566_v43 = vpop.permute.xlu1 %1908  ;;  %v1705_v5 = vmul.f32 %v8157_v53, %v1699_v28  ;;  %v8608_v38 = vsel %vm1772_vm11, %v8206_v50, %v8211_v45  ;;  %v8614_v9 = vsel %vm1772_vm11, %v8211_v45, %v8206_v50  ;;  %v1758_v2 = vmul.f32 %v1751_v52, %v8589_v8 }
 0x458   : > { %11688 = vst [vmem:[#allocation25_spill] sm:$0xff] %v8608_v38  ;;  %11689 = vst [vmem:[#allocation27_spill] sm:$0xff] %v8614_v9  ;;  %v1759_v16 = vmul.f32 %v1755_v26, %v8583_v34  ;;  %vm1850_vm14 = vcmp.lt.s32.totalorder %v7574_v61, 28  ;;  %v1859_v53 = vrot.slane %v8594_v37, %v7579_v47  ;;  %v1676_v17 = vadd.f32 %v1674_v49, %v1646_v29  ;;  %v8659_v29 = vpop.permute.xlu0 %1983 }
 0x459   : > { %v1677_v60 = vadd.f32 %v1675_v18, %v1647_v62  ;;  %v1734_v22 = vmul.f32 %v8164_v10, %v1728_v33  ;;  %v1735_v4 = vmul.f32 %v8164_v10, %v1729_v42  ;;  %v1788_v28 = vmul.f32 %v1781_v58, %v8614_v9  ;;  %v6223_v10 = vld [vmem:[%s11316_s1 + $0x52] sm:$0x3]  ;;  %v11692_v33 = vld [vmem:[#allocation66_spill] sm:$0xff]  ;;  %v11699_v9 = vld [vmem:[#allocation39_spill] sm:$0xff] }
 0x45a   : > { %v1789_v45 = vmul.f32 %v1785_v36, %v8608_v38  ;;  %v8629_v50 = vsel %vm594_vm4, %v8213_v13, %v8218_v55  ;;  %v8635_v52 = vsel %vm594_vm4, %v8218_v55, %v8213_v13  ;;  %v1706_v0 = vadd.f32 %v1704_v12, %v1676_v17  ;;  %v11693_v13 = vld [vmem:[#allocation65_spill] sm:$0xff]  ;;  %v11697_v58 = vld [vmem:[#allocation38_spill] sm:$0xff] }
 0x45b   : > { %v8598_v59 = vpop.permute.xlu1 %1936  ;;  %11690 = vst [vmem:[#allocation30_spill] sm:$0xff] %v8629_v50  ;;  %11691 = vst [vmem:[#allocation32_spill] sm:$0xff] %v8635_v52  ;;  %v1707_v23 = vadd.f32 %v1705_v5, %v1677_v60  ;;  %v1863_v11 = vrot.slane %v8594_v37, %v7581_v51  ;;  %vm1880_vm3 = vcmp.lt.s32.totalorder %v7574_v61, 26  ;;  %v1764_v49 = vmul.f32 %v8171_v6, %v1758_v2  ;;  %v11696_v37 = vld [vmem:[#allocation37_spill] sm:$0xff]  ;;  %v6224_v5 = vld [vmem:[%s11316_s1 + $0x54] sm:$0x3] }
 0x45c   : > { %v1765_v18 = vmul.f32 %v8171_v6, %v1759_v16  ;;  %v8651_v55 = vsel %vm653_vm5, %v11693_v13, %v11692_v33  ;;  %v8657_v42 = vsel %vm653_vm5, %v11692_v33, %v11693_v13  ;;  %v1804_v62 = vmul.f32 %v8635_v52, %v11696_v37  ;;  %v11698_v17 = vld [vmem:[#allocation18_spill] sm:$0xff]  ;;  %v11700_v52 = vld [vmem:[#allocation40_spill] sm:$0xff]  ;;  %v11708_v38 = vld [vmem:[#allocation33_spill] sm:$0xff] }
 0x45d   : > { %11694 = vst [vmem:[#allocation34_spill] sm:$0xff] %v8651_v55  ;;  %11695 = vst [vmem:[#allocation35_spill] sm:$0xff] %v8657_v42  ;;  %v1805_v6 = vmul.f32 %v8629_v50, %v11697_v58  ;;  %v1889_v36 = vrot.slane %v6223_v10, %v7579_v47  ;;  %v1893_v12 = vrot.slane %v6223_v10, %v7581_v51  ;;  %v11701_v50 = vld [vmem:[#allocation71_spill] sm:$0xff]  ;;  %vm1910_vm6 = vcmp.lt.s32.totalorder %v7574_v61, 6 }
 0x45e   : > { %v1736_v2 = vadd.f32 %v1734_v22, %v1706_v0  ;;  %v1737_v16 = vadd.f32 %v1735_v4, %v1707_v23  ;;  %v1794_v60 = vmul.f32 %v11698_v17, %v1788_v28  ;;  %v1795_v33 = vmul.f32 %v11698_v17, %v1789_v45  ;;  %v8690_v45 = vpop.permute.xlu0 %2059  ;;  %v11704_v17 = vld [vmem:[#allocation11_spill] sm:$0xff] }
 0x45f   : > { %v8640_v26 = vpop.permute.xlu1 %1938  ;;  %v1820_v37 = vmul.f32 %v8657_v42, %v11699_v9  ;;  %v1821_v58 = vmul.f32 %v8651_v55, %v11700_v52  ;;  %v8680_v10 = vsel %vm713_vm7, %v11701_v50, %v8344_v20  ;;  %v8686_v22 = vsel %vm713_vm7, %v8344_v20, %v11701_v50  ;;  %v11703_v52 = vld [vmem:[#allocation19_spill] sm:$0xff]  ;;  %v11706_v50 = vld [vmem:[#allocation41_spill] sm:$0xff] }
 0x460   : > { %11702 = vst [vmem:[#allocation36_spill] sm:$0xff] %v8686_v22  ;;  %v1766_v4 = vadd.f32 %v1764_v49, %v1736_v2  ;;  %v1767_v28 = vadd.f32 %v1765_v18, %v1737_v16  ;;  %v1919_v9 = vrot.slane %v6224_v5, %v7579_v47  ;;  %v1810_v0 = vmul.f32 %v11703_v52, %v1804_v62  ;;  %v11707_v18 = vld [vmem:[#allocation42_spill] sm:$0xff]  ;;  %v6225_v2 = vld [vmem:[%s11316_s1 + $0x56] sm:$0x3] }
 0x461   : > { %v1811_v23 = vmul.f32 %v11703_v52, %v1805_v6  ;;  %v8698_v42 = vsel %vm1850_vm14, %v11704_v17, %v8421_v3  ;;  %v8704_v20 = vsel %vm1850_vm14, %v8421_v3, %v11704_v17  ;;  %v1836_v49 = vmul.f32 %v8686_v22, %v11706_v50 }
 0x462   : > { %11705 = vst [vmem:[#allocation66_spill] sm:$0xff] %v8704_v20  ;;  %v1837_v62 = vmul.f32 %v8680_v10, %v11707_v18  ;;  %v1923_v6 = vrot.slane %v6224_v5, %v7581_v51  ;;  %vm1940_vm15 = vcmp.lt.s32.totalorder %v7574_v61, 4  ;;  %v1796_v52 = vadd.f32 %v1794_v60, %v1766_v4 }
 0x463   : > { %v1967_v13 = vpop.permute.xlu1 %1966  ;;  %v1797_v55 = vadd.f32 %v1795_v33, %v1767_v28  ;;  %v1826_v3 = vmul.f32 %v11708_v38, %v1820_v37  ;;  %v1827_v17 = vmul.f32 %v11708_v38, %v1821_v58  ;;  %v1866_v50 = vmul.f32 %v1859_v53, %v8704_v20  ;;  %v11711_v58 = vld [vmem:[#allocation20_spill] sm:$0xff] }
 0x464   : > { %v1867_v22 = vmul.f32 %v1863_v11, %v8698_v42  ;;  %v8723_v5 = vsel %vm1880_vm3, %v8464_v21, %v8488_v1  ;;  %v8729_v60 = vsel %vm1880_vm3, %v8488_v1, %v8464_v21  ;;  %v1812_v33 = vadd.f32 %v1810_v0, %v1796_v52 }
 0x465   : > { %11709 = vst [vmem:[#allocation65_spill] sm:$0xff] %v8723_v5  ;;  %11710 = vst [vmem:[#allocation37_spill] sm:$0xff] %v8729_v60  ;;  %v1813_v37 = vadd.f32 %v1811_v23, %v1797_v55  ;;  %v1949_v38 = vrot.slane %v6225_v2, %v7579_v47  ;;  %v1953_v53 = vrot.slane %v6225_v2, %v7581_v51  ;;  %v8743_v55 = vpop.permute.xlu0 %2082  ;;  %vm2010_vm11 = vcmp.lt.s32.totalorder %v7574_v61, 124 }
 0x466   : > { %v1842_v11 = vmul.f32 %v11711_v58, %v1836_v49  ;;  %v1843_v4 = vmul.f32 %v11711_v58, %v1837_v62  ;;  %v1911_v28 = vsel %vm1910_vm6, %v8530_v35, %v8566_v43  ;;  %v1912_v1 = vsel %vm1910_vm6, %v8566_v43, %v8530_v35  ;;  %v11712_v62 = vld [vmem:[#allocation21_spill] sm:$0xff] }
 0x467   : > { %v1969_v16 = vpop.permute.xlu1 %1968  ;;  %v1828_v0 = vadd.f32 %v1826_v3, %v1812_v33  ;;  %v1829_v23 = vadd.f32 %v1827_v17, %v1813_v37  ;;  %v1896_v18 = vmul.f32 %v1889_v36, %v8729_v60  ;;  %v1897_v49 = vmul.f32 %v1893_v12, %v8723_v5  ;;  %v11713_v33 = vld [vmem:[#allocation63_spill] sm:$0xff] }
 0x468   : > { %v1872_v2 = vmul.f32 %v11712_v62, %v1866_v50  ;;  %v1873_v52 = vmul.f32 %v11712_v62, %v1867_v22  ;;  %v1941_v58 = vsel %vm1940_vm15, %v8598_v59, %v8640_v26  ;;  %v1942_v35 = vsel %vm1940_vm15, %v8640_v26, %v8598_v59 }
 0x469   : > { %v1926_v43 = vmul.f32 %v1919_v9, %v1912_v1  ;;  %v1927_v3 = vmul.f32 %v1923_v6, %v1911_v28  ;;  %v1844_v17 = vadd.f32 %v1842_v11, %v1828_v0  ;;  %v1845_v36 = vadd.f32 %v1843_v4, %v1829_v23  ;;  %v1993_v26 = vpop.permute.xlu0 %1992  ;;  %v11714_v9 = vld [vmem:[#allocation64_spill] sm:$0xff]  ;;  %v11715_v4 = vld [vmem:[#allocation49_spill] sm:$0xff]  ;;  %v11716_v1 = vld [vmem:[#allocation50_spill] sm:$0xff] }
 0x46a   : > { %v1970_v12 = vsel %vm893_vm13, %v1967_v13, %v1969_v16  ;;  %v1971_v22 = vsel %vm893_vm13, %v1969_v16, %v1967_v13  ;;  %v1902_v37 = vmul.f32 %v11713_v33, %v1896_v18  ;;  %v1903_v62 = vmul.f32 %v11713_v33, %v1897_v49 }
 0x46b   : > { %v1991_v21 = vpop.permute.xlu1 %1990  ;;  %v1956_v60 = vmul.f32 %v1949_v38, %v1942_v35  ;;  %v1957_v5 = vmul.f32 %v1953_v53, %v1941_v58  ;;  %v1874_v20 = vadd.f32 %v1872_v2, %v1844_v17  ;;  %v1875_v59 = vadd.f32 %v1873_v52, %v1845_v36  ;;  %v6226_v38 = vld [vmem:[%s11316_s1 + $0x58] sm:$0x3] }
 0x46c   : > { %v1932_v6 = vmul.f32 %v11714_v9, %v1926_v43  ;;  %v1933_v11 = vmul.f32 %v11714_v9, %v1927_v3  ;;  %v1972_v28 = vmul.f32 %v1971_v22, %v11715_v4  ;;  %v1973_v0 = vmul.f32 %v1970_v12, %v11716_v1  ;;  %v11719_v9 = vld [vmem:[#allocation28_spill] sm:$0xff] }
 0x46d   : > { %v1904_v13 = vadd.f32 %v1902_v37, %v1874_v20  ;;  %v1905_v16 = vadd.f32 %v1903_v62, %v1875_v59  ;;  %v1962_v23 = vmul.f32 %v8548_v39, %v1956_v60  ;;  %v1963_v18 = vmul.f32 %v8548_v39, %v1957_v5  ;;  %v2007_v5 = vpop.permute.xlu0 %2006  ;;  %v11717_v37 = vld [vmem:[#allocation55_spill] sm:$0xff]  ;;  %v11718_v62 = vld [vmem:[#allocation56_spill] sm:$0xff] }
 0x46e   : > { %v1978_v52 = vmul.f32 %v8600_v32, %v1972_v28  ;;  %v1979_v58 = vmul.f32 %v8600_v32, %v1973_v0  ;;  %v1994_v20 = vsel %vm991_vm12, %v1991_v21, %v1993_v26  ;;  %v1995_v39 = vsel %vm991_vm12, %v1993_v26, %v1991_v21  ;;  %v6227_v21 = vld [vmem:[%s11316_s1 + $0x5a] sm:$0x3]  ;;  %v6228_v26 = vld [vmem:[%s11316_s1 + $0x5c] sm:$0x3]  ;;  %v6229_v28 = vld [vmem:[%s11316_s1 + $0x5e] sm:$0x3] }
 0x46f   : > { %v8761_v50 = vpop.permute.xlu1 %2135  ;;  %v1934_v53 = vadd.f32 %v1932_v6, %v1904_v13  ;;  %v1935_v2 = vadd.f32 %v1933_v11, %v1905_v16  ;;  %v2019_v43 = vrot.slane %v6226_v38, %v7579_v47  ;;  %v2023_v3 = vrot.slane %v6226_v38, %v7581_v51  ;;  %v11720_v11 = vld [vmem:[#allocation15_spill] sm:$0xff] }
 0x470   : > { %v1996_v32 = vmul.f32 %v1994_v20, %v11717_v37  ;;  %v1997_v59 = vmul.f32 %v1995_v39, %v11718_v62  ;;  %v1986_v6 = vmul.f32 %v8659_v29, %v11719_v9  ;;  %v1987_v4 = vmul.f32 %v8659_v29, %v11720_v11  ;;  %v11723_v37 = vld [vmem:[#allocation69_spill] sm:$0xff]  ;;  %v11724_v62 = vld [vmem:[#allocation70_spill] sm:$0xff]  ;;  %v11726_v9 = vld [vmem:[#allocation68_spill] sm:$0xff] }
 0x471   : > { %v1964_v60 = vadd.f32 %v1962_v23, %v1934_v53  ;;  %v1965_v35 = vadd.f32 %v1963_v18, %v1935_v2  ;;  %vm2040_vm14 = vcmp.lt.s32.totalorder %v7574_v61, 122  ;;  %v2049_v16 = vrot.slane %v6227_v21, %v7579_v47  ;;  %v11721_v53 = vld [vmem:[#allocation16_spill] sm:$0xff] }
 0x472   : > { %v2053_v23 = vrot.slane %v6227_v21, %v7581_v51  ;;  %v2002_v2 = vmul.f32 %v11721_v53, %v1996_v32  ;;  %v2072_v29 = vrot.slane %v6228_v26, %v7579_v47  ;;  %v2095_v20 = vrot.slane %v6229_v28, %v7579_v47  ;;  %v11725_v21 = vld [vmem:[#allocation67_spill] sm:$0xff] }
 0x473   : > { %v1980_v22 = vadd.f32 %v1978_v52, %v1964_v60  ;;  %v1981_v33 = vadd.f32 %v1979_v58, %v1965_v35  ;;  %v2003_v52 = vmul.f32 %v11721_v53, %v1997_v59  ;;  %v2076_v58 = vrot.slane %v6228_v26, %v7581_v51  ;;  %v11729_v53 = vld [vmem:[#allocation12_spill] sm:$0xff] }
 0x474   : > { %v8771_v49 = vpop.permute.xlu1 %2158  ;;  %v2099_v39 = vrot.slane %v6229_v28, %v7581_v51  ;;  %v2079_v32 = vmul.f32 %v2072_v29, %v11723_v37  ;;  %v2102_v26 = vmul.f32 %v2095_v20, %v11725_v21  ;;  %v6230_v29 = vld [vmem:[%s11316_s1 + $0x60] sm:$0x3]  ;;  %vm11763_vm6 = vcmp.lt.s32.totalorder %v7574_v61, 1 }
 0x475   : > { %v1988_v18 = vadd.f32 %v1986_v6, %v1980_v22  ;;  %v1989_v38 = vadd.f32 %v1987_v4, %v1981_v33  ;;  %v2080_v59 = vmul.f32 %v2076_v58, %v11724_v62  ;;  %v2152_v62 = vrot.slane %v6230_v29, %v7581_v51  ;;  %vm11764_vm15 = vmmov %vm11763_vm6 }
 0x476   : > { %v2103_v6 = vmul.f32 %v2099_v39, %v11726_v9  ;;  %v11731_v39 = vld [vmem:[#allocation24_spill] sm:$0xff] }
 0x478   : > { %v2009_v17 = vpop.permute.xlu1 %2008 }
 0x479   : > { %v2011_v36 = vsel %vm2010_vm11, %v2007_v5, %v2009_v17  ;;  %v2012_v12 = vsel %vm2010_vm11, %v2009_v17, %v2007_v5  ;;  %v11722_v5 = vld [vmem:[#allocation29_spill] sm:$0xff]  ;;  %vm11767_vm11 = vcmp.lt.s32.totalorder %v7574_v61, 127 }
 0x47a   : > { %v2026_v1 = vmul.f32 %v2019_v43, %v2011_v36  ;;  %v2027_v0 = vmul.f32 %v2023_v3, %v2012_v12  ;;  %v2004_v36 = vadd.f32 %v2002_v2, %v1988_v18  ;;  %v2005_v12 = vadd.f32 %v2003_v52, %v1989_v38  ;;  %v11728_v18 = vld [vmem:[#allocation72_spill] sm:$0xff]  ;;  %v11730_v2 = vld [vmem:[#allocation73_spill] sm:$0xff] }
 0x47b   : > { %v2113_v52 = vmul.f32 %v11730_v2, %v11729_v53  ;;  %v11738_v2 = vld [vmem:[#allocation14_spill] sm:$0xff] }
 0x47c   : > { %v2037_v13 = vpop.permute.xlu1 %2036  ;;  %v2032_v60 = vmul.f32 %v11722_v5, %v2026_v1  ;;  %v2033_v35 = vmul.f32 %v11722_v5, %v2027_v0  ;;  %v11732_v5 = vld [vmem:[#allocation74_spill] sm:$0xff] }
 0x47e   : > { %v2034_v11 = vadd.f32 %v2032_v60, %v2004_v36  ;;  %v2035_v4 = vadd.f32 %v2033_v35, %v2005_v12  ;;  %v2122_v60 = vmul.f32 %v11732_v5, %v11731_v39  ;;  %v11734_v35 = vld [vmem:[#allocation75_spill] sm:$0xff]  ;;  %v2126_v12 = vpop.permute.xlu0 %2125  ;;  %v2156_v39 = vmul.f32 %v2152_v62, %v8387_v56 }
 0x480   : > { %v2039_v43 = vpop.permute.xlu1 %2038 }
 0x481   : > { %v2041_v3 = vsel %vm2040_vm14, %v2037_v13, %v2039_v43  ;;  %v2042_v17 = vsel %vm2040_vm14, %v2039_v43, %v2037_v13  ;;  %v2085_v13 = vmul.f32 %v8743_v55, %v2079_v32  ;;  %v2148_v32 = vrot.slane %v6230_v29, %v7579_v47  ;;  %vm11768_vm14 = vmmov %vm11767_vm11 }
 0x482   : > { %v2056_v22 = vmul.f32 %v2049_v16, %v2041_v3  ;;  %v2057_v33 = vmul.f32 %v2053_v23, %v2042_v17  ;;  %v2086_v16 = vmul.f32 %v8743_v55, %v2080_v59  ;;  %v11727_v23 = vld [vmem:[#allocation23_spill] sm:$0xff]  ;;  %v11733_v55 = vld [vmem:[#allocation13_spill] sm:$0xff]  ;;  %v2133_v29 = vmul.f32 %v8363_v19, %v11738_v2  ;;  %v6238_v2 = vld [vmem:[%s11316_s1 + $0x70] sm:$0x3] }
 0x483   : > { %v2112_v38 = vmul.f32 %v11728_v18, %v11727_v23  ;;  %v2123_v43 = vmul.f32 %v11734_v35, %v11733_v55  ;;  %v11735_v3 = vld [vmem:[#allocation17_spill] sm:$0xff]  ;;  %v11737_v18 = vld [vmem:[#allocation26_spill] sm:$0xff]  ;;  %v6235_v19 = vld [vmem:[%s11316_s1 + $0x6a] sm:$0x3] }
 0x484   : > { %v2062_v28 = vmul.f32 %v8690_v45, %v2056_v22  ;;  %v2063_v1 = vmul.f32 %v8690_v45, %v2057_v33  ;;  %v8817_v0 = vpop.permute.xlu1 %2204  ;;  %v6231_v45 = vld [vmem:[%s11316_s1 + $0x62] sm:$0x3]  ;;  %v2108_v17 = vmul.f32 %v11735_v3, %v2102_v26  ;;  %v2109_v36 = vmul.f32 %v11735_v3, %v2103_v6  ;;  %v6232_v22 = vld [vmem:[%s11316_s1 + $0x64] sm:$0x3] }
 0x485   : > { %v2171_v59 = vrot.slane %v6231_v45, %v7579_v47  ;;  %v2175_v21 = vrot.slane %v6231_v45, %v7581_v51  ;;  %v2129_v23 = vmul.f32 %v2126_v12, %v2123_v43  ;;  %v2132_v53 = vmul.f32 %v8357_v57, %v11737_v18 }
 0x486   : > { %v2064_v58 = vadd.f32 %v2062_v28, %v2034_v11  ;;  %v2065_v20 = vadd.f32 %v2063_v1, %v2035_v4  ;;  %v11736_v11 = vld [vmem:[#allocation31_spill] sm:$0xff]  ;;  %v2128_v1 = vmul.f32 %v2126_v12, %v2122_v60  ;;  %v2182_v60 = vpop.permute.xlu0 %2181  ;;  %v2139_v35 = vmul.f32 %v8761_v50, %v2133_v29 }
 0x487   : > { %v2118_v26 = vmul.f32 %v11736_v11, %v2112_v38  ;;  %v2119_v6 = vmul.f32 %v11736_v11, %v2113_v52  ;;  %v6233_v38 = vld [vmem:[%s11316_s1 + $0x66] sm:$0x3]  ;;  %v6234_v52 = vld [vmem:[%s11316_s1 + $0x68] sm:$0x3]  ;;  %v2178_v5 = vmul.f32 %v2171_v59, %v8410_v14  ;;  %v2179_v57 = vmul.f32 %v2175_v21, %v8416_v24 }
 0x488   : > { %v2087_v33 = vadd.f32 %v2085_v13, %v2064_v58  ;;  %v2088_v37 = vadd.f32 %v2086_v16, %v2065_v20  ;;  %v2194_v13 = vrot.slane %v6232_v22, %v7579_v47  ;;  %v2198_v16 = vrot.slane %v6232_v22, %v7581_v51  ;;  %v11739_v59 = vld [vmem:[#allocation10_spill] sm:$0xff] }
 0x489   : > { %v2228_v9 = vpop.permute.xlu1 %2227  ;;  %v2155_v20 = vmul.f32 %v2148_v32, %v8381_v48  ;;  %v2138_v55 = vmul.f32 %v8761_v50, %v2132_v53  ;;  %v2217_v48 = vrot.slane %v6233_v38, %v7579_v47  ;;  %v2221_v56 = vrot.slane %v6233_v38, %v7581_v51  ;;  %v11740_v11 = vld [vmem:[#allocation22_spill] sm:$0xff] }
 0x48a   : > { %v2110_v4 = vadd.f32 %v2108_v17, %v2087_v33  ;;  %v2111_v28 = vadd.f32 %v2109_v36, %v2088_v37  ;;  %v2240_v14 = vrot.slane %v6234_v52, %v7579_v47  ;;  %v2244_v24 = vrot.slane %v6234_v52, %v7581_v51 }
 0x48b   : > { %v2161_v36 = vmul.f32 %v8771_v49, %v2155_v20  ;;  %v2162_v12 = vmul.f32 %v8771_v49, %v2156_v39  ;;  %v2184_v37 = vmul.f32 %v2182_v60, %v2178_v5  ;;  %v2185_v32 = vmul.f32 %v2182_v60, %v2179_v57  ;;  %v6237_v49 = vld [vmem:[%s11316_s1 + $0x6e] sm:$0x3] }
 0x48c   : > { %v2120_v45 = vadd.f32 %v2118_v26, %v2110_v4  ;;  %v2121_v58 = vadd.f32 %v2119_v6, %v2111_v28  ;;  %v2263_v50 = vrot.slane %v6235_v19, %v7579_v47  ;;  %v2267_v62 = vrot.slane %v6235_v19, %v7581_v51  ;;  %v6236_v6 = vld [vmem:[%s11316_s1 + $0x6c] sm:$0x3] }
 0x48d   : > { %v2201_v21 = vmul.f32 %v2194_v13, %v11739_v59  ;;  %v2202_v26 = vmul.f32 %v2198_v16, %v11740_v11  ;;  %v2247_v18 = vmul.f32 %v2240_v14, %v8474_v15  ;;  %v2248_v13 = vmul.f32 %v2244_v24, %v8480_v44  ;;  %v2251_v16 = vpop.permute.xlu0 %2250 }
 0x48e   : > { %v2130_v43 = vadd.f32 %v2128_v1, %v2120_v45  ;;  %v2131_v3 = vadd.f32 %v2129_v23, %v2121_v58  ;;  %v2274_v17 = vpop.permute.xlu1 %2273  ;;  %v2224_v1 = vmul.f32 %v2217_v48, %v8453_v25  ;;  %v2225_v23 = vmul.f32 %v2221_v56, %v8459_v40 }
 0x48f   : > { %v2207_v52 = vmul.f32 %v8817_v0, %v2201_v21  ;;  %v2208_v45 = vmul.f32 %v8817_v0, %v2202_v26  ;;  %v2286_v25 = vrot.slane %v6236_v6, %v7579_v47  ;;  %v2290_v40 = vrot.slane %v6236_v6, %v7581_v51 }
 0x490   : > { %v2140_v22 = vadd.f32 %v2138_v55, %v2130_v43  ;;  %v2141_v33 = vadd.f32 %v2139_v35, %v2131_v3  ;;  %v2309_v15 = vrot.slane %v6237_v49, %v7579_v47  ;;  %v2313_v44 = vrot.slane %v6237_v49, %v7581_v51  ;;  %v6239_v43 = vld [vmem:[%s11316_s1 + $0x72] sm:$0x3]  ;;  %v6240_v3 = vld [vmem:[%s11316_s1 + $0x74] sm:$0x3] }
 0x491   : > { %v2230_v39 = vmul.f32 %v2228_v9, %v2224_v1  ;;  %v2231_v5 = vmul.f32 %v2228_v9, %v2225_v23  ;;  %v2253_v57 = vmul.f32 %v2251_v16, %v2247_v18  ;;  %v2254_v60 = vmul.f32 %v2251_v16, %v2248_v13  ;;  %v6242_v1 = vld [vmem:[%s11316_s1 + $0x78] sm:$0x3] }
 0x492   : > { %v2163_v4 = vadd.f32 %v2161_v36, %v2140_v22  ;;  %v2164_v28 = vadd.f32 %v2162_v12, %v2141_v33  ;;  %v2332_v19 = vrot.slane %v6238_v2, %v7579_v47  ;;  %v2336_v55 = vrot.slane %v6238_v2, %v7581_v51  ;;  %v6241_v12 = vld [vmem:[%s11316_s1 + $0x76] sm:$0x3]  ;;  %v11741_v16 = vld [vmem:[#allocation25_spill] sm:$0xff] }
 0x493   : > { %v2297_v53 = vpop.permute.xlu1 %2296  ;;  %v2270_v0 = vmul.f32 %v2263_v50, %v8496_v46  ;;  %v2271_v35 = vmul.f32 %v2267_v62, %v8502_v27  ;;  %v2293_v14 = vmul.f32 %v2286_v25, %v8515_v30  ;;  %v2294_v24 = vmul.f32 %v2290_v40, %v8521_v7  ;;  %v2320_v27 = vpop.permute.xlu0 %2319 }
 0x494   : > { %v2186_v29 = vadd.f32 %v2184_v37, %v2163_v4  ;;  %v2187_v38 = vadd.f32 %v2185_v32, %v2164_v28  ;;  %v2316_v36 = vmul.f32 %v2309_v15, %v8540_v31  ;;  %v2317_v46 = vmul.f32 %v2313_v44, %v8546_v63 }
 0x495   : > { %v2276_v37 = vmul.f32 %v2274_v17, %v2270_v0  ;;  %v2277_v32 = vmul.f32 %v2274_v17, %v2271_v35  ;;  %v2355_v50 = vrot.slane %v6239_v43, %v7579_v47  ;;  %v2359_v62 = vrot.slane %v6239_v43, %v7581_v51  ;;  %v11744_v35 = vld [vmem:[#allocation32_spill] sm:$0xff] }
 0x496   : > { %v2209_v58 = vadd.f32 %v2207_v52, %v2186_v29  ;;  %v2210_v20 = vadd.f32 %v2208_v45, %v2187_v38  ;;  %v2378_v30 = vrot.slane %v6240_v3, %v7579_v47  ;;  %v2382_v7 = vrot.slane %v6240_v3, %v7581_v51  ;;  %v11742_v29 = vld [vmem:[#allocation27_spill] sm:$0xff]  ;;  %v6244_v3 = vld [vmem:[%s11316_s1 + $0x7c] sm:$0x3] }
 0x497   : > { %v2299_v63 = vmul.f32 %v2297_v53, %v2293_v14  ;;  %v2300_v21 = vmul.f32 %v2297_v53, %v2294_v24  ;;  %v2322_v11 = vmul.f32 %v2320_v27, %v2316_v36  ;;  %v2323_v26 = vmul.f32 %v2320_v27, %v2317_v46  ;;  %v2389_v52 = vpop.permute.xlu0 %2388  ;;  %v11746_v24 = vld [vmem:[#allocation35_spill] sm:$0xff] }
 0x498   : > { %v2232_v48 = vadd.f32 %v2230_v39, %v2209_v58  ;;  %v2233_v9 = vadd.f32 %v2231_v5, %v2210_v20  ;;  %v2343_v56 = vpop.permute.xlu1 %2342  ;;  %v2401_v6 = vrot.slane %v6241_v12, %v7579_v47  ;;  %v2405_v49 = vrot.slane %v6241_v12, %v7581_v51 }
 0x499   : > { %v2339_v17 = vmul.f32 %v2332_v19, %v8558_v41  ;;  %v2340_v28 = vmul.f32 %v2336_v55, %v8564_v54  ;;  %v2362_v13 = vmul.f32 %v2355_v50, %v8583_v34  ;;  %v2363_v53 = vmul.f32 %v2359_v62, %v8589_v8  ;;  %v6243_v41 = vld [vmem:[%s11316_s1 + $0x7a] sm:$0x3]  ;;  %v11743_v55 = vld [vmem:[#allocation30_spill] sm:$0xff] }
 0x49a   : > { %v2255_v22 = vadd.f32 %v2253_v57, %v2232_v48  ;;  %v2256_v33 = vadd.f32 %v2254_v60, %v2233_v9  ;;  %v2385_v2 = vmul.f32 %v2378_v30, %v11741_v16  ;;  %v2386_v38 = vmul.f32 %v2382_v7, %v11742_v29  ;;  %v6245_v7 = vld [vmem:[%s11316_s1 + $0x7e] sm:$0x3] }
 0x49b   : > { %v2345_v25 = vmul.f32 %v2343_v56, %v2339_v17  ;;  %v2346_v40 = vmul.f32 %v2343_v56, %v2340_v28  ;;  %v2424_v15 = vrot.slane %v6242_v1, %v7579_v47  ;;  %v2428_v44 = vrot.slane %v6242_v1, %v7581_v51  ;;  %v11745_v56 = vld [vmem:[#allocation34_spill] sm:$0xff]  ;;  %v11749_v29 = vld [vmem:[#allocation65_spill] sm:$0xff] }
 0x49c   : > { %v2278_v31 = vadd.f32 %v2276_v37, %v2255_v22  ;;  %v2279_v59 = vadd.f32 %v2277_v32, %v2256_v33  ;;  %v2391_v5 = vmul.f32 %v2389_v52, %v2385_v2  ;;  %v2392_v57 = vmul.f32 %v2389_v52, %v2386_v38  ;;  %v11747_v37 = vld [vmem:[#allocation36_spill] sm:$0xff]  ;;  %v11748_v1 = vld [vmem:[#allocation66_spill] sm:$0xff]  ;;  %v11750_v52 = vld [vmem:[#allocation37_spill] sm:$0xff] }
 0x49d   : > { %v2366_v4 = vpop.permute.xlu1 %2365  ;;  %v2447_v60 = vrot.slane %v6243_v41, %v7579_v47  ;;  %v2451_v19 = vrot.slane %v6243_v41, %v7581_v51  ;;  %v2408_v0 = vmul.f32 %v2401_v6, %v11743_v55  ;;  %v2409_v43 = vmul.f32 %v2405_v49, %v11744_v35 }
 0x49e   : > { %v2301_v23 = vadd.f32 %v2299_v63, %v2278_v31  ;;  %v2302_v18 = vadd.f32 %v2300_v21, %v2279_v59  ;;  %v2368_v8 = vmul.f32 %v2366_v4, %v2362_v13  ;;  %v2369_v20 = vmul.f32 %v2366_v4, %v2363_v53 }
 0x49f   : > { %v2431_v14 = vmul.f32 %v2424_v15, %v11745_v56  ;;  %v2432_v36 = vmul.f32 %v2428_v44, %v11746_v24  ;;  %v2454_v33 = vmul.f32 %v2447_v60, %v8680_v10  ;;  %v2455_v32 = vmul.f32 %v2451_v19, %v11747_v37 }
 0x4a0   : > { %v2324_v54 = vadd.f32 %v2322_v11, %v2301_v23  ;;  %v2325_v45 = vadd.f32 %v2323_v26, %v2302_v18  ;;  %v2470_v50 = vrot.slane %v6244_v3, %v7579_v47  ;;  %v2474_v62 = vrot.slane %v6244_v3, %v7581_v51  ;;  %v2458_v11 = vpop.permute.xlu0 %2457 }
 0x4a1   : > { %v2493_v10 = vrot.slane %v6245_v7, %v7579_v47  ;;  %v2497_v49 = vrot.slane %v6245_v7, %v7581_v51  ;;  %v2460_v4 = vmul.f32 %v2458_v11, %v2454_v33  ;;  %v2461_v17 = vmul.f32 %v2458_v11, %v2455_v32  ;;  %v11752_v11 = vld [vmem:[#allocation9_spill] sm:$0xff] }
 0x4a2   : > { %v2347_v34 = vadd.f32 %v2345_v25, %v2324_v54  ;;  %v2348_v58 = vadd.f32 %v2346_v40, %v2325_v45  ;;  %v2412_v39 = vpop.permute.xlu1 %2411  ;;  %v2477_v28 = vmul.f32 %v2470_v50, %v8698_v42  ;;  %v2478_v23 = vmul.f32 %v2474_v62, %v11748_v1 }
 0x4a3   : > { %v2414_v12 = vmul.f32 %v2412_v39, %v2408_v0  ;;  %v2415_v22 = vmul.f32 %v2412_v39, %v2409_v43  ;;  %v2500_v38 = vmul.f32 %v2493_v10, %v11749_v29  ;;  %v2501_v41 = vmul.f32 %v2497_v49, %v11750_v52  ;;  %v2597_v0 = vld [vmem:[#allocation3 + $0x180] sm:$0xff] }
 0x4a4   : > { %v2370_v48 = vadd.f32 %v2368_v8, %v2347_v34  ;;  %v2371_v9 = vadd.f32 %v2369_v20, %v2348_v58  ;;  %v2512_v44 = vpop.permute.xlu0 %2511  ;;  %v2517_v20 = vld [vmem:[#allocation3 + $0x140] sm:$0xff]  ;;  %v11751_v39 = vmov 0.0   ;;  %v7170_v35 = vmov 103  }
 0x4a5   : > { %6874 = vset.pattern.permute.xlu1 %v7170_v35  ;;  %v2703_v43 = vld [vmem:[%s11318_s3] sm:$0xf]  ;;  %v7171_v3 = vmov 99   ;;  %v7177_v33 = vmov 106   ;;  %v7178_v37 = vmov 107   ;;  %v11473_v32 = vmov 13  }
 0x4a6   : > { %v2393_v46 = vadd.f32 %v2391_v5, %v2370_v48  ;;  %v2394_v27 = vadd.f32 %v2392_v57, %v2371_v9  ;;  %6870 = vset.pattern.permute.xlu0 %v7171_v3  ;;  %v7172_v48 = vmov 100   ;;  %v11475_v49 = vmov 12   ;;  %v9047_v29 = vld [vmem:[%s11317_s2] sm:$0xff]  ;;  %v11755_v35 = vld [vmem:[#allocation45_spill] sm:$0xff] }
 0x4a7   : > { %v2435_v30 = vpop.permute.xlu1 %2434  ;;  %2706 = vperm.xlu0 %6870, %v2703_v43   ;;  %v11756_v3 = vld [vmem:[#allocation46_spill] sm:$0xff] }
 0x4a8   : > { %v2416_v31 = vadd.f32 %v2414_v12, %v2393_v46  ;;  %v2417_v59 = vadd.f32 %v2415_v22, %v2394_v27  ;;  %v2437_v63 = vmul.f32 %v2435_v30, %v2431_v14  ;;  %v2438_v21 = vmul.f32 %v2435_v30, %v2432_v36 }
 0x4a9   : > { %v7173_v46 = vmov 101   ;;  %v7174_v27 = vmov 102   ;;  %v7175_v12 = vmov 104   ;;  %v7176_v22 = vmov 105  }
 0x4aa   : > { %v2439_v26 = vadd.f32 %v2437_v63, %v2416_v31  ;;  %v2440_v6 = vadd.f32 %v2438_v21, %v2417_v59 }
 0x4ab   : > { %6871 = vset.pattern.permute.xlu0 %v7172_v48 }
 0x4ac   : > { %v2481_v18 = vpop.permute.xlu1 %2480  ;;  %v2462_v13 = vadd.f32 %v2460_v4, %v2439_v26  ;;  %v2463_v53 = vadd.f32 %v2461_v17, %v2440_v6  ;;  %2720 = vperm.xlu0 %6871, %v2703_v43   ;;  %v11753_v6 = vld [vmem:[#allocation8_spill] sm:$0xff]  ;;  %v7000_v4 = vld [vmem:[%s11317_s2] sm:$0xf]  ;;  %v11472_v17 = vmov 14  }
 0x4ad   : > { %v2483_v16 = vmul.f32 %v2481_v18, %v2477_v28  ;;  %v2484_v2 = vmul.f32 %v2481_v18, %v2478_v23  ;;  %v9012_v28 = vld [vmem:[%s11317_s2 + $0x30] sm:$0xff]  ;;  %v9021_v23 = vld [vmem:[%s11317_s2 + $0x38] sm:$0xff]  ;;  %v11474_v18 = vmov 15  }
 0x4af   : > { %v2485_v45 = vadd.f32 %v2483_v16, %v2462_v13  ;;  %v2486_v25 = vadd.f32 %v2484_v2, %v2463_v53  ;;  %v9028_v13 = vld [vmem:[%s11317_s2 + $0x20] sm:$0xff]  ;;  %v9035_v16 = vld [vmem:[%s11317_s2 + $0x18] sm:$0xff]  ;;  %v9041_v2 = vld [vmem:[%s11317_s2 + $0x28] sm:$0xff] }
 0x4b0   : > { %6872 = vset.pattern.permute.xlu0 %v7173_v46 }
 0x4b1   : > { %v2504_v54 = vpop.permute.xlu1 %2503  ;;  %2736 = vperm.xlu0 %6872, %v2703_v43  }
 0x4b2   : > { %v2506_v40 = vmul.f32 %v2504_v54, %v2500_v38  ;;  %v2507_v15 = vmul.f32 %v2504_v54, %v2501_v41  ;;  %v9059_v41 = vld [vmem:[%s11317_s2 + $0x10] sm:$0xff] }
 0x4b4   : > { %v2508_v34 = vadd.f32 %v2506_v40, %v2485_v45  ;;  %v2509_v58 = vadd.f32 %v2507_v15, %v2486_v25  ;;  %v3000_v25 = vld [vmem:[%s11317_s2 + $0x8] sm:$0xff] }
 0x4b5   : > { %6873 = vset.pattern.permute.xlu0 %v7174_v27 }
 0x4b6   : > { %v2514_v42 = vadd.f32 %v2512_v44, %v2508_v34  ;;  %v2515_v8 = vadd.f32 %v2512_v44, %v2509_v58  ;;  %v2520_v57 = vpop.permute.xlu1 %2519  ;;  %2752 = vperm.xlu0 %6873, %v2703_v43  }
 0x4b8   : > { %2555 = vmatprep.subr.mxu1 %v2515_v8 }
 0x4b9   : > { %2556 = vmatpush1.msra.mxu1 %v2514_v42 }
 0x4ba   : > { %6246 = vmatmul.mubr.msk.f32.vlgmr.msra.gmra.mxu1 %vm271_vm0, %v2517_v20  ;;  %6875 = vset.pattern.permute.xlu0 %v7175_v12  ;;  %vm11759_vm0 = vcmp.lt.s32.totalorder %v7574_v61, 15 }
 0x4bb   : > { %2950 = vmatprep.mubr.f32.mxu1 %v11751_v39  ;;  %2776 = vperm.xlu0 %6875, %v2703_v43   ;;  %vm11760_vm3 = vmmov %vm11759_vm0 }
 0x4bf   : > { %6876 = vset.pattern.permute.xlu0 %v7176_v22 }
 0x4c0   : > { %2792 = vperm.xlu0 %6876, %v2703_v43  }
 0x4c4   : > { %6877 = vset.pattern.permute.xlu0 %v7177_v33 }
 0x4c5   : > { %2808 = vperm.xlu0 %6877, %v2703_v43  }
 0x4c9   : > { %6878 = vset.pattern.permute.xlu0 %v7178_v37  ;;  %v11761_v37 = vld [vmem:[#allocation47_spill] sm:$0xff] }
 0x522   : > { %v9016_v1 = vpop.permute.xlu0 %2706 }
 0x527   : > { %v2721_v53 = vpop.permute.xlu0 %2720 }
 0x52c   : > { %v2737_v38 = vpop.permute.xlu0 %2736 }
 0x531   : > { %v2753_v52 = vpop.permute.xlu0 %2752 }
 0x536   : > { %v9064_v54 = vpop.permute.xlu0 %2776 }
 0x53b   : > { %v9068_v45 = vpop.permute.xlu0 %2792 }
 0x540   : > { %v9075_v40 = vpop.permute.xlu0 %2808 }
 0x57a   : > { %v2591_v5 = vpop.f32.mrf.mxu1 }
 0x57b   : > { %v2592_v55 = vadd.f32 %v2591_v5, %v2520_v57 }
 0x57c   : > { %v2593_v60 = vpop.f32.mrf.mxu1 }
 0x57d   : > { %v2594_v19 = vadd.f32 %v2593_v60, %v2520_v57 }
 0x57f   : > { %6247 = vmatprep.subr.msk.mxu0 %vm482_vm1, %v2594_v19 }
 0x580   : > { %6248 = vmatpush1.msk.msra.mxu0 %vm482_vm1, %v2592_v55 }
 0x581   : > { %6249 = vmatmul.mubr.msk.f32.vlgmr.msra.gmra.mxu0 %vm478_vm2, %v2597_v0 }
 0x641   : > { %v2673_v9 = vpop.f32.mrf.mxu0 }
 0x642   : > { %v2678_v14 = vsel %vm482_vm1, %v2673_v9, 0.0  ;;  %v11757_v9 = vld [vmem:[#allocation43_spill] sm:$0xff] }
 0x643   : > { %v2675_v56 = vpop.f32.mrf.mxu0 }
 0x644   : > { %v2679_v24 = vsel %vm482_vm1, %v2675_v56, 0.0 }
 0x645   : > { %v2680_v36 = vadd.f32 %v2679_v24, %v2678_v14  ;;  %v11758_v14 = vld [vmem:[#allocation44_spill] sm:$0xff] }
 0x647   : > { %2681 = vadd.xlane.f32.xlu1 %v2680_v36 }
 0x658   : > { %2760 = vperm.xlu1 %6874, %v2703_v43  }
 0x65c   : > { %6880 = vset.pattern.permute.xlu1 %v11473_v32 }
 0x6d0   : > { %v2682_v50 = vpop.xlane.xlu1 %2681 }
 0x6d1   : > { %v6250_v62 = vmul.f32 -0.00390625, %v2682_v50 }
 0x6d3   : > { %v2686_v30 = vmul.f32 1.442695, %v6250_v62  ;;  %v11762_v62 = vld [vmem:[#allocation48_spill] sm:$0xff] }
 0x6d4   : > { %v2761_v15 = vpop.permute.xlu1 %2760 }
 0x6d5   : > { %6977 = vpow2.f32 %v2686_v30 }
 0x6e2   : > { %v6978_v7 = vpop.eup %6977 }
 0x6e3   : > { %v2688_v31 = vadd.f32 1.0, %v6978_v7 }
 0x6e5   : > { %6979 = vrcp.f32 %v2688_v31 }
 0x6f2   : > { %v6980_v59 = vpop.eup %6979 }
 0x6f3   : > { %v2691_v63 = vmul.f32 %v6980_v59, %v2592_v55  ;;  %v2692_v21 = vmul.f32 %v6980_v59, %v2594_v19 }
 0x6f5   : > { %v8967_v26 = vadd.f32 %v2691_v63, %v11752_v11  ;;  %v8974_v10 = vadd.f32 %v2692_v21, %v11753_v6  ;;  %v6935_v6 = vld [vmem:[%s11320_s5 + $0x4] ss:$20 sps:$4 sm:$0xff]  }
 0x6f6   : > { %4828 = vmatprep.mubr.bf16.mxu0 %v6935_v6 }
 0x6f7   : > { %2727 = vrot.lane.b32.xlu1 %v8967_v26, %s7098_s29  ;;  %2695 = vrot.lane.b32.xlu0 %v8967_v26, %s7096_s27 }
 0x6fb   : > { %2743 = vrot.lane.b32.xlu1 %v8967_v26, %s7101_s9  ;;  %2697 = vrot.lane.b32.xlu0 %v8974_v10, %s7096_s27 }
 0x6ff   : > { %2767 = vrot.lane.b32.xlu1 %v8967_v26, %s11754_s30  ;;  %2711 = vrot.lane.b32.xlu0 %v8967_v26, %s7097_s28 }
 0x703   : > { %2769 = vrot.lane.b32.xlu1 %v8974_v10, %s11754_s30  ;;  %2713 = vrot.lane.b32.xlu0 %v8974_v10, %s7097_s28 }
 0x707   : > { %2783 = vrot.lane.b32.xlu1 %v8967_v26, %s7103_s11  ;;  %2729 = vrot.lane.b32.xlu0 %v8974_v10, %s7098_s29 }
 0x70b   : > { %2785 = vrot.lane.b32.xlu1 %v8974_v10, %s7103_s11  ;;  %2745 = vrot.lane.b32.xlu0 %v8974_v10, %s7101_s9 }
 0x70f   : > { %2799 = vrot.lane.b32.xlu1 %v8967_v26, %s7104_s12  ;;  %2824 = vperm.xlu0 %6878, %v2703_v43  }
 0x713   : > { %2801 = vrot.lane.b32.xlu1 %v8974_v10, %s7104_s12  ;;  %6879 = vset.pattern.permute.xlu0 %v11475_v49 }
 0x714   : > { %2832 = vperm.xlu0 %6879, %v7000_v4  }
 0x717   : > { %2815 = vrot.lane.b32.xlu1 %v8967_v26, %s7105_s13 }
 0x718   : > { %6882 = vset.pattern.permute.xlu0 %v11472_v17 }
 0x719   : > { %3044 = vperm.xlu0 %6882, %v9021_v23  }
 0x71b   : > { %2817 = vrot.lane.b32.xlu1 %v8974_v10, %s7105_s13 }
 0x71d   : > { %3029 = vperm.xlu0 %6882, %v9028_v13  }
 0x71f   : > { %2838 = vperm.xlu1 %6880, %v7000_v4  }
 0x721   : > { %3024 = vperm.xlu0 %6882, %v9035_v16  }
 0x723   : > { %6881 = vset.pattern.permute.xlu1 %v11472_v17 }
 0x724   : > { %3039 = vperm.xlu1 %6881, %v9012_v28  }
 0x725   : > { %3009 = vperm.xlu0 %6882, %v9047_v29  }
 0x728   : > { %6883 = vset.pattern.permute.xlu1 %v11474_v18 }
 0x729   : > { %3088 = vperm.xlu1 %6883, %v9012_v28   ;;  %6888 = vset.pattern.permute.xlu0 %v11474_v18 }
 0x72a   : > { %3080 = vperm.xlu0 %6888, %v9028_v13  }
 0x72d   : > { %3092 = vperm.xlu1 %6883, %v9021_v23  }
 0x72e   : > { %3064 = vperm.xlu0 %6888, %v9047_v29  }
 0x731   : > { %6884 = vset.pattern.permute.xlu1 %v11472_v17 }
 0x732   : > { %3034 = vperm.xlu1 %6884, %v9041_v2  }
 0x736   : > { %6885 = vset.pattern.permute.xlu1 %v11474_v18 }
 0x737   : > { %3084 = vperm.xlu1 %6885, %v9041_v2  }
 0x73b   : > { %6886 = vset.pattern.permute.xlu1 %v11472_v17 }
 0x73c   : > { %3019 = vperm.xlu1 %6886, %v9059_v41  }
 0x740   : > { %6887 = vset.pattern.permute.xlu1 %v11474_v18 }
 0x741   : > { %3072 = vperm.xlu1 %6887, %v9059_v41  }
 0x745   : > { %3076 = vperm.xlu1 %6887, %v9035_v16  }
 0x749   : > { %6889 = vset.pattern.permute.xlu1 %v11472_v17 }
 0x74a   : > { %3014 = vperm.xlu1 %6889, %v3000_v25  }
 0x74e   : > { %6890 = vset.pattern.permute.xlu1 %v11474_v18 }
 0x74f   : > { %3068 = vperm.xlu1 %6890, %v3000_v25  }
 0x769   : > { %v2696_v44 = vpop.permute.xlu0 %2695  ;;  %v2728_v34 = vpop.permute.xlu1 %2727 }
 0x76d   : > { %v2698_v58 = vpop.permute.xlu0 %2697  ;;  %v2744_v42 = vpop.permute.xlu1 %2743 }
 0x76e   : > { %v2699_v60 = vsel %vm773_vm9, %v2696_v44, %v2698_v58  ;;  %v2700_v19 = vsel %vm773_vm9, %v2698_v58, %v2696_v44  ;;  %v11765_v58 = vld [vmem:[#allocation51_spill] sm:$0xff] }
 0x76f   : > { %v2701_v56 = vmul.f32 %v2700_v19, %v11757_v9  ;;  %v2702_v24 = vmul.f32 %v2699_v60, %v11758_v14 }
 0x771   : > { %v2712_v8 = vpop.permute.xlu0 %2711  ;;  %v2768_v20 = vpop.permute.xlu1 %2767  ;;  %v2709_v7 = vmul.f32 %v9016_v1, %v2701_v56  ;;  %v2710_v31 = vmul.f32 %v9016_v1, %v2702_v24 }
 0x775   : > { %v2714_v5 = vpop.permute.xlu0 %2713  ;;  %v2770_v57 = vpop.permute.xlu1 %2769 }
 0x776   : > { %v2715_v55 = vsel %vm803_vm10, %v2712_v8, %v2714_v5  ;;  %v2716_v0 = vsel %vm803_vm10, %v2714_v5, %v2712_v8  ;;  %v11766_v5 = vld [vmem:[#allocation52_spill] sm:$0xff]  ;;  %v2771_v19 = vsel %vm11767_vm11, %v2768_v20, %v2770_v57  ;;  %v2772_v1 = vsel %vm11768_vm14, %v2770_v57, %v2768_v20 }
 0x777   : > { %v2717_v43 = vmul.f32 %v2716_v0, %v11755_v35  ;;  %v2718_v48 = vmul.f32 %v2715_v55, %v11756_v3  ;;  %v11769_v3 = vld [vmem:[#allocation53_spill] sm:$0xff]  ;;  %vm11779_vm11 = vcmp.lt.s32.totalorder %v7574_v61, 111 }
 0x778   : > { %vm11780_vm14 = vmmov %vm11779_vm11 }
 0x779   : > { %v2730_v36 = vpop.permute.xlu0 %2729  ;;  %v2784_v46 = vpop.permute.xlu1 %2783  ;;  %v2723_v22 = vmul.f32 %v2721_v53, %v2717_v43  ;;  %v2724_v33 = vmul.f32 %v2721_v53, %v2718_v48  ;;  %v2773_v48 = vmul.f32 %v2771_v19, %v11769_v3 }
 0x77a   : > { %v2731_v27 = vsel %vm11759_vm0, %v2728_v34, %v2730_v36  ;;  %v2732_v12 = vsel %vm11760_vm3, %v2730_v36, %v2728_v34  ;;  %vm11771_vm0 = vcmp.lt.s32.totalorder %v7574_v61, 113 }
 0x77b   : > { %v2733_v50 = vmul.f32 %v2732_v12, %v11761_v37  ;;  %v2734_v30 = vmul.f32 %v2731_v27, %v11762_v62  ;;  %v2725_v34 = vadd.f32 %v2723_v22, %v2709_v7  ;;  %v2726_v53 = vadd.f32 %v2724_v33, %v2710_v31  ;;  %vm11772_vm3 = vmmov %vm11771_vm0  ;;  %v11773_v62 = vld [vmem:[#allocation57_spill] sm:$0xff]  ;;  %v11774_v7 = vld [vmem:[#allocation58_spill] sm:$0xff] }
 0x77c   : > { %v2763_v27 = vmul.f32 %v2761_v15, %v8967_v26  ;;  %v2764_v12 = vmul.f32 %v2761_v15, %v8974_v10  ;;  %v2779_v37 = vmul.f32 %v9064_v54, %v2773_v48 }
 0x77d   : > { %v2739_v59 = vmul.f32 %v2737_v38, %v2733_v50  ;;  %v2740_v63 = vmul.f32 %v2737_v38, %v2734_v30  ;;  %v2746_v21 = vpop.permute.xlu0 %2745  ;;  %v2786_v4 = vpop.permute.xlu1 %2785 }
 0x77e   : > { %v2747_v25 = vsel %vm11763_vm6, %v2744_v42, %v2746_v21  ;;  %v2748_v44 = vsel %vm11764_vm15, %v2746_v21, %v2744_v42  ;;  %v11770_v42 = vld [vmem:[#allocation54_spill] sm:$0xff]  ;;  %v2787_v22 = vsel %vm11771_vm0, %v2784_v46, %v2786_v4  ;;  %v2788_v20 = vsel %vm11772_vm3, %v2786_v4, %v2784_v46  ;;  %v11777_v4 = vld [vmem:[#allocation59_spill] sm:$0xff] }
 0x77f   : > { %v2749_v8 = vmul.f32 %v2748_v44, %v11765_v58  ;;  %v2750_v60 = vmul.f32 %v2747_v25, %v11766_v5  ;;  %v2741_v38 = vadd.f32 %v2739_v59, %v2725_v34  ;;  %v2742_v55 = vadd.f32 %v2740_v63, %v2726_v53  ;;  %v11778_v44 = vld [vmem:[#allocation60_spill] sm:$0xff] }
 0x780   : > { %v2774_v56 = vmul.f32 %v2772_v1, %v11770_v42  ;;  %v2789_v30 = vmul.f32 %v2787_v22, %v11773_v62  ;;  %v2790_v31 = vmul.f32 %v2788_v20, %v11774_v7  ;;  %vm11775_vm6 = vcmp.lt.s32.totalorder %v7574_v61, 112  ;;  %v2848_v62 = vld [vmem:[#allocation3 + $0x1c0] sm:$0xff]  ;;  %v2850_v7 = vld [vmem:[#allocation3 + $0x1d0] sm:$0xff] }
 0x781   : > { %v2755_v0 = vmul.f32 %v2753_v52, %v2749_v8  ;;  %v2756_v35 = vmul.f32 %v2753_v52, %v2750_v60  ;;  %v2800_v43 = vpop.permute.xlu1 %2799  ;;  %vm11776_vm15 = vmmov %vm11775_vm6  ;;  %vm11851_vm0 = vcmp.lt.s32.totalorder %v7574_v61, 127 }
 0x782   : > { %v2780_v50 = vmul.f32 %v9064_v54, %v2774_v56  ;;  %v2795_v53 = vmul.f32 %v9068_v45, %v2789_v30  ;;  %v2796_v54 = vmul.f32 %v9068_v45, %v2790_v31  ;;  %v2849_v30 = vld [vmem:[#allocation3 + $0x1c8] sm:$0xff]  ;;  %vm11852_vm3 = vmmov %vm11851_vm0 }
 0x783   : > { %v2757_v24 = vadd.f32 %v2755_v0, %v2741_v38  ;;  %v2758_v36 = vadd.f32 %v2756_v35, %v2742_v55  ;;  %v11781_v0 = vld [vmem:[#allocation61_spill] sm:$0xff]  ;;  %v2853_v31 = vld [vmem:[#allocation3 + $0x1e8] sm:$0xff] }
 0x785   : > { %v2802_v57 = vpop.permute.xlu1 %2801  ;;  %v2765_v33 = vadd.f32 %v2763_v27, %v2757_v24  ;;  %v2766_v52 = vadd.f32 %v2764_v12, %v2758_v36 }
 0x786   : > { %v2803_v15 = vsel %vm11775_vm6, %v2800_v43, %v2802_v57  ;;  %v2804_v59 = vsel %vm11776_vm15, %v2802_v57, %v2800_v43  ;;  %v11782_v43 = vld [vmem:[#allocation62_spill] sm:$0xff]  ;;  %vm11857_vm6 = vmmov %vm11851_vm0 }
 0x787   : > { %v2781_v21 = vadd.f32 %v2779_v37, %v2765_v33  ;;  %v2782_v46 = vadd.f32 %v2780_v50, %v2766_v52  ;;  %v2805_v25 = vmul.f32 %v2803_v15, %v11777_v4  ;;  %v2806_v34 = vmul.f32 %v2804_v59, %v11778_v44  ;;  %v2854_v15 = vld [vmem:[#allocation3 + $0x1f0] sm:$0xff]  ;;  %v2855_v59 = vld [vmem:[#allocation3 + $0x1f8] sm:$0xff]  ;;  %vm11860_vm15 = vmmov %vm11851_vm0 }
 0x789   : > { %v2816_v63 = vpop.permute.xlu1 %2815  ;;  %v2797_v8 = vadd.f32 %v2795_v53, %v2781_v21  ;;  %v2798_v5 = vadd.f32 %v2796_v54, %v2782_v46  ;;  %v2811_v38 = vmul.f32 %v9075_v40, %v2805_v25  ;;  %v2812_v55 = vmul.f32 %v9075_v40, %v2806_v34 }
 0x78a   : > { %v2825_v1 = vpop.permute.xlu0 %2824 }
 0x78b   : > { %v2813_v42 = vadd.f32 %v2811_v38, %v2797_v8  ;;  %v2814_v56 = vadd.f32 %v2812_v55, %v2798_v5 }
 0x78d   : > { %v2818_v58 = vpop.permute.xlu1 %2817 }
 0x78e   : > { %v2819_v60 = vsel %vm11779_vm11, %v2816_v63, %v2818_v58  ;;  %v2820_v19 = vsel %vm11780_vm14, %v2818_v58, %v2816_v63  ;;  %vm11863_vm11 = vcmp.lt.s32.totalorder %v7574_v61, 1  ;;  %vm11866_vm14 = vmmov %vm11851_vm0 }
 0x78f   : > { %v2821_v35 = vmul.f32 %v2819_v60, %v11781_v0  ;;  %v2822_v3 = vmul.f32 %v2820_v19, %v11782_v43  ;;  %v2833_v27 = vpop.permute.xlu0 %2832 }
 0x791   : > { %v2827_v48 = vmul.f32 %v2825_v1, %v2821_v35  ;;  %v2828_v45 = vmul.f32 %v2825_v1, %v2822_v3 }
 0x793   : > { %v2829_v24 = vadd.f32 %v2827_v48, %v2813_v42  ;;  %v2830_v36 = vadd.f32 %v2828_v45, %v2814_v56 }
 0x794   : > { %v9163_v25 = vpop.permute.xlu0 %3044 }
 0x795   : > { %v2835_v12 = vmul.f32 %v2833_v27, %v2829_v24  ;;  %v2836_v22 = vmul.f32 %v2833_v27, %v2830_v36 }
 0x798   : > { %v9167_v34 = vpop.permute.xlu0 %3029 }
 0x79a   : > { %v2839_v20 = vpop.permute.xlu1 %2838 }
 0x79b   : > { %v2841_v57 = vadd.f32 %v2839_v20, %v2835_v12  ;;  %v2842_v33 = vadd.f32 %v2839_v20, %v2836_v22 }
 0x79c   : > { %v9169_v54 = vpop.permute.xlu0 %3024 }
 0x79d   : > { %v2843_v52 = vmax.f32 %v2841_v57, 0.0  ;;  %v2844_v37 = vmax.f32 %v2842_v33, 0.0 }
 0x79f   : > { %v2845_v40 = vadd.f32 %v2843_v52, %v8967_v26  ;;  %v2846_v50 = vadd.f32 %v2844_v37, %v8974_v10  ;;  %v2851_v26 = vld [vmem:[#allocation3 + $0x1d8] sm:$0xff]  ;;  %v2852_v10 = vld [vmem:[#allocation3 + $0x1e0] sm:$0xff]  ;;  %v9155_v63 = vpop.permute.xlu1 %3039 }
 0x7a0   : > { %v3010_v8 = vpop.permute.xlu0 %3009 }
 0x7a1   : > { %6251 = vmatprep.subr.msk.mxu1 %vm482_vm1, %v2846_v50 }
 0x7a2   : > { %6252 = vmatpush1.msk.msra.mxu1 %vm482_vm1, %v2845_v40 }
 0x7a3   : > { %6253 = vmatmul.mubr.msk.f32.vlgmr.msra.gmra.mxu1 %vm478_vm2, %v2848_v62 }
 0x7a4   : > { %2956 = vmatprep.mubr.f32.mxu1 %v11751_v39  ;;  %v9157_v21 = vpop.permute.xlu1 %3088 }
 0x7a5   : > { %v9175_v60 = vpop.permute.xlu0 %3080 }
 0x7a7   : > { %6254 = vmatmul.mubr.msk.f32.gmra.mxu1 %vm478_vm2, %v2849_v30 }
 0x7a8   : > { %2962 = vmatprep.mubr.f32.mxu1 %v11751_v39  ;;  %v9159_v46 = vpop.permute.xlu1 %3092 }
 0x7a9   : > { %v3065_v38 = vpop.permute.xlu0 %3064 }
 0x7ab   : > { %6255 = vmatmul.mubr.msk.f32.gmra.mxu1 %vm478_vm2, %v2850_v7 }
 0x7ac   : > { %2968 = vmatprep.mubr.f32.mxu1 %v11751_v39 }
 0x7ad   : > { %v9161_v4 = vpop.permute.xlu1 %3034 }
 0x7af   : > { %6256 = vmatmul.mubr.msk.f32.gmra.mxu1 %vm478_vm2, %v2851_v26 }
 0x7b0   : > { %2974 = vmatprep.mubr.f32.mxu1 %v11751_v39 }
 0x7b2   : > { %v9165_v44 = vpop.permute.xlu1 %3084 }
 0x7b3   : > { %6257 = vmatmul.mubr.msk.f32.gmra.mxu1 %vm478_vm2, %v2852_v10 }
 0x7b4   : > { %2980 = vmatprep.mubr.f32.mxu1 %v11751_v39 }
 0x7b7   : > { %6258 = vmatmul.mubr.msk.f32.gmra.mxu1 %vm478_vm2, %v2853_v31  ;;  %v3020_v53 = vpop.permute.xlu1 %3019 }
 0x7b8   : > { %2986 = vmatprep.mubr.f32.mxu1 %v11751_v39 }
 0x7bb   : > { %6259 = vmatmul.mubr.msk.f32.gmra.mxu1 %vm478_vm2, %v2854_v15 }
 0x7bc   : > { %2992 = vmatprep.mubr.f32.mxu1 %v11751_v39  ;;  %v9171_v58 = vpop.permute.xlu1 %3072 }
 0x7bf   : > { %6260 = vmatmul.mubr.msk.f32.gmra.mxu1 %vm478_vm2, %v2855_v59 }
 0x7c0   : > { %v9173_v5 = vpop.permute.xlu1 %3076 }
 0x7c5   : > { %v3015_v19 = vpop.permute.xlu1 %3014 }
 0x7ca   : > { %v3069_v3 = vpop.permute.xlu1 %3068 }
 0x863   : > { %v2952_v1 = vpop.f32.mrf.mxu1 }
 0x864   : > { %v3047_v55 = vmul.f32 %v3010_v8, %v2952_v1 }
 0x865   : > { %v2954_v0 = vpop.f32.mrf.mxu1 }
 0x866   : > { %v3095_v35 = vadd.f32 %v3065_v38, %v3047_v55  ;;  %v3048_v24 = vmul.f32 %v3010_v8, %v2954_v0 }
 0x867   : > { %v2958_v43 = vpop.f32.mrf.mxu1 }
 0x868   : > { %v9177_v48 = vmax.f32 %v3095_v35, 0.0  ;;  %v3049_v45 = vmul.f32 %v3015_v19, %v2958_v43  ;;  %v3096_v27 = vadd.f32 %v3065_v38, %v3048_v24 }
 0x869   : > { %v2960_v36 = vpop.f32.mrf.mxu1 }
 0x86a   : > { %11783 = vst [vmem:[#allocation38_spill] sm:$0xff] %v9177_v48  ;;  %v3097_v42 = vadd.f32 %v3069_v3, %v3049_v45  ;;  %3247 = vrot.lane.b32.xlu1 %v9177_v48, %s7097_s28  ;;  %v3050_v12 = vmul.f32 %v3015_v19, %v2960_v36  ;;  %v9199_v22 = vmax.f32 %v3096_v27, 0.0 }
 0x86b   : > { %v2964_v33 = vpop.f32.mrf.mxu1 }
 0x86c   : > { %v9181_v56 = vmax.f32 %v3097_v42, 0.0  ;;  %11785 = vst [vmem:[#allocation39_spill] sm:$0xff] %v9199_v22  ;;  %v3098_v20 = vadd.f32 %v3069_v3, %v3050_v12  ;;  %v3051_v37 = vmul.f32 %v3020_v53, %v2964_v33 }
 0x86d   : > { %v2966_v52 = vpop.f32.mrf.mxu1 }
 0x86e   : > { %11784 = vst [vmem:[#allocation18_spill] sm:$0xff] %v9181_v56  ;;  %3127 = vrot.lane.b32.xlu1 %v9177_v48, %s7096_s27  ;;  %3249 = vrot.lane.b32.xlu0 %v9181_v56, %s7097_s28  ;;  %v9205_v57 = vmax.f32 %v3098_v20, 0.0  ;;  %v3099_v50 = vadd.f32 %v9171_v58, %v3051_v37  ;;  %v3052_v10 = vmul.f32 %v3020_v53, %v2966_v52 }
 0x86f   : > { %v2970_v40 = vpop.f32.mrf.mxu1 }
 0x870   : > { %11786 = vst [vmem:[#allocation40_spill] sm:$0xff] %v9205_v57  ;;  %v3053_v62 = vmul.f32 %v9169_v54, %v2970_v40  ;;  %v9225_v30 = vmax.f32 %v3099_v50, 0.0  ;;  %v3100_v15 = vadd.f32 %v9171_v58, %v3052_v10 }
 0x871   : > { %v2972_v31 = vpop.f32.mrf.mxu1 }
 0x872   : > { %3699 = vrot.lane.b32.xlu1 %v9177_v48, %s11754_s30  ;;  %3129 = vrot.lane.b32.xlu0 %v9181_v56, %s7096_s27  ;;  %11787 = vst [vmem:[#allocation71_spill] sm:$0xff] %v9225_v30  ;;  %v3101_v7 = vadd.f32 %v9173_v5, %v3053_v62  ;;  %v3054_v59 = vmul.f32 %v9169_v54, %v2972_v31  ;;  %v9256_v8 = vmax.f32 %v3100_v15, 0.0 }
 0x873   : > { %v2976_v54 = vpop.f32.mrf.mxu1 }
 0x874   : > { %v9232_v26 = vmax.f32 %v3101_v7, 0.0  ;;  %11789 = vst [vmem:[#allocation11_spill] sm:$0xff] %v9256_v8  ;;  %v3102_v53 = vadd.f32 %v9173_v5, %v3054_v59  ;;  %v3055_v5 = vmul.f32 %v9167_v34, %v2976_v54  ;;  %v11476_v7 = vmov 16  }
 0x875   : > { %v2978_v58 = vpop.f32.mrf.mxu1  ;;  %6891 = vset.pattern.permute.xlu1 %v11476_v7 }
 0x876   : > { %3511 = vrot.lane.b32.xlu1 %v9177_v48, %s7101_s9  ;;  %3701 = vrot.lane.b32.xlu0 %v9181_v56, %s11754_s30  ;;  %11788 = vst [vmem:[#allocation19_spill] sm:$0xff] %v9232_v26  ;;  %v9263_v19 = vmax.f32 %v3102_v53, 0.0  ;;  %v3103_v38 = vadd.f32 %v9175_v60, %v3055_v5  ;;  %v3056_v3 = vmul.f32 %v9167_v34, %v2978_v58  ;;  %v11478_v53 = vmov 17  }
 0x877   : > { %v2982_v1 = vpop.f32.mrf.mxu1  ;;  %6894 = vset.pattern.permute.xlu0 %v11478_v53 }
 0x878   : > { %11790 = vst [vmem:[#allocation41_spill] sm:$0xff] %v9263_v19  ;;  %v3057_v55 = vmul.f32 %v9161_v4, %v2982_v1  ;;  %v9288_v0 = vmax.f32 %v3103_v38, 0.0  ;;  %v3104_v42 = vadd.f32 %v9175_v60, %v3056_v3 }
 0x879   : > { %v2984_v45 = vpop.f32.mrf.mxu1 }
 0x87a   : > { %3379 = vrot.lane.b32.xlu1 %v9177_v48, %s7098_s29  ;;  %3513 = vrot.lane.b32.xlu0 %v9181_v56, %s7101_s9  ;;  %v3105_v35 = vadd.f32 %v9165_v44, %v3057_v55  ;;  %v3058_v24 = vmul.f32 %v9161_v4, %v2984_v45  ;;  %v9320_v36 = vmax.f32 %v3104_v42, 0.0 }
 0x87c   : > { %v9295_v43 = vmax.f32 %v3105_v35, 0.0  ;;  %v3106_v34 = vadd.f32 %v9165_v44, %v3058_v24  ;;  %v2988_v44 = vpop.f32.mrf.mxu1 }
 0x87d   : > { %v3059_v37 = vmul.f32 %v9155_v63, %v2988_v44 }
 0x87e   : > { %3263 = vrot.lane.b32.xlu1 %v9199_v22, %s7097_s28  ;;  %3381 = vrot.lane.b32.xlu0 %v9181_v56, %s7098_s29  ;;  %v9327_v27 = vmax.f32 %v3106_v34, 0.0  ;;  %v2990_v52 = vpop.f32.mrf.mxu1 }
 0x87f   : > { %v3107_v10 = vadd.f32 %v9157_v21, %v3059_v37  ;;  %v3060_v34 = vmul.f32 %v9155_v63, %v2990_v52 }
 0x880   : > { %v2994_v62 = vpop.f32.mrf.mxu1 }
 0x881   : > { %v3061_v59 = vmul.f32 %v9163_v25, %v2994_v62  ;;  %v9372_v54 = vmax.f32 %v3107_v10, 0.0  ;;  %v3108_v10 = vadd.f32 %v9157_v21, %v3060_v34 }
 0x882   : > { %3143 = vrot.lane.b32.xlu1 %v9199_v22, %s7096_s27  ;;  %3265 = vrot.lane.b32.xlu0 %v9205_v57, %s7097_s28  ;;  %v2996_v62 = vpop.f32.mrf.mxu1 }
 0x883   : > { %v3109_v1 = vadd.f32 %v9159_v46, %v3061_v59  ;;  %v3062_v17 = vmul.f32 %v9163_v25, %v2996_v62  ;;  %v9428_v63 = vmax.f32 %v3108_v10, 0.0 }
 0x885   : > { %v9387_v35 = vmax.f32 %v3109_v1, 0.0  ;;  %11801 = vst [vmem:[#allocation28_spill] sm:$0xff] %v9428_v63  ;;  %v3110_v21 = vadd.f32 %v9159_v46, %v3062_v17 }
 0x886   : > { %3715 = vrot.lane.b32.xlu1 %v9199_v22, %s11754_s30  ;;  %3145 = vrot.lane.b32.xlu0 %v9205_v57, %s7096_s27 }
 0x887   : > { %v9443_v62 = vmax.f32 %v3110_v21, 0.0 }
 0x889   : > { %11804 = vst [vmem:[#allocation29_spill] sm:$0xff] %v9443_v62 }
 0x88a   : > { %3527 = vrot.lane.b32.xlu1 %v9199_v22, %s7101_s9  ;;  %3717 = vrot.lane.b32.xlu0 %v9205_v57, %s11754_s30 }
 0x88e   : > { %3395 = vrot.lane.b32.xlu1 %v9199_v22, %s7098_s29  ;;  %3529 = vrot.lane.b32.xlu0 %v9205_v57, %s7101_s9 }
 0x892   : > { %3251 = vrot.lane.b32.xlu1 %v9225_v30, %s7097_s28  ;;  %3397 = vrot.lane.b32.xlu0 %v9205_v57, %s7098_s29 }
 0x896   : > { %3131 = vrot.lane.b32.xlu1 %v9225_v30, %s7096_s27  ;;  %3253 = vrot.lane.b32.xlu0 %v9232_v26, %s7097_s28 }
 0x89a   : > { %3703 = vrot.lane.b32.xlu1 %v9225_v30, %s11754_s30  ;;  %3133 = vrot.lane.b32.xlu0 %v9232_v26, %s7096_s27 }
 0x89e   : > { %3515 = vrot.lane.b32.xlu1 %v9225_v30, %s7101_s9  ;;  %3705 = vrot.lane.b32.xlu0 %v9232_v26, %s11754_s30 }
 0x8a2   : > { %3383 = vrot.lane.b32.xlu1 %v9225_v30, %s7098_s29  ;;  %3517 = vrot.lane.b32.xlu0 %v9232_v26, %s7101_s9 }
 0x8a6   : > { %3967 = vrot.lane.b32.xlu1 %v9225_v30, %s7104_s12  ;;  %3385 = vrot.lane.b32.xlu0 %v9232_v26, %s7098_s29 }
 0x8aa   : > { %3267 = vrot.lane.b32.xlu1 %v9256_v8, %s7097_s28  ;;  %3969 = vrot.lane.b32.xlu0 %v9232_v26, %s7104_s12 }
 0x8ae   : > { %3147 = vrot.lane.b32.xlu1 %v9256_v8, %s7096_s27  ;;  %3269 = vrot.lane.b32.xlu0 %v9263_v19, %s7097_s28 }
 0x8b2   : > { %3719 = vrot.lane.b32.xlu1 %v9256_v8, %s11754_s30  ;;  %3149 = vrot.lane.b32.xlu0 %v9263_v19, %s7096_s27 }
 0x8b6   : > { %3531 = vrot.lane.b32.xlu1 %v9256_v8, %s7101_s9  ;;  %3721 = vrot.lane.b32.xlu0 %v9263_v19, %s11754_s30 }
 0x8ba   : > { %3399 = vrot.lane.b32.xlu1 %v9256_v8, %s7098_s29  ;;  %3533 = vrot.lane.b32.xlu0 %v9263_v19, %s7101_s9 }
 0x8be   : > { %3983 = vrot.lane.b32.xlu1 %v9256_v8, %s7104_s12  ;;  %3401 = vrot.lane.b32.xlu0 %v9263_v19, %s7098_s29 }
 0x8c2   : > { %3255 = vrot.lane.b32.xlu1 %v9288_v0, %s7097_s28  ;;  %3985 = vrot.lane.b32.xlu0 %v9263_v19, %s7104_s12 }
 0x8c6   : > { %3135 = vrot.lane.b32.xlu1 %v9288_v0, %s7096_s27  ;;  %3257 = vrot.lane.b32.xlu0 %v9295_v43, %s7097_s28 }
 0x8ca   : > { %3707 = vrot.lane.b32.xlu1 %v9288_v0, %s11754_s30  ;;  %3137 = vrot.lane.b32.xlu0 %v9295_v43, %s7096_s27 }
 0x8ce   : > { %3519 = vrot.lane.b32.xlu1 %v9288_v0, %s7101_s9  ;;  %3709 = vrot.lane.b32.xlu0 %v9295_v43, %s11754_s30 }
 0x8d2   : > { %3387 = vrot.lane.b32.xlu1 %v9288_v0, %s7098_s29  ;;  %3521 = vrot.lane.b32.xlu0 %v9295_v43, %s7101_s9 }
 0x8d6   : > { %3971 = vrot.lane.b32.xlu1 %v9288_v0, %s7104_s12  ;;  %3389 = vrot.lane.b32.xlu0 %v9295_v43, %s7098_s29 }
 0x8da   : > { %3271 = vrot.lane.b32.xlu1 %v9320_v36, %s7097_s28  ;;  %3973 = vrot.lane.b32.xlu0 %v9295_v43, %s7104_s12 }
 0x8dc   : > { %v9329_v60 = vpop.permute.xlu1 %3247 }
 0x8de   : > { %3151 = vrot.lane.b32.xlu1 %v9320_v36, %s7096_s27  ;;  %3273 = vrot.lane.b32.xlu0 %v9327_v27, %s7097_s28 }
 0x8e0   : > { %v9335_v4 = vpop.permute.xlu0 %3249  ;;  %v9337_v12 = vpop.permute.xlu1 %3127 }
 0x8e2   : > { %3723 = vrot.lane.b32.xlu1 %v9320_v36, %s11754_s30  ;;  %3153 = vrot.lane.b32.xlu0 %v9327_v27, %s7096_s27 }
 0x8e4   : > { %v9343_v20 = vpop.permute.xlu0 %3129  ;;  %v9345_v33 = vpop.permute.xlu1 %3699 }
 0x8e6   : > { %3535 = vrot.lane.b32.xlu1 %v9320_v36, %s7101_s9  ;;  %3725 = vrot.lane.b32.xlu0 %v9327_v27, %s11754_s30 }
 0x8e8   : > { %v9352_v40 = vpop.permute.xlu0 %3701  ;;  %v9354_v50 = vpop.permute.xlu1 %3511 }
 0x8e9   : > { %11791 = vst [vmem:[#allocation42_spill] sm:$0xff] %v9352_v40  ;;  %11792 = vst [vmem:[#allocation33_spill] sm:$0xff] %v9354_v50 }
 0x8ea   : > { %3403 = vrot.lane.b32.xlu1 %v9320_v36, %s7098_s29  ;;  %3537 = vrot.lane.b32.xlu0 %v9327_v27, %s7101_s9 }
 0x8ec   : > { %v9362_v31 = vpop.permute.xlu0 %3513  ;;  %v9364_v15 = vpop.permute.xlu1 %3379 }
 0x8ed   : > { %11793 = vst [vmem:[#allocation20_spill] sm:$0xff] %v9362_v31  ;;  %11794 = vst [vmem:[#allocation21_spill] sm:$0xff] %v9364_v15 }
 0x8ee   : > { %3987 = vrot.lane.b32.xlu1 %v9320_v36, %s7104_s12  ;;  %3405 = vrot.lane.b32.xlu0 %v9327_v27, %s7098_s29 }
 0x8f0   : > { %v9374_v58 = vpop.permute.xlu0 %3381  ;;  %v9376_v5 = vpop.permute.xlu1 %3263 }
 0x8f1   : > { %11795 = vst [vmem:[#allocation63_spill] sm:$0xff] %v9374_v58 }
 0x8f2   : > { %3259 = vrot.lane.b32.xlu1 %v9372_v54, %s7097_s28  ;;  %3989 = vrot.lane.b32.xlu0 %v9327_v27, %s7104_s12 }
 0x8f4   : > { %v9383_v38 = vpop.permute.xlu0 %3265  ;;  %v9385_v55 = vpop.permute.xlu1 %3143 }
 0x8f6   : > { %3139 = vrot.lane.b32.xlu1 %v9372_v54, %s7096_s27  ;;  %3261 = vrot.lane.b32.xlu0 %v9387_v35, %s7097_s28 }
 0x8f8   : > { %v9393_v3 = vpop.permute.xlu0 %3145  ;;  %v9395_v45 = vpop.permute.xlu1 %3715 }
 0x8fa   : > { %3711 = vrot.lane.b32.xlu1 %v9372_v54, %s11754_s30  ;;  %3141 = vrot.lane.b32.xlu0 %v9387_v35, %s7096_s27 }
 0x8fc   : > { %v9401_v42 = vpop.permute.xlu0 %3717  ;;  %v9403_v24 = vpop.permute.xlu1 %3527 }
 0x8fd   : > { %11796 = vst [vmem:[#allocation64_spill] sm:$0xff] %v9401_v42  ;;  %11797 = vst [vmem:[#allocation49_spill] sm:$0xff] %v9403_v24  ;;  %v11841_v24 = vmov 16  }
 0x8fe   : > { %3523 = vrot.lane.b32.xlu1 %v9372_v54, %s7101_s9  ;;  %3713 = vrot.lane.b32.xlu0 %v9387_v35, %s11754_s30 }
 0x900   : > { %v9410_v44 = vpop.permute.xlu0 %3529  ;;  %v9412_v37 = vpop.permute.xlu1 %3395 }
 0x901   : > { %11798 = vst [vmem:[#allocation50_spill] sm:$0xff] %v9410_v44  ;;  %11799 = vst [vmem:[#allocation55_spill] sm:$0xff] %v9412_v37 }
 0x902   : > { %3391 = vrot.lane.b32.xlu1 %v9372_v54, %s7098_s29  ;;  %3525 = vrot.lane.b32.xlu0 %v9387_v35, %s7101_s9 }
 0x904   : > { %v9419_v59 = vpop.permute.xlu0 %3397  ;;  %v9421_v1 = vpop.permute.xlu1 %3251 }
 0x905   : > { %11800 = vst [vmem:[#allocation56_spill] sm:$0xff] %v9419_v59 }
 0x906   : > { %3975 = vrot.lane.b32.xlu1 %v9372_v54, %s7104_s12  ;;  %3393 = vrot.lane.b32.xlu0 %v9387_v35, %s7098_s29 }
 0x908   : > { %v9430_v52 = vpop.permute.xlu0 %3253  ;;  %v9432_v32 = vpop.permute.xlu1 %3131 }
 0x909   : > { %11802 = vst [vmem:[#allocation15_spill] sm:$0xff] %v9432_v32 }
 0x90a   : > { %3275 = vrot.lane.b32.xlu1 %v9428_v63, %s7097_s28  ;;  %3977 = vrot.lane.b32.xlu0 %v9387_v35, %s7104_s12 }
 0x90c   : > { %v9439_v25 = vpop.permute.xlu0 %3133  ;;  %v9441_v34 = vpop.permute.xlu1 %3703 }
 0x90d   : > { %11803 = vst [vmem:[#allocation16_spill] sm:$0xff] %v9441_v34 }
 0x90e   : > { %3963 = vrot.lane.b32.xlu1 %v9177_v48, %s7104_s12  ;;  %3277 = vrot.lane.b32.xlu0 %v9443_v62, %s7097_s28 }
 0x910   : > { %v9449_v10 = vpop.permute.xlu0 %3705  ;;  %v9451_v17 = vpop.permute.xlu1 %3515 }
 0x911   : > { %11805 = vst [vmem:[#allocation69_spill] sm:$0xff] %v9449_v10  ;;  %11806 = vst [vmem:[#allocation70_spill] sm:$0xff] %v9451_v17 }
 0x912   : > { %3155 = vrot.lane.b32.xlu1 %v9428_v63, %s7096_s27  ;;  %3965 = vrot.lane.b32.xlu0 %v9181_v56, %s7104_s12 }
 0x914   : > { %v9457_v46 = vpop.permute.xlu0 %3517  ;;  %v9459_v21 = vpop.permute.xlu1 %3383 }
 0x915   : > { %11807 = vst [vmem:[#allocation67_spill] sm:$0xff] %v9457_v46  ;;  %11808 = vst [vmem:[#allocation68_spill] sm:$0xff] %v9459_v21 }
 0x916   : > { %3727 = vrot.lane.b32.xlu1 %v9428_v63, %s11754_s30  ;;  %3981 = vrot.lane.b32.xlu0 %v9205_v57, %s7104_s12 }
 0x918   : > { %v9465_v18 = vpop.permute.xlu0 %3385  ;;  %v9467_v49 = vpop.permute.xlu1 %3967 }
 0x919   : > { %11809 = vst [vmem:[#allocation23_spill] sm:$0xff] %v9465_v18  ;;  %11810 = vst [vmem:[#allocation72_spill] sm:$0xff] %v9467_v49 }
 0x91a   : > { %3539 = vrot.lane.b32.xlu1 %v9428_v63, %s7101_s9  ;;  %3845 = vrot.lane.b32.xlu0 %v9387_v35, %s7103_s11 }
 0x91c   : > { %v9473_v7 = vpop.permute.xlu0 %3969  ;;  %v9475_v53 = vpop.permute.xlu1 %3267 }
 0x91d   : > { %11811 = vst [vmem:[#allocation12_spill] sm:$0xff] %v9473_v7 }
 0x91e   : > { %3407 = vrot.lane.b32.xlu1 %v9428_v63, %s7098_s29  ;;  %3157 = vrot.lane.b32.xlu0 %v9443_v62, %s7096_s27 }
 0x920   : > { %v9481_v39 = vpop.permute.xlu0 %3269  ;;  %v9483_v21 = vpop.permute.xlu1 %3147 }
 0x921   : > { %11812 = vst [vmem:[#allocation73_spill] sm:$0xff] %v9483_v21 }
 0x922   : > { %3991 = vrot.lane.b32.xlu1 %v9428_v63, %s7104_s12  ;;  %4109 = vrot.lane.b32.xlu0 %v9387_v35, %s7105_s13 }
 0x924   : > { %v9489_v49 = vpop.permute.xlu0 %3149  ;;  %v9491_v7 = vpop.permute.xlu1 %3719 }
 0x925   : > { %11813 = vst [vmem:[#allocation24_spill] sm:$0xff] %v9491_v7 }
 0x926   : > { %3979 = vrot.lane.b32.xlu1 %v9199_v22, %s7104_s12  ;;  %3841 = vrot.lane.b32.xlu0 %v9295_v43, %s7103_s11 }
 0x928   : > { %v9497_v18 = vpop.permute.xlu0 %3721  ;;  %v9499_v59 = vpop.permute.xlu1 %3531 }
 0x929   : > { %11814 = vst [vmem:[#allocation74_spill] sm:$0xff] %v9497_v18  ;;  %11815 = vst [vmem:[#allocation13_spill] sm:$0xff] %v9499_v59 }
 0x92a   : > { %3843 = vrot.lane.b32.xlu1 %v9372_v54, %s7103_s11  ;;  %3729 = vrot.lane.b32.xlu0 %v9443_v62, %s11754_s30 }
 0x92c   : > { %v9505_v58 = vpop.permute.xlu0 %3533  ;;  %v9507_v15 = vpop.permute.xlu1 %3399 }
 0x92d   : > { %11816 = vst [vmem:[#allocation75_spill] sm:$0xff] %v9505_v58  ;;  %11817 = vst [vmem:[#allocation17_spill] sm:$0xff] %v9507_v15 }
 0x92e   : > { %3859 = vrot.lane.b32.xlu1 %v9428_v63, %s7103_s11  ;;  %3541 = vrot.lane.b32.xlu0 %v9443_v62, %s7101_s9 }
 0x930   : > { %v9513_v37 = vpop.permute.xlu0 %3401  ;;  %v9515_v31 = vpop.permute.xlu1 %3983 }
 0x931   : > { %11818 = vst [vmem:[#allocation31_spill] sm:$0xff] %v9513_v37  ;;  %11819 = vst [vmem:[#allocation26_spill] sm:$0xff] %v9515_v31 }
 0x932   : > { %4107 = vrot.lane.b32.xlu1 %v9372_v54, %s7105_s13  ;;  %3857 = vrot.lane.b32.xlu0 %v9327_v27, %s7103_s11 }
 0x934   : > { %v9521_v44 = vpop.permute.xlu0 %3985  ;;  %v9523_v17 = vpop.permute.xlu1 %3255 }
 0x935   : > { %11820 = vst [vmem:[#allocation14_spill] sm:$0xff] %v9521_v44 }
 0x936   : > { %4123 = vrot.lane.b32.xlu1 %v9428_v63, %s7105_s13  ;;  %4105 = vrot.lane.b32.xlu0 %v9295_v43, %s7105_s13 }
 0x938   : > { %v9529_v15 = vpop.permute.xlu0 %3257  ;;  %v9531_v37 = vpop.permute.xlu1 %3135 }
 0x93a   : > { %3839 = vrot.lane.b32.xlu1 %v9288_v0, %s7103_s11  ;;  %4121 = vrot.lane.b32.xlu0 %v9327_v27, %s7105_s13 }
 0x93c   : > { %v9537_v31 = vpop.permute.xlu0 %3137  ;;  %v9539_v44 = vpop.permute.xlu1 %3707 }
 0x93d   : > { %11821 = vst [vmem:[#allocation10_spill] sm:$0xff] %v9539_v44 }
 0x93e   : > { %3855 = vrot.lane.b32.xlu1 %v9320_v36, %s7103_s11  ;;  %3409 = vrot.lane.b32.xlu0 %v9443_v62, %s7098_s29 }
 0x940   : > { %v9545_v63 = vpop.permute.xlu0 %3709  ;;  %v9547_v59 = vpop.permute.xlu1 %3519 }
 0x941   : > { %11822 = vst [vmem:[#allocation22_spill] sm:$0xff] %v9545_v63  ;;  %11823 = vst [vmem:[#allocation25_spill] sm:$0xff] %v9547_v59 }
 0x942   : > { %4103 = vrot.lane.b32.xlu1 %v9288_v0, %s7105_s13  ;;  %3837 = vrot.lane.b32.xlu0 %v9232_v26, %s7103_s11 }
 0x944   : > { %v9553_v46 = vpop.permute.xlu0 %3521  ;;  %v9555_v58 = vpop.permute.xlu1 %3387 }
 0x945   : > { %11824 = vst [vmem:[#allocation27_spill] sm:$0xff] %v9553_v46  ;;  %11825 = vst [vmem:[#allocation30_spill] sm:$0xff] %v9555_v58 }
 0x946   : > { %4119 = vrot.lane.b32.xlu1 %v9320_v36, %s7105_s13  ;;  %3853 = vrot.lane.b32.xlu0 %v9263_v19, %s7103_s11 }
 0x948   : > { %v9564_v59 = vpop.permute.xlu0 %3389  ;;  %v9566_v63 = vpop.permute.xlu1 %3971 }
 0x949   : > { %11826 = vst [vmem:[#allocation32_spill] sm:$0xff] %v9564_v59  ;;  %11827 = vst [vmem:[#allocation34_spill] sm:$0xff] %v9566_v63 }
 0x94a   : > { %3835 = vrot.lane.b32.xlu1 %v9225_v30, %s7103_s11  ;;  %3993 = vrot.lane.b32.xlu0 %v9443_v62, %s7104_s12 }
 0x94c   : > { %v9572_v58 = vpop.permute.xlu0 %3973  ;;  %v9574_v46 = vpop.permute.xlu1 %3271 }
 0x94d   : > { %11828 = vst [vmem:[#allocation35_spill] sm:$0xff] %v9572_v58 }
 0x94e   : > { %3851 = vrot.lane.b32.xlu1 %v9256_v8, %s7103_s11  ;;  %4101 = vrot.lane.b32.xlu0 %v9232_v26, %s7105_s13 }
 0x950   : > { %v9580_v59 = vpop.permute.xlu0 %3273  ;;  %v9582_v63 = vpop.permute.xlu1 %3151 }
 0x952   : > { %4099 = vrot.lane.b32.xlu1 %v9225_v30, %s7105_s13  ;;  %4117 = vrot.lane.b32.xlu0 %v9263_v19, %s7105_s13 }
 0x954   : > { %v9588_v6 = vpop.permute.xlu0 %3153  ;;  %v9590_v58 = vpop.permute.xlu1 %3723 }
 0x955   : > { %11829 = vst [vmem:[#allocation36_spill] sm:$0xff] %v9590_v58 }
 0x956   : > { %4115 = vrot.lane.b32.xlu1 %v9256_v8, %s7105_s13  ;;  %3833 = vrot.lane.b32.xlu0 %v9181_v56, %s7103_s11 }
 0x958   : > { %v9596_v44 = vpop.permute.xlu0 %3725  ;;  %v9598_v18 = vpop.permute.xlu1 %3535 }
 0x959   : > { %11830 = vst [vmem:[#allocation66_spill] sm:$0xff] %v9596_v44  ;;  %11831 = vst [vmem:[#allocation65_spill] sm:$0xff] %v9598_v18  ;;  %v6947_v18 = vld [vmem:[%s11320_s5 + $0xc] ss:$20 sps:$4 sm:$0xff]  }
 0x95a   : > { %3831 = vrot.lane.b32.xlu1 %v9177_v48, %s7103_s11  ;;  %3861 = vrot.lane.b32.xlu0 %v9443_v62, %s7103_s11 }
 0x95b   : > { %4901 = vmatprep.mubr.bf16.mxu1 %v6947_v18 }
 0x95c   : > { %v9604_v10 = vpop.permute.xlu0 %3537  ;;  %v9606_v7 = vpop.permute.xlu1 %3403 }
 0x95d   : > { %11832 = vst [vmem:[#allocation37_spill] sm:$0xff] %v9604_v10  ;;  %11833 = vst [vmem:[#allocation9_spill] sm:$0xff] %v9606_v7 }
 0x95e   : > { %3847 = vrot.lane.b32.xlu1 %v9199_v22, %s7103_s11  ;;  %4125 = vrot.lane.b32.xlu0 %v9443_v62, %s7105_s13 }
 0x960   : > { %v9612_v58 = vpop.permute.xlu0 %3405  ;;  %v9614_v44 = vpop.permute.xlu1 %3987 }
 0x961   : > { %11834 = vst [vmem:[#allocation45_spill] sm:$0xff] %v9612_v58  ;;  %11835 = vst [vmem:[#allocation46_spill] sm:$0xff] %v9614_v44 }
 0x962   : > { %4095 = vrot.lane.b32.xlu1 %v9177_v48, %s7105_s13  ;;  %3849 = vrot.lane.b32.xlu0 %v9205_v57, %s7103_s11 }
 0x964   : > { %v9623_v7 = vpop.permute.xlu0 %3989  ;;  %v3260_v10 = vpop.permute.xlu1 %3259 }
 0x965   : > { %11836 = vst [vmem:[#allocation43_spill] sm:$0xff] %v9623_v7  ;;  %v11838_v7 = vmov 17  }
 0x966   : > { %4111 = vrot.lane.b32.xlu1 %v9199_v22, %s7105_s13  ;;  %4097 = vrot.lane.b32.xlu0 %v9181_v56, %s7105_s13  ;;  %v6278_v22 = vld [vmem:[%s11316_s1 + $0x10] sm:$0x3] }
 0x967   : > { %v9750_v8 = vrot.slane %v6278_v22, %v7579_v47 }
 0x968   : > { %v9629_v44 = vpop.permute.xlu1 %3139  ;;  %v3262_v58 = vpop.permute.xlu0 %3261 }
 0x96a   : > { %5055 = vperm.xlu1 %6891, %v9012_v28   ;;  %4113 = vrot.lane.b32.xlu0 %v9205_v57, %s7105_s13 }
 0x96c   : > { %v9634_v62 = vpop.permute.xlu1 %3711  ;;  %v9636_v34 = vpop.permute.xlu0 %3141 }
 0x96d   : > { %11837 = vst [vmem:[#allocation44_spill] sm:$0xff] %v9634_v62 }
 0x96e   : > { %6892 = vset.pattern.permute.xlu1 %v11838_v7  ;;  %5096 = vperm.xlu0 %6894, %v9028_v13  }
 0x96f   : > { %5104 = vperm.xlu1 %6892, %v9012_v28  }
 0x970   : > { %v9641_v18 = vpop.permute.xlu1 %3523  ;;  %v9643_v50 = vpop.permute.xlu0 %3713 }
 0x971   : > { %11839 = vst [vmem:[#allocation47_spill] sm:$0xff] %v9641_v18  ;;  %11840 = vst [vmem:[#allocation48_spill] sm:$0xff] %v9643_v50  ;;  %v6269_v50 = vld [vmem:[%s11316_s1 + $0xe] sm:$0x3] }
 0x972   : > { %6895 = vset.pattern.permute.xlu0 %v11841_v24 }
 0x973   : > { %5108 = vperm.xlu1 %6892, %v9021_v23   ;;  %5060 = vperm.xlu0 %6895, %v9021_v23  }
 0x974   : > { %v9648_v32 = vpop.permute.xlu1 %3391  ;;  %v9650_v62 = vpop.permute.xlu0 %3525 }
 0x975   : > { %11842 = vst [vmem:[#allocation51_spill] sm:$0xff] %v9648_v32  ;;  %11843 = vst [vmem:[#allocation52_spill] sm:$0xff] %v9650_v62 }
 0x977   : > { %6893 = vset.pattern.permute.xlu1 %v11841_v24  ;;  %5045 = vperm.xlu0 %6895, %v9028_v13   ;;  %v6304_v13 = vld [vmem:[%s11316_s1 + $0x18] sm:$0x3] }
 0x978   : > { %5050 = vperm.xlu1 %6893, %v9041_v2   ;;  %v9655_v28 = vpop.permute.xlu1 %3975  ;;  %v9657_v18 = vpop.permute.xlu0 %3393 }
 0x979   : > { %11844 = vst [vmem:[#allocation53_spill] sm:$0xff] %v9655_v28  ;;  %11845 = vst [vmem:[#allocation54_spill] sm:$0xff] %v9657_v18  ;;  %v9671_v28 = vrot.slane %v6269_v50, %v7579_v47  ;;  %v3284_v18 = vsel %vm803_vm10, %v9529_v15, %v9580_v59 }
 0x97b   : > { %5040 = vperm.xlu0 %6895, %v9035_v16   ;;  %v9694_v16 = vrot.slane %v6304_v13, %v7579_v47 }
 0x97c   : > { %6896 = vset.pattern.permute.xlu1 %v11838_v7  ;;  %v3276_v23 = vpop.permute.xlu1 %3275  ;;  %v9664_v32 = vpop.permute.xlu0 %3977 }
 0x97d   : > { %11846 = vst [vmem:[#allocation57_spill] sm:$0xff] %v9664_v32  ;;  %5100 = vperm.xlu1 %6896, %v9041_v2   ;;  %v9682_v2 = vrot.slane %v6269_v50, %v7581_v51  ;;  %v3285_v62 = vsel %vm803_vm10, %v3260_v10, %v3276_v23  ;;  %v3293_v21 = vsel %vm803_vm10, %v3276_v23, %v3260_v10  ;;  %v6287_v50 = vld [vmem:[%s11316_s1 + $0x16] sm:$0x3] }
 0x97e   : > { %v9697_v32 = vrot.slane %v6304_v13, %v7581_v51  ;;  %v3283_v10 = vsel %vm803_vm10, %v9523_v17, %v9574_v46  ;;  %v3292_v13 = vsel %vm803_vm10, %v9580_v59, %v9529_v15  ;;  %v3319_v42 = vmul.f32 %v9671_v28, %v3293_v21 }
 0x97f   : > { %5025 = vperm.xlu0 %6895, %v9047_v29   ;;  %v3318_v48 = vmul.f32 %v9682_v2, %v3284_v18  ;;  %v3320_v57 = vmul.f32 %v9682_v2, %v3285_v62  ;;  %v9727_v18 = vrot.slane %v6287_v50, %v7579_v47  ;;  %v9730_v30 = vrot.slane %v6287_v50, %v7581_v51 }
 0x980   : > { %v9689_v40 = vpop.permute.xlu1 %3963  ;;  %v3278_v23 = vpop.permute.xlu0 %3277  ;;  %v3316_v62 = vmul.f32 %v9682_v2, %v3283_v10  ;;  %v3317_v19 = vmul.f32 %v9671_v28, %v3292_v13  ;;  %v3280_v10 = vsel %vm803_vm10, %v9335_v4, %v9383_v38 }
 0x981   : > { %11847 = vst [vmem:[#allocation58_spill] sm:$0xff] %v9689_v40  ;;  %6897 = vset.pattern.permute.xlu1 %v11841_v24  ;;  %v3286_v56 = vsel %vm803_vm10, %v3262_v58, %v3278_v23  ;;  %v3294_v40 = vsel %vm803_vm10, %v3278_v23, %v3262_v58  ;;  %v3282_v58 = vsel %vm803_vm10, %v9430_v52, %v9481_v39 }
 0x982   : > { %5035 = vperm.xlu1 %6897, %v9059_v41   ;;  %v3321_v15 = vmul.f32 %v9671_v28, %v3294_v40  ;;  %v3322_v59 = vmul.f32 %v9682_v2, %v3286_v56  ;;  %v3291_v56 = vsel %vm803_vm10, %v9574_v46, %v9523_v17  ;;  %v3281_v40 = vsel %vm803_vm10, %v9421_v1, %v9475_v53 }
 0x983   : > { %6900 = vset.pattern.permute.xlu0 %v11838_v7  ;;  %v6557_v17 = vpack.c.bf16 %v3318_v48, %v3316_v62  ;;  %v3279_v46 = vsel %vm803_vm10, %v9329_v60, %v9376_v5  ;;  %v3287_v48 = vsel %vm803_vm10, %v9376_v5, %v9329_v60  ;;  %v3312_v13 = vmul.f32 %v9682_v2, %v3281_v40 }
 0x984   : > { %v9737_v21 = vpop.permute.xlu1 %3155  ;;  %v6558_v50 = vpack.c.bf16 %v3321_v15, %v3319_v42  ;;  %5080 = vperm.xlu0 %6900, %v9047_v29   ;;  %v9747_v23 = vpop.permute.xlu0 %3965  ;;  %v6559_v26 = vpack.c.bf16 %v3322_v59, %v3320_v57  ;;  %v3290_v29 = vsel %vm803_vm10, %v9481_v39, %v9430_v52  ;;  %v3314_v57 = vmul.f32 %v9682_v2, %v3282_v58  ;;  %v9807_v15 = vld [vmem:[%s11318_s3] sm:$0xf]  ;;  %v11889_v42 = vld [vmem:[#allocation65_spill] sm:$0xff] }
 0x985   : > { %v3288_v39 = vsel %vm803_vm10, %v9383_v38, %v9335_v4  ;;  %v3289_v52 = vsel %vm803_vm10, %v9475_v53, %v9421_v1  ;;  %v3159_v38 = vsel %vm773_vm9, %v9337_v12, %v9385_v55  ;;  %v3168_v60 = vsel %vm773_vm9, %v9393_v3, %v9343_v20 }
 0x986   : > { %6898 = vset.pattern.permute.xlu1 %v11838_v7  ;;  %4796 = vmatprep.subr.bf16.mxu0 %v6559_v26  ;;  %v3315_v26 = vmul.f32 %v9671_v28, %v3291_v56  ;;  %v3313_v53 = vmul.f32 %v9671_v28, %v3290_v29  ;;  %v11849_v1 = vmov 2   ;;  %v3309_v59 = vmul.f32 %v9671_v28, %v3288_v39 }
 0x987   : > { %5088 = vperm.xlu1 %6898, %v9059_v41   ;;  %4797 = vmatpush1.bf16.msra.mxu0 %v6558_v50  ;;  %v3310_v58 = vmul.f32 %v9682_v2, %v3280_v10  ;;  %v3167_v40 = vsel %vm773_vm9, %v9385_v55, %v9337_v12  ;;  %v6555_v56 = vpack.c.bf16 %v3314_v57, %v3312_v13  ;;  %v11890_v10 = vld [vmem:[#allocation25_spill] sm:$0xff] }
 0x988   : > { %v9779_v41 = vpop.permute.xlu1 %3727  ;;  %5240 = vrot.lane.b32.xlu0 %v11752_v11, %s11848_s16  ;;  %v9792_v4 = vpop.permute.xlu0 %3981  ;;  %4798 = vmatprep.subr.bf16.mxu0 %v6557_v17  ;;  %v6556_v5 = vpack.c.bf16 %v3317_v19, %v3315_v26  ;;  %v7001_v19 = vld [vmem:[%s11317_s2 + $0x18] sm:$0xff]  ;;  %v3307_v62 = vmul.f32 %v9671_v28, %v3287_v48  ;;  %v9820_v50 = vrot.slane %v6278_v22, %v7581_v51 }
 0x989   : > { %6903 = vset.pattern.permute.xlu0 %v11849_v1  ;;  %v3311_v29 = vmul.f32 %v9671_v28, %v3289_v52  ;;  %v3308_v12 = vmul.f32 %v9682_v2, %v3279_v46  ;;  %v3160_v55 = vsel %vm773_vm9, %v9343_v20, %v9393_v3  ;;  %v9833_v57 = vmul.f32 %v3168_v60, %v11757_v9  ;;  %v5016_v28 = vld [vmem:[%s11317_s2 + $0x8] sm:$0xff] }
 0x98a   : > { %v9842_v39 = vmul.f32 %v3167_v40, %v11757_v9  ;;  %v9845_v2 = vmul.f32 %v3159_v38, %v11758_v14  ;;  %v3739_v20 = vsel %vm11851_vm0, %v9395_v45, %v9345_v33  ;;  %v6552_v46 = vpack.c.bf16 %v3309_v59, %v3307_v62 }
 0x98b   : > { %5092 = vperm.xlu1 %6898, %v7001_v19   ;;  %4799 = vmatpush1.bf16.msra.mxu0 %v6556_v5  ;;  %v6554_v3 = vpack.c.bf16 %v3313_v53, %v3311_v29  ;;  %v9855_v26 = vsel %vm11852_vm3, %v9345_v33, %v9395_v45  ;;  %v3164_v48 = vsel %vm773_vm9, %v9537_v31, %v9588_v6  ;;  %v11853_v1 = vmov 3   ;;  %vm11872_vm3 = vmmov %vm11851_vm0 }
 0x98c   : > { %v9823_v17 = vpop.permute.xlu1 %3539  ;;  %5289 = vperm.xlu0 %6903, %v9807_v15   ;;  %v9836_v22 = vpop.permute.xlu0 %3845  ;;  %4800 = vmatprep.subr.bf16.mxu0 %v6555_v56  ;;  %v6553_v52 = vpack.c.bf16 %v3310_v58, %v3308_v12  ;;  %v9863_v13 = vmul.f32 %v3160_v55, %v11758_v14  ;;  %v3165_v38 = vsel %vm773_vm9, %v9629_v44, %v9737_v21  ;;  %v11894_v12 = vld [vmem:[#allocation27_spill] sm:$0xff] }
 0x98d   : > { %11850 = vst [vmem:[#allocation59_spill] sm:$0xff] %v9836_v22  ;;  %v3173_v33 = vsel %vm773_vm9, %v9737_v21, %v9629_v44  ;;  %v9878_v53 = vmul.f32 %v9697_v32, %v3739_v20  ;;  %v3163_v5 = vsel %vm773_vm9, %v9531_v37, %v9582_v63  ;;  %v3172_v44 = vsel %vm773_vm9, %v9588_v6, %v9537_v31 }
 0x98e   : > { %v3186_v21 = vmul.f32 %v3164_v48, %v11758_v14  ;;  %v3187_v19 = vmul.f32 %v3173_v33, %v11757_v9  ;;  %v3188_v56 = vmul.f32 %v3165_v38, %v11758_v14  ;;  %v3162_v6 = vsel %vm773_vm9, %v9439_v25, %v9489_v49  ;;  %v11858_v38 = vld [vmem:[#allocation73_spill] sm:$0xff]  ;;  %v11859_v33 = vld [vmem:[#allocation15_spill] sm:$0xff] }
 0x98f   : > { %6899 = vset.pattern.permute.xlu1 %v11841_v24  ;;  %4801 = vmatpush1.bf16.msra.mxu0 %v6554_v3  ;;  %v3171_v55 = vsel %vm773_vm9, %v9582_v63, %v9531_v37  ;;  %v3184_v20 = vmul.f32 %v3163_v5, %v11758_v14  ;;  %v3185_v37 = vmul.f32 %v3172_v44, %v11757_v9  ;;  %v11544_v63 = vmov 4  }
 0x990   : > { %5030 = vperm.xlu1 %6899, %v5016_v28   ;;  %v9873_v45 = vpop.permute.xlu1 %3407  ;;  %6904 = vset.pattern.permute.xlu0 %v11853_v1  ;;  %v3158_v59 = vpop.permute.xlu0 %3157  ;;  %v3161_v1 = vsel %vm773_vm9, %v11859_v33, %v11858_v38  ;;  %v3182_v5 = vmul.f32 %v3162_v6, %v11758_v14  ;;  %v11864_v6 = vld [vmem:[#allocation16_spill] sm:$0xff] }
 0x991   : > { %4802 = vmatprep.subr.bf16.mxu0 %v6553_v52  ;;  %v3166_v58 = vsel %vm773_vm9, %v9636_v34, %v3158_v59  ;;  %v3174_v40 = vsel %vm773_vm9, %v3158_v59, %v9636_v34  ;;  %5317 = vperm.xlu0 %6904, %v9807_v15   ;;  %v3170_v34 = vsel %vm773_vm9, %v9489_v49, %v9439_v25  ;;  %v11855_v25 = vld [vmem:[#allocation64_spill] sm:$0xff] }
 0x992   : > { %v3189_v62 = vmul.f32 %v3174_v40, %v11757_v9  ;;  %v3190_v31 = vmul.f32 %v3166_v58, %v11758_v14  ;;  %v6549_v59 = vpack.c.bf16 %v3186_v21, %v3184_v20  ;;  %v3181_v44 = vmul.f32 %v3170_v34, %v11757_v9  ;;  %v11865_v20 = vld [vmem:[#allocation24_spill] sm:$0xff] }
 0x993   : > { %4803 = vmatpush1.bf16.msra.mxu0 %v6552_v46  ;;  %v11856_v46 = vld [vmem:[#allocation42_spill] sm:$0xff]  ;;  %v3183_v40 = vmul.f32 %v3171_v55, %v11757_v9  ;;  %v3180_v21 = vmul.f32 %v3161_v1, %v11758_v14  ;;  %v11545_v34 = vmov 0   ;;  %v11871_v1 = vld [vmem:[#allocation36_spill] sm:$0xff] }
 0x994   : > { %6901 = vset.pattern.permute.xlu1 %v11838_v7  ;;  %v9910_v29 = vpop.permute.xlu1 %3991  ;;  %v6550_v3 = vpack.c.bf16 %v3189_v62, %v3187_v19  ;;  %v9919_v48 = vpop.permute.xlu0 %4109  ;;  %v6551_v49 = vpack.c.bf16 %v3190_v31, %v3188_v56  ;;  %v9925_v52 = vsel %vm11857_vm6, %v11856_v46, %v11855_v25  ;;  %v3740_v58 = vsel %vm11860_vm15, %v11855_v25, %v11856_v46  ;;  %v11861_v56 = vld [vmem:[#allocation49_spill] sm:$0xff]  ;;  %v11869_v46 = vld [vmem:[#allocation74_spill] sm:$0xff]  ;;  %vm11873_vm6 = vmmov %vm11863_vm11 }
 0x995   : > { %11854 = vst [vmem:[#allocation60_spill] sm:$0xff] %v9919_v48  ;;  %5084 = vperm.xlu1 %6901, %v5016_v28   ;;  %6905 = vset.pattern.permute.xlu0 %v11544_v63  ;;  %v3169_v28 = vsel %vm773_vm9, %v11858_v38, %v11859_v33  ;;  %v11862_v62 = vld [vmem:[#allocation33_spill] sm:$0xff]  ;;  %v6548_v33 = vpack.c.bf16 %v3185_v37, %v3183_v40  ;;  %v11870_v14 = vld [vmem:[#allocation10_spill] sm:$0xff]  ;;  %vm11874_vm15 = vmmov %vm11851_vm0 }
 0x996   : > { %5345 = vperm.xlu0 %6905, %v9807_v15   ;;  %4804 = vmatprep.subr.bf16.mxu0 %v6551_v49  ;;  %v9951_v31 = vsel %vm11863_vm11, %v11862_v62, %v11861_v56  ;;  %v3741_v49 = vsel %vm11866_vm14, %v11865_v20, %v11864_v6  ;;  %v3179_v55 = vmul.f32 %v3169_v28, %v11757_v9  ;;  %v11547_v28 = vmov 5   ;;  %vm11875_vm11 = vmmov %vm11851_vm0 }
 0x997   : > { %4805 = vmatpush1.bf16.msra.mxu0 %v6550_v3  ;;  %v11868_v3 = vld [vmem:[#allocation69_spill] sm:$0xff]  ;;  %v3743_v63 = vsel %vm11872_vm3, %v11871_v1, %v11870_v14  ;;  %v9978_v9 = vsel %vm11873_vm6, %v11861_v56, %v11862_v62  ;;  %v9984_v37 = vsel %vm11874_vm15, %v11864_v6, %v11865_v20  ;;  %v6547_v40 = vpack.c.bf16 %v3182_v5, %v3180_v21  ;;  %vm11877_vm14 = vmmov %vm11851_vm0  ;;  %v11878_v21 = vld [vmem:[#allocation44_spill] sm:$0xff] }
 0x998   : > { %v9945_v19 = vpop.permute.xlu1 %3979  ;;  %v9958_v25 = vpop.permute.xlu0 %3841  ;;  %4806 = vmatprep.subr.bf16.mxu0 %v6549_v59  ;;  %v3742_v38 = vsel %vm11851_vm0, %v11869_v46, %v11868_v3  ;;  %v9972_v59 = vmul.f32 %v9697_v32, %v3740_v58  ;;  %v9988_v58 = vmul.f32 %v9697_v32, %v3741_v49  ;;  %v3734_v56 = vsel %vm11875_vm11, %v11868_v3, %v11869_v46  ;;  %v11880_v3 = vld [vmem:[#allocation66_spill] sm:$0xff]  ;;  %vm11881_vm3 = vmmov %vm11851_vm0 }
 0x999   : > { %11867 = vst [vmem:[#allocation61_spill] sm:$0xff] %v9958_v25  ;;  %6902 = vset.pattern.permute.xlu1 %v11545_v34  ;;  %v6546_v34 = vpack.c.bf16 %v3181_v44, %v3179_v55  ;;  %v9998_v6 = vmul.f32 %v9697_v32, %v3742_v38  ;;  %v3735_v5 = vsel %vm11877_vm14, %v11870_v14, %v11871_v1  ;;  %v11879_v55 = vld [vmem:[#allocation22_spill] sm:$0xff]  ;;  %vm11882_vm6 = vmmov %vm11851_vm0 }
 0x99a   : > { %5235 = vperm.xlu1 %6902, %v9807_v15   ;;  %6906 = vset.pattern.permute.xlu0 %v11547_v28  ;;  %v3768_v44 = vmul.f32 %v9697_v32, %v3743_v63  ;;  %v3737_v20 = vsel %vm11851_vm0, %v11878_v21, %v9779_v41  ;;  %v3744_v46 = vsel %vm11881_vm3, %v11880_v3, %v11879_v55  ;;  %vm11884_vm15 = vmmov %vm11851_vm0 }
 0x99b   : > { %5373 = vperm.xlu0 %6906, %v9807_v15   ;;  %4807 = vmatpush1.bf16.msra.mxu0 %v6548_v33  ;;  %v3745_v38 = vsel %vm11882_vm6, %v9779_v41, %v11878_v21  ;;  %v11883_v33 = vld [vmem:[#allocation48_spill] sm:$0xff]  ;;  %vm11885_vm11 = vmmov %vm11851_vm0 }
 0x99c   : > { %v9995_v62 = vpop.permute.xlu1 %3843  ;;  %v3730_v49 = vpop.permute.xlu0 %3729  ;;  %4808 = vmatprep.subr.bf16.mxu0 %v6547_v40  ;;  %vm11886_vm14 = vmmov %vm11851_vm0  ;;  %v11887_v40 = vld [vmem:[#allocation47_spill] sm:$0xff]  ;;  %vm11888_vm0 = vcmp.lt.s32.totalorder %v7574_v61, 1 }
 0x99d   : > { %11876 = vst [vmem:[#allocation62_spill] sm:$0xff] %v9995_v62  ;;  %v3738_v63 = vsel %vm11884_vm15, %v11883_v33, %v3730_v49  ;;  %v3746_v14 = vsel %vm11885_vm11, %v3730_v49, %v11883_v33  ;;  %v3736_v1 = vsel %vm11886_vm14, %v11879_v55, %v11880_v3  ;;  %v3557_v41 = vsel %vm11888_vm0, %v9823_v17, %v11887_v40  ;;  %vm11891_vm3 = vmmov %vm11888_vm0 }
 0x99e   : > { %5212 = vrot.lane.b32.xlu1 %v11752_v11, %s7088_s18  ;;  %v3773_v21 = vmul.f32 %v9694_v16, %v3738_v63  ;;  %v3774_v28 = vmul.f32 %v9697_v32, %v3746_v14  ;;  %v3547_v49 = vsel %vm11891_vm3, %v11890_v10, %v11889_v42  ;;  %v3771_v33 = vmul.f32 %v9694_v16, %v3737_v20  ;;  %vm11892_vm6 = vmmov %vm11888_vm0  ;;  %v11893_v14 = vld [vmem:[#allocation37_spill] sm:$0xff] }
 0x99f   : > { %v3549_v55 = vsel %vm11892_vm6, %v11887_v40, %v9823_v17  ;;  %v11551_v3 = vmov 6   ;;  %4809 = vmatpush1.bf16.msra.mxu0 %v6546_v34  ;;  %v3770_v63 = vmul.f32 %v9697_v32, %v3744_v46  ;;  %vm11895_vm15 = vmmov %vm11888_vm0  ;;  %v3772_v20 = vmul.f32 %v9697_v32, %v3745_v38  ;;  %v11900_v32 = vld [vmem:[#allocation8_spill] sm:$0xff] }
 0x9a0   : > { %6907 = vset.pattern.permute.xlu0 %v11551_v3  ;;  %v10045_v60 = vpop.permute.xlu1 %3859  ;;  %v3548_v7 = vsel %vm11895_vm15, %v11894_v12, %v11893_v14  ;;  %v3542_v24 = vpop.permute.xlu0 %3541  ;;  %v11896_v17 = vpack.c.bf16 %v9863_v13, %v9845_v2  ;;  %v3583_v34 = vmul.f32 %v9727_v18, %v3557_v41  ;;  %v6590_v40 = vpack.c.bf16 %v3773_v21, %v3771_v33  ;;  %v11897_v3 = vld [vmem:[#allocation52_spill] sm:$0xff]  ;;  %vm11898_vm11 = vmmov %vm11888_vm0  ;;  %v11901_v41 = vld [vmem:[#allocation75_spill] sm:$0xff] }
 0x9a1   : > { %5401 = vperm.xlu0 %6907, %v9807_v15   ;;  %v3550_v46 = vsel %vm11898_vm11, %v11897_v3, %v3542_v24  ;;  %vm11899_vm14 = vmmov %vm11888_vm0  ;;  %v3584_v38 = vmul.f32 %v9730_v30, %v3549_v55  ;;  %v6591_v13 = vpack.c.bf16 %v3774_v28, %v3772_v20  ;;  %v11902_v21 = vld [vmem:[#allocation67_spill] sm:$0xff]  ;;  %v11905_v20 = vmov 7  }
 0x9a2   : > { %4810 = vmatprep.subr.bf16.mxu0 %v11896_v17  ;;  %v3558_v48 = vsel %vm11899_vm14, %v3542_v24, %v11897_v3  ;;  %5214 = vrot.lane.b32.xlu1 %v11900_v32, %s7088_s18  ;;  %v3586_v2 = vmul.f32 %v9730_v30, %v3550_v46  ;;  %v3546_v33 = vsel %vm11888_vm0, %v11902_v21, %v11901_v41  ;;  %vm11903_vm3 = vmmov %vm11888_vm0  ;;  %s12052_s18 = smov 95  }
 0x9a3   : > { %v3585_v22 = vmul.f32 %v9727_v18, %v3558_v48  ;;  %v3769_v17 = vmul.f32 %v9694_v16, %v3736_v1  ;;  %v3556_v24 = vsel %vm11903_vm3, %v11893_v14, %v11894_v12  ;;  %v3582_v3 = vmul.f32 %v9730_v30, %v3548_v7  ;;  %4869 = vmatprep.subr.bf16.mxu1 %v6591_v13  ;;  %vm11906_vm6 = vmmov %vm11888_vm0  ;;  %v11908_v12 = vld [vmem:[#allocation70_spill] sm:$0xff] }
 0x9a4   : > { %v11904_v48 = vpack.c.bf16 %v9833_v57, %v9842_v39  ;;  %v10082_v55 = vpop.permute.xlu1 %4107  ;;  %v10085_v46 = vpop.permute.xlu0 %3857  ;;  %v6589_v1 = vpack.c.bf16 %v3770_v63, %v3768_v44  ;;  %v6575_v25 = vpack.c.bf16 %v3586_v2, %v3584_v38  ;;  %v3767_v62 = vmul.f32 %v9694_v16, %v3735_v5  ;;  %4870 = vmatpush1.bf16.msra.mxu1 %v6590_v40  ;;  %v11907_v39 = vld [vmem:[#allocation13_spill] sm:$0xff]  ;;  %vm11909_vm15 = vmmov %vm11888_vm0  ;;  %v11911_v14 = vld [vmem:[#allocation50_spill] sm:$0xff] }
 0x9a5   : > { %v6574_v28 = vpack.c.bf16 %v3585_v22, %v3583_v34  ;;  %6908 = vset.pattern.permute.xlu0 %v11905_v20  ;;  %v3555_v7 = vsel %vm11906_vm6, %v11889_v42, %v11890_v10  ;;  %v3580_v57 = vmul.f32 %v9730_v30, %v3547_v49  ;;  %v3765_v22 = vmul.f32 %v9694_v16, %v3734_v56  ;;  %vm11910_vm11 = vmmov %vm11888_vm0  ;;  %v11912_v34 = vld [vmem:[#allocation20_spill] sm:$0xff] }
 0x9a6   : > { %4811 = vmatpush1.bf16.msra.mxu0 %v11904_v48  ;;  %5429 = vperm.xlu0 %6908, %v9807_v15   ;;  %v3545_v44 = vsel %vm11909_vm15, %v11908_v12, %v11907_v39  ;;  %v3581_v63 = vmul.f32 %v9727_v18, %v3556_v24  ;;  %v3554_v42 = vsel %vm11910_vm11, %v11901_v41, %v11902_v21  ;;  %vm11913_vm14 = vmmov %vm11888_vm0  ;;  %vm11919_vm6 = vcmp.lt.s32.totalorder %v7574_v61, 15 }
 0x9a7   : > { %4871 = vmatprep.subr.bf16.mxu1 %v6589_v1  ;;  %5242 = vrot.lane.b32.xlu1 %v11900_v32, %s11848_s16  ;;  %v3578_v10 = vmul.f32 %v9730_v30, %v3546_v33  ;;  %v6588_v5 = vpack.c.bf16 %v3769_v17, %v3767_v62  ;;  %v6573_v56 = vpack.c.bf16 %v3582_v3, %v3580_v57  ;;  %vm11914_vm3 = vmmov %vm11888_vm0 }
 0x9a8   : > { %4812 = vmatprep.subr.bf16.mxu0 %v6575_v25  ;;  %v10107_v49 = vpop.permute.xlu1 %4123  ;;  %v3544_v40 = vsel %vm11913_vm14, %v11912_v34, %v11911_v14  ;;  %v3552_v38 = vsel %vm11888_vm0, %v11911_v14, %v11912_v34  ;;  %v3579_v2 = vmul.f32 %v9727_v18, %v3555_v7  ;;  %v10118_v13 = vpop.permute.xlu0 %4105  ;;  %v6587_v25 = vpack.c.bf16 %v9998_v6, %v9988_v58  ;;  %v10135_v58 = vld [vmem:[%s11316_s1 + $0x20] sm:$0x3]  ;;  %vm11921_vm15 = vmmov %vm11919_vm6  ;;  %v11924_v34 = vld [vmem:[#allocation63_spill] sm:$0xff] }
 0x9a9   : > { %v3763_v62 = vmul.f32 %v9694_v16, %v9984_v37  ;;  %v3553_v41 = vsel %vm11914_vm3, %v11907_v39, %v11908_v12  ;;  %v3576_v21 = vmul.f32 %v9730_v30, %v3545_v44  ;;  %4872 = vmatpush1.bf16.msra.mxu1 %v6588_v5  ;;  %v3761_v33 = vmul.f32 %v9694_v16, %v9925_v52  ;;  %vm11922_vm11 = vmmov %vm11919_vm6 }
 0x9aa   : > { %4813 = vmatpush2.bf16.msra.mxu0 %v6574_v28  ;;  %v3577_v17 = vmul.f32 %v9727_v18, %v3554_v42  ;;  %v6572_v37 = vpack.c.bf16 %v3581_v63, %v3579_v2  ;;  %4873 = vmatprep.subr.bf16.mxu1 %v6587_v25  ;;  %v7189_v6 = vmov 1   ;;  %v3574_v24 = vmul.f32 %v9730_v30, %v3544_v40  ;;  %v11917_v42 = vld [vmem:[#allocation55_spill] sm:$0xff]  ;;  %vm11923_vm14 = vmmov %vm11919_vm6  ;;  %v11925_v40 = vld [vmem:[#allocation56_spill] sm:$0xff] }
 0x9ab   : > { %4814 = vmatprep.subr.bf16.mxu0 %v6573_v56  ;;  %6909 = vset.pattern.permute.xlu0 %v7189_v6  ;;  %v6586_v3 = vpack.c.bf16 %v3765_v22, %v3763_v62  ;;  %v6571_v52 = vpack.c.bf16 %v3578_v10, %v3576_v21  ;;  %v3759_v28 = vmul.f32 %v9694_v16, %v9855_v26  ;;  %v11915_v16 = vld [vmem:[#allocation28_spill] sm:$0xff]  ;;  %v11916_v26 = vld [vmem:[#allocation29_spill] sm:$0xff]  ;;  %vm11926_vm0 = vmmov %vm11919_vm6 }
 0x9ac   : > { %5261 = vperm.xlu0 %6909, %v9807_v15   ;;  %5268 = vrot.lane.b32.xlu1 %v11752_v11, %s7089_s19  ;;  %v10141_v48 = vpop.permute.xlu1 %3839  ;;  %v3573_v20 = vmul.f32 %v9727_v18, %v3552_v38  ;;  %v3575_v1 = vmul.f32 %v9727_v18, %v3553_v41  ;;  %v10147_v7 = vpop.permute.xlu0 %4121  ;;  %v6585_v57 = vpack.c.bf16 %v9972_v59, %v9878_v53  ;;  %v11918_v10 = vld [vmem:[#allocation21_spill] sm:$0xff]  ;;  %v11928_v2 = vld [vmem:[#allocation32_spill] sm:$0xff]  ;;  %vm11929_vm3 = vmmov %vm11926_vm0 }
 0x9ad   : > { %v3572_v22 = vmul.f32 %v9730_v30, %v9951_v31  ;;  %v10155_v39 = vrot.slane %v10135_v58, %v7579_v47  ;;  %4874 = vmatpush1.bf16.msra.mxu1 %v6586_v3  ;;  %v6583_v12 = vpack.c.bf16 %v11916_v26, %v11915_v16  ;;  %v6584_v44 = vpack.c.bf16 %v3761_v33, %v3759_v28  ;;  %v11920_v30 = vld [vmem:[#allocation51_spill] sm:$0xff]  ;;  %v11927_v38 = vld [vmem:[#allocation45_spill] sm:$0xff]  ;;  %v11931_v21 = vld [vmem:[#allocation30_spill] sm:$0xff] }
 0x9ae   : > { %4815 = vmatpush2.bf16.msra.mxu0 %v6572_v37  ;;  %v3571_v63 = vmul.f32 %v9727_v18, %v9978_v9  ;;  %v3411_v53 = vsel %vm11919_vm6, %v11918_v10, %v11917_v42  ;;  %v6570_v59 = vpack.c.bf16 %v3577_v17, %v3575_v1  ;;  %4875 = vmatprep.subr.bf16.mxu1 %v6585_v57  ;;  %v11930_v41 = vld [vmem:[#allocation9_spill] sm:$0xff]  ;;  %vm11932_vm6 = vmmov %vm11926_vm0  ;;  %v11933_v17 = vld [vmem:[#allocation54_spill] sm:$0xff] }
 0x9af   : > { %4816 = vmatprep.subr.bf16.mxu0 %v6571_v52  ;;  %v3417_v31 = vsel %vm11921_vm15, %v11920_v30, %v9873_v45  ;;  %v3425_v5 = vsel %vm11922_vm11, %v9873_v45, %v11920_v30  ;;  %v6569_v18 = vpack.c.bf16 %v3574_v24, %v3572_v22  ;;  %v3419_v14 = vsel %vm11923_vm14, %v11917_v42, %v11918_v10  ;;  %vm11934_vm15 = vmmov %vm11926_vm0  ;;  %v10217_v22 = vld [vmem:[%s11317_s2] sm:$0xf] }
 0x9b0   : > { %5410 = vrot.lane.b32.xlu0 %v11900_v32, %s7097_s28  ;;  %5270 = vrot.lane.b32.xlu1 %v11900_v32, %s7089_s19  ;;  %v10177_v9 = vpop.permute.xlu1 %3855  ;;  %v6568_v56 = vpack.c.bf16 %v3573_v20, %v3571_v63  ;;  %v3420_v45 = vsel %vm11926_vm0, %v11925_v40, %v11924_v34  ;;  %v3416_v25 = vsel %vm11929_vm3, %v11928_v2, %v11927_v38  ;;  %v3410_v62 = vpop.permute.xlu0 %3409  ;;  %vm11935_vm11 = vmmov %vm11926_vm0 }
 0x9b1   : > { %v3415_v33 = vsel %vm11932_vm6, %v11931_v21, %v11930_v41  ;;  %4876 = vmatpush1.bf16.msra.mxu1 %v6584_v44  ;;  %v3418_v37 = vsel %vm11934_vm15, %v11933_v17, %v3410_v62  ;;  %v3426_v6 = vsel %vm11935_vm11, %v3410_v62, %v11933_v17  ;;  %v3451_v24 = vmul.f32 %v9750_v8, %v3425_v5  ;;  %vm11936_vm14 = vmmov %vm11926_vm0  ;;  %v11939_v44 = vld [vmem:[#allocation31_spill] sm:$0xff] }
 0x9b2   : > { %4817 = vmatpush2.bf16.msra.mxu0 %v6570_v59  ;;  %v3452_v3 = vmul.f32 %v9820_v50, %v3417_v31  ;;  %v3453_v52 = vmul.f32 %v9750_v8, %v3426_v6  ;;  %v3454_v28 = vmul.f32 %v9820_v50, %v3418_v37  ;;  %4877 = vmatprep.subr.bf16.mxu1 %v6583_v12  ;;  %v11938_v12 = vld [vmem:[#allocation23_spill] sm:$0xff]  ;;  %vm11940_vm3 = vmmov %vm11926_vm0  ;;  %v11949_v62 = vmov 9  }
 0x9b3   : > { %4818 = vmatprep.subr.bf16.mxu0 %v6569_v18  ;;  %v3412_v20 = vsel %vm11936_vm14, %v11924_v34, %v11925_v40  ;;  %v3424_v1 = vsel %vm11926_vm0, %v11927_v38, %v11928_v2  ;;  %v3450_v57 = vmul.f32 %v9820_v50, %v3416_v25  ;;  %v10225_v26 = vmul.f32 %v9750_v8, %v3419_v14  ;;  %vm11941_vm6 = vmmov %vm11926_vm0  ;;  %v11944_v34 = vld [vmem:[#allocation68_spill] sm:$0xff]  ;;  %v11945_v40 = vld [vmem:[#allocation17_spill] sm:$0xff] }
 0x9b4   : > { %355 = vperm.xlu0 %6909, %v10217_v22   ;;  %5296 = vrot.lane.b32.xlu1 %v11752_v11, %s11937_s25  ;;  %v10222_v16 = vpop.permute.xlu1 %4103  ;;  %v3422_v63 = vsel %vm11940_vm3, %v11939_v44, %v11938_v12  ;;  %v6566_v42 = vpack.c.bf16 %v3453_v52, %v3451_v24  ;;  %v10231_v10 = vpop.permute.xlu0 %3837  ;;  %v6567_v59 = vpack.c.bf16 %v3454_v28, %v3452_v3  ;;  %vm11942_vm15 = vmmov %vm11926_vm0  ;;  %v6313_v25 = vld [vmem:[%s11316_s1 + $0x1e] sm:$0x3] }
 0x9b5   : > { %v10234_v30 = vmul.f32 %v9750_v8, %v3420_v45  ;;  %v3414_v31 = vsel %vm11941_vm6, %v11938_v12, %v11939_v44  ;;  %v3423_v5 = vsel %vm11942_vm15, %v11930_v41, %v11931_v21  ;;  %v3448_v18 = vmul.f32 %v9820_v50, %v3415_v33  ;;  %vm11946_vm11 = vmmov %vm11926_vm0  ;;  %v11955_v44 = vld [vmem:[#allocation72_spill] sm:$0xff] }
 0x9b6   : > { %4819 = vmatpush2.bf16.msra.mxu0 %v6568_v56  ;;  %v11943_v56 = vpack.c.bf16 %v9387_v35, %v9372_v54  ;;  %v10249_v14 = vmul.f32 %v9820_v50, %v3412_v20  ;;  %v3421_v45 = vsel %vm11946_vm11, %v11945_v40, %v11944_v34  ;;  %v3449_v38 = vmul.f32 %v9750_v8, %v3424_v1  ;;  %vm11948_vm14 = vmmov %vm11926_vm0  ;;  %v11951_v20 = vld [vmem:[#allocation41_spill] sm:$0xff]  ;;  %v11952_v1 = vld [vmem:[#allocation11_spill] sm:$0xff] }
 0x9b7   : > { %v11947_v2 = vpack.c.bf16 %v9327_v27, %v9320_v36  ;;  %4820 = vmatprep.subr.bf16.mxu0 %v6567_v59  ;;  %v3413_v54 = vsel %vm11948_vm14, %v11944_v34, %v11945_v40  ;;  %v3445_v35 = vmul.f32 %v9750_v8, %v3422_v63  ;;  %v6565_v41 = vpack.c.bf16 %v3450_v57, %v3448_v18  ;;  %v11959_v59 = vld [vmem:[#allocation14_spill] sm:$0xff]  ;;  %v11964_v40 = vld [vmem:[#allocation35_spill] sm:$0xff] }
 0x9b8   : > { %4878 = vmatpush1.bf16.msra.mxu1 %v11943_v56  ;;  %6911 = vset.pattern.permute.xlu0 %v11949_v62  ;;  %v10270_v36 = vpop.permute.xlu1 %4119  ;;  %v3440_v27 = vmul.f32 %v9820_v50, %v3411_v53  ;;  %v3446_v21 = vmul.f32 %v9820_v50, %v3414_v31  ;;  %v3447_v33 = vmul.f32 %v9750_v8, %v3423_v5  ;;  %v10276_v17 = vpop.permute.xlu0 %3853  ;;  %vm11956_vm0 = vcmp.lt.s32.totalorder %v7574_v61, 112  ;;  %v11960_v31 = vld [vmem:[#allocation12_spill] sm:$0xff] }
 0x9b9   : > { %4879 = vmatprep.subr.bf16.mxu1 %v11947_v2  ;;  %5298 = vrot.lane.b32.xlu1 %v11900_v32, %s11937_s25  ;;  %v6560_v37 = vpack.c.bf16 %v10234_v30, %v10225_v26  ;;  %v3443_v6 = vmul.f32 %v9750_v8, %v3421_v45  ;;  %v10283_v24 = vrot.slane %v10135_v58, %v7581_v51  ;;  %v11954_v58 = vld [vmem:[#allocation26_spill] sm:$0xff]  ;;  %vm11958_vm3 = vmmov %vm11956_vm0  ;;  %v11963_v56 = vmov 10   ;;  %v11965_v45 = vld [vmem:[#allocation43_spill] sm:$0xff] }
 0x9ba   : > { %5485 = vperm.xlu0 %6911, %v9807_v15   ;;  %4821 = vmatpush2.bf16.msra.mxu0 %v6566_v42  ;;  %v11950_v53 = vpack.c.bf16 %v9295_v43, %v9288_v0  ;;  %v3444_v3 = vmul.f32 %v9820_v50, %v3413_v54  ;;  %v6564_v52 = vpack.c.bf16 %v3449_v38, %v3447_v33  ;;  %v11957_v43 = vld [vmem:[#allocation53_spill] sm:$0xff]  ;;  %vm11961_vm6 = vmmov %vm11956_vm0  ;;  %v11967_v2 = vld [vmem:[#allocation19_spill] sm:$0xff] }
 0x9bb   : > { %4822 = vmatprep.subr.bf16.mxu0 %v6565_v41  ;;  %v10290_v28 = vrot.slane %v6313_v25, %v7579_v47  ;;  %v11953_v57 = vpack.c.bf16 %v11951_v20, %v11952_v1  ;;  %v6561_v8 = vpack.c.bf16 %v10249_v14, %v3440_v27  ;;  %v6562_v12 = vpack.c.bf16 %v3445_v35, %v3443_v6  ;;  %vm11962_vm15 = vmmov %vm11956_vm0  ;;  %v11968_v54 = vld [vmem:[#allocation71_spill] sm:$0xff]  ;;  %v11972_v33 = vld [vmem:[#allocation40_spill] sm:$0xff] }
 0x9bc   : > { %4880 = vmatpush1.bf16.msra.mxu1 %v11950_v53  ;;  %v3997_v0 = vsel %vm11956_vm0, %v11955_v44, %v11954_v58  ;;  %v4009_v50 = vsel %vm11958_vm3, %v9910_v29, %v11957_v43  ;;  %v10305_v63 = vrot.slane %v6313_v25, %v7581_v51  ;;  %v10309_v42 = vpop.permute.xlu1 %3835  ;;  %v3998_v5 = vsel %vm11961_vm6, %v11960_v31, %v11959_v59  ;;  %v3994_v14 = vpop.permute.xlu0 %3993  ;;  %vm11966_vm11 = vmmov %vm11956_vm0  ;;  %v11970_v25 = vld [vmem:[#allocation57_spill] sm:$0xff]  ;;  %v11973_v6 = vld [vmem:[#allocation39_spill] sm:$0xff] }
 0x9bd   : > { %4881 = vmatprep.subr.bf16.mxu1 %v11953_v57  ;;  %5324 = vrot.lane.b32.xlu1 %v11752_v11, %s7092_s23  ;;  %v4001_v18 = vsel %vm11962_vm15, %v11957_v43, %v9910_v29  ;;  %v6563_v34 = vpack.c.bf16 %v3446_v21, %v3444_v3  ;;  %v4008_v38 = vsel %vm11966_vm11, %v11965_v45, %v11964_v40  ;;  %vm11971_vm14 = vmmov %vm11956_vm0  ;;  %v11977_v20 = vld [vmem:[#allocation34_spill] sm:$0xff] }
 0x9be   : > { %6912 = vset.pattern.permute.xlu0 %v11963_v56  ;;  %4823 = vmatpush2.bf16.msra.mxu0 %v6564_v52  ;;  %v11969_v35 = vpack.c.bf16 %v11967_v2, %v11968_v54  ;;  %v4002_v29 = vsel %vm11971_vm14, %v11970_v25, %v3994_v14  ;;  %v4010_v62 = vsel %vm11956_vm0, %v3994_v14, %v11970_v25  ;;  %vm11975_vm3 = vmmov %vm11956_vm0  ;;  %v11978_v1 = vld [vmem:[#allocation46_spill] sm:$0xff] }
 0x9bf   : > { %5513 = vperm.xlu0 %6912, %v9807_v15   ;;  %v4036_v41 = vmul.f32 %v10283_v24, %v4009_v50  ;;  %v4037_v27 = vmul.f32 %v10155_v39, %v4002_v29  ;;  %v4038_v21 = vmul.f32 %v10283_v24, %v4010_v62  ;;  %4824 = vmatprep.subr.bf16.mxu0 %v6563_v34  ;;  %vm11976_vm6 = vmmov %vm11956_vm0  ;;  %v11981_v14 = vld [vmem:[#allocation58_spill] sm:$0xff] }
 0x9c0   : > { %4882 = vmatpush1.bf16.msra.mxu1 %v11969_v35  ;;  %v11974_v53 = vpack.c.bf16 %v11972_v33, %v11973_v6  ;;  %v4005_v3 = vsel %vm11975_vm3, %v11954_v58, %v11955_v44  ;;  %v4006_v52 = vsel %vm11976_vm6, %v11959_v59, %v11960_v31  ;;  %vm11979_vm15 = vmmov %vm11956_vm0  ;;  %v4035_v43 = vmul.f32 %v10155_v39, %v4001_v18  ;;  %v10355_v50 = vpop.permute.xlu1 %3851  ;;  %v10365_v59 = vpop.permute.xlu0 %4101  ;;  %v11983_v2 = vld [vmem:[#allocation18_spill] sm:$0xff] }
 0x9c1   : > { %v4007_v57 = vsel %vm11979_vm15, %v11978_v1, %v11977_v20  ;;  %5326 = vrot.lane.b32.xlu1 %v11900_v32, %s7092_s23  ;;  %v10358_v56 = vmul.f32 %v10155_v39, %v3997_v0  ;;  %vm11980_vm11 = vmmov %vm11956_vm0  ;;  %v4034_v44 = vmul.f32 %v10283_v24, %v4008_v38  ;;  %v6607_v31 = vpack.c.bf16 %v4038_v21, %v4036_v41  ;;  %v11984_v54 = vld [vmem:[#allocation38_spill] sm:$0xff] }
 0x9c2   : > { %4883 = vmatprep.subr.bf16.mxu1 %v11974_v53  ;;  %v4000_v58 = vsel %vm11980_vm11, %v11964_v40, %v11965_v45  ;;  %4825 = vmatpush2.bf16.msra.mxu0 %v6562_v12  ;;  %v10368_v18 = vmul.f32 %v10155_v39, %v3998_v5  ;;  %vm11982_vm14 = vmmov %vm11956_vm0  ;;  %v6606_v34 = vpack.c.bf16 %v4037_v27, %v4035_v43  ;;  %v11986_v40 = vmov 11   ;;  %v6331_v38 = vld [vmem:[%s11316_s1 + $0x22] sm:$0x3] }
 0x9c3   : > { %v3995_v0 = vsel %vm11982_vm14, %v11981_v14, %v9945_v19  ;;  %v11985_v35 = vpack.c.bf16 %v11983_v2, %v11984_v54  ;;  %6913 = vset.pattern.permute.xlu0 %v11986_v40  ;;  %v4030_v12 = vmul.f32 %v10283_v24, %v4006_v52  ;;  %v3999_v5 = vsel %vm11956_vm0, %v11977_v20, %v11978_v1  ;;  %vm11987_vm3 = vmmov %vm11956_vm0  ;;  %v6933_v6 = vld [vmem:[%s11320_s5] ss:$20 sps:$4 sm:$0xff]  }
 0x9c4   : > { %v4032_v45 = vmul.f32 %v10283_v24, %v4007_v57  ;;  %4826 = vmatprep.subr.bf16.mxu0 %v6561_v8  ;;  %5541 = vperm.xlu0 %6913, %v9807_v15   ;;  %v4033_v25 = vmul.f32 %v10155_v39, %v4000_v58  ;;  %v3996_v29 = vsel %vm11987_vm3, %v9747_v23, %v9792_v4  ;;  %vm11988_vm6 = vmmov %vm11956_vm0  ;;  %v10399_v41 = vpop.permute.xlu1 %4099  ;;  %v6936_v26 = vld [vmem:[%s11320_s5 + $0x2c] ss:$20 sps:$4 sm:$0xff]   ;;  %v11991_v52 = vmov 12  }
 0x9c5   : > { %4884 = vmatpush1.bf16.msra.mxu1 %v11985_v35  ;;  %v4003_v62 = vsel %vm11988_vm6, %v9945_v19, %v11981_v14  ;;  %5352 = vrot.lane.b32.xlu1 %v11752_v11, %s11989_s26  ;;  %v4028_v8 = vmul.f32 %v10283_v24, %v4005_v3  ;;  %vm11990_vm15 = vmmov %vm11956_vm0  ;;  %v10407_v21 = vmul.f32 %v10155_v39, %v3995_v0  ;;  %v10412_v19 = vpop.permute.xlu0 %4117  ;;  %v11992_v43 = vld [vmem:[#allocation62_spill] sm:$0xff]  ;;  %vm11993_vm11 = vcmp.lt.s32.totalorder %v7574_v61, 113  ;;  %v11997_v14 = vld [vmem:[#allocation61_spill] sm:$0xff] }
 0x9c6   : > { %4885 = vmatprep.subr.bf16.mxu1 %v6607_v31  ;;  %v4004_v27 = vsel %vm11990_vm15, %v9792_v4, %v9747_v23  ;;  %4827 = vmatpush2.bf16.msra.mxu0 %v6560_v37  ;;  %v6605_v33 = vpack.c.bf16 %v4034_v44, %v4032_v45  ;;  %v6602_v53 = vpack.c.bf16 %v10368_v18, %v10358_v56  ;;  %vm11994_vm14 = vmmov %vm11993_vm11  ;;  %v6938_v45 = vld [vmem:[%s11320_s5 + $0x28] ss:$20 sps:$4 sm:$0xff]  }
 0x9c7   : > { %v4031_v3 = vmul.f32 %v10155_v39, %v3999_v5  ;;  %v10421_v23 = vrot.slane %v6331_v38, %v7579_v47  ;;  %v10424_v4 = vrot.slane %v6331_v38, %v7581_v51  ;;  %v10430_v30 = vmul.f32 %v10155_v39, %v3996_v29  ;;  %vm11995_vm0 = vmmov %vm11993_vm11 }
 0x9c8   : > { %v4024_v37 = vmul.f32 %v10283_v24, %v4003_v62  ;;  %6914 = vset.pattern.permute.xlu0 %v11991_v52  ;;  %v6603_v20 = vpack.c.bf16 %v4030_v12, %v4028_v8  ;;  %v4026_v57 = vmul.f32 %v10283_v24, %v4004_v27  ;;  %v3869_v56 = vsel %vm11993_vm11, %v11992_v43, %v10045_v60  ;;  %v10442_v39 = vpop.permute.xlu1 %4115  ;;  %vm11996_vm3 = vmmov %vm11995_vm0  ;;  %v12005_v62 = vld [vmem:[#allocation59_spill] sm:$0xff] }
 0x9c9   : > { %4886 = vmatpush2.bf16.msra.mxu1 %v6606_v34  ;;  %v6604_v1 = vpack.c.bf16 %v4033_v25, %v4031_v3  ;;  %5549 = vperm.xlu0 %6914, %v9807_v15   ;;  %v6600_v58 = vpack.c.bf16 %v10430_v30, %v10407_v21  ;;  %v3877_v24 = vsel %vm11994_vm14, %v10045_v60, %v11992_v43  ;;  %v10458_v18 = vpop.permute.xlu0 %3833  ;;  %vm11998_vm6 = vmmov %vm11995_vm0  ;;  %vm12000_vm11 = vcmp.lt.s32.totalorder %v7574_v61, 111 }
 0x9ca   : > { %4887 = vmatprep.subr.bf16.mxu1 %v6605_v33  ;;  %5354 = vrot.lane.b32.xlu1 %v11900_v32, %s11989_s26  ;;  %v3867_v44 = vsel %vm11995_vm0, %v10141_v48, %v10177_v9  ;;  %v3875_v31 = vsel %vm11996_vm3, %v10177_v9, %v10141_v48  ;;  %v3868_v0 = vsel %vm11998_vm6, %v11997_v14, %v10085_v46  ;;  %vm11999_vm15 = vmmov %vm11995_vm0  ;;  %v12004_v38 = vmov 15   ;;  %s12051_s26 = smov 96  }
 0x9cb   : > { %4829 = vmatmul.mubr.bf16.vlgmr.msra.gmra.mxu0 %v6933_v6  ;;  %v3876_v60 = vsel %vm11999_vm15, %v10085_v46, %v11997_v14  ;;  %v4133_v34 = vsel %vm12000_vm11, %v10082_v55, %v10107_v49  ;;  %v10473_v48 = vmul.f32 %v10290_v28, %v3869_v56  ;;  %vm12001_vm14 = vmmov %vm12000_vm11  ;;  %v6601_v2 = vpack.c.bf16 %v4026_v57, %v4024_v37 }
 0x9cc   : > { %4838 = vmatprep.mubr.bf16.mxu0 %v6936_v26  ;;  %v4141_v9 = vsel %vm12001_vm14, %v10107_v49, %v10082_v55  ;;  %vm12002_vm0 = vmmov %vm12000_vm11  ;;  %v10488_v35 = vmul.f32 %v10290_v28, %v3867_v44  ;;  %v10491_v40 = vmul.f32 %v10305_v63, %v3875_v31  ;;  %v10497_v55 = vpop.permute.xlu1 %3831  ;;  %v3904_v49 = vmul.f32 %v10305_v63, %v3877_v24  ;;  %v12012_v24 = vld [vmem:[#allocation60_spill] sm:$0xff] }
 0x9cd   : > { %4888 = vmatpush2.bf16.msra.mxu1 %v6604_v1  ;;  %v4132_v46 = vsel %vm12002_vm0, %v10118_v13, %v10147_v7  ;;  %vm12003_vm3 = vmmov %vm12002_vm0  ;;  %5558 = vrot.lane.b32.xlu0 %v11900_v32, %s11754_s30  ;;  %v10501_v12 = vmul.f32 %v10290_v28, %v3868_v0  ;;  %v3862_v5 = vpop.permute.xlu0 %3861  ;;  %v4168_v25 = vmul.f32 %v10424_v4, %v4141_v9 }
 0x9ce   : > { %4889 = vmatprep.subr.bf16.mxu1 %v6603_v20  ;;  %v4140_v54 = vsel %vm12003_vm3, %v10147_v7, %v10118_v13  ;;  %5380 = vrot.lane.b32.xlu1 %v11752_v11, %s7096_s27  ;;  %v3902_v13 = vmul.f32 %v10305_v63, %v3876_v60  ;;  %v10505_v7 = vmul.f32 %v10421_v23, %v4133_v34  ;;  %vm12006_vm15 = vmmov %vm11998_vm6 }
 0x9cf   : > { %6917 = vset.pattern.permute.xlu0 %v12004_v38  ;;  %v10513_v29 = vmul.f32 %v10421_v23, %v4132_v46  ;;  %v3870_v8 = vsel %vm11998_vm6, %v12005_v62, %v3862_v5  ;;  %v3878_v27 = vsel %vm12006_vm15, %v3862_v5, %v12005_v62  ;;  %v4166_v21 = vmul.f32 %v10424_v4, %v4140_v54  ;;  %vm12007_vm11 = vmmov %vm12002_vm0  ;;  %v6941_v46 = vld [vmem:[%s11320_s5 + $0x50] ss:$20 sps:$4 sm:$0xff]  }
 0x9d0   : > { %v4139_v33 = vsel %vm12007_vm11, %v10270_v36, %v10222_v16  ;;  %v3905_v6 = vmul.f32 %v10290_v28, %v3870_v8  ;;  %v3906_v3 = vmul.f32 %v10305_v63, %v3878_v27  ;;  %v6596_v26 = vpack.c.bf16 %v10501_v12, %v10488_v35  ;;  %vm12008_vm14 = vmmov %vm12002_vm0  ;;  %v3848_v37 = vpop.permute.xlu1 %3847 }
 0x9d1   : > { %4890 = vmatpush2.bf16.msra.mxu1 %v6602_v53  ;;  %v6939_v53 = vld [vmem:[%s11320_s5 + $0x54] ss:$20 sps:$4 sm:$0xff]   ;;  %v4131_v30 = vsel %vm12008_vm14, %v10222_v16, %v10270_v36  ;;  %5584 = vrot.lane.b32.xlu0 %v11752_v11, %s7093_s24  ;;  %v6597_v52 = vpack.c.bf16 %v3902_v13, %v10491_v40  ;;  %vm12009_vm0 = vmmov %vm11998_vm6  ;;  %v4126_v36 = vpop.permute.xlu0 %4125  ;;  %v4164_v43 = vmul.f32 %v10424_v4, %v4139_v33 }
 0x9d2   : > { %4891 = vmatprep.subr.bf16.mxu1 %v6601_v2  ;;  %5382 = vrot.lane.b32.xlu1 %v11900_v32, %s7096_s27  ;;  %v3866_v20 = vsel %vm12009_vm0, %v10231_v10, %v10276_v17  ;;  %vm12010_vm3 = vmmov %vm12009_vm0  ;;  %v6599_v57 = vpack.c.bf16 %v3906_v3, %v3904_v49  ;;  %v6598_v56 = vpack.c.bf16 %v3905_v6, %v10473_v48  ;;  %s12031_s27 = smov 14  }
 0x9d3   : > { %v3874_v1 = vsel %vm12010_vm3, %v10276_v17, %v10231_v10  ;;  %vm12011_vm6 = vmmov %vm12009_vm0  ;;  %4839 = vmatmul.mubr.bf16.gmra.mxu0 %v6938_v45  ;;  %v4142_v10 = vsel %vm12007_vm11, %v4126_v36, %v12012_v24  ;;  %v6613_v13 = vpack.c.bf16 %v4166_v21, %v4164_v43  ;;  %v12021_v21 = vmov 8  }
 0x9d4   : > { %v3873_v16 = vsel %vm12011_vm6, %v10355_v50, %v10309_v42  ;;  %vm12013_vm15 = vmmov %vm12007_vm11  ;;  %v4170_v14 = vmul.f32 %v10424_v4, %v4142_v10  ;;  %4848 = vmatprep.mubr.bf16.mxu0 %v6939_v53  ;;  %v4096_v34 = vpop.permute.xlu1 %4095  ;;  %v12027_v10 = vmov 13  }
 0x9d5   : > { %4892 = vmatpush2.bf16.msra.mxu1 %v6600_v58  ;;  %v4134_v44 = vsel %vm12013_vm15, %v12012_v24, %v4126_v36  ;;  %vm12014_vm14 = vmmov %vm12009_vm0  ;;  %v4163_v58 = vmul.f32 %v10421_v23, %v4131_v30  ;;  %v3896_v0 = vmul.f32 %v10305_v63, %v3873_v16  ;;  %5633 = vperm.xlu0 %6917, %v9807_v15   ;;  %v3850_v9 = vpop.permute.xlu0 %3849  ;;  %v6945_v24 = vld [vmem:[%s11320_s5 + $0x8] ss:$20 sps:$4 sm:$0xff]  }
 0x9d6   : > { %v3865_v17 = vsel %vm12014_vm14, %v10309_v42, %v10355_v50  ;;  %v4169_v31 = vmul.f32 %v10421_v23, %v4134_v44  ;;  %4893 = vmatprep.subr.bf16.mxu1 %v6599_v57  ;;  %vm12015_vm0 = vmmov %vm12007_vm11  ;;  %349 = vperm.xlu1 %6902, %v10217_v22   ;;  %v3897_v42 = vmul.f32 %v10290_v28, %v3866_v20 }
 0x9d7   : > { %v4137_v60 = vsel %vm12015_vm0, %v10442_v39, %v10399_v41  ;;  %vm12016_vm3 = vmmov %vm12015_vm0  ;;  %v6615_v2 = vpack.c.bf16 %v4170_v14, %v4168_v25  ;;  %v3898_v22 = vmul.f32 %v10305_v63, %v3874_v1  ;;  %v3895_v54 = vmul.f32 %v10290_v28, %v3865_v17 }
 0x9d8   : > { %v4138_v50 = vsel %vm12016_vm3, %v10412_v19, %v10365_v59  ;;  %v6614_v48 = vpack.c.bf16 %v4169_v31, %v10505_v7  ;;  %vm12017_vm6 = vmmov %vm12015_vm0  ;;  %v4160_v12 = vmul.f32 %v10424_v4, %v4137_v60  ;;  %v6942_v7 = vld [vmem:[%s11320_s5 + $0x7c] ss:$20 sps:$4 sm:$0xff]   ;;  %v4112_v25 = vpop.permute.xlu1 %4111  ;;  %v6612_v62 = vpack.c.bf16 %v10513_v29, %v4163_v58 }
 0x9d9   : > { %v4129_v35 = vsel %vm12017_vm6, %v10399_v41, %v10442_v39  ;;  %4894 = vmatpush2.bf16.msra.mxu1 %v6598_v56  ;;  %vm12018_vm15 = vmmov %vm12014_vm14  ;;  %4950 = vmatprep.subr.bf16.mxu0 %v6615_v2  ;;  %v4162_v41 = vmul.f32 %v10424_v4, %v4138_v50  ;;  %v3871_v39 = vsel %vm12014_vm14, %v3848_v37, %v10497_v55  ;;  %v4098_v38 = vpop.permute.xlu0 %4097  ;;  %v12028_v17 = vmov 0   ;;  %v6948_v31 = vld [vmem:[%s11320_s5 + $0x10] ss:$20 sps:$4 sm:$0xff]   ;;  %v6952_v50 = vld [vmem:[%s11320_s5 + $0x38] ss:$20 sps:$4 sm:$0xff]  }
 0x9da   : > { %v3872_v40 = vsel %vm12018_vm15, %v3850_v9, %v10458_v18  ;;  %vm12019_vm11 = vmmov %vm12015_vm0  ;;  %4895 = vmatprep.subr.bf16.mxu1 %v6597_v52  ;;  %5408 = vrot.lane.b32.xlu1 %v11752_v11, %s7097_s28  ;;  %v6594_v8 = vpack.c.bf16 %v3897_v42, %v3895_v54  ;;  %v4127_v29 = vsel %vm12017_vm6, %v4096_v34, %v4112_v25  ;;  %v6951_v58 = vld [vmem:[%s11320_s5 + $0x30] ss:$20 sps:$4 sm:$0xff]   ;;  %v6955_v2 = vld [vmem:[%s11320_s5 + $0x58] ss:$20 sps:$4 sm:$0xff]  }
 0x9db   : > { %v4130_v49 = vsel %vm12019_vm11, %v10365_v59, %v10412_v19  ;;  %4951 = vmatpush1.bf16.msra.mxu0 %v6614_v48  ;;  %v6595_v59 = vpack.c.bf16 %v3898_v22, %v3896_v0  ;;  %v4159_v19 = vmul.f32 %v10421_v23, %v4129_v35  ;;  %vm12020_vm0 = vmmov %vm12014_vm14  ;;  %v3894_v45 = vmul.f32 %v10305_v63, %v3872_v40  ;;  %v6957_v22 = vld [vmem:[%s11320_s5 + $0x84] ss:$20 sps:$4 sm:$0xff]  }
 0x9dc   : > { %v3864_v5 = vsel %vm12020_vm0, %v10458_v18, %v3850_v9  ;;  %4849 = vmatmul.mubr.bf16.gmra.mxu0 %v6941_v46  ;;  %4952 = vmatprep.subr.bf16.mxu0 %v6613_v13  ;;  %v4161_v27 = vmul.f32 %v10421_v23, %v4130_v49  ;;  %vm12022_vm3 = vmmov %vm12020_vm0  ;;  %v3892_v18 = vmul.f32 %v10305_v63, %v3871_v39  ;;  %v6944_v63 = vld [vmem:[%s11320_s5 + $0x78] ss:$20 sps:$4 sm:$0xff]   ;;  %vm4783_vm0 = vcmask 523264   ;;  %v6956_v49 = vld [vmem:[%s11320_s5 + $0x60] ss:$20 sps:$4 sm:$0xff]  }
 0x9dd   : > { %4896 = vmatpush2.bf16.msra.mxu1 %v6596_v26  ;;  %6910 = vset.pattern.permute.xlu1 %v12021_v21  ;;  %v3863_v33 = vsel %vm12022_vm3, %v10497_v55, %v3848_v37  ;;  %v6611_v6 = vpack.c.bf16 %v4162_v41, %v4160_v12  ;;  %v3893_v3 = vmul.f32 %v10290_v28, %v3864_v5  ;;  %vm12023_vm15 = vmmov %vm12017_vm6  ;;  %v4114_v30 = vpop.permute.xlu0 %4113  ;;  %v12024_v55 = vmov 16   ;;  %v6959_v41 = vld [vmem:[%s11320_s5 + $0x80] ss:$20 sps:$4 sm:$0xff]  }
 0x9de   : > { %4897 = vmatprep.subr.bf16.mxu1 %v6595_v59  ;;  %4858 = vmatprep.mubr.bf16.mxu0 %v6942_v7  ;;  %v4135_v53 = vsel %vm12023_vm15, %v4112_v25, %v4096_v34  ;;  %v6610_v26 = vpack.c.bf16 %v4161_v27, %v4159_v19  ;;  %v6593_v52 = vpack.c.bf16 %v3894_v45, %v3892_v18  ;;  %vm12025_vm11 = vmmov %vm12017_vm6  ;;  %v7190_v0 = vmov 18   ;;  %v6953_v34 = vld [vmem:[%s11320_s5 + $0x5c] ss:$20 sps:$4 sm:$0xff]   ;;  %v10741_v18 = vld [vmem:[%s11317_s2] sm:$0xf] }
 0x9df   : > { %5457 = vperm.xlu1 %6910, %v9807_v15   ;;  %4953 = vmatpush1.bf16.msra.mxu0 %v6612_v62  ;;  %v3891_v37 = vmul.f32 %v10290_v28, %v3863_v33  ;;  %v4128_v20 = vsel %vm12025_vm11, %v4098_v38, %v4114_v30  ;;  %vm12026_vm14 = vmmov %vm12017_vm6  ;;  %v4155_v16 = vmul.f32 %v10421_v23, %v4127_v29  ;;  %v7191_v9 = vmov 19   ;;  %v6960_v59 = vld [vmem:[%s11320_s5 + $0x88] ss:$20 sps:$4 sm:$0xff]  }
 0x9e0   : > { %4954 = vmatprep.subr.bf16.mxu0 %v6611_v6  ;;  %6918 = vset.pattern.permute.xlu0 %v12024_v55  ;;  %v4136_v1 = vsel %vm12026_vm14, %v4114_v30, %v4098_v38  ;;  %v4156_v36 = vmul.f32 %v10424_v4, %v4135_v53  ;;  %v4157_v57 = vmul.f32 %v10421_v23, %v4128_v20  ;;  %v6949_v23 = vld [vmem:[%s11320_s5 + $0x34] ss:$20 sps:$4 sm:$0xff]   ;;  %v7192_v40 = vmov 20  }
 0x9e1   : > { %4898 = vmatpush2.bf16.msra.mxu1 %v6594_v8  ;;  %5661 = vperm.xlu0 %6918, %v9807_v15   ;;  %v4158_v43 = vmul.f32 %v10424_v4, %v4136_v1  ;;  %v6592_v56 = vpack.c.bf16 %v3893_v3, %v3891_v37  ;;  %v12029_v4 = vmov 17   ;;  %v7193_v7 = vmov 21   ;;  %v6437_v1 = vld [vmem:[%s11316_s1 + $0x2] sm:$0x3] }
 0x9e2   : > { %4899 = vmatprep.subr.bf16.mxu1 %v6593_v52  ;;  %v6608_v28 = vpack.c.bf16 %v4157_v57, %v4155_v16  ;;  %v7194_v5 = vmov 22   ;;  %v7195_v25 = vmov 23   ;;  %v12039_v8 = vmov 14   ;;  %v5218_v16 = vld [vmem:[%s11316_s1] sm:$0x3] }
 0x9e3   : > { %5436 = vrot.lane.b32.xlu1 %v11752_v11, %s7098_s29  ;;  %4955 = vmatpush1.bf16.msra.mxu0 %v6610_v26  ;;  %v6609_v44 = vpack.c.bf16 %v4158_v43, %v4156_v36  ;;  %v7196_v21 = vmov 24   ;;  %v12041_v3 = vmov 6   ;;  %v12043_v26 = vmov 4  }
 0x9e4   : > { %4859 = vmatmul.mubr.bf16.gmra.mxu0 %v6944_v63  ;;  %6915 = vset.pattern.permute.xlu1 %v12027_v10  ;;  %v5251_v57 = vrot.slane %v6437_v1, %v7579_v47  ;;  %v5255_v43 = vrot.slane %v6437_v1, %v7581_v51  ;;  %vm12044_vm3 = vcmp.lt.s32.totalorder %v7574_v61, 33  ;;  %v5227_v10 = vrot.slane %v5218_v16, %v7581_v51 }
 0x9e5   : > { %4900 = vmatpush2.bf16.msra.mxu1 %v6592_v56  ;;  %4974 = vmatprep.mubr.bf16.mxu0 %v12028_v17  ;;  %v10656_v14 = vpop.permute.xlu1 %5055  ;;  %vm12045_vm6 = vmmov %vm12044_vm3  ;;  %vm12056_vm11 = vcmp.lt.s32.totalorder %v7574_v61, 14 }
 0x9e6   : > { %4956 = vmatprep.subr.bf16.mxu0 %v6609_v44  ;;  %6919 = vset.pattern.permute.xlu0 %v12029_v4  ;;  %12030 = vst [vmem:[#allocation64_spill] sm:$0xff] %v10656_v14  ;;  %v5223_v44 = vrot.slane %v5218_v16, %v7579_v47  ;;  %v6438_v4 = vld [vmem:[%s11316_s1 + $0x4] sm:$0x3]  ;;  %vm12057_vm14 = vmmov %vm12056_vm11 }
 0x9e7   : > { %5438 = vrot.lane.b32.xlu1 %v11900_v32, %s7098_s29  ;;  %4957 = vmatpush1.bf16.msra.mxu0 %v6608_v28 }
 0x9e8   : > { %4902 = vmatmul.mubr.bf16.vlgmr.msra.gmra.mxu1 %v6945_v24  ;;  %5689 = vperm.xlu0 %6919, %v9807_v15  }
 0x9e9   : > { %4911 = vmatprep.mubr.bf16.mxu1 %v6949_v23  ;;  %v10666_v60 = vpop.permute.xlu0 %5096 }
 0x9ea   : > { %12032 = vst [vmem:[#allocation42_spill] sm:$0xff] %v10666_v60  ;;  %v10672_v42 = vpop.permute.xlu1 %5104 }
 0x9eb   : > { %5464 = vrot.lane.b32.xlu1 %v11752_v11, %s12031_s27  ;;  %12033 = vst [vmem:[#allocation73_spill] sm:$0xff] %v10672_v42 }
 0x9ec   : > { %6432 = vmatmul.mubr.msk.bf16.vlgmr.msra.gmra.mxu0 %vm4783_vm0, %v6948_v31  ;;  %6920 = vset.pattern.permute.xlu0 %v7190_v0 }
 0x9ed   : > { %4984 = vmatprep.mubr.bf16.mxu0 %v12028_v17  ;;  %5717 = vperm.xlu0 %6920, %v9807_v15   ;;  %v7003_v15 = vld [vmem:[%s11318_s3] sm:$0xf] }
 0x9ee   : > { %v10680_v48 = vpop.permute.xlu1 %5108  ;;  %v10683_v46 = vpop.permute.xlu0 %5060 }
 0x9ef   : > { %5466 = vrot.lane.b32.xlu1 %v11900_v32, %s12031_s27  ;;  %12034 = vst [vmem:[#allocation15_spill] sm:$0xff] %v10680_v48  ;;  %12035 = vst [vmem:[#allocation49_spill] sm:$0xff] %v10683_v46  ;;  %s12048_s27 = smov 97  }
 0x9f0   : > { %4912 = vmatmul.mubr.bf16.gmra.mxu1 %v6951_v58 }
 0x9f1   : > { %4921 = vmatprep.mubr.bf16.mxu1 %v6953_v34  ;;  %6921 = vset.pattern.permute.xlu0 %v7191_v9 }
 0x9f2   : > { %5745 = vperm.xlu0 %6921, %v7003_v15   ;;  %v10698_v54 = vpop.permute.xlu0 %5045 }
 0x9f3   : > { %5492 = vrot.lane.b32.xlu1 %v11752_v11, %s7100_s8  ;;  %12036 = vst [vmem:[#allocation33_spill] sm:$0xff] %v10698_v54  ;;  %v10700_v35 = vpop.permute.xlu1 %5050 }
 0x9f4   : > { %6433 = vmatmul.mubr.msk.bf16.gmra.mxu0 %vm4783_vm0, %v6952_v50 }
 0x9f5   : > { %4994 = vmatprep.mubr.bf16.mxu0 %v12028_v17 }
 0x9f6   : > { %6922 = vset.pattern.permute.xlu0 %v7192_v40  ;;  %v10707_v12 = vpop.permute.xlu0 %5040 }
 0x9f7   : > { %5494 = vrot.lane.b32.xlu1 %v11900_v32, %s7100_s8  ;;  %5773 = vperm.xlu0 %6922, %v7003_v15  }
 0x9f8   : > { %4922 = vmatmul.mubr.bf16.gmra.mxu1 %v6955_v2  ;;  %v10711_v13 = vpop.permute.xlu1 %5100  ;;  %v5279_v2 = vrot.slane %v6438_v4, %v7579_v47 }
 0x9f9   : > { %4931 = vmatprep.mubr.bf16.mxu1 %v6957_v22  ;;  %12037 = vst [vmem:[#allocation16_spill] sm:$0xff] %v10711_v13  ;;  %v5283_v22 = vrot.slane %v6438_v4, %v7581_v51 }
 0x9fa   : > { %v10718_v39 = vpop.permute.xlu0 %5025 }
 0x9fb   : > { %5520 = vrot.lane.b32.xlu1 %v11752_v11, %s7101_s9  ;;  %6923 = vset.pattern.permute.xlu0 %v7193_v7 }
 0x9fc   : > { %6434 = vmatmul.mubr.msk.bf16.gmra.mxu0 %vm4783_vm0, %v6956_v49  ;;  %5801 = vperm.xlu0 %6923, %v7003_v15  }
 0x9fd   : > { %5004 = vmatprep.mubr.bf16.mxu0 %v12028_v17  ;;  %v10725_v19 = vpop.permute.xlu1 %5035 }
 0x9ff   : > { %5522 = vrot.lane.b32.xlu1 %v11900_v32, %s7101_s9  ;;  %v10728_v45 = vpop.permute.xlu0 %5080  ;;  %s12053_s9 = smov 94  }
 0xa00   : > { %4932 = vmatmul.mubr.bf16.gmra.mxu1 %v6959_v41  ;;  %6924 = vset.pattern.permute.xlu0 %v7194_v5 }
 0xa01   : > { %5829 = vperm.xlu0 %6924, %v7003_v15   ;;  %5189 = vmatprep.mubr.bf16.mxu1 %v12028_v17 }
 0xa02   : > { %v10731_v38 = vpop.permute.xlu1 %5088 }
 0xa03   : > { %5577 = vperm.xlu1 %6915, %v7003_v15   ;;  %12038 = vst [vmem:[#allocation24_spill] sm:$0xff] %v10731_v38  ;;  %v5241_v62 = vpop.permute.xlu0 %5240 }
 0xa04   : > { %6435 = vmatmul.mubr.msk.bf16.gmra.mxu0 %vm4783_vm0, %v6960_v59 }
 0xa05   : > { %6925 = vset.pattern.permute.xlu0 %v7195_v25 }
 0xa06   : > { %5857 = vperm.xlu0 %6925, %v7003_v15   ;;  %v10736_v27 = vpop.permute.xlu1 %5092 }
 0xa07   : > { %5556 = vrot.lane.b32.xlu1 %v11752_v11, %s11754_s30  ;;  %12040 = vst [vmem:[#allocation69_spill] sm:$0xff] %v10736_v27  ;;  %v5290_v33 = vpop.permute.xlu0 %5289  ;;  %s12042_s30 = smov 114  }
 0xa08   : > { %6916 = vset.pattern.permute.xlu1 %v12039_v8 }
 0xa0a   : > { %6926 = vset.pattern.permute.xlu0 %v7196_v21  ;;  %v6439_v21 = vld [vmem:[%s11316_s1 + $0x6] sm:$0x3] }
 0xa0b   : > { %5605 = vperm.xlu1 %6916, %v7003_v15   ;;  %5885 = vperm.xlu0 %6926, %v7003_v15   ;;  %v10743_v6 = vpop.permute.xlu1 %5030 }
 0xa0c   : > { %v10748_v29 = vpop.permute.xlu0 %5317 }
 0xa0f   : > { %5586 = vrot.lane.b32.xlu1 %v11900_v32, %s7093_s24  ;;  %6927 = vset.pattern.permute.xlu0 %v12041_v3 }
 0xa10   : > { %5893 = vperm.xlu0 %6927, %v10741_v18   ;;  %6928 = vset.pattern.permute.xlu1 %v7190_v0  ;;  %v10754_v53 = vpop.permute.xlu1 %5084 }
 0xa11   : > { %v10757_v30 = vpop.permute.xlu0 %5345 }
 0xa13   : > { %5612 = vrot.lane.b32.xlu1 %v11752_v11, %s12042_s30 }
 0xa14   : > { %6930 = vset.pattern.permute.xlu0 %v12043_v26 }
 0xa15   : > { %v5236_v52 = vpop.permute.xlu1 %5235 }
 0xa16   : > { %v10761_v63 = vpop.permute.xlu0 %5373 }
 0xa17   : > { %5614 = vrot.lane.b32.xlu1 %v11900_v32, %s12042_s30 }
 0xa19   : > { %v5213_v55 = vpop.permute.xlu1 %5212 }
 0xa1b   : > { %5640 = vrot.lane.b32.xlu1 %v11752_v11, %s7103_s11 }
 0xa1c   : > { %v10767_v37 = vpop.permute.xlu0 %5401 }
 0xa1d   : > { %v5215_v20 = vpop.permute.xlu1 %5214 }
 0xa1e   : > { %v5216_v17 = vsel %vm594_vm4, %v5213_v55, %v5215_v20  ;;  %v5217_v23 = vsel %vm594_vm4, %v5215_v20, %v5213_v55  ;;  %vm12046_vm4 = vcmp.lt.s32.totalorder %v7574_v61, 31 }
 0xa1f   : > { %5642 = vrot.lane.b32.xlu1 %v11900_v32, %s7103_s11  ;;  %v5230_v34 = vmul.f32 %v5223_v44, %v5217_v23  ;;  %v5231_v50 = vmul.f32 %v5227_v10, %v5216_v17 }
 0xa21   : > { %v10777_v36 = vpop.permute.xlu0 %5429  ;;  %v5243_v56 = vpop.permute.xlu1 %5242  ;;  %v5238_v5 = vmul.f32 %v5236_v52, %v5230_v34  ;;  %v5239_v25 = vmul.f32 %v5236_v52, %v5231_v50  ;;  %v5311_v52 = vrot.slane %v6439_v21, %v7581_v51 }
 0xa22   : > { %v5244_v28 = vsel %vm12044_vm3, %v5241_v62, %v5243_v56  ;;  %v5245_v24 = vsel %vm12045_vm6, %v5243_v56, %v5241_v62  ;;  %vm12059_vm3 = vcmp.lt.s32.totalorder %v7574_v61, 1  ;;  %vm12061_vm6 = vcmp.lt.s32.totalorder %v7574_v61, 127 }
 0xa23   : > { %5668 = vrot.lane.b32.xlu1 %v11752_v11, %s7104_s12  ;;  %v5258_v31 = vmul.f32 %v5251_v57, %v5245_v24  ;;  %v5259_v58 = vmul.f32 %v5255_v43, %v5244_v28  ;;  %v5307_v43 = vrot.slane %v6439_v21, %v7579_v47 }
 0xa25   : > { %v5269_v0 = vpop.permute.xlu1 %5268 }
 0xa27   : > { %5670 = vrot.lane.b32.xlu1 %v11900_v32, %s7104_s12  ;;  %v5262_v15 = vpop.permute.xlu0 %5261 }
 0xa28   : > { %v5264_v40 = vmul.f32 %v5262_v15, %v5258_v31  ;;  %v5265_v49 = vmul.f32 %v5262_v15, %v5259_v58 }
 0xa29   : > { %v5271_v7 = vpop.permute.xlu1 %5270 }
 0xa2a   : > { %v5272_v41 = vsel %vm653_vm5, %v5269_v0, %v5271_v7  ;;  %v5273_v59 = vsel %vm653_vm5, %v5271_v7, %v5269_v0  ;;  %v5266_v3 = vadd.f32 %v5264_v40, %v5238_v5  ;;  %v5267_v26 = vadd.f32 %v5265_v49, %v5239_v25  ;;  %vm12047_vm5 = vmmov %vm12046_vm4 }
 0xa2b   : > { %5696 = vrot.lane.b32.xlu1 %v11752_v11, %s7105_s13  ;;  %v5286_v62 = vmul.f32 %v5279_v2, %v5273_v59  ;;  %v5287_v8 = vmul.f32 %v5283_v22, %v5272_v41 }
 0xa2d   : > { %v5292_v55 = vmul.f32 %v5290_v33, %v5286_v62  ;;  %v5293_v20 = vmul.f32 %v5290_v33, %v5287_v8  ;;  %v5297_v1 = vpop.permute.xlu1 %5296  ;;  %v6440_v33 = vld [vmem:[%s11316_s1 + $0x8] sm:$0x3] }
 0xa2e   : > { %v5335_v0 = vrot.slane %v6440_v33, %v7579_v47  ;;  %v5339_v34 = vrot.slane %v6440_v33, %v7581_v51 }
 0xa2f   : > { %5698 = vrot.lane.b32.xlu1 %v11900_v32, %s7105_s13  ;;  %v5294_v16 = vadd.f32 %v5292_v55, %v5266_v3  ;;  %v5295_v57 = vadd.f32 %v5293_v20, %v5267_v26 }
 0xa31   : > { %v5299_v56 = vpop.permute.xlu1 %5298 }
 0xa32   : > { %v5300_v28 = vsel %vm12046_vm4, %v5297_v1, %v5299_v56  ;;  %v5301_v24 = vsel %vm12047_vm5, %v5299_v56, %v5297_v1  ;;  %vm12062_vm4 = vmmov %vm12061_vm6 }
 0xa33   : > { %5724 = vrot.lane.b32.xlu1 %v11752_v11, %s11584_s10  ;;  %v5314_v44 = vmul.f32 %v5307_v43, %v5301_v24  ;;  %v5315_v10 = vmul.f32 %v5311_v52, %v5300_v28 }
 0xa35   : > { %v5320_v17 = vmul.f32 %v10748_v29, %v5314_v44  ;;  %v5321_v23 = vmul.f32 %v10748_v29, %v5315_v10  ;;  %v5325_v4 = vpop.permute.xlu1 %5324  ;;  %v6441_v29 = vld [vmem:[%s11316_s1 + $0xa] sm:$0x3] }
 0xa36   : > { %v5363_v25 = vrot.slane %v6441_v29, %v7579_v47  ;;  %v5367_v62 = vrot.slane %v6441_v29, %v7581_v51 }
 0xa37   : > { %5726 = vrot.lane.b32.xlu1 %v11900_v32, %s11584_s10  ;;  %v5322_v31 = vadd.f32 %v5320_v17, %v5294_v16  ;;  %v5323_v58 = vadd.f32 %v5321_v23, %v5295_v57  ;;  %v6443_v23 = vld [vmem:[%s11316_s1 + $0xe] sm:$0x3]  ;;  %s12110_s10 = sshll.u32 %s12112_s22, 4 }
 0xa39   : > { %v5327_v50 = vpop.permute.xlu1 %5326 }
 0xa3a   : > { %v5328_v15 = vsel %vm713_vm7, %v5325_v4, %v5327_v50  ;;  %v5329_v2 = vsel %vm713_vm7, %v5327_v50, %v5325_v4  ;;  %vm12049_vm7 = vcmp.lt.s32.totalorder %v7574_v61, 18  ;;  %v5411_v50 = vpop.permute.xlu0 %5410 }
 0xa3b   : > { %5752 = vrot.lane.b32.xlu1 %v11752_v11, %s7107_s15  ;;  %v5342_v22 = vmul.f32 %v5335_v0, %v5329_v2  ;;  %v5343_v40 = vmul.f32 %v5339_v34, %v5328_v15  ;;  %vm12050_vm15 = vmmov %vm12049_vm7  ;;  %v5419_v0 = vrot.slane %v6443_v23, %v7579_v47  ;;  %v5423_v34 = vrot.slane %v6443_v23, %v7581_v51 }
 0xa3c   : > { %v12058_v23 = vmov 5  }
 0xa3d   : > { %v5348_v49 = vmul.f32 %v10757_v30, %v5342_v22  ;;  %v5349_v7 = vmul.f32 %v10757_v30, %v5343_v40  ;;  %v5353_v41 = vpop.permute.xlu1 %5352  ;;  %v6442_v30 = vld [vmem:[%s11316_s1 + $0xc] sm:$0x3] }
 0xa3e   : > { %v5391_v52 = vrot.slane %v6442_v30, %v7579_v47  ;;  %v5395_v56 = vrot.slane %v6442_v30, %v7581_v51 }
 0xa3f   : > { %5754 = vrot.lane.b32.xlu1 %v11900_v32, %s7107_s15  ;;  %v5350_v59 = vadd.f32 %v5348_v49, %v5322_v31  ;;  %v5351_v5 = vadd.f32 %v5349_v7, %v5323_v58  ;;  %s266_s15 = scalar_lea.vmem %s11321_s6, %s12110_s10 }
 0xa41   : > { %v5355_v8 = vpop.permute.xlu1 %5354 }
 0xa42   : > { %v5356_v21 = vsel %vm12049_vm7, %v5353_v41, %v5355_v8  ;;  %v5357_v3 = vsel %vm12050_vm15, %v5355_v8, %v5353_v41  ;;  %vm12070_vm7 = vcmp.lt.s32.totalorder %v7574_v61, 113 }
 0xa43   : > { %5780 = vrot.lane.b32.xlu1 %v11752_v11, %s12048_s27  ;;  %v5370_v26 = vmul.f32 %v5363_v25, %v5357_v3  ;;  %v5371_v55 = vmul.f32 %v5367_v62, %v5356_v21  ;;  %vm12071_vm15 = vmmov %vm12070_vm7 }
 0xa45   : > { %v5376_v20 = vmul.f32 %v10761_v63, %v5370_v26  ;;  %v5377_v1 = vmul.f32 %v10761_v63, %v5371_v55  ;;  %v5381_v16 = vpop.permute.xlu1 %5380  ;;  %v10897_v26 = vpop.permute.xlu0 %355 }
 0xa47   : > { %5782 = vrot.lane.b32.xlu1 %v11900_v32, %s12048_s27  ;;  %v5378_v57 = vadd.f32 %v5376_v20, %v5350_v59  ;;  %v5379_v43 = vadd.f32 %v5377_v1, %v5351_v5  ;;  %v6444_v5 = vld [vmem:[%s11316_s1 + $0x10] sm:$0x3]  ;;  %v6445_v20 = vld [vmem:[%s11316_s1 + $0x12] sm:$0x3] }
 0xa48   : > { %v5447_v62 = vrot.slane %v6444_v5, %v7579_v47  ;;  %v5451_v8 = vrot.slane %v6444_v5, %v7581_v51 }
 0xa49   : > { %v5383_v28 = vpop.permute.xlu1 %5382 }
 0xa4a   : > { %v5384_v24 = vsel %vm773_vm9, %v5381_v16, %v5383_v28  ;;  %v5385_v44 = vsel %vm773_vm9, %v5383_v28, %v5381_v16  ;;  %vm12054_vm9 = vcmp.lt.s32.totalorder %v7574_v61, 15  ;;  %v5479_v28 = vrot.slane %v6445_v20, %v7581_v51 }
 0xa4b   : > { %5808 = vrot.lane.b32.xlu1 %v11752_v11, %s12051_s26  ;;  %v5398_v10 = vmul.f32 %v5391_v52, %v5385_v44  ;;  %v5399_v33 = vmul.f32 %v5395_v56, %v5384_v24  ;;  %v5475_v56 = vrot.slane %v6445_v20, %v7579_v47  ;;  %v5486_v24 = vpop.permute.xlu0 %5485 }
 0xa4d   : > { %v5404_v63 = vmul.f32 %v10767_v37, %v5398_v10  ;;  %v5405_v17 = vmul.f32 %v10767_v37, %v5399_v33 }
 0xa4f   : > { %5810 = vrot.lane.b32.xlu1 %v11900_v32, %s12051_s26  ;;  %v5406_v4 = vadd.f32 %v5404_v63, %v5378_v57  ;;  %v5407_v31 = vadd.f32 %v5405_v17, %v5379_v43 }
 0xa51   : > { %v10869_v58 = vpop.permute.xlu1 %349 }
 0xa53   : > { %5836 = vrot.lane.b32.xlu1 %v11752_v11, %s12052_s18 }
 0xa55   : > { %v5409_v15 = vpop.permute.xlu1 %5408 }
 0xa56   : > { %v5412_v37 = vsel %vm803_vm10, %v5409_v15, %v5411_v50  ;;  %v5413_v2 = vsel %vm803_vm10, %v5411_v50, %v5409_v15  ;;  %vm12055_vm10 = vmmov %vm12054_vm9 }
 0xa57   : > { %5838 = vrot.lane.b32.xlu1 %v11900_v32, %s12052_s18  ;;  %v5426_v22 = vmul.f32 %v5419_v0, %v5413_v2  ;;  %v5427_v40 = vmul.f32 %v5423_v34, %v5412_v37 }
 0xa59   : > { %v5432_v29 = vmul.f32 %v10777_v36, %v5426_v22  ;;  %v5433_v49 = vmul.f32 %v10777_v36, %v5427_v40 }
 0xa5a   : > { %v5458_v7 = vpop.permute.xlu1 %5457 }
 0xa5b   : > { %5864 = vrot.lane.b32.xlu1 %v11752_v11, %s12053_s9  ;;  %v5434_v41 = vadd.f32 %v5432_v29, %v5406_v4  ;;  %v5435_v59 = vadd.f32 %v5433_v49, %v5407_v31 }
 0xa5e   : > { %v5437_v25 = vpop.permute.xlu1 %5436 }
 0xa5f   : > { %5866 = vrot.lane.b32.xlu1 %v11900_v32, %s12053_s9 }
 0xa62   : > { %v5439_v21 = vpop.permute.xlu1 %5438 }
 0xa63   : > { %v5440_v36 = vsel %vm12054_vm9, %v5437_v25, %v5439_v21  ;;  %v5441_v3 = vsel %vm12055_vm10, %v5439_v21, %v5437_v25  ;;  %5201 = vperm.xlu1 %6928, %v10741_v18   ;;  %vm12072_vm9 = vcmp.lt.s32.totalorder %v7574_v61, 112 }
 0xa64   : > { %v5454_v55 = vmul.f32 %v5447_v62, %v5441_v3  ;;  %v5455_v30 = vmul.f32 %v5451_v8, %v5440_v36  ;;  %vm12073_vm10 = vmmov %vm12072_vm9 }
 0xa66   : > { %v5460_v1 = vmul.f32 %v5458_v7, %v5454_v55  ;;  %v5461_v16 = vmul.f32 %v5458_v7, %v5455_v30  ;;  %v5465_v57 = vpop.permute.xlu1 %5464  ;;  %v6447_v7 = vld [vmem:[%s11316_s1 + $0x16] sm:$0x3] }
 0xa67   : > { %6929 = vset.pattern.permute.xlu1 %v7191_v9  ;;  %v6446_v9 = vld [vmem:[%s11316_s1 + $0x14] sm:$0x3]  ;;  %v5531_v21 = vrot.slane %v6447_v7, %v7579_v47  ;;  %v5535_v36 = vrot.slane %v6447_v7, %v7581_v51 }
 0xa68   : > { %v5462_v43 = vadd.f32 %v5460_v1, %v5434_v41  ;;  %v5463_v52 = vadd.f32 %v5461_v16, %v5435_v59  ;;  %5207 = vperm.xlu1 %6929, %v10741_v18   ;;  %v5514_v18 = vpop.permute.xlu0 %5513  ;;  %v5503_v15 = vrot.slane %v6446_v9, %v7579_v47  ;;  %v5507_v37 = vrot.slane %v6446_v9, %v7581_v51 }
 0xa6a   : > { %v5467_v44 = vpop.permute.xlu1 %5466 }
 0xa6b   : > { %v5468_v10 = vsel %vm12056_vm11, %v5465_v57, %v5467_v44  ;;  %v5469_v33 = vsel %vm12057_vm14, %v5467_v44, %v5465_v57  ;;  %v6448_v57 = vld [vmem:[%s11316_s1 + $0x18] sm:$0x3]  ;;  %vm12075_vm11 = vcmp.lt.s32.totalorder %v7574_v61, 111 }
 0xa6c   : > { %v5482_v63 = vmul.f32 %v5475_v56, %v5469_v33  ;;  %v5483_v17 = vmul.f32 %v5479_v28, %v5468_v10  ;;  %6931 = vset.pattern.permute.xlu1 %v12058_v23  ;;  %v5542_v41 = vpop.permute.xlu0 %5541  ;;  %v5567_v44 = vrot.slane %v6448_v57, %v7579_v47  ;;  %v5571_v10 = vrot.slane %v6448_v57, %v7581_v51  ;;  %vm12076_vm14 = vmmov %vm12075_vm11 }
 0xa6e   : > { %v5488_v4 = vmul.f32 %v5486_v24, %v5482_v63  ;;  %v5489_v31 = vmul.f32 %v5486_v24, %v5483_v17  ;;  %v5493_v0 = vpop.permute.xlu1 %5492 }
 0xa70   : > { %v5490_v34 = vadd.f32 %v5488_v4, %v5462_v43  ;;  %v5491_v50 = vadd.f32 %v5489_v31, %v5463_v52  ;;  %v5550_v20 = vpop.permute.xlu0 %5549 }
 0xa71   : > { %v5552_v4 = vmul.f32 %v5550_v20, %v11752_v11  ;;  %v5553_v31 = vmul.f32 %v5550_v20, %v11900_v32 }
 0xa72   : > { %v5495_v2 = vpop.permute.xlu1 %5494 }
 0xa73   : > { %v5496_v22 = vsel %vm893_vm13, %v5493_v0, %v5495_v2  ;;  %v5497_v40 = vsel %vm893_vm13, %v5495_v2, %v5493_v0  ;;  %vm12060_vm13 = vmmov %vm12059_vm3 }
 0xa74   : > { %v5510_v29 = vmul.f32 %v5503_v15, %v5497_v40  ;;  %v5511_v49 = vmul.f32 %v5507_v37, %v5496_v22  ;;  %v5559_v33 = vpop.permute.xlu0 %5558 }
 0xa76   : > { %v5516_v59 = vmul.f32 %v5514_v18, %v5510_v29  ;;  %v5517_v5 = vmul.f32 %v5514_v18, %v5511_v49  ;;  %v5521_v25 = vpop.permute.xlu1 %5520 }
 0xa78   : > { %v5518_v62 = vadd.f32 %v5516_v59, %v5490_v34  ;;  %v5519_v8 = vadd.f32 %v5517_v5, %v5491_v50  ;;  %v6449_v34 = vld [vmem:[%s11316_s1 + $0x1a] sm:$0x3]  ;;  %v5585_v11 = vpop.permute.xlu0 %5584 }
 0xa79   : > { %v5595_v49 = vrot.slane %v6449_v34, %v7579_v47  ;;  %v5599_v7 = vrot.slane %v6449_v34, %v7581_v51 }
 0xa7a   : > { %v5523_v3 = vpop.permute.xlu1 %5522 }
 0xa7b   : > { %v5524_v55 = vsel %vm12059_vm3, %v5521_v25, %v5523_v3  ;;  %v5525_v30 = vsel %vm12060_vm13, %v5523_v3, %v5521_v25  ;;  %vm12078_vm3 = vcmp.lt.s32.totalorder %v7574_v61, 110 }
 0xa7c   : > { %v5538_v1 = vmul.f32 %v5531_v21, %v5525_v30  ;;  %v5539_v16 = vmul.f32 %v5535_v36, %v5524_v55  ;;  %vm12079_vm13 = vmmov %vm12078_vm3 }
 0xa7e   : > { %v5544_v43 = vmul.f32 %v5542_v41, %v5538_v1  ;;  %v5545_v52 = vmul.f32 %v5542_v41, %v5539_v16  ;;  %v5578_v56 = vpop.permute.xlu1 %5577 }
 0xa80   : > { %v5546_v28 = vadd.f32 %v5544_v43, %v5518_v62  ;;  %v5547_v24 = vadd.f32 %v5545_v52, %v5519_v8 }
 0xa82   : > { %v5557_v63 = vpop.permute.xlu1 %5556  ;;  %v5554_v50 = vadd.f32 %v5552_v4, %v5546_v28  ;;  %v5555_v15 = vadd.f32 %v5553_v31, %v5547_v24  ;;  %v12064_v4 = vld [vmem:[#allocation7_spill] sm:$0xff] }
 0xa83   : > { %v5560_v17 = vsel %vm12061_vm6, %v5557_v63, %v5559_v33  ;;  %v5561_v9 = vsel %vm12062_vm4, %v5559_v33, %v5557_v63  ;;  %v12063_v63 = vld [vmem:[#allocation6_spill] sm:$0xff]  ;;  %v353_v31 = vmul.f32 %v10869_v58, %v12064_v4  ;;  %vm12082_vm6 = vcmp.lt.s32.totalorder %v7574_v61, 98 }
 0xa84   : > { %v5574_v0 = vmul.f32 %v5567_v44, %v5560_v17  ;;  %v5575_v18 = vmul.f32 %v5571_v10, %v5561_v9  ;;  %v352_v17 = vmul.f32 %v10869_v58, %v12063_v63  ;;  %vm12083_vm4 = vmmov %vm12082_vm6 }
 0xa86   : > { %v5580_v37 = vmul.f32 %v5578_v56, %v5574_v0  ;;  %v5581_v2 = vmul.f32 %v5578_v56, %v5575_v18  ;;  %v5606_v22 = vpop.permute.xlu1 %5605  ;;  %v10982_v34 = vadd.f32 %v10897_v26, %v352_v17 }
 0xa88   : > { %v5582_v40 = vadd.f32 %v5580_v37, %v5554_v50  ;;  %v5583_v29 = vadd.f32 %v5581_v2, %v5555_v15  ;;  %12065 = vst [vmem:[#allocation74_spill] sm:$0xff] %v10982_v34  ;;  %v10987_v15 = vadd.f32 %v10897_v26, %v353_v31  ;;  %v6450_v26 = vld [vmem:[%s11316_s1 + $0x1c] sm:$0x3]  ;;  %v5634_v31 = vpop.permute.xlu0 %5633 }
 0xa89   : > { %v5623_v17 = vrot.slane %v6450_v26, %v7579_v47  ;;  %v5627_v4 = vrot.slane %v6450_v26, %v7581_v51 }
 0xa8a   : > { %v5587_v41 = vpop.permute.xlu1 %5586  ;;  %12066 = vst [vmem:[#allocation10_spill] sm:$0xff] %v10987_v15 }
 0xa8b   : > { %v5588_v32 = vsel %vm991_vm12, %v5585_v11, %v5587_v41  ;;  %v5589_v59 = vsel %vm991_vm12, %v5587_v41, %v5585_v11  ;;  %v4830_v62 = vpop.f32.mrf.mxu0  ;;  %vm12068_vm12 = vcmp.lt.s32.totalorder %v7574_v61, 114 }
 0xa8c   : > { %v5602_v5 = vmul.f32 %v5595_v49, %v5588_v32  ;;  %v5603_v25 = vmul.f32 %v5599_v7, %v5589_v59  ;;  %v6451_v32 = vld [vmem:[%s11316_s1 + $0x1e] sm:$0x3]  ;;  %vm12069_vm5 = vmmov %vm12068_vm12 }
 0xa8d   : > { %v4832_v36 = vpop.f32.mrf.mxu0 }
 0xa8e   : > { %v5608_v8 = vmul.f32 %v5606_v22, %v5602_v5  ;;  %v5609_v21 = vmul.f32 %v5606_v22, %v5603_v25  ;;  %v5613_v3 = vpop.permute.xlu1 %5612  ;;  %v6173_v22 = vmul.f32 -1.442695, %v10982_v34 }
 0xa8f   : > { %v4834_v55 = vpop.f32.mrf.mxu0 }
 0xa90   : > { %v10949_v30 = vadd.f32 %v5608_v8, %v5582_v40  ;;  %v10951_v20 = vadd.f32 %v5609_v21, %v5583_v29  ;;  %v6174_v29 = vmul.f32 -1.442695, %v10987_v15  ;;  %6981 = vpow2.f32 %v6173_v22  ;;  %v11010_v8 = vld [vmem:[%s11316_s1 + $0x20] sm:$0x3] }
 0xa91   : > { %v4836_v1 = vpop.f32.mrf.mxu0  ;;  %v5651_v22 = vrot.slane %v6451_v32, %v7579_v47  ;;  %v5655_v15 = vrot.slane %v6451_v32, %v7581_v51  ;;  %v5679_v34 = vrot.slane %v11010_v8, %v7579_v47  ;;  %v5683_v60 = vrot.slane %v11010_v8, %v7581_v51  ;;  %v11042_v32 = vld [vmem:[%s11316_s1 + $0x24] sm:$0x3] }
 0xa92   : > { %v5615_v16 = vpop.permute.xlu1 %5614  ;;  %6983 = vpow2.f32 %v6174_v29 }
 0xa93   : > { %v10953_v57 = vpop.f32.mrf.mxu0  ;;  %v5617_v38 = vsel %vm12069_vm5, %v5615_v16, %v5613_v3 }
 0xa95   : > { %v10955_v43 = vpop.f32.mrf.mxu0 }
 0xa96   : > { %v10957_v52 = vpop.permute.xlu1 %5640 }
 0xa97   : > { %v10959_v56 = vpop.f32.mrf.mxu0 }
 0xa99   : > { %v10961_v28 = vpop.f32.mrf.mxu0 }
 0xa9a   : > { %v10963_v24 = vpop.permute.xlu1 %5642 }
 0xa9c   : > { %v10965_v44 = vpop.f32.mrf.mxu0 }
 0xa9e   : > { %v10967_v10 = vpop.f32.mrf.mxu0  ;;  %v10969_v33 = vpop.permute.xlu1 %5668 }
 0xaa0   : > { %v10973_v9 = vpop.f32.mrf.mxu0 }
 0xaa2   : > { %v10977_v0 = vpop.f32.mrf.mxu0  ;;  %v10979_v18 = vpop.permute.xlu1 %5670 }
 0xaa4   : > { %v10984_v50 = vpop.f32.mrf.mxu0 }
 0xaa6   : > { %v10989_v37 = vpop.f32.mrf.mxu0  ;;  %v10991_v2 = vpop.permute.xlu1 %5696 }
 0xaa8   : > { %v10994_v40 = vpop.f32.mrf.mxu0  ;;  %v4903_v58 = vpop.f32.mrf.mxu1 }
 0xaa9   : > { %v4904_v11 = vadd.f32 %v4903_v58, %v4830_v62  ;;  %v11018_v58 = vld [vmem:[%s11316_s1 + $0x22] sm:$0x3] }
 0xaaa   : > { %v10997_v49 = vpop.f32.mrf.mxu0  ;;  %v4905_v7 = vpop.f32.mrf.mxu1 }
 0xaab   : > { %12067 = vst [vmem:[#allocation36_spill] sm:$0xff] %v10997_v49  ;;  %v10999_v41 = vpop.permute.xlu1 %5698  ;;  %v4906_v62 = vadd.f32 %v4905_v7, %v4832_v36 }
 0xaac   : > { %v4907_v59 = vpop.f32.mrf.mxu1  ;;  %v4976_v5 = vpop.f32.mrf.mxu0 }
 0xaad   : > { %v4977_v25 = vadd.f32 %v4976_v5, %v4904_v11  ;;  %v5616_v11 = vsel %vm12068_vm12, %v5613_v3, %v5615_v16  ;;  %v4908_v36 = vadd.f32 %v4907_v59, %v4834_v55  ;;  %v5707_v55 = vrot.slane %v11018_v58, %v7579_v47 }
 0xaae   : > { %v4909_v21 = vpop.f32.mrf.mxu1  ;;  %v4978_v63 = vpop.f32.mrf.mxu0  ;;  %v5630_v48 = vmul.f32 %v5623_v17, %v5616_v11  ;;  %v5644_v3 = vsel %vm12070_vm7, %v10957_v52, %v10963_v24  ;;  %v5711_v16 = vrot.slane %v11018_v58, %v7581_v51  ;;  %v5672_v17 = vsel %vm12072_vm9, %v10969_v33, %v10979_v18 }
 0xaaf   : > { %v11020_v29 = vpop.permute.xlu1 %5724  ;;  %v5063_v7 = vmul.f32 %v10718_v39, %v4977_v25  ;;  %v4979_v5 = vadd.f32 %v4978_v63, %v4906_v62  ;;  %v4910_v27 = vadd.f32 %v4909_v21, %v4836_v1  ;;  %v5662_v1 = vpop.permute.xlu0 %5661  ;;  %v5645_v21 = vsel %vm12071_vm15, %v10963_v24, %v10957_v52  ;;  %v11104_v52 = vld [vmem:[%s11316_s1 + $0x28] sm:$0x3] }
 0xab0   : > { %v11025_v23 = vpop.f32.mrf.mxu1  ;;  %v4980_v26 = vpop.f32.mrf.mxu0  ;;  %v5658_v24 = vmul.f32 %v5651_v22, %v5644_v3  ;;  %vm12097_vm12 = vcmp.lt.s32.totalorder %v7574_v61, 97  ;;  %vm12099_vm7 = vcmp.lt.s32.totalorder %v7574_v61, 96  ;;  %vm12101_vm9 = vcmp.lt.s32.totalorder %v7574_v61, 95 }
 0xab1   : > { %v5064_v59 = vmul.f32 %v10718_v39, %v4979_v5  ;;  %v4981_v25 = vadd.f32 %v4980_v26, %v4908_v36  ;;  %v5111_v11 = vadd.f32 %v10728_v45, %v5063_v7  ;;  %v5673_v7 = vsel %vm12073_vm10, %v10979_v18, %v10969_v33  ;;  %v11087_v33 = vld [vmem:[%s11316_s1 + $0x26] sm:$0x3]  ;;  %vm12098_vm5 = vmmov %vm12097_vm12 }
 0xab2   : > { %v11037_v62 = vpop.f32.mrf.mxu1  ;;  %v4982_v63 = vpop.f32.mrf.mxu0  ;;  %12074 = vst [vmem:[#allocation44_spill] sm:$0xff] %v11087_v33  ;;  %v5700_v18 = vsel %vm12075_vm11, %v10991_v2, %v10999_v41  ;;  %v5664_v46 = vmul.f32 %v5662_v1, %v5658_v24  ;;  %v5791_v33 = vrot.slane %v11104_v52, %v7579_v47  ;;  %vm12100_vm15 = vmmov %vm12099_vm7 }
 0xab3   : > { %v4983_v39 = vadd.f32 %v4982_v63, %v4910_v27  ;;  %v11050_v8 = vpop.permute.xlu1 %5726  ;;  %v5065_v36 = vmul.f32 %v10743_v6, %v4981_v25  ;;  %v5631_v27 = vmul.f32 %v5627_v4, %v5617_v38  ;;  %v5112_v26 = vadd.f32 %v10728_v45, %v5064_v59  ;;  %v5690_v59 = vpop.permute.xlu0 %5689  ;;  %vm12102_vm10 = vmmov %vm12101_vm9 }
 0xab4   : > { %v11062_v5 = vpop.f32.mrf.mxu1  ;;  %v11064_v58 = vpop.f32.mrf.mxu0  ;;  %v5636_v45 = vmul.f32 %v5634_v31, %v5630_v48  ;;  %v5686_v4 = vmul.f32 %v5679_v34, %v5672_v17  ;;  %v5701_v48 = vsel %vm12076_vm14, %v10999_v41, %v10991_v2  ;;  %v5127_v34 = vmax.f32 %v5111_v11, 0.0 }
 0xab5   : > { %v5066_v63 = vmul.f32 %v10743_v6, %v4983_v39  ;;  %v5113_v25 = vadd.f32 %v10754_v53, %v5065_v36  ;;  %v5659_v6 = vmul.f32 %v5655_v15, %v5645_v21  ;;  %v6982_v21 = vpop.eup %6981  ;;  %v5637_v17 = vmul.f32 %v5634_v31, %v5631_v27  ;;  %v11119_v31 = vld [vmem:[%s11316_s1 + $0x2a] sm:$0x3] }
 0xab6   : > { %v11077_v13 = vpop.f32.mrf.mxu1  ;;  %v11079_v38 = vpop.f32.mrf.mxu0  ;;  %v5687_v36 = vmul.f32 %v5683_v60, %v5673_v7  ;;  %v5714_v24 = vmul.f32 %v5707_v55, %v5700_v18  ;;  %v5715_v7 = vmul.f32 %v5711_v16, %v5701_v48  ;;  %v5638_v11 = vadd.f32 %v5636_v45, %v10949_v30  ;;  %v11138_v30 = vld [vmem:[%s11316_s1 + $0x2c] sm:$0x3] }
 0xab7   : > { %v5114_v22 = vadd.f32 %v10754_v53, %v5066_v63  ;;  %v11082_v3 = vpop.permute.xlu1 %5752  ;;  %v5129_v15 = vmax.f32 %v5113_v25, 0.0  ;;  %v5128_v63 = vmax.f32 %v5112_v26, 0.0  ;;  %v6984_v27 = vpop.eup %6983  ;;  %v5665_v26 = vmul.f32 %v5662_v1, %v5659_v6 }
 0xab8   : > { %v11097_v53 = vpop.f32.mrf.mxu1  ;;  %v11099_v39 = vpop.f32.mrf.mxu0  ;;  %v5639_v49 = vadd.f32 %v5637_v17, %v10951_v20  ;;  %v5693_v1 = vmul.f32 %v5690_v59, %v5687_v36  ;;  %v5795_v55 = vrot.slane %v11104_v52, %v7581_v51  ;;  %v367_v16 = vadd.f32 1.0, %v6984_v27  ;;  %v11155_v36 = vld [vmem:[%s11316_s1 + $0x2e] sm:$0x3] }
 0xab9   : > { %v5130_v42 = vmax.f32 %v5114_v22, 0.0  ;;  %v11106_v54 = vpack.c.bf16 %v5129_v15, %v5127_v34  ;;  %v5718_v25 = vpop.permute.xlu0 %5717  ;;  %v366_v15 = vadd.f32 1.0, %v6982_v21  ;;  %v5666_v45 = vadd.f32 %v5664_v46, %v5638_v11 }
 0xaba   : > { %v11108_v2 = vpop.f32.mrf.mxu1  ;;  %v11110_v41 = vpop.f32.mrf.mxu0  ;;  %v5728_v6 = vsel %vm12078_vm3, %v11020_v29, %v11050_v8  ;;  %v5729_v20 = vsel %vm12079_vm13, %v11050_v8, %v11020_v29  ;;  %v5667_v18 = vadd.f32 %v5665_v26, %v5639_v49  ;;  %v5720_v48 = vmul.f32 %v5718_v25, %v5714_v24 }
 0xabb   : > { %12077 = vst [vmem:[#allocation22_spill] sm:$0xff] %v11106_v54  ;;  %v11121_v22 = vpop.permute.xlu1 %5754  ;;  %v11123_v34 = vpack.c.bf16 %v5130_v42, %v5128_v63  ;;  %v5692_v54 = vmul.f32 %v5690_v59, %v5686_v4  ;;  %v5819_v42 = vrot.slane %v11119_v31, %v7579_v47  ;;  %v5721_v21 = vmul.f32 %v5718_v25, %v5715_v7 }
 0xabc   : > { %v4927_v14 = vpop.f32.mrf.mxu1  ;;  %v11126_v60 = vpop.f32.mrf.mxu0  ;;  %v5823_v46 = vrot.slane %v11119_v31, %v7581_v51  ;;  %6985 = vrcp.f32 %v366_v15  ;;  %v5695_v8 = vadd.f32 %v5693_v1, %v5667_v18  ;;  %v4916_v26 = vadd.f32 %v11037_v62, %v10955_v43 }
 0xabd   : > { %v5694_v63 = vadd.f32 %v5692_v54, %v5666_v45  ;;  %v12080_v24 = vrot.slane %v11042_v32, %v7579_v47  ;;  %v12081_v25 = vrot.slane %v11042_v32, %v7581_v51  ;;  %v5746_v15 = vpop.permute.xlu0 %5745  ;;  %6987 = vrcp.f32 %v367_v16 }
 0xabe   : > { %v4929_v4 = vpop.f32.mrf.mxu1  ;;  %v4998_v59 = vpop.f32.mrf.mxu0  ;;  %v4914_v45 = vadd.f32 %v11025_v23, %v10953_v57  ;;  %v4918_v49 = vadd.f32 %v11062_v5, %v10959_v56  ;;  %v5875_v43 = vrot.slane %v11155_v36, %v7579_v47  ;;  %v11175_v29 = vadd.f32 %v5721_v21, %v5695_v8 }
 0xabf   : > { %v11148_v17 = vpop.permute.xlu1 %5780  ;;  %v5742_v7 = vmul.f32 %v12080_v24, %v5728_v6  ;;  %v5743_v54 = vmul.f32 %v12081_v25, %v5729_v20  ;;  %v5722_v62 = vadd.f32 %v5720_v48, %v5694_v63  ;;  %v4989_v6 = vadd.f32 %v11079_v38, %v4916_v26 }
 0xac0   : > { %v4933_v11 = vpop.f32.mrf.mxu1  ;;  %v5000_v27 = vpop.f32.mrf.mxu0  ;;  %v4930_v32 = vadd.f32 %v4929_v4, %v10977_v0  ;;  %v4987_v16 = vadd.f32 %v11064_v58, %v4914_v45  ;;  %v4920_v23 = vadd.f32 %v11077_v13, %v10961_v28  ;;  %v4991_v57 = vadd.f32 %v11099_v39, %v4918_v49 }
 0xac1   : > { %v4934_v56 = vadd.f32 %v4933_v11, %v10984_v50  ;;  %v5748_v48 = vmul.f32 %v5746_v15, %v5742_v7  ;;  %v11186_v21 = vmul.f32 %v5746_v15, %v5743_v54  ;;  %v4926_v38 = vadd.f32 %v11108_v2, %v10967_v10  ;;  %v5774_v54 = vpop.permute.xlu0 %5773  ;;  %v12085_v15 = vld [vmem:[#allocation64_spill] sm:$0xff] }
 0xac2   : > { %v4935_v1 = vpop.f32.mrf.mxu1  ;;  %v5002_v18 = vpop.f32.mrf.mxu0  ;;  %v4993_v4 = vadd.f32 %v11110_v41, %v4920_v23  ;;  %v4928_v58 = vadd.f32 %v4927_v14, %v10973_v9  ;;  %v5068_v50 = vmul.f32 %v10725_v19, %v4989_v6  ;;  %v4924_v11 = vadd.f32 %v11097_v53, %v10965_v44  ;;  %v12084_v53 = vld [vmem:[#allocation36_spill] sm:$0xff]  ;;  %v12089_v23 = vld [vmem:[#allocation49_spill] sm:$0xff] }
 0xac3   : > { %v11179_v20 = vpop.permute.xlu1 %5782  ;;  %v5003_v0 = vadd.f32 %v5002_v18, %v4930_v32  ;;  %v4936_v63 = vadd.f32 %v4935_v1, %v10989_v37  ;;  %v4999_v49 = vadd.f32 %v4998_v59, %v4926_v38  ;;  %v5069_v10 = vmul.f32 %v10707_v12, %v4991_v57  ;;  %v12086_v18 = vld [vmem:[#allocation44_spill] sm:$0xff] }
 0xac4   : > { %v4937_v5 = vpop.f32.mrf.mxu1  ;;  %v5006_v24 = vpop.f32.mrf.mxu0  ;;  %v5756_v14 = vsel %vm12082_vm6, %v11082_v3, %v11121_v22  ;;  %v5001_v9 = vadd.f32 %v5000_v27, %v4928_v58  ;;  %v5757_v41 = vsel %vm12083_vm4, %v11121_v22, %v11082_v3  ;;  %v5070_v7 = vmul.f32 %v10707_v12, %v4993_v4  ;;  %v12088_v3 = vld [vmem:[#allocation33_spill] sm:$0xff]  ;;  %v12091_v58 = vld [vmem:[#allocation16_spill] sm:$0xff] }
 0xac5   : > { %v5007_v13 = vadd.f32 %v5006_v24, %v4934_v56  ;;  %v4938_v8 = vadd.f32 %v4937_v5, %v10994_v40  ;;  %v5074_v44 = vmul.f32 %v10700_v35, %v5003_v0  ;;  %v4997_v25 = vadd.f32 %v11126_v60, %v4924_v11 }
 0xac6   : > { %v4939_v28 = vpop.f32.mrf.mxu1  ;;  %v5008_v39 = vpop.f32.mrf.mxu0  ;;  %v12087_v6 = vrot.slane %v12086_v18, %v7579_v47  ;;  %v5072_v22 = vmul.f32 %v12088_v3, %v4999_v49  ;;  %v5067_v12 = vmul.f32 %v10725_v19, %v4987_v16  ;;  %v5750_v24 = vadd.f32 %v5748_v48, %v5722_v62  ;;  %v12095_v19 = vld [vmem:[#allocation69_spill] sm:$0xff] }
 0xac7   : > { %v5809_v26 = vpop.permute.xlu1 %5808  ;;  %v5009_v37 = vadd.f32 %v5008_v39, %v4936_v63  ;;  %v4940_v40 = vadd.f32 %v4939_v28, %v12084_v53  ;;  %v5075_v45 = vmul.f32 %v12085_v15, %v5007_v13  ;;  %v12090_v60 = vrot.slane %v12086_v18, %v7581_v51  ;;  %v12092_v13 = vld [vmem:[#allocation73_spill] sm:$0xff]  ;;  %v12093_v39 = vld [vmem:[#allocation15_spill] sm:$0xff] }
 0xac8   : > { %v5010_v2 = vpop.f32.mrf.mxu0  ;;  %v5770_v32 = vmul.f32 %v12087_v6, %v5756_v14  ;;  %v5073_v0 = vmul.f32 %v10700_v35, %v5001_v9  ;;  %v5122_v63 = vadd.f32 %v12091_v58, %v5074_v44  ;;  %v11230_v62 = vadd.f32 %v12095_v19, %v5069_v10  ;;  %v5802_v35 = vpop.permute.xlu0 %5801 }
 0xac9   : > { %v5011_v59 = vadd.f32 %v5010_v2, %v4938_v8  ;;  %v5076_v27 = vmul.f32 %v12085_v15, %v5009_v37  ;;  %v5771_v38 = vmul.f32 %v12090_v60, %v5757_v41  ;;  %v11222_v4 = vpop.eup %6985  ;;  %v12094_v8 = vld [vmem:[#allocation24_spill] sm:$0xff]  ;;  %v5071_v16 = vmul.f32 %v12088_v3, %v4997_v25  ;;  %v12096_v41 = vld [vmem:[#allocation42_spill] sm:$0xff] }
 0xaca   : > { %v5012_v1 = vpop.f32.mrf.mxu0  ;;  %v5116_v14 = vadd.f32 %v12094_v8, %v5068_v50  ;;  %v5123_v48 = vadd.f32 %v12092_v13, %v5075_v45  ;;  %v11234_v9 = vpop.eup %6987  ;;  %v5118_v37 = vadd.f32 %v12095_v19, %v5070_v7  ;;  %v5776_v2 = vmul.f32 %v5774_v54, %v5770_v32 }
 0xacb   : > { %v5077_v57 = vmul.f32 %v12089_v23, %v5011_v59  ;;  %v5013_v56 = vadd.f32 %v5012_v1, %v4940_v40  ;;  %v5811_v5 = vpop.permute.xlu1 %5810  ;;  %v5124_v28 = vadd.f32 %v12092_v13, %v5076_v27  ;;  %v5120_v44 = vadd.f32 %v12096_v41, %v5072_v22 }
 0xacc   : > { %v5121_v50 = vadd.f32 %v12091_v58, %v5073_v0  ;;  %v5784_v10 = vsel %vm12097_vm12, %v11148_v17, %v11179_v20  ;;  %v5785_v59 = vsel %vm12098_vm5, %v11179_v20, %v11148_v17  ;;  %v5777_v7 = vmul.f32 %v5774_v54, %v5771_v38  ;;  %v5830_v3 = vpop.permute.xlu0 %5829 }
 0xacd   : > { %v5125_v11 = vadd.f32 %v12093_v39, %v5077_v57  ;;  %v5078_v49 = vmul.f32 %v12089_v23, %v5013_v56  ;;  %v5138_v15 = vmax.f32 %v5122_v63, 0.0  ;;  %v5140_v45 = vmax.f32 %v5124_v28, 0.0 }
 0xace   : > { %v5119_v1 = vadd.f32 %v12096_v41, %v5071_v16  ;;  %v5139_v18 = vmax.f32 %v5123_v48, 0.0  ;;  %v5812_v6 = vsel %vm12099_vm7, %v5809_v26, %v5811_v5  ;;  %v5813_v32 = vsel %vm12100_vm15, %v5811_v5, %v5809_v26 }
 0xacf   : > { %v5126_v53 = vadd.f32 %v12093_v39, %v5078_v49  ;;  %v5837_v40 = vpop.permute.xlu1 %5836  ;;  %v5141_v25 = vmax.f32 %v5125_v11, 0.0  ;;  %v5136_v22 = vmax.f32 %v5120_v44, 0.0  ;;  %v5798_v17 = vmul.f32 %v5791_v33, %v5784_v10 }
 0xad0   : > { %v5799_v20 = vmul.f32 %v5795_v55, %v5785_v59  ;;  %v5137_v57 = vmax.f32 %v5121_v50, 0.0  ;;  %v5134_v5 = vmax.f32 %v5118_v37, 0.0  ;;  %v5826_v38 = vmul.f32 %v5819_v42, %v5812_v6  ;;  %v5858_v13 = vpop.permute.xlu0 %5857 }
 0xad1   : > { %v5142_v27 = vmax.f32 %v5126_v53, 0.0  ;;  %v5152_v56 = vpack.c.bf16 %v5141_v25, %v5139_v18  ;;  %v5827_v52 = vmul.f32 %v5823_v46, %v5813_v32  ;;  %v5151_v33 = vpack.c.bf16 %v5138_v15, %v5136_v22  ;;  %v5144_v25 = vld [vmem:[#allocation3 + $0x200] sm:$0xff] }
 0xad2   : > { %v5115_v55 = vadd.f32 %v12094_v8, %v5067_v12  ;;  %v5751_v0 = vadd.f32 %v11186_v21, %v11175_v29  ;;  %v5132_v58 = vmax.f32 %v5116_v14, 0.0  ;;  %v5135_v63 = vmax.f32 %v5119_v1, 0.0  ;;  %v12105_v32 = vld [vmem:[#allocation22_spill] sm:$0xff] }
 0xad3   : > { %v5839_v54 = vpop.permute.xlu1 %5838  ;;  %v5153_v23 = vpack.c.bf16 %v5142_v27, %v5140_v45  ;;  %v5804_v28 = vmul.f32 %v5802_v35, %v5798_v17  ;;  %v5805_v39 = vmul.f32 %v5802_v35, %v5799_v20  ;;  %v12103_v42 = vrot.slane %v11138_v30, %v7579_v47  ;;  %v12107_v47 = vld [vmem:[#allocation10_spill] sm:$0xff] }
 0xad4   : > { %v5840_v60 = vsel %vm12101_vm9, %v5837_v40, %v5839_v54  ;;  %v5841_v26 = vsel %vm12102_vm10, %v5839_v54, %v5837_v40  ;;  %v12104_v31 = vrot.slane %v11138_v30, %v7581_v51  ;;  %v5133_v12 = vmax.f32 %v11230_v62, 0.0  ;;  %v5886_v37 = vpop.permute.xlu0 %5885 }
 0xad5   : > { %5165 = vmatprep.subr.bf16.mxu1 %v5153_v23  ;;  %v5854_v11 = vmul.f32 %v12103_v42, %v5840_v60  ;;  %v5778_v8 = vadd.f32 %v5776_v2, %v5750_v24  ;;  %v5150_v29 = vpack.c.bf16 %v5137_v57, %v5135_v63  ;;  %v5879_v21 = vrot.slane %v11155_v36, %v7581_v51 }
 0xad6   : > { %5166 = vmatpush1.bf16.msra.mxu1 %v5152_v56  ;;  %v5855_v46 = vmul.f32 %v12104_v31, %v5841_v26  ;;  %v5779_v14 = vadd.f32 %v5777_v7, %v5751_v0  ;;  %v5832_v19 = vmul.f32 %v5830_v3, %v5826_v38  ;;  %v5833_v16 = vmul.f32 %v5830_v3, %v5827_v52  ;;  %v12106_v3 = vld [vmem:[#allocation74_spill] sm:$0xff] }
 0xad7   : > { %5167 = vmatprep.subr.bf16.mxu1 %v5151_v33  ;;  %v5865_v49 = vpop.permute.xlu1 %5864  ;;  %v5149_v48 = vpack.c.bf16 %v5134_v5, %v5132_v58  ;;  %v5131_v35 = vmax.f32 %v5115_v55, 0.0  ;;  %v5806_v41 = vadd.f32 %v5804_v28, %v5778_v8  ;;  %v5860_v30 = vmul.f32 %v5858_v13, %v5854_v11  ;;  %v5901_v0 = vld [vmem:[#allocation3 + $0x80] sm:$0xff] }
 0xad8   : > { %v5807_v44 = vadd.f32 %v5805_v39, %v5779_v14  ;;  %v5861_v53 = vmul.f32 %v5858_v13, %v5855_v46  ;;  %v5894_v1 = vpop.permute.xlu0 %5893  ;;  %v5145_v61 = vpack.c.bf16 %v5144_v25, %v5144_v25  ;;  %v372_v22 = vmul.f32 %v11222_v4, %v12106_v3  ;;  %v6064_v4 = vld [vmem:[%s11317_s2] sm:$0xff] }
 0xad9   : > { %v5148_v50 = vpack.c.bf16 %v5133_v12, %v5131_v35  ;;  %v5834_v62 = vadd.f32 %v5832_v19, %v5806_v41  ;;  %v373_v36 = vmul.f32 %v11234_v9, %v12107_v47  ;;  %v12108_v23 = vmov 0.0   ;;  %6067 = vperm.xlu0 %6930, %v6064_v4   ;;  %6073 = vperm.xlu1 %6931, %v6064_v4  }
 0xada   : > { %5168 = vmatpush1.bf16.msra.mxu1 %v5150_v29  ;;  %v5835_v2 = vadd.f32 %v5833_v16, %v5807_v44  ;;  %v12109_v9 = vmov 5  }
 0xadb   : > { %5169 = vmatprep.subr.bf16.mxu1 %v5149_v48  ;;  %v5867_v40 = vpop.permute.xlu1 %5866  ;;  %v5862_v7 = vadd.f32 %v5860_v30, %v5834_v62 }
 0xadc   : > { %v5868_v24 = vsel %vm1291_vm8, %v5865_v49, %v5867_v40  ;;  %v5869_v51 = vsel %vm1291_vm8, %v5867_v40, %v5865_v49  ;;  %v5863_v15 = vadd.f32 %v5861_v53, %v5835_v2 }
 0xadd   : > { %v5882_v10 = vmul.f32 %v5875_v43, %v5868_v24  ;;  %v5883_v59 = vmul.f32 %v5879_v21, %v5869_v51  ;;  %6932 = vset.pattern.permute.xlu0 %v12109_v9 }
 0xade   : > { %5170 = vmatpush1.bf16.msra.mxu1 %v5148_v50 }
 0xadf   : > { %v5888_v45 = vmul.f32 %v5886_v37, %v5882_v10  ;;  %v5889_v27 = vmul.f32 %v5886_v37, %v5883_v59  ;;  %5171 = vmatprep.subr.bf16.mxu1 %v11123_v34  ;;  %v5903_v34 = vld [vmem:[#allocation3 + $0xc0] sm:$0xff]  ;;  %v5202_v57 = vpop.permute.xlu1 %5201 }
 0xae1   : > { %v5890_v18 = vadd.f32 %v5888_v45, %v5862_v7  ;;  %v5891_v6 = vadd.f32 %v5889_v27, %v5863_v15 }
 0xae2   : > { %5172 = vmatpush1.bf16.msra.mxu1 %v12105_v32 }
 0xae3   : > { %v5896_v43 = vadd.f32 %v5894_v1, %v5890_v18  ;;  %v5897_v17 = vadd.f32 %v5894_v1, %v5891_v6  ;;  %v5208_v38 = vpop.permute.xlu1 %5207 }
 0xae5   : > { %v5898_v20 = vmul.f32 %v5896_v43, %v372_v22  ;;  %v5899_v54 = vmul.f32 %v5897_v17, %v373_v36  ;;  %6436 = vmatmul.mubr.msk.bf16.vlgmr.msra.gmra.mxu1 %vm4783_vm0, %v5145_v61 }
 0xae6   : > { %5977 = vmatprep.mubr.f32.mxu1 %v12108_v23 }
 0xae7   : > { %6460 = vmatprep.subr.msk.mxu1 %vm482_vm1, %v5899_v54 }
 0xae8   : > { %6461 = vmatpush1.msk.msra.mxu1 %vm482_vm1, %v5898_v20 }
 0xaed   : > { %6462 = vmatmul.mubr.msk.f32.vlgmr.msra.gmra.mxu1 %vm478_vm2, %v5903_v34 }
 0xaee   : > { %6057 = vmatprep.mubr.f32.mxu1 %v12108_v23 }
 0xb54   : > { %v6068_v39 = vpop.permute.xlu0 %6067  ;;  %v6074_v31 = vpop.permute.xlu1 %6073 }
 0xba5   : > { %v5191_v56 = vpop.f32.mrf.mxu1 }
 0xba6   : > { %v5204_v60 = vmul.f32 %v5202_v57, %v5191_v56 }
 0xba7   : > { %v5193_v26 = vpop.f32.mrf.mxu1 }
 0xba8   : > { %v5205_v5 = vmul.f32 %v5202_v57, %v5193_v26  ;;  %v5210_v55 = vadd.f32 %v5208_v38, %v5204_v60 }
 0xba9   : > { %v5195_v52 = vpop.f32.mrf.mxu1 }
 0xbaa   : > { %v5211_v33 = vadd.f32 %v5208_v38, %v5205_v5 }
 0xbab   : > { %v5196_v58 = vpop.f32.mrf.mxu1 }
 0xbac   : > { %6463 = vmatprep.subr.msk.mxu1 %vm482_vm1, %v5211_v33 }
 0xbad   : > { %6464 = vmatpush1.msk.msra.mxu1 %vm482_vm1, %v5210_v55  ;;  %v5979_v63 = vpop.f32.mrf.mxu1 }
 0xbae   : > { %6465 = vmatmul.mubr.msk.f32.vlgmr.msra.gmra.mxu1 %vm478_vm2, %v5901_v0 }
 0xbaf   : > { %v5981_v13 = vpop.f32.mrf.mxu1 }
 0xc6e   : > { %v6059_v28 = vpop.f32.mrf.mxu1 }
 0xc6f   : > { %v6060_v42 = vadd.f32 %v6059_v28, %v5979_v63 }
 0xc70   : > { %v6061_v11 = vpop.f32.mrf.mxu1 }
 0xc71   : > { %v6070_v46 = vmul.f32 %v6068_v39, %v6060_v42  ;;  %v6062_v49 = vadd.f32 %v6061_v11, %v5981_v13 }
 0xc73   : > { %v6071_v12 = vmul.f32 %v6068_v39, %v6062_v49  ;;  %v6076_v8 = vadd.f32 %v6074_v31, %v6070_v46 }
 0xc75   : > { %v6077_v29 = vadd.f32 %v6074_v31, %v6071_v12  ;;  %v6466_v21 = vmul.f32 -1.442695, %v6076_v8 }
 0xc77   : > { %6989 = vpow2.f32 %v6466_v21  ;;  %v6467_v14 = vmul.f32 -1.442695, %v6077_v29 }
 0xc79   : > { %6991 = vpow2.f32 %v6467_v14 }
 0xc84   : > { %v6990_v19 = vpop.eup %6989 }
 0xc85   : > { %v6084_v16 = vadd.f32 1.0, %v6990_v19 }
 0xc86   : > { %v6992_v48 = vpop.eup %6991 }
 0xc87   : > { %v6085_v35 = vadd.f32 1.0, %v6992_v48  ;;  %6993 = vrcp.f32 %v6084_v16 }
 0xc89   : > { %6995 = vrcp.f32 %v6085_v35 }
 0xc94   : > { %v6994_v37 = vpop.eup %6993 }
 0xc95   : > { %v6090_v41 = vmul.f32 %v6994_v37, %v6076_v8 }
 0xc96   : > { %v6996_v44 = vpop.eup %6995 }
 0xc97   : > { %v6091_v30 = vmul.f32 %v6996_v44, %v6077_v29  ;;  %6092 = vst [vmem:[%s266_s15] sm:$0xff] %v6090_v41 }
 0xc99   : > { %6093 = vst [vmem:[%s266_s15 + $0x8] sm:$0xff] %v6091_v30 }
 0xc9a PF: > { %s17_s21 = sadd.s32 1, %s7040_s21  }
 0xc9b   : > { %p14_p1 = scmp.ge.s32.totalorder %s17_s21, 4  }
 0xc9d   :  { %16 = sbr.rel (!%p14_p1) target bundleno = 1 (0x1), region = 150 }
 0xca2   :  { %6115 = vsyncpa [#allocation4], 1 }
 0xca3   :  { %6117 = vsyncpa [#allocation4 + $0x1], 1 }

</bundles_post_ra>
